<compile_context>
chip_gen: v6e
topology: v6e:2x2x1
jax: 0.10.0
libtpu: 0.0.40
codegen_flags: <defaults>
</compile_context>

<pallas_src>
import functools

import jax
import jax.numpy as jnp
from jax import lax
from jax.experimental import pallas as pl
from jax.experimental.pallas import tpu as pltpu


# ----------------------------------------------------------------------------
# Fused SeparableConv3D (+ folded BN affine + activation) Pallas kernel
# ----------------------------------------------------------------------------

def _sepconv3d_kernel(xp_ref, dw_ref, pw_ref, pb_ref, o_ref, acc_ref, *,
                      K, tD, Ho, Wo, activation):
    """One (batch, D-tile) grid step.

    xp_ref : (1, Dp, Hp, Wp, Cin)  zero-padded input (VMEM resident per batch)
    dw_ref : (K^3, Cin)            depthwise taps, channels on the lane axis
    pw_ref : (Cin, Cout)           pointwise weight (BN scale folded in)
    pb_ref : (1, Cout)             pointwise bias  (depthwise bias + BN folded in)
    o_ref  : (1, tD, Ho, Wo, Cout) output tile
    acc_ref: (tD, Ho, Wo, Cin)     f32 VMEM scratch accumulator
    """
    d0 = pl.program_id(1) * tD

    # Depthwise conv: K^3 shifted-window reads straight from the ref (no
    # full-volume value + misaligned value slices), accumulate in VMEM scratch.
    for kd in range(K):
        for kh in range(K):
            for kw in range(K):
                tap = dw_ref[kd * K * K + kh * K + kw, :].reshape(1, 1, 1, -1)
                win = xp_ref[0, pl.ds(d0 + kd, tD), kh:kh + Ho, kw:kw + Wo, :]
                contrib = win.astype(jnp.float32) * tap
                if kd == 0 and kh == 0 and kw == 0:
                    acc_ref[...] = contrib          # init with first tap
                else:
                    acc_ref[...] += contrib

    cin = acc_ref.shape[-1]
    cout = o_ref.shape[-1]

    # Pointwise 1x1x1 conv as a (tD*Ho*Wo, Cin) @ (Cin, Cout) MXU matmul.
    # (Reshape only merges leading dims; the lane (channel) layout is unchanged.)
    y = jnp.dot(acc_ref[...].reshape(tD * Ho * Wo, cin), pw_ref[...],
                preferred_element_type=jnp.float32)
    y = y + pb_ref[...]

    if activation == "relu":
        y = jnp.maximum(y, 0.0)
    elif activation == "sigmoid":
        y = 1.0 / (1.0 + jnp.exp(-y))

    o_ref[0] = y.reshape(tD, Ho, Wo, cout).astype(o_ref.dtype)


def _vmem_limit_bytes():
    """~75% of physical VMEM (headroom for Mosaic internals). Falls back to a
    value that is safe on v5e/v6e (128 MiB) and v7x (64 MiB)."""
    try:
        cap = getattr(pltpu.get_tpu_info(), "vmem_capacity_bytes", None)
        if cap:
            return int(cap) * 3 // 4
    except Exception:
        pass
    return 48 * 1024 * 1024


def _pick_tile_d(Do, Ho, Wo, Cin, Cout, budget_bytes):
    """Largest D tile (dividing Do) whose per-step working set (f32 scratch
    accumulator + double-buffered output block) fits the budget; stop early once
    the pointwise matmul has >=256 rows while keeping >=2 grid steps for
    pipelining / megacore sharding."""
    best = 1
    for tD in range(1, Do + 1):
        if Do % tD:
            continue
        step_bytes = 4 * (tD * Ho * Wo * Cin + 2 * tD * Ho * Wo * Cout)
        if step_bytes > budget_bytes and tD > 1:
            break
        best = tD
        if tD * Ho * Wo >= 256 and Do // tD >= 2:
            break
    return best


def separable_conv3d(x_ndhwc, dw, db, pw, pb, *, padding, activation=None,
                     bn_scale=None, bn_shift=None):
    """Fused SeparableConv3D (+ optional folded BN affine + activation), NDHWC.

    dw: (Cin, 1, K, K, K), db: (Cin,)          -- PyTorch depthwise layout
    pw: (Cout, Cin, 1, 1, 1), pb: (Cout,)      -- PyTorch pointwise layout
    """
    N, D, H, W, Cin = x_ndhwc.shape
    K = dw.shape[-1]
    p = padding
    Do, Ho, Wo = D + 2 * p - K + 1, H + 2 * p - K + 1, W + 2 * p - K + 1
    Cout = pw.shape[0]

    # ---- weight prep (once, outside the kernel) ------------------------------
    dw2 = jnp.transpose(dw[:, 0], (1, 2, 3, 0)).reshape(K * K * K, Cin)   # (K^3, Cin)
    pw2 = jnp.transpose(pw[:, :, 0, 0, 0], (1, 0))                        # (Cin, Cout)
    pb2 = db @ pw2 + pb                    # fold depthwise bias (pointwise is linear)
    if bn_scale is not None:               # fold BatchNorm (inference affine)
        pw2 = pw2 * bn_scale[None, :]
        pb2 = pb2 * bn_scale + bn_shift
    dw2 = dw2.astype(jnp.float32)
    pw2 = pw2.astype(jnp.float32)
    pb2 = pb2.reshape(1, Cout).astype(jnp.float32)

    # Zero padding of the halo.
    # TODO(synk): move padding + halo handling into the kernel (manual DMA) so the
    # wrapper does not make an extra HBM pass for very large volumes.
    xp = jnp.pad(x_ndhwc, ((0, 0), (p, p), (p, p), (p, p), (0, 0))) if p else x_ndhwc
    Dp, Hp, Wp = D + 2 * p, H + 2 * p, W + 2 * p

    vmem_limit = _vmem_limit_bytes()
    in_block_bytes = 4 * Dp * Hp * Wp * Cin
    w_bytes = 4 * (K * K * K * Cin + Cin * Cout + Cout)
    budget = max(vmem_limit - 2 * (in_block_bytes + w_bytes), 1 << 20)
    tD = _pick_tile_d(Do, Ho, Wo, Cin, Cout, budget)
    nDt = Do // tD

    kernel = functools.partial(_sepconv3d_kernel, K=K, tD=tD, Ho=Ho, Wo=Wo,
                               activation=activation)
    out = pl.pallas_call(
        kernel,
        out_shape=jax.ShapeDtypeStruct((N, Do, Ho, Wo, Cout), x_ndhwc.dtype),
        grid=(N, nDt),
        in_specs=[
            # Full padded volume of one batch element. The block index is constant
            # along the D-tile axis, so it is DMA'd once per batch element and
            # stays resident in VMEM while output D tiles stream.
            pl.BlockSpec((1, Dp, Hp, Wp, Cin), lambda n, d: (n, 0, 0, 0, 0)),
            pl.BlockSpec((K * K * K, Cin), lambda n, d: (0, 0)),
            pl.BlockSpec((Cin, Cout), lambda n, d: (0, 0)),
            pl.BlockSpec((1, Cout), lambda n, d: (0, 0)),
        ],
        out_specs=pl.BlockSpec((1, tD, Ho, Wo, Cout), lambda n, d: (n, d, 0, 0, 0)),
        scratch_shapes=[pltpu.VMEM((tD, Ho, Wo, Cin), jnp.float32)],
        compiler_params=pltpu.CompilerParams(
            dimension_semantics=("parallel", "parallel"),
            vmem_limit_bytes=vmem_limit),
    )(xp, dw2, pw2, pb2)
    return out


# ----------------------------------------------------------------------------
# SeparableConv3D + BN + activation blocks (Pallas-backed and lax reference)
# ----------------------------------------------------------------------------

def _bn_affine(bn):
    scale = bn["gamma"] * lax.rsqrt(bn["var"] + 1e-5)
    shift = bn["beta"] - scale * bn["mean"]
    return scale, shift


def sepconv_block_pallas(x, cp, bn, *, padding, activation):
    scale = shift = None
    if bn is not None:
        scale, shift = _bn_affine(bn)
    return separable_conv3d(x, cp["dw"], cp["db"], cp["pw"], cp["pb"],
                            padding=padding, activation=activation,
                            bn_scale=scale, bn_shift=shift)


def _sepconv3d_lax(x_ndhwc, dw, db, pw, pb, *, padding):
    """Pure-lax reference for SeparableConv3D (matches nn.Conv3d semantics)."""
    x = jnp.transpose(x_ndhwc, (0, 4, 1, 2, 3))
    dn = lax.conv_dimension_numbers(x.shape, dw.shape, ("NCDHW", "OIDHW", "NCDHW"))
    y = lax.conv_general_dilated(x, dw, (1, 1, 1), [(padding, padding)] * 3,
                                 dimension_numbers=dn, feature_group_count=x.shape[1])
    y = y + db.reshape(1, -1, 1, 1, 1)
    dn2 = lax.conv_dimension_numbers(y.shape, pw.shape, ("NCDHW", "OIDHW", "NCDHW"))
    z = lax.conv_general_dilated(y, pw, (1, 1, 1), [(0, 0)] * 3, dimension_numbers=dn2)
    z = z + pb.reshape(1, -1, 1, 1, 1)
    return jnp.transpose(z, (0, 2, 3, 4, 1))


def sepconv_block_ref(x, cp, bn, *, padding, activation):
    y = _sepconv3d_lax(x, cp["dw"], cp["db"], cp["pw"], cp["pb"], padding=padding)
    if bn is not None:
        scale, shift = _bn_affine(bn)
        y = y * scale + shift
    if activation == "relu":
        y = jnp.maximum(y, 0.0)
    elif activation == "sigmoid":
        y = 1.0 / (1.0 + jnp.exp(-y))
    return y


# ----------------------------------------------------------------------------
# SeparableUNet3D forward (channels-last). Pool / transpose-conv / concat are
# plain XLA glue; every SeparableConv3D+BN+activation goes through `block`.
# ----------------------------------------------------------------------------

def _maxpool3d_2(x):                      # nn.MaxPool3d(2), NDHWC
    n, d, h, w, c = x.shape
    return x.reshape(n, d // 2, 2, h // 2, 2, w // 2, 2, c).max(axis=(2, 4, 6))


def _upconv3d_2(x, p):                    # nn.ConvTranspose3d(k=2, s=2), NDHWC
    # kernel == stride -> no overlap: einsum + pixel-shuffle reshape.
    y = jnp.einsum("ndhwc,coijk->ndihjwko", x, p["w"])
    n, d, _, h, _, w, _, co = y.shape
    return y.reshape(n, 2 * d, 2 * h, 2 * w, co) + p["b"]


_CFG = [
    ("1a", 3, 64), ("1b", 64, 64),
    ("2a", 64, 128), ("2b", 128, 128),
    ("3a", 128, 256), ("3b", 256, 256),
    ("4a", 256, 512), ("4b", 512, 512),
    ("5a", 512 + 256, 256), ("5b", 256, 256),
    ("6a", 256 + 128, 128), ("6b", 128, 128),
    ("7a", 128 + 64, 64), ("7b", 64, 64),
]


def unet_forward(params, x, block):
    conv = functools.partial(block, padding=1, activation="relu")

    def stage(h, a, b):
        h = conv(h, params["conv" + a], params["bn" + a])
        return conv(h, params["conv" + b], params["bn" + b])

    skip64 = stage(x, "1a", "1b")
    h = _maxpool3d_2(skip64)
    skip128 = stage(h, "2a", "2b")
    h = _maxpool3d_2(skip128)
    skip256 = stage(h, "3a", "3b")
    h = _maxpool3d_2(skip256)
    h = stage(h, "4a", "4b")                 # bottleneck (maxpool4 unused, as in the spec)
    h = _upconv3d_2(h, params["up1"])
    h = stage(jnp.concatenate([h, skip256], axis=-1), "5a", "5b")
    h = _upconv3d_2(h, params["up2"])
    h = stage(jnp.concatenate([h, skip128], axis=-1), "6a", "6b")
    h = _upconv3d_2(h, params["up3"])
    h = stage(jnp.concatenate([h, skip64], axis=-1), "7a", "7b")
    # finalconv: SeparableConv3D(64, class_num, k=1, p=0) followed by Sigmoid.
    return block(h, params["convfinal"], None, padding=0, activation="sigmoid")


# ----------------------------------------------------------------------------
# Parameter construction (deterministic, PyTorch weight layouts)
# ----------------------------------------------------------------------------

def _init_sepconv(key, cin, cout, k):
    k1, k2, k3, k4 = jax.random.split(key, 4)
    dw = jax.random.normal(k1, (cin, 1, k, k, k), jnp.float32) / (k ** 1.5)
    db = 0.05 * jax.random.normal(k2, (cin,), jnp.float32)
    pw = jax.random.normal(k3, (cout, cin, 1, 1, 1), jnp.float32) * (2.0 / cin) ** 0.5
    pb = 0.05 * jax.random.normal(k4, (cout,), jnp.float32)
    return dict(dw=dw, db=db, pw=pw, pb=pb)


def _init_bn(key, c):
    k1, k2, k3, k4 = jax.random.split(key, 4)
    return dict(gamma=1.0 + 0.1 * jax.random.normal(k1, (c,), jnp.float32),
                beta=0.1 * jax.random.normal(k2, (c,), jnp.float32),
                mean=0.1 * jax.random.normal(k3, (c,), jnp.float32),
                var=1.0 + 0.1 * jnp.abs(jax.random.normal(k4, (c,), jnp.float32)))


def _init_upconv(key, cin, cout):
    k1, k2 = jax.random.split(key)
    w = jax.random.normal(k1, (cin, cout, 2, 2, 2), jnp.float32) / (8.0 * cin) ** 0.5
    b = 0.05 * jax.random.normal(k2, (cout,), jnp.float32)
    return dict(w=w, b=b)


def init_unet_params(key, class_num=1):
    params = {}
    for name, cin, cout in _CFG:
        key, ka, kb = jax.random.split(key, 3)
        params["conv" + name] = _init_sepconv(ka, cin, cout, 3)
        params["bn" + name] = _init_bn(kb, cout)
    for name, cin, cout in [("up1", 512, 512), ("up2", 256, 256), ("up3", 128, 128)]:
        key, ku = jax.random.split(key)
        params[name] = _init_upconv(ku, cin, cout)
    key, kf = jax.random.split(key)
    params["convfinal"] = _init_sepconv(kf, 64, class_num, 1)
    return params


# ----------------------------------------------------------------------------
# Main: build small deterministic inputs, run, and check against the reference.
# ----------------------------------------------------------------------------

if __name__ == "__main__":
    N, S, CLASS_NUM = 2, 8, 1

    key = jax.random.PRNGKey(0)
    key, kp, kx, kchk = jax.random.split(key, 4)
    params = init_unet_params(kp, CLASS_NUM)

    x_ncdhw = 0.5 * jax.random.normal(kx, (N, 3, S, S, S), jnp.float32)  # PyTorch layout
    x = jnp.transpose(x_ncdhw, (0, 2, 3, 4, 1))                          # run channels-last

    # --- direct check: fused Pallas sepconv+BN+ReLU block vs lax reference -----
    xc = jax.random.normal(kchk, (N, S, S, S, 64), jnp.float32)
    got = sepconv_block_pallas(xc, params["conv1b"], params["bn1b"],
                               padding=1, activation="relu")
    want = sepconv_block_ref(xc, params["conv1b"], params["bn1b"],
                             padding=1, activation="relu")
    got, want = jax.block_until_ready((got, want))
    err_blk = float(jnp.max(jnp.abs(got - want)))
    assert err_blk < 1e-3, f"sepconv block mismatch: {err_blk}"

    # --- full SeparableUNet3D forward: Pallas-backed vs pure-lax reference -----
    fwd_pallas = jax.jit(lambda p, a: unet_forward(p, a, sepconv_block_pallas))
    fwd_ref = jax.jit(lambda p, a: unet_forward(p, a, sepconv_block_ref))

    out = jax.block_until_ready(fwd_pallas(params, x))
    ref = jax.block_until_ready(fwd_ref(params, x))

    out_ncdhw = jnp.transpose(out, (0, 4, 1, 2, 3))
    assert out_ncdhw.shape == (N, CLASS_NUM, S, S, S), out_ncdhw.shape
    assert bool(jnp.all(jnp.isfinite(out)))
    err = float(jnp.max(jnp.abs(out - ref)))
    assert err < 1e-3, f"UNet forward mismatch: {err}"

    print("KERNEL_OK")
</pallas_src>

<mosaic_0001>
module attributes {stable_mosaic.version = 11 : i64} {
  func.func @_sepconv3d_kernel(%arg0: i32, %arg1: i32, %arg2: memref<1x10x10x10x64xf32, #tpu.memory_space<vmem>>, %arg3: memref<27x64xf32, #tpu.memory_space<vmem>>, %arg4: memref<64x64xf32, #tpu.memory_space<vmem>>, %arg5: memref<1x64xf32, #tpu.memory_space<vmem>>, %arg6: memref<1x4x8x8x64xf32, #tpu.memory_space<vmem>>, %arg7: memref<4x8x8x64xf32, #tpu.memory_space<vmem>>) attributes {dimension_semantics = [#tpu.dimension_semantics<parallel>, #tpu.dimension_semantics<parallel>], iteration_bounds = array<i64: 2, 2>, scalar_prefetch = 0 : i64, scratch_operands = 1 : i64, tpu.core_type = #tpu.core_type<tc>, window_params = [{transform_indices = @transform_0, window_bounds = array<i64: 1, 10, 10, 10, 64>}, {pipeline_mode = #tpu.pipeline_mode<synchronous>, transform_indices = @transform_1, window_bounds = array<i64: 27, 64>}, {pipeline_mode = #tpu.pipeline_mode<synchronous>, transform_indices = @transform_2, window_bounds = array<i64: 64, 64>}, {pipeline_mode = #tpu.pipeline_mode<synchronous>, transform_indices = @transform_3, window_bounds = array<i64: 1, 64>}, {transform_indices = @transform_4, window_bounds = array<i64: 1, 4, 8, 8, 64>}]} {
    %c4_i32 = arith.constant 4 : i32
    %0 = arith.muli %arg1, %c4_i32 : i32
    %c0 = arith.constant 0 : index
    %c0_0 = arith.constant 0 : index
    %1 = vector.load %arg3[%c0, %c0_0] : memref<27x64xf32, #tpu.memory_space<vmem>>, vector<1x64xf32>
    %2 = vector.shape_cast %1 : vector<1x64xf32> to vector<64xf32>
    %3 = vector.shape_cast %2 : vector<64xf32> to vector<1x1x1x64xf32>
    %c0_i32 = arith.constant 0 : i32
    %4 = arith.addi %0, %c0_i32 : i32
    %c0_1 = arith.constant 0 : index
    %5 = arith.index_cast %4 : i32 to index
    %c0_2 = arith.constant 0 : index
    %c0_3 = arith.constant 0 : index
    %c0_4 = arith.constant 0 : index
    %6 = vector.load %arg2[%c0_1, %5, %c0_2, %c0_3, %c0_4] : memref<1x10x10x10x64xf32, #tpu.memory_space<vmem>>, vector<1x4x8x8x64xf32>
    %7 = vector.shape_cast %6 : vector<1x4x8x8x64xf32> to vector<4x8x8x64xf32>
    %8 = vector.broadcast %3 : vector<1x1x1x64xf32> to vector<4x8x8x64xf32>
    %9 = arith.mulf %7, %8 : vector<4x8x8x64xf32>
    %c0_5 = arith.constant 0 : index
    %c0_6 = arith.constant 0 : index
    %c0_7 = arith.constant 0 : index
    %c0_8 = arith.constant 0 : index
    %10 = vector.load %arg7[%c0_5, %c0_6, %c0_7, %c0_8] : memref<4x8x8x64xf32, #tpu.memory_space<vmem>>, vector<4x8x8x64xf32>
    tpu.vector_store %arg7[%c0_5, %c0_6, %c0_7, %c0_8], %9 {strides = array<i32>} : memref<4x8x8x64xf32, #tpu.memory_space<vmem>>, vector<4x8x8x64xf32>,
    %c1 = arith.constant 1 : index
    %c0_9 = arith.constant 0 : index
    %11 = vector.load %arg3[%c1, %c0_9] : memref<27x64xf32, #tpu.memory_space<vmem>>, vector<1x64xf32>
    %12 = vector.shape_cast %11 : vector<1x64xf32> to vector<64xf32>
    %13 = vector.shape_cast %12 : vector<64xf32> to vector<1x1x1x64xf32>
    %c0_i32_10 = arith.constant 0 : i32
    %14 = arith.addi %0, %c0_i32_10 : i32
    %c0_11 = arith.constant 0 : index
    %15 = arith.index_cast %14 : i32 to index
    %c0_12 = arith.constant 0 : index
    %c1_13 = arith.constant 1 : index
    %c0_14 = arith.constant 0 : index
    %16 = vector.load %arg2[%c0_11, %15, %c0_12, %c1_13, %c0_14] : memref<1x10x10x10x64xf32, #tpu.memory_space<vmem>>, vector<1x4x8x8x64xf32>
    %17 = vector.shape_cast %16 : vector<1x4x8x8x64xf32> to vector<4x8x8x64xf32>
    %18 = vector.broadcast %13 : vector<1x1x1x64xf32> to vector<4x8x8x64xf32>
    %19 = arith.mulf %17, %18 : vector<4x8x8x64xf32>
    %c0_15 = arith.constant 0 : index
    %c0_16 = arith.constant 0 : index
    %c0_17 = arith.constant 0 : index
    %c0_18 = arith.constant 0 : index
    %20 = vector.load %arg7[%c0_15, %c0_16, %c0_17, %c0_18] : memref<4x8x8x64xf32, #tpu.memory_space<vmem>>, vector<4x8x8x64xf32>
    %21 = arith.addf %20, %19 : vector<4x8x8x64xf32>
    %c0_19 = arith.constant 0 : index
    %c0_20 = arith.constant 0 : index
    %c0_21 = arith.constant 0 : index
    %c0_22 = arith.constant 0 : index
    %22 = vector.load %arg7[%c0_19, %c0_20, %c0_21, %c0_22] : memref<4x8x8x64xf32, #tpu.memory_space<vmem>>, vector<4x8x8x64xf32>
    tpu.vector_store %arg7[%c0_19, %c0_20, %c0_21, %c0_22], %21 {strides = array<i32>} : memref<4x8x8x64xf32, #tpu.memory_space<vmem>>, vector<4x8x8x64xf32>,
    %c2 = arith.constant 2 : index
    %c0_23 = arith.constant 0 : index
    %23 = vector.load %arg3[%c2, %c0_23] : memref<27x64xf32, #tpu.memory_space<vmem>>, vector<1x64xf32>
    %24 = vector.shape_cast %23 : vector<1x64xf32> to vector<64xf32>
    %25 = vector.shape_cast %24 : vector<64xf32> to vector<1x1x1x64xf32>
    %c0_i32_24 = arith.constant 0 : i32
    %26 = arith.addi %0, %c0_i32_24 : i32
    %c0_25 = arith.constant 0 : index
    %27 = arith.index_cast %26 : i32 to index
    %c0_26 = arith.constant 0 : index
    %c2_27 = arith.constant 2 : index
    %c0_28 = arith.constant 0 : index
    %28 = vector.load %arg2[%c0_25, %27, %c0_26, %c2_27, %c0_28] : memref<1x10x10x10x64xf32, #tpu.memory_space<vmem>>, vector<1x4x8x8x64xf32>
    %29 = vector.shape_cast %28 : vector<1x4x8x8x64xf32> to vector<4x8x8x64xf32>
    %30 = vector.broadcast %25 : vector<1x1x1x64xf32> to vector<4x8x8x64xf32>
    %31 = arith.mulf %29, %30 : vector<4x8x8x64xf32>
    %c0_29 = arith.constant 0 : index
    %c0_30 = arith.constant 0 : index
    %c0_31 = arith.constant 0 : index
    %c0_32 = arith.constant 0 : index
    %32 = vector.load %arg7[%c0_29, %c0_30, %c0_31, %c0_32] : memref<4x8x8x64xf32, #tpu.memory_space<vmem>>, vector<4x8x8x64xf32>
    %33 = arith.addf %32, %31 : vector<4x8x8x64xf32>
    %c0_33 = arith.constant 0 : index
    %c0_34 = arith.constant 0 : index
    %c0_35 = arith.constant 0 : index
    %c0_36 = arith.constant 0 : index
    %34 = vector.load %arg7[%c0_33, %c0_34, %c0_35, %c0_36] : memref<4x8x8x64xf32, #tpu.memory_space<vmem>>, vector<4x8x8x64xf32>
    tpu.vector_store %arg7[%c0_33, %c0_34, %c0_35, %c0_36], %33 {strides = array<i32>} : memref<4x8x8x64xf32, #tpu.memory_space<vmem>>, vector<4x8x8x64xf32>,
    %c3 = arith.constant 3 : index
    %c0_37 = arith.constant 0 : index
    %35 = vector.load %arg3[%c3, %c0_37] : memref<27x64xf32, #tpu.memory_space<vmem>>, vector<1x64xf32>
    %36 = vector.shape_cast %35 : vector<1x64xf32> to vector<64xf32>
    %37 = vector.shape_cast %36 : vector<64xf32> to vector<1x1x1x64xf32>
    %c0_i32_38 = arith.constant 0 : i32
    %38 = arith.addi %0, %c0_i32_38 : i32
    %c0_39 = arith.constant 0 : index
    %39 = arith.index_cast %38 : i32 to index
    %c1_40 = arith.constant 1 : index
    %c0_41 = arith.constant 0 : index
    %c0_42 = arith.constant 0 : index
    %40 = vector.load %arg2[%c0_39, %39, %c1_40, %c0_41, %c0_42] : memref<1x10x10x10x64xf32, #tpu.memory_space<vmem>>, vector<1x4x8x8x64xf32>
    %41 = vector.shape_cast %40 : vector<1x4x8x8x64xf32> to vector<4x8x8x64xf32>
    %42 = vector.broadcast %37 : vector<1x1x1x64xf32> to vector<4x8x8x64xf32>
    %43 = arith.mulf %41, %42 : vector<4x8x8x64xf32>
    %c0_43 = arith.constant 0 : index
    %c0_44 = arith.constant 0 : index
    %c0_45 = arith.constant 0 : index
    %c0_46 = arith.constant 0 : index
    %44 = vector.load %arg7[%c0_43, %c0_44, %c0_45, %c0_46] : memref<4x8x8x64xf32, #tpu.memory_space<vmem>>, vector<4x8x8x64xf32>
    %45 = arith.addf %44, %43 : vector<4x8x8x64xf32>
    %c0_47 = arith.constant 0 : index
    %c0_48 = arith.constant 0 : index
    %c0_49 = arith.constant 0 : index
    %c0_50 = arith.constant 0 : index
    %46 = vector.load %arg7[%c0_47, %c0_48, %c0_49, %c0_50] : memref<4x8x8x64xf32, #tpu.memory_space<vmem>>, vector<4x8x8x64xf32>
    tpu.vector_store %arg7[%c0_47, %c0_48, %c0_49, %c0_50], %45 {strides = array<i32>} : memref<4x8x8x64xf32, #tpu.memory_space<vmem>>, vector<4x8x8x64xf32>,
    %c4 = arith.constant 4 : index
    %c0_51 = arith.constant 0 : index
    %47 = vector.load %arg3[%c4, %c0_51] : memref<27x64xf32, #tpu.memory_space<vmem>>, vector<1x64xf32>
    %48 = vector.shape_cast %47 : vector<1x64xf32> to vector<64xf32>
    %49 = vector.shape_cast %48 : vector<64xf32> to vector<1x1x1x64xf32>
    %c0_i32_52 = arith.constant 0 : i32
    %50 = arith.addi %0, %c0_i32_52 : i32
    %c0_53 = arith.constant 0 : index
    %51 = arith.index_cast %50 : i32 to index
    %c1_54 = arith.constant 1 : index
    %c1_55 = arith.constant 1 : index
    %c0_56 = arith.constant 0 : index
    %52 = vector.load %arg2[%c0_53, %51, %c1_54, %c1_55, %c0_56] : memref<1x10x10x10x64xf32, #tpu.memory_space<vmem>>, vector<1x4x8x8x64xf32>
    %53 = vector.shape_cast %52 : vector<1x4x8x8x64xf32> to vector<4x8x8x64xf32>
    %54 = vector.broadcast %49 : vector<1x1x1x64xf32> to vector<4x8x8x64xf32>
    %55 = arith.mulf %53, %54 : vector<4x8x8x64xf32>
    %c0_57 = arith.constant 0 : index
    %c0_58 = arith.constant 0 : index
    %c0_59 = arith.constant 0 : index
    %c0_60 = arith.constant 0 : index
    %56 = vector.load %arg7[%c0_57, %c0_58, %c0_59, %c0_60] : memref<4x8x8x64xf32, #tpu.memory_space<vmem>>, vector<4x8x8x64xf32>
    %57 = arith.addf %56, %55 : vector<4x8x8x64xf32>
    %c0_61 = arith.constant 0 : index
    %c0_62 = arith.constant 0 : index
    %c0_63 = arith.constant 0 : index
    %c0_64 = arith.constant 0 : index
    %58 = vector.load %arg7[%c0_61, %c0_62, %c0_63, %c0_64] : memref<4x8x8x64xf32, #tpu.memory_space<vmem>>, vector<4x8x8x64xf32>
    tpu.vector_store %arg7[%c0_61, %c0_62, %c0_63, %c0_64], %57 {strides = array<i32>} : memref<4x8x8x64xf32, #tpu.memory_space<vmem>>, vector<4x8x8x64xf32>,
    %c5 = arith.constant 5 : index
    %c0_65 = arith.constant 0 : index
    %59 = vector.load %arg3[%c5, %c0_65] : memref<27x64xf32, #tpu.memory_space<vmem>>, vector<1x64xf32>
    %60 = vector.shape_cast %59 : vector<1x64xf32> to vector<64xf32>
    %61 = vector.shape_cast %60 : vector<64xf32> to vector<1x1x1x64xf32>
    %c0_i32_66 = arith.constant 0 : i32
    %62 = arith.addi %0, %c0_i32_66 : i32
    %c0_67 = arith.constant 0 : index
    %63 = arith.index_cast %62 : i32 to index
    %c1_68 = arith.constant 1 : index
    %c2_69 = arith.constant 2 : index
    %c0_70 = arith.constant 0 : index
    %64 = vector.load %arg2[%c0_67, %63, %c1_68, %c2_69, %c0_70] : memref<1x10x10x10x64xf32, #tpu.memory_space<vmem>>, vector<1x4x8x8x64xf32>
    %65 = vector.shape_cast %64 : vector<1x4x8x8x64xf32> to vector<4x8x8x64xf32>
    %66 = vector.broadcast %61 : vector<1x1x1x64xf32> to vector<4x8x8x64xf32>
    %67 = arith.mulf %65, %66 : vector<4x8x8x64xf32>
    %c0_71 = arith.constant 0 : index
    %c0_72 = arith.constant 0 : index
    %c0_73 = arith.constant 0 : index
    %c0_74 = arith.constant 0 : index
    %68 = vector.load %arg7[%c0_71, %c0_72, %c0_73, %c0_74] : memref<4x8x8x64xf32, #tpu.memory_space<vmem>>, vector<4x8x8x64xf32>
    %69 = arith.addf %68, %67 : vector<4x8x8x64xf32>
    %c0_75 = arith.constant 0 : index
    %c0_76 = arith.constant 0 : index
    %c0_77 = arith.constant 0 : index
    %c0_78 = arith.constant 0 : index
    %70 = vector.load %arg7[%c0_75, %c0_76, %c0_77, %c0_78] : memref<4x8x8x64xf32, #tpu.memory_space<vmem>>, vector<4x8x8x64xf32>
    tpu.vector_store %arg7[%c0_75, %c0_76, %c0_77, %c0_78], %69 {strides = array<i32>} : memref<4x8x8x64xf32, #tpu.memory_space<vmem>>, vector<4x8x8x64xf32>,
    %c6 = arith.constant 6 : index
    %c0_79 = arith.constant 0 : index
    %71 = vector.load %arg3[%c6, %c0_79] : memref<27x64xf32, #tpu.memory_space<vmem>>, vector<1x64xf32>
    %72 = vector.shape_cast %71 : vector<1x64xf32> to vector<64xf32>
    %73 = vector.shape_cast %72 : vector<64xf32> to vector<1x1x1x64xf32>
    %c0_i32_80 = arith.constant 0 : i32
    %74 = arith.addi %0, %c0_i32_80 : i32
    %c0_81 = arith.constant 0 : index
    %75 = arith.index_cast %74 : i32 to index
    %c2_82 = arith.constant 2 : index
    %c0_83 = arith.constant 0 : index
    %c0_84 = arith.constant 0 : index
    %76 = vector.load %arg2[%c0_81, %75, %c2_82, %c0_83, %c0_84] : memref<1x10x10x10x64xf32, #tpu.memory_space<vmem>>, vector<1x4x8x8x64xf32>
    %77 = vector.shape_cast %76 : vector<1x4x8x8x64xf32> to vector<4x8x8x64xf32>
    %78 = vector.broadcast %73 : vector<1x1x1x64xf32> to vector<4x8x8x64xf32>
    %79 = arith.mulf %77, %78 : vector<4x8x8x64xf32>
    %c0_85 = arith.constant 0 : index
    %c0_86 = arith.constant 0 : index
    %c0_87 = arith.constant 0 : index
    %c0_88 = arith.constant 0 : index
    %80 = vector.load %arg7[%c0_85, %c0_86, %c0_87, %c0_88] : memref<4x8x8x64xf32, #tpu.memory_space<vmem>>, vector<4x8x8x64xf32>
    %81 = arith.addf %80, %79 : vector<4x8x8x64xf32>
    %c0_89 = arith.constant 0 : index
    %c0_90 = arith.constant 0 : index
    %c0_91 = arith.constant 0 : index
    %c0_92 = arith.constant 0 : index
    %82 = vector.load %arg7[%c0_89, %c0_90, %c0_91, %c0_92] : memref<4x8x8x64xf32, #tpu.memory_space<vmem>>, vector<4x8x8x64xf32>
    tpu.vector_store %arg7[%c0_89, %c0_90, %c0_91, %c0_92], %81 {strides = array<i32>} : memref<4x8x8x64xf32, #tpu.memory_space<vmem>>, vector<4x8x8x64xf32>,
    %c7 = arith.constant 7 : index
    %c0_93 = arith.constant 0 : index
    %83 = vector.load %arg3[%c7, %c0_93] : memref<27x64xf32, #tpu.memory_space<vmem>>, vector<1x64xf32>
    %84 = vector.shape_cast %83 : vector<1x64xf32> to vector<64xf32>
    %85 = vector.shape_cast %84 : vector<64xf32> to vector<1x1x1x64xf32>
    %c0_i32_94 = arith.constant 0 : i32
    %86 = arith.addi %0, %c0_i32_94 : i32
    %c0_95 = arith.constant 0 : index
    %87 = arith.index_cast %86 : i32 to index
    %c2_96 = arith.constant 2 : index
    %c1_97 = arith.constant 1 : index
    %c0_98 = arith.constant 0 : index
    %88 = vector.load %arg2[%c0_95, %87, %c2_96, %c1_97, %c0_98] : memref<1x10x10x10x64xf32, #tpu.memory_space<vmem>>, vector<1x4x8x8x64xf32>
    %89 = vector.shape_cast %88 : vector<1x4x8x8x64xf32> to vector<4x8x8x64xf32>
    %90 = vector.broadcast %85 : vector<1x1x1x64xf32> to vector<4x8x8x64xf32>
    %91 = arith.mulf %89, %90 : vector<4x8x8x64xf32>
    %c0_99 = arith.constant 0 : index
    %c0_100 = arith.constant 0 : index
    %c0_101 = arith.constant 0 : index
    %c0_102 = arith.constant 0 : index
    %92 = vector.load %arg7[%c0_99, %c0_100, %c0_101, %c0_102] : memref<4x8x8x64xf32, #tpu.memory_space<vmem>>, vector<4x8x8x64xf32>
    %93 = arith.addf %92, %91 : vector<4x8x8x64xf32>
    %c0_103 = arith.constant 0 : index
    %c0_104 = arith.constant 0 : index
    %c0_105 = arith.constant 0 : index
    %c0_106 = arith.constant 0 : index
    %94 = vector.load %arg7[%c0_103, %c0_104, %c0_105, %c0_106] : memref<4x8x8x64xf32, #tpu.memory_space<vmem>>, vector<4x8x8x64xf32>
    tpu.vector_store %arg7[%c0_103, %c0_104, %c0_105, %c0_106], %93 {strides = array<i32>} : memref<4x8x8x64xf32, #tpu.memory_space<vmem>>, vector<4x8x8x64xf32>,
    %c8 = arith.constant 8 : index
    %c0_107 = arith.constant 0 : index
    %95 = vector.load %arg3[%c8, %c0_107] : memref<27x64xf32, #tpu.memory_space<vmem>>, vector<1x64xf32>
    %96 = vector.shape_cast %95 : vector<1x64xf32> to vector<64xf32>
    %97 = vector.shape_cast %96 : vector<64xf32> to vector<1x1x1x64xf32>
    %c0_i32_108 = arith.constant 0 : i32
    %98 = arith.addi %0, %c0_i32_108 : i32
    %c0_109 = arith.constant 0 : index
    %99 = arith.index_cast %98 : i32 to index
    %c2_110 = arith.constant 2 : index
    %c2_111 = arith.constant 2 : index
    %c0_112 = arith.constant 0 : index
    %100 = vector.load %arg2[%c0_109, %99, %c2_110, %c2_111, %c0_112] : memref<1x10x10x10x64xf32, #tpu.memory_space<vmem>>, vector<1x4x8x8x64xf32>
    %101 = vector.shape_cast %100 : vector<1x4x8x8x64xf32> to vector<4x8x8x64xf32>
    %102 = vector.broadcast %97 : vector<1x1x1x64xf32> to vector<4x8x8x64xf32>
    %103 = arith.mulf %101, %102 : vector<4x8x8x64xf32>
    %c0_113 = arith.constant 0 : index
    %c0_114 = arith.constant 0 : index
    %c0_115 = arith.constant 0 : index
    %c0_116 = arith.constant 0 : index
    %104 = vector.load %arg7[%c0_113, %c0_114, %c0_115, %c0_116] : memref<4x8x8x64xf32, #tpu.memory_space<vmem>>, vector<4x8x8x64xf32>
    %105 = arith.addf %104, %103 : vector<4x8x8x64xf32>
    %c0_117 = arith.constant 0 : index
    %c0_118 = arith.constant 0 : index
    %c0_119 = arith.constant 0 : index
    %c0_120 = arith.constant 0 : index
    %106 = vector.load %arg7[%c0_117, %c0_118, %c0_119, %c0_120] : memref<4x8x8x64xf32, #tpu.memory_space<vmem>>, vector<4x8x8x64xf32>
    tpu.vector_store %arg7[%c0_117, %c0_118, %c0_119, %c0_120], %105 {strides = array<i32>} : memref<4x8x8x64xf32, #tpu.memory_space<vmem>>, vector<4x8x8x64xf32>,
    %c9 = arith.constant 9 : index
    %c0_121 = arith.constant 0 : index
    %107 = vector.load %arg3[%c9, %c0_121] : memref<27x64xf32, #tpu.memory_space<vmem>>, vector<1x64xf32>
    %108 = vector.shape_cast %107 : vector<1x64xf32> to vector<64xf32>
    %109 = vector.shape_cast %108 : vector<64xf32> to vector<1x1x1x64xf32>
    %c1_i32 = arith.constant 1 : i32
    %110 = arith.addi %0, %c1_i32 : i32
    %c0_122 = arith.constant 0 : index
    %111 = arith.index_cast %110 : i32 to index
    %c0_123 = arith.constant 0 : index
    %c0_124 = arith.constant 0 : index
    %c0_125 = arith.constant 0 : index
    %112 = vector.load %arg2[%c0_122, %111, %c0_123, %c0_124, %c0_125] : memref<1x10x10x10x64xf32, #tpu.memory_space<vmem>>, vector<1x4x8x8x64xf32>
    %113 = vector.shape_cast %112 : vector<1x4x8x8x64xf32> to vector<4x8x8x64xf32>
    %114 = vector.broadcast %109 : vector<1x1x1x64xf32> to vector<4x8x8x64xf32>
    %115 = arith.mulf %113, %114 : vector<4x8x8x64xf32>
    %c0_126 = arith.constant 0 : index
    %c0_127 = arith.constant 0 : index
    %c0_128 = arith.constant 0 : index
    %c0_129 = arith.constant 0 : index
    %116 = vector.load %arg7[%c0_126, %c0_127, %c0_128, %c0_129] : memref<4x8x8x64xf32, #tpu.memory_space<vmem>>, vector<4x8x8x64xf32>
    %117 = arith.addf %116, %115 : vector<4x8x8x64xf32>
    %c0_130 = arith.constant 0 : index
    %c0_131 = arith.constant 0 : index
    %c0_132 = arith.constant 0 : index
    %c0_133 = arith.constant 0 : index
    %118 = vector.load %arg7[%c0_130, %c0_131, %c0_132, %c0_133] : memref<4x8x8x64xf32, #tpu.memory_space<vmem>>, vector<4x8x8x64xf32>
    tpu.vector_store %arg7[%c0_130, %c0_131, %c0_132, %c0_133], %117 {strides = array<i32>} : memref<4x8x8x64xf32, #tpu.memory_space<vmem>>, vector<4x8x8x64xf32>,
    %c10 = arith.constant 10 : index
    %c0_134 = arith.constant 0 : index
    %119 = vector.load %arg3[%c10, %c0_134] : memref<27x64xf32, #tpu.memory_space<vmem>>, vector<1x64xf32>
    %120 = vector.shape_cast %119 : vector<1x64xf32> to vector<64xf32>
    %121 = vector.shape_cast %120 : vector<64xf32> to vector<1x1x1x64xf32>
    %c1_i32_135 = arith.constant 1 : i32
    %122 = arith.addi %0, %c1_i32_135 : i32
    %c0_136 = arith.constant 0 : index
    %123 = arith.index_cast %122 : i32 to index
    %c0_137 = arith.constant 0 : index
    %c1_138 = arith.constant 1 : index
    %c0_139 = arith.constant 0 : index
    %124 = vector.load %arg2[%c0_136, %123, %c0_137, %c1_138, %c0_139] : memref<1x10x10x10x64xf32, #tpu.memory_space<vmem>>, vector<1x4x8x8x64xf32>
    %125 = vector.shape_cast %124 : vector<1x4x8x8x64xf32> to vector<4x8x8x64xf32>
    %126 = vector.broadcast %121 : vector<1x1x1x64xf32> to vector<4x8x8x64xf32>
    %127 = arith.mulf %125, %126 : vector<4x8x8x64xf32>
    %c0_140 = arith.constant 0 : index
    %c0_141 = arith.constant 0 : index
    %c0_142 = arith.constant 0 : index
    %c0_143 = arith.constant 0 : index
    %128 = vector.load %arg7[%c0_140, %c0_141, %c0_142, %c0_143] : memref<4x8x8x64xf32, #tpu.memory_space<vmem>>, vector<4x8x8x64xf32>
    %129 = arith.addf %128, %127 : vector<4x8x8x64xf32>
    %c0_144 = arith.constant 0 : index
    %c0_145 = arith.constant 0 : index
    %c0_146 = arith.constant 0 : index
    %c0_147 = arith.constant 0 : index
    %130 = vector.load %arg7[%c0_144, %c0_145, %c0_146, %c0_147] : memref<4x8x8x64xf32, #tpu.memory_space<vmem>>, vector<4x8x8x64xf32>
    tpu.vector_store %arg7[%c0_144, %c0_145, %c0_146, %c0_147], %129 {strides = array<i32>} : memref<4x8x8x64xf32, #tpu.memory_space<vmem>>, vector<4x8x8x64xf32>,
    %c11 = arith.constant 11 : index
    %c0_148 = arith.constant 0 : index
    %131 = vector.load %arg3[%c11, %c0_148] : memref<27x64xf32, #tpu.memory_space<vmem>>, vector<1x64xf32>
    %132 = vector.shape_cast %131 : vector<1x64xf32> to vector<64xf32>
    %133 = vector.shape_cast %132 : vector<64xf32> to vector<1x1x1x64xf32>
    %c1_i32_149 = arith.constant 1 : i32
    %134 = arith.addi %0, %c1_i32_149 : i32
    %c0_150 = arith.constant 0 : index
    %135 = arith.index_cast %134 : i32 to index
    %c0_151 = arith.constant 0 : index
    %c2_152 = arith.constant 2 : index
    %c0_153 = arith.constant 0 : index
    %136 = vector.load %arg2[%c0_150, %135, %c0_151, %c2_152, %c0_153] : memref<1x10x10x10x64xf32, #tpu.memory_space<vmem>>, vector<1x4x8x8x64xf32>
    %137 = vector.shape_cast %136 : vector<1x4x8x8x64xf32> to vector<4x8x8x64xf32>
    %138 = vector.broadcast %133 : vector<1x1x1x64xf32> to vector<4x8x8x64xf32>
    %139 = arith.mulf %137, %138 : vector<4x8x8x64xf32>
    %c0_154 = arith.constant 0 : index
    %c0_155 = arith.constant 0 : index
    %c0_156 = arith.constant 0 : index
    %c0_157 = arith.constant 0 : index
    %140 = vector.load %arg7[%c0_154, %c0_155, %c0_156, %c0_157] : memref<4x8x8x64xf32, #tpu.memory_space<vmem>>, vector<4x8x8x64xf32>
    %141 = arith.addf %140, %139 : vector<4x8x8x64xf32>
    %c0_158 = arith.constant 0 : index
    %c0_159 = arith.constant 0 : index
    %c0_160 = arith.constant 0 : index
    %c0_161 = arith.constant 0 : index
    %142 = vector.load %arg7[%c0_158, %c0_159, %c0_160, %c0_161] : memref<4x8x8x64xf32, #tpu.memory_space<vmem>>, vector<4x8x8x64xf32>
    tpu.vector_store %arg7[%c0_158, %c0_159, %c0_160, %c0_161], %141 {strides = array<i32>} : memref<4x8x8x64xf32, #tpu.memory_space<vmem>>, vector<4x8x8x64xf32>,
    %c12 = arith.constant 12 : index
    %c0_162 = arith.constant 0 : index
    %143 = vector.load %arg3[%c12, %c0_162] : memref<27x64xf32, #tpu.memory_space<vmem>>, vector<1x64xf32>
    %144 = vector.shape_cast %143 : vector<1x64xf32> to vector<64xf32>
    %145 = vector.shape_cast %144 : vector<64xf32> to vector<1x1x1x64xf32>
    %c1_i32_163 = arith.constant 1 : i32
    %146 = arith.addi %0, %c1_i32_163 : i32
    %c0_164 = arith.constant 0 : index
    %147 = arith.index_cast %146 : i32 to index
    %c1_165 = arith.constant 1 : index
    %c0_166 = arith.constant 0 : index
    %c0_167 = arith.constant 0 : index
    %148 = vector.load %arg2[%c0_164, %147, %c1_165, %c0_166, %c0_167] : memref<1x10x10x10x64xf32, #tpu.memory_space<vmem>>, vector<1x4x8x8x64xf32>
    %149 = vector.shape_cast %148 : vector<1x4x8x8x64xf32> to vector<4x8x8x64xf32>
    %150 = vector.broadcast %145 : vector<1x1x1x64xf32> to vector<4x8x8x64xf32>
    %151 = arith.mulf %149, %150 : vector<4x8x8x64xf32>
    %c0_168 = arith.constant 0 : index
    %c0_169 = arith.constant 0 : index
    %c0_170 = arith.constant 0 : index
    %c0_171 = arith.constant 0 : index
    %152 = vector.load %arg7[%c0_168, %c0_169, %c0_170, %c0_171] : memref<4x8x8x64xf32, #tpu.memory_space<vmem>>, vector<4x8x8x64xf32>
    %153 = arith.addf %152, %151 : vector<4x8x8x64xf32>
    %c0_172 = arith.constant 0 : index
    %c0_173 = arith.constant 0 : index
    %c0_174 = arith.constant 0 : index
    %c0_175 = arith.constant 0 : index
    %154 = vector.load %arg7[%c0_172, %c0_173, %c0_174, %c0_175] : memref<4x8x8x64xf32, #tpu.memory_space<vmem>>, vector<4x8x8x64xf32>
    tpu.vector_store %arg7[%c0_172, %c0_173, %c0_174, %c0_175], %153 {strides = array<i32>} : memref<4x8x8x64xf32, #tpu.memory_space<vmem>>, vector<4x8x8x64xf32>,
    %c13 = arith.constant 13 : index
    %c0_176 = arith.constant 0 : index
    %155 = vector.load %arg3[%c13, %c0_176] : memref<27x64xf32, #tpu.memory_space<vmem>>, vector<1x64xf32>
    %156 = vector.shape_cast %155 : vector<1x64xf32> to vector<64xf32>
    %157 = vector.shape_cast %156 : vector<64xf32> to vector<1x1x1x64xf32>
    %c1_i32_177 = arith.constant 1 : i32
    %158 = arith.addi %0, %c1_i32_177 : i32
    %c0_178 = arith.constant 0 : index
    %159 = arith.index_cast %158 : i32 to index
    %c1_179 = arith.constant 1 : index
    %c1_180 = arith.constant 1 : index
    %c0_181 = arith.constant 0 : index
    %160 = vector.load %arg2[%c0_178, %159, %c1_179, %c1_180, %c0_181] : memref<1x10x10x10x64xf32, #tpu.memory_space<vmem>>, vector<1x4x8x8x64xf32>
    %161 = vector.shape_cast %160 : vector<1x4x8x8x64xf32> to vector<4x8x8x64xf32>
    %162 = vector.broadcast %157 : vector<1x1x1x64xf32> to vector<4x8x8x64xf32>
    %163 = arith.mulf %161, %162 : vector<4x8x8x64xf32>
    %c0_182 = arith.constant 0 : index
    %c0_183 = arith.constant 0 : index
    %c0_184 = arith.constant 0 : index
    %c0_185 = arith.constant 0 : index
    %164 = vector.load %arg7[%c0_182, %c0_183, %c0_184, %c0_185] : memref<4x8x8x64xf32, #tpu.memory_space<vmem>>, vector<4x8x8x64xf32>
    %165 = arith.addf %164, %163 : vector<4x8x8x64xf32>
    %c0_186 = arith.constant 0 : index
    %c0_187 = arith.constant 0 : index
    %c0_188 = arith.constant 0 : index
    %c0_189 = arith.constant 0 : index
    %166 = vector.load %arg7[%c0_186, %c0_187, %c0_188, %c0_189] : memref<4x8x8x64xf32, #tpu.memory_space<vmem>>, vector<4x8x8x64xf32>
    tpu.vector_store %arg7[%c0_186, %c0_187, %c0_188, %c0_189], %165 {strides = array<i32>} : memref<4x8x8x64xf32, #tpu.memory_space<vmem>>, vector<4x8x8x64xf32>,
    %c14 = arith.constant 14 : index
    %c0_190 = arith.constant 0 : index
    %167 = vector.load %arg3[%c14, %c0_190] : memref<27x64xf32, #tpu.memory_space<vmem>>, vector<1x64xf32>
    %168 = vector.shape_cast %167 : vector<1x64xf32> to vector<64xf32>
    %169 = vector.shape_cast %168 : vector<64xf32> to vector<1x1x1x64xf32>
    %c1_i32_191 = arith.constant 1 : i32
    %170 = arith.addi %0, %c1_i32_191 : i32
    %c0_192 = arith.constant 0 : index
    %171 = arith.index_cast %170 : i32 to index
    %c1_193 = arith.constant 1 : index
    %c2_194 = arith.constant 2 : index
    %c0_195 = arith.constant 0 : index
    %172 = vector.load %arg2[%c0_192, %171, %c1_193, %c2_194, %c0_195] : memref<1x10x10x10x64xf32, #tpu.memory_space<vmem>>, vector<1x4x8x8x64xf32>
    %173 = vector.shape_cast %172 : vector<1x4x8x8x64xf32> to vector<4x8x8x64xf32>
    %174 = vector.broadcast %169 : vector<1x1x1x64xf32> to vector<4x8x8x64xf32>
    %175 = arith.mulf %173, %174 : vector<4x8x8x64xf32>
    %c0_196 = arith.constant 0 : index
    %c0_197 = arith.constant 0 : index
    %c0_198 = arith.constant 0 : index
    %c0_199 = arith.constant 0 : index
    %176 = vector.load %arg7[%c0_196, %c0_197, %c0_198, %c0_199] : memref<4x8x8x64xf32, #tpu.memory_space<vmem>>, vector<4x8x8x64xf32>
    %177 = arith.addf %176, %175 : vector<4x8x8x64xf32>
    %c0_200 = arith.constant 0 : index
    %c0_201 = arith.constant 0 : index
    %c0_202 = arith.constant 0 : index
    %c0_203 = arith.constant 0 : index
    %178 = vector.load %arg7[%c0_200, %c0_201, %c0_202, %c0_203] : memref<4x8x8x64xf32, #tpu.memory_space<vmem>>, vector<4x8x8x64xf32>
    tpu.vector_store %arg7[%c0_200, %c0_201, %c0_202, %c0_203], %177 {strides = array<i32>} : memref<4x8x8x64xf32, #tpu.memory_space<vmem>>, vector<4x8x8x64xf32>,
    %c15 = arith.constant 15 : index
    %c0_204 = arith.constant 0 : index
    %179 = vector.load %arg3[%c15, %c0_204] : memref<27x64xf32, #tpu.memory_space<vmem>>, vector<1x64xf32>
    %180 = vector.shape_cast %179 : vector<1x64xf32> to vector<64xf32>
    %181 = vector.shape_cast %180 : vector<64xf32> to vector<1x1x1x64xf32>
    %c1_i32_205 = arith.constant 1 : i32
    %182 = arith.addi %0, %c1_i32_205 : i32
    %c0_206 = arith.constant 0 : index
    %183 = arith.index_cast %182 : i32 to index
    %c2_207 = arith.constant 2 : index
    %c0_208 = arith.constant 0 : index
    %c0_209 = arith.constant 0 : index
    %184 = vector.load %arg2[%c0_206, %183, %c2_207, %c0_208, %c0_209] : memref<1x10x10x10x64xf32, #tpu.memory_space<vmem>>, vector<1x4x8x8x64xf32>
    %185 = vector.shape_cast %184 : vector<1x4x8x8x64xf32> to vector<4x8x8x64xf32>
    %186 = vector.broadcast %181 : vector<1x1x1x64xf32> to vector<4x8x8x64xf32>
    %187 = arith.mulf %185, %186 : vector<4x8x8x64xf32>
    %c0_210 = arith.constant 0 : index
    %c0_211 = arith.constant 0 : index
    %c0_212 = arith.constant 0 : index
    %c0_213 = arith.constant 0 : index
    %188 = vector.load %arg7[%c0_210, %c0_211, %c0_212, %c0_213] : memref<4x8x8x64xf32, #tpu.memory_space<vmem>>, vector<4x8x8x64xf32>
    %189 = arith.addf %188, %187 : vector<4x8x8x64xf32>
    %c0_214 = arith.constant 0 : index
    %c0_215 = arith.constant 0 : index
    %c0_216 = arith.constant 0 : index
    %c0_217 = arith.constant 0 : index
    %190 = vector.load %arg7[%c0_214, %c0_215, %c0_216, %c0_217] : memref<4x8x8x64xf32, #tpu.memory_space<vmem>>, vector<4x8x8x64xf32>
    tpu.vector_store %arg7[%c0_214, %c0_215, %c0_216, %c0_217], %189 {strides = array<i32>} : memref<4x8x8x64xf32, #tpu.memory_space<vmem>>, vector<4x8x8x64xf32>,
    %c16 = arith.constant 16 : index
    %c0_218 = arith.constant 0 : index
    %191 = vector.load %arg3[%c16, %c0_218] : memref<27x64xf32, #tpu.memory_space<vmem>>, vector<1x64xf32>
    %192 = vector.shape_cast %191 : vector<1x64xf32> to vector<64xf32>
    %193 = vector.shape_cast %192 : vector<64xf32> to vector<1x1x1x64xf32>
    %c1_i32_219 = arith.constant 1 : i32
    %194 = arith.addi %0, %c1_i32_219 : i32
    %c0_220 = arith.constant 0 : index
    %195 = arith.index_cast %194 : i32 to index
    %c2_221 = arith.constant 2 : index
    %c1_222 = arith.constant 1 : index
    %c0_223 = arith.constant 0 : index
    %196 = vector.load %arg2[%c0_220, %195, %c2_221, %c1_222, %c0_223] : memref<1x10x10x10x64xf32, #tpu.memory_space<vmem>>, vector<1x4x8x8x64xf32>
    %197 = vector.shape_cast %196 : vector<1x4x8x8x64xf32> to vector<4x8x8x64xf32>
    %198 = vector.broadcast %193 : vector<1x1x1x64xf32> to vector<4x8x8x64xf32>
    %199 = arith.mulf %197, %198 : vector<4x8x8x64xf32>
    %c0_224 = arith.constant 0 : index
    %c0_225 = arith.constant 0 : index
    %c0_226 = arith.constant 0 : index
    %c0_227 = arith.constant 0 : index
    %200 = vector.load %arg7[%c0_224, %c0_225, %c0_226, %c0_227] : memref<4x8x8x64xf32, #tpu.memory_space<vmem>>, vector<4x8x8x64xf32>
    %201 = arith.addf %200, %199 : vector<4x8x8x64xf32>
    %c0_228 = arith.constant 0 : index
    %c0_229 = arith.constant 0 : index
    %c0_230 = arith.constant 0 : index
    %c0_231 = arith.constant 0 : index
    %202 = vector.load %arg7[%c0_228, %c0_229, %c0_230, %c0_231] : memref<4x8x8x64xf32, #tpu.memory_space<vmem>>, vector<4x8x8x64xf32>
    tpu.vector_store %arg7[%c0_228, %c0_229, %c0_230, %c0_231], %201 {strides = array<i32>} : memref<4x8x8x64xf32, #tpu.memory_space<vmem>>, vector<4x8x8x64xf32>,
    %c17 = arith.constant 17 : index
    %c0_232 = arith.constant 0 : index
    %203 = vector.load %arg3[%c17, %c0_232] : memref<27x64xf32, #tpu.memory_space<vmem>>, vector<1x64xf32>
    %204 = vector.shape_cast %203 : vector<1x64xf32> to vector<64xf32>
    %205 = vector.shape_cast %204 : vector<64xf32> to vector<1x1x1x64xf32>
    %c1_i32_233 = arith.constant 1 : i32
    %206 = arith.addi %0, %c1_i32_233 : i32
    %c0_234 = arith.constant 0 : index
    %207 = arith.index_cast %206 : i32 to index
    %c2_235 = arith.constant 2 : index
    %c2_236 = arith.constant 2 : index
    %c0_237 = arith.constant 0 : index
    %208 = vector.load %arg2[%c0_234, %207, %c2_235, %c2_236, %c0_237] : memref<1x10x10x10x64xf32, #tpu.memory_space<vmem>>, vector<1x4x8x8x64xf32>
    %209 = vector.shape_cast %208 : vector<1x4x8x8x64xf32> to vector<4x8x8x64xf32>
    %210 = vector.broadcast %205 : vector<1x1x1x64xf32> to vector<4x8x8x64xf32>
    %211 = arith.mulf %209, %210 : vector<4x8x8x64xf32>
    %c0_238 = arith.constant 0 : index
    %c0_239 = arith.constant 0 : index
    %c0_240 = arith.constant 0 : index
    %c0_241 = arith.constant 0 : index
    %212 = vector.load %arg7[%c0_238, %c0_239, %c0_240, %c0_241] : memref<4x8x8x64xf32, #tpu.memory_space<vmem>>, vector<4x8x8x64xf32>
    %213 = arith.addf %212, %211 : vector<4x8x8x64xf32>
    %c0_242 = arith.constant 0 : index
    %c0_243 = arith.constant 0 : index
    %c0_244 = arith.constant 0 : index
    %c0_245 = arith.constant 0 : index
    %214 = vector.load %arg7[%c0_242, %c0_243, %c0_244, %c0_245] : memref<4x8x8x64xf32, #tpu.memory_space<vmem>>, vector<4x8x8x64xf32>
    tpu.vector_store %arg7[%c0_242, %c0_243, %c0_244, %c0_245], %213 {strides = array<i32>} : memref<4x8x8x64xf32, #tpu.memory_space<vmem>>, vector<4x8x8x64xf32>,
    %c18 = arith.constant 18 : index
    %c0_246 = arith.constant 0 : index
    %215 = vector.load %arg3[%c18, %c0_246] : memref<27x64xf32, #tpu.memory_space<vmem>>, vector<1x64xf32>
    %216 = vector.shape_cast %215 : vector<1x64xf32> to vector<64xf32>
    %217 = vector.shape_cast %216 : vector<64xf32> to vector<1x1x1x64xf32>
    %c2_i32 = arith.constant 2 : i32
    %218 = arith.addi %0, %c2_i32 : i32
    %c0_247 = arith.constant 0 : index
    %219 = arith.index_cast %218 : i32 to index
    %c0_248 = arith.constant 0 : index
    %c0_249 = arith.constant 0 : index
    %c0_250 = arith.constant 0 : index
    %220 = vector.load %arg2[%c0_247, %219, %c0_248, %c0_249, %c0_250] : memref<1x10x10x10x64xf32, #tpu.memory_space<vmem>>, vector<1x4x8x8x64xf32>
    %221 = vector.shape_cast %220 : vector<1x4x8x8x64xf32> to vector<4x8x8x64xf32>
    %222 = vector.broadcast %217 : vector<1x1x1x64xf32> to vector<4x8x8x64xf32>
    %223 = arith.mulf %221, %222 : vector<4x8x8x64xf32>
    %c0_251 = arith.constant 0 : index
    %c0_252 = arith.constant 0 : index
    %c0_253 = arith.constant 0 : index
    %c0_254 = arith.constant 0 : index
    %224 = vector.load %arg7[%c0_251, %c0_252, %c0_253, %c0_254] : memref<4x8x8x64xf32, #tpu.memory_space<vmem>>, vector<4x8x8x64xf32>
    %225 = arith.addf %224, %223 : vector<4x8x8x64xf32>
    %c0_255 = arith.constant 0 : index
    %c0_256 = arith.constant 0 : index
    %c0_257 = arith.constant 0 : index
    %c0_258 = arith.constant 0 : index
    %226 = vector.load %arg7[%c0_255, %c0_256, %c0_257, %c0_258] : memref<4x8x8x64xf32, #tpu.memory_space<vmem>>, vector<4x8x8x64xf32>
    tpu.vector_store %arg7[%c0_255, %c0_256, %c0_257, %c0_258], %225 {strides = array<i32>} : memref<4x8x8x64xf32, #tpu.memory_space<vmem>>, vector<4x8x8x64xf32>,
    %c19 = arith.constant 19 : index
    %c0_259 = arith.constant 0 : index
    %227 = vector.load %arg3[%c19, %c0_259] : memref<27x64xf32, #tpu.memory_space<vmem>>, vector<1x64xf32>
    %228 = vector.shape_cast %227 : vector<1x64xf32> to vector<64xf32>
    %229 = vector.shape_cast %228 : vector<64xf32> to vector<1x1x1x64xf32>
    %c2_i32_260 = arith.constant 2 : i32
    %230 = arith.addi %0, %c2_i32_260 : i32
    %c0_261 = arith.constant 0 : index
    %231 = arith.index_cast %230 : i32 to index
    %c0_262 = arith.constant 0 : index
    %c1_263 = arith.constant 1 : index
    %c0_264 = arith.constant 0 : index
    %232 = vector.load %arg2[%c0_261, %231, %c0_262, %c1_263, %c0_264] : memref<1x10x10x10x64xf32, #tpu.memory_space<vmem>>, vector<1x4x8x8x64xf32>
    %233 = vector.shape_cast %232 : vector<1x4x8x8x64xf32> to vector<4x8x8x64xf32>
    %234 = vector.broadcast %229 : vector<1x1x1x64xf32> to vector<4x8x8x64xf32>
    %235 = arith.mulf %233, %234 : vector<4x8x8x64xf32>
    %c0_265 = arith.constant 0 : index
    %c0_266 = arith.constant 0 : index
    %c0_267 = arith.constant 0 : index
    %c0_268 = arith.constant 0 : index
    %236 = vector.load %arg7[%c0_265, %c0_266, %c0_267, %c0_268] : memref<4x8x8x64xf32, #tpu.memory_space<vmem>>, vector<4x8x8x64xf32>
    %237 = arith.addf %236, %235 : vector<4x8x8x64xf32>
    %c0_269 = arith.constant 0 : index
    %c0_270 = arith.constant 0 : index
    %c0_271 = arith.constant 0 : index
    %c0_272 = arith.constant 0 : index
    %238 = vector.load %arg7[%c0_269, %c0_270, %c0_271, %c0_272] : memref<4x8x8x64xf32, #tpu.memory_space<vmem>>, vector<4x8x8x64xf32>
    tpu.vector_store %arg7[%c0_269, %c0_270, %c0_271, %c0_272], %237 {strides = array<i32>} : memref<4x8x8x64xf32, #tpu.memory_space<vmem>>, vector<4x8x8x64xf32>,
    %c20 = arith.constant 20 : index
    %c0_273 = arith.constant 0 : index
    %239 = vector.load %arg3[%c20, %c0_273] : memref<27x64xf32, #tpu.memory_space<vmem>>, vector<1x64xf32>
    %240 = vector.shape_cast %239 : vector<1x64xf32> to vector<64xf32>
    %241 = vector.shape_cast %240 : vector<64xf32> to vector<1x1x1x64xf32>
    %c2_i32_274 = arith.constant 2 : i32
    %242 = arith.addi %0, %c2_i32_274 : i32
    %c0_275 = arith.constant 0 : index
    %243 = arith.index_cast %242 : i32 to index
    %c0_276 = arith.constant 0 : index
    %c2_277 = arith.constant 2 : index
    %c0_278 = arith.constant 0 : index
    %244 = vector.load %arg2[%c0_275, %243, %c0_276, %c2_277, %c0_278] : memref<1x10x10x10x64xf32, #tpu.memory_space<vmem>>, vector<1x4x8x8x64xf32>
    %245 = vector.shape_cast %244 : vector<1x4x8x8x64xf32> to vector<4x8x8x64xf32>
    %246 = vector.broadcast %241 : vector<1x1x1x64xf32> to vector<4x8x8x64xf32>
    %247 = arith.mulf %245, %246 : vector<4x8x8x64xf32>
    %c0_279 = arith.constant 0 : index
    %c0_280 = arith.constant 0 : index
    %c0_281 = arith.constant 0 : index
    %c0_282 = arith.constant 0 : index
    %248 = vector.load %arg7[%c0_279, %c0_280, %c0_281, %c0_282] : memref<4x8x8x64xf32, #tpu.memory_space<vmem>>, vector<4x8x8x64xf32>
    %249 = arith.addf %248, %247 : vector<4x8x8x64xf32>
    %c0_283 = arith.constant 0 : index
    %c0_284 = arith.constant 0 : index
    %c0_285 = arith.constant 0 : index
    %c0_286 = arith.constant 0 : index
    %250 = vector.load %arg7[%c0_283, %c0_284, %c0_285, %c0_286] : memref<4x8x8x64xf32, #tpu.memory_space<vmem>>, vector<4x8x8x64xf32>
    tpu.vector_store %arg7[%c0_283, %c0_284, %c0_285, %c0_286], %249 {strides = array<i32>} : memref<4x8x8x64xf32, #tpu.memory_space<vmem>>, vector<4x8x8x64xf32>,
    %c21 = arith.constant 21 : index
    %c0_287 = arith.constant 0 : index
    %251 = vector.load %arg3[%c21, %c0_287] : memref<27x64xf32, #tpu.memory_space<vmem>>, vector<1x64xf32>
    %252 = vector.shape_cast %251 : vector<1x64xf32> to vector<64xf32>
    %253 = vector.shape_cast %252 : vector<64xf32> to vector<1x1x1x64xf32>
    %c2_i32_288 = arith.constant 2 : i32
    %254 = arith.addi %0, %c2_i32_288 : i32
    %c0_289 = arith.constant 0 : index
    %255 = arith.index_cast %254 : i32 to index
    %c1_290 = arith.constant 1 : index
    %c0_291 = arith.constant 0 : index
    %c0_292 = arith.constant 0 : index
    %256 = vector.load %arg2[%c0_289, %255, %c1_290, %c0_291, %c0_292] : memref<1x10x10x10x64xf32, #tpu.memory_space<vmem>>, vector<1x4x8x8x64xf32>
    %257 = vector.shape_cast %256 : vector<1x4x8x8x64xf32> to vector<4x8x8x64xf32>
    %258 = vector.broadcast %253 : vector<1x1x1x64xf32> to vector<4x8x8x64xf32>
    %259 = arith.mulf %257, %258 : vector<4x8x8x64xf32>
    %c0_293 = arith.constant 0 : index
    %c0_294 = arith.constant 0 : index
    %c0_295 = arith.constant 0 : index
    %c0_296 = arith.constant 0 : index
    %260 = vector.load %arg7[%c0_293, %c0_294, %c0_295, %c0_296] : memref<4x8x8x64xf32, #tpu.memory_space<vmem>>, vector<4x8x8x64xf32>
    %261 = arith.addf %260, %259 : vector<4x8x8x64xf32>
    %c0_297 = arith.constant 0 : index
    %c0_298 = arith.constant 0 : index
    %c0_299 = arith.constant 0 : index
    %c0_300 = arith.constant 0 : index
    %262 = vector.load %arg7[%c0_297, %c0_298, %c0_299, %c0_300] : memref<4x8x8x64xf32, #tpu.memory_space<vmem>>, vector<4x8x8x64xf32>
    tpu.vector_store %arg7[%c0_297, %c0_298, %c0_299, %c0_300], %261 {strides = array<i32>} : memref<4x8x8x64xf32, #tpu.memory_space<vmem>>, vector<4x8x8x64xf32>,
    %c22 = arith.constant 22 : index
    %c0_301 = arith.constant 0 : index
    %263 = vector.load %arg3[%c22, %c0_301] : memref<27x64xf32, #tpu.memory_space<vmem>>, vector<1x64xf32>
    %264 = vector.shape_cast %263 : vector<1x64xf32> to vector<64xf32>
    %265 = vector.shape_cast %264 : vector<64xf32> to vector<1x1x1x64xf32>
    %c2_i32_302 = arith.constant 2 : i32
    %266 = arith.addi %0, %c2_i32_302 : i32
    %c0_303 = arith.constant 0 : index
    %267 = arith.index_cast %266 : i32 to index
    %c1_304 = arith.constant 1 : index
    %c1_305 = arith.constant 1 : index
    %c0_306 = arith.constant 0 : index
    %268 = vector.load %arg2[%c0_303, %267, %c1_304, %c1_305, %c0_306] : memref<1x10x10x10x64xf32, #tpu.memory_space<vmem>>, vector<1x4x8x8x64xf32>
    %269 = vector.shape_cast %268 : vector<1x4x8x8x64xf32> to vector<4x8x8x64xf32>
    %270 = vector.broadcast %265 : vector<1x1x1x64xf32> to vector<4x8x8x64xf32>
    %271 = arith.mulf %269, %270 : vector<4x8x8x64xf32>
    %c0_307 = arith.constant 0 : index
    %c0_308 = arith.constant 0 : index
    %c0_309 = arith.constant 0 : index
    %c0_310 = arith.constant 0 : index
    %272 = vector.load %arg7[%c0_307, %c0_308, %c0_309, %c0_310] : memref<4x8x8x64xf32, #tpu.memory_space<vmem>>, vector<4x8x8x64xf32>
    %273 = arith.addf %272, %271 : vector<4x8x8x64xf32>
    %c0_311 = arith.constant 0 : index
    %c0_312 = arith.constant 0 : index
    %c0_313 = arith.constant 0 : index
    %c0_314 = arith.constant 0 : index
    %274 = vector.load %arg7[%c0_311, %c0_312, %c0_313, %c0_314] : memref<4x8x8x64xf32, #tpu.memory_space<vmem>>, vector<4x8x8x64xf32>
    tpu.vector_store %arg7[%c0_311, %c0_312, %c0_313, %c0_314], %273 {strides = array<i32>} : memref<4x8x8x64xf32, #tpu.memory_space<vmem>>, vector<4x8x8x64xf32>,
    %c23 = arith.constant 23 : index
    %c0_315 = arith.constant 0 : index
    %275 = vector.load %arg3[%c23, %c0_315] : memref<27x64xf32, #tpu.memory_space<vmem>>, vector<1x64xf32>
    %276 = vector.shape_cast %275 : vector<1x64xf32> to vector<64xf32>
    %277 = vector.shape_cast %276 : vector<64xf32> to vector<1x1x1x64xf32>
    %c2_i32_316 = arith.constant 2 : i32
    %278 = arith.addi %0, %c2_i32_316 : i32
    %c0_317 = arith.constant 0 : index
    %279 = arith.index_cast %278 : i32 to index
    %c1_318 = arith.constant 1 : index
    %c2_319 = arith.constant 2 : index
    %c0_320 = arith.constant 0 : index
    %280 = vector.load %arg2[%c0_317, %279, %c1_318, %c2_319, %c0_320] : memref<1x10x10x10x64xf32, #tpu.memory_space<vmem>>, vector<1x4x8x8x64xf32>
    %281 = vector.shape_cast %280 : vector<1x4x8x8x64xf32> to vector<4x8x8x64xf32>
    %282 = vector.broadcast %277 : vector<1x1x1x64xf32> to vector<4x8x8x64xf32>
    %283 = arith.mulf %281, %282 : vector<4x8x8x64xf32>
    %c0_321 = arith.constant 0 : index
    %c0_322 = arith.constant 0 : index
    %c0_323 = arith.constant 0 : index
    %c0_324 = arith.constant 0 : index
    %284 = vector.load %arg7[%c0_321, %c0_322, %c0_323, %c0_324] : memref<4x8x8x64xf32, #tpu.memory_space<vmem>>, vector<4x8x8x64xf32>
    %285 = arith.addf %284, %283 : vector<4x8x8x64xf32>
    %c0_325 = arith.constant 0 : index
    %c0_326 = arith.constant 0 : index
    %c0_327 = arith.constant 0 : index
    %c0_328 = arith.constant 0 : index
    %286 = vector.load %arg7[%c0_325, %c0_326, %c0_327, %c0_328] : memref<4x8x8x64xf32, #tpu.memory_space<vmem>>, vector<4x8x8x64xf32>
    tpu.vector_store %arg7[%c0_325, %c0_326, %c0_327, %c0_328], %285 {strides = array<i32>} : memref<4x8x8x64xf32, #tpu.memory_space<vmem>>, vector<4x8x8x64xf32>,
    %c24 = arith.constant 24 : index
    %c0_329 = arith.constant 0 : index
    %287 = vector.load %arg3[%c24, %c0_329] : memref<27x64xf32, #tpu.memory_space<vmem>>, vector<1x64xf32>
    %288 = vector.shape_cast %287 : vector<1x64xf32> to vector<64xf32>
    %289 = vector.shape_cast %288 : vector<64xf32> to vector<1x1x1x64xf32>
    %c2_i32_330 = arith.constant 2 : i32
    %290 = arith.addi %0, %c2_i32_330 : i32
    %c0_331 = arith.constant 0 : index
    %291 = arith.index_cast %290 : i32 to index
    %c2_332 = arith.constant 2 : index
    %c0_333 = arith.constant 0 : index
    %c0_334 = arith.constant 0 : index
    %292 = vector.load %arg2[%c0_331, %291, %c2_332, %c0_333, %c0_334] : memref<1x10x10x10x64xf32, #tpu.memory_space<vmem>>, vector<1x4x8x8x64xf32>
    %293 = vector.shape_cast %292 : vector<1x4x8x8x64xf32> to vector<4x8x8x64xf32>
    %294 = vector.broadcast %289 : vector<1x1x1x64xf32> to vector<4x8x8x64xf32>
    %295 = arith.mulf %293, %294 : vector<4x8x8x64xf32>
    %c0_335 = arith.constant 0 : index
    %c0_336 = arith.constant 0 : index
    %c0_337 = arith.constant 0 : index
    %c0_338 = arith.constant 0 : index
    %296 = vector.load %arg7[%c0_335, %c0_336, %c0_337, %c0_338] : memref<4x8x8x64xf32, #tpu.memory_space<vmem>>, vector<4x8x8x64xf32>
    %297 = arith.addf %296, %295 : vector<4x8x8x64xf32>
    %c0_339 = arith.constant 0 : index
    %c0_340 = arith.constant 0 : index
    %c0_341 = arith.constant 0 : index
    %c0_342 = arith.constant 0 : index
    %298 = vector.load %arg7[%c0_339, %c0_340, %c0_341, %c0_342] : memref<4x8x8x64xf32, #tpu.memory_space<vmem>>, vector<4x8x8x64xf32>
    tpu.vector_store %arg7[%c0_339, %c0_340, %c0_341, %c0_342], %297 {strides = array<i32>} : memref<4x8x8x64xf32, #tpu.memory_space<vmem>>, vector<4x8x8x64xf32>,
    %c25 = arith.constant 25 : index
    %c0_343 = arith.constant 0 : index
    %299 = vector.load %arg3[%c25, %c0_343] : memref<27x64xf32, #tpu.memory_space<vmem>>, vector<1x64xf32>
    %300 = vector.shape_cast %299 : vector<1x64xf32> to vector<64xf32>
    %301 = vector.shape_cast %300 : vector<64xf32> to vector<1x1x1x64xf32>
    %c2_i32_344 = arith.constant 2 : i32
    %302 = arith.addi %0, %c2_i32_344 : i32
    %c0_345 = arith.constant 0 : index
    %303 = arith.index_cast %302 : i32 to index
    %c2_346 = arith.constant 2 : index
    %c1_347 = arith.constant 1 : index
    %c0_348 = arith.constant 0 : index
    %304 = vector.load %arg2[%c0_345, %303, %c2_346, %c1_347, %c0_348] : memref<1x10x10x10x64xf32, #tpu.memory_space<vmem>>, vector<1x4x8x8x64xf32>
    %305 = vector.shape_cast %304 : vector<1x4x8x8x64xf32> to vector<4x8x8x64xf32>
    %306 = vector.broadcast %301 : vector<1x1x1x64xf32> to vector<4x8x8x64xf32>
    %307 = arith.mulf %305, %306 : vector<4x8x8x64xf32>
    %c0_349 = arith.constant 0 : index
    %c0_350 = arith.constant 0 : index
    %c0_351 = arith.constant 0 : index
    %c0_352 = arith.constant 0 : index
    %308 = vector.load %arg7[%c0_349, %c0_350, %c0_351, %c0_352] : memref<4x8x8x64xf32, #tpu.memory_space<vmem>>, vector<4x8x8x64xf32>
    %309 = arith.addf %308, %307 : vector<4x8x8x64xf32>
    %c0_353 = arith.constant 0 : index
    %c0_354 = arith.constant 0 : index
    %c0_355 = arith.constant 0 : index
    %c0_356 = arith.constant 0 : index
    %310 = vector.load %arg7[%c0_353, %c0_354, %c0_355, %c0_356] : memref<4x8x8x64xf32, #tpu.memory_space<vmem>>, vector<4x8x8x64xf32>
    tpu.vector_store %arg7[%c0_353, %c0_354, %c0_355, %c0_356], %309 {strides = array<i32>} : memref<4x8x8x64xf32, #tpu.memory_space<vmem>>, vector<4x8x8x64xf32>,
    %c26 = arith.constant 26 : index
    %c0_357 = arith.constant 0 : index
    %311 = vector.load %arg3[%c26, %c0_357] : memref<27x64xf32, #tpu.memory_space<vmem>>, vector<1x64xf32>
    %312 = vector.shape_cast %311 : vector<1x64xf32> to vector<64xf32>
    %313 = vector.shape_cast %312 : vector<64xf32> to vector<1x1x1x64xf32>
    %c2_i32_358 = arith.constant 2 : i32
    %314 = arith.addi %0, %c2_i32_358 : i32
    %c0_359 = arith.constant 0 : index
    %315 = arith.index_cast %314 : i32 to index
    %c2_360 = arith.constant 2 : index
    %c2_361 = arith.constant 2 : index
    %c0_362 = arith.constant 0 : index
    %316 = vector.load %arg2[%c0_359, %315, %c2_360, %c2_361, %c0_362] : memref<1x10x10x10x64xf32, #tpu.memory_space<vmem>>, vector<1x4x8x8x64xf32>
    %317 = vector.shape_cast %316 : vector<1x4x8x8x64xf32> to vector<4x8x8x64xf32>
    %318 = vector.broadcast %313 : vector<1x1x1x64xf32> to vector<4x8x8x64xf32>
    %319 = arith.mulf %317, %318 : vector<4x8x8x64xf32>
    %c0_363 = arith.constant 0 : index
    %c0_364 = arith.constant 0 : index
    %c0_365 = arith.constant 0 : index
    %c0_366 = arith.constant 0 : index
    %320 = vector.load %arg7[%c0_363, %c0_364, %c0_365, %c0_366] : memref<4x8x8x64xf32, #tpu.memory_space<vmem>>, vector<4x8x8x64xf32>
    %321 = arith.addf %320, %319 : vector<4x8x8x64xf32>
    %c0_367 = arith.constant 0 : index
    %c0_368 = arith.constant 0 : index
    %c0_369 = arith.constant 0 : index
    %c0_370 = arith.constant 0 : index
    %322 = vector.load %arg7[%c0_367, %c0_368, %c0_369, %c0_370] : memref<4x8x8x64xf32, #tpu.memory_space<vmem>>, vector<4x8x8x64xf32>
    tpu.vector_store %arg7[%c0_367, %c0_368, %c0_369, %c0_370], %321 {strides = array<i32>} : memref<4x8x8x64xf32, #tpu.memory_space<vmem>>, vector<4x8x8x64xf32>,
    %c0_371 = arith.constant 0 : index
    %c0_372 = arith.constant 0 : index
    %c0_373 = arith.constant 0 : index
    %c0_374 = arith.constant 0 : index
    %323 = vector.load %arg7[%c0_371, %c0_372, %c0_373, %c0_374] : memref<4x8x8x64xf32, #tpu.memory_space<vmem>>, vector<4x8x8x64xf32>
    %324 = vector.shape_cast %323 : vector<4x8x8x64xf32> to vector<256x64xf32>
    %c0_375 = arith.constant 0 : index
    %c0_376 = arith.constant 0 : index
    %325 = vector.load %arg4[%c0_375, %c0_376] : memref<64x64xf32, #tpu.memory_space<vmem>>, vector<64x64xf32>
    %cst = arith.constant dense<0.000000e+00> : vector<256x64xf32>
    %326 = tpu.matmul %324, %325, %cst {dimension_numbers = #tpu.dot_dimension_numbers<[1], [0], [0], [1], [0, 0, 1, 1], [], []>} : vector<256x64xf32>, vector<64x64xf32>, vector<256x64xf32> -> vector<256x64xf32>
    %c0_377 = arith.constant 0 : index
    %c0_378 = arith.constant 0 : index
    %327 = vector.load %arg5[%c0_377, %c0_378] : memref<1x64xf32, #tpu.memory_space<vmem>>, vector<1x64xf32>
    %328 = vector.broadcast %327 : vector<1x64xf32> to vector<256x64xf32>
    %329 = arith.addf %326, %328 : vector<256x64xf32>
    %cst_379 = arith.constant 0.000000e+00 : f32
    %330 = vector.broadcast %cst_379 : f32 to vector<256x64xf32>
    %331 = arith.maximumf %329, %330 : vector<256x64xf32>
    %332 = vector.shape_cast %331 : vector<256x64xf32> to vector<4x8x8x64xf32>
    %c0_380 = arith.constant 0 : index
    %c0_381 = arith.constant 0 : index
    %c0_382 = arith.constant 0 : index
    %c0_383 = arith.constant 0 : index
    %c0_384 = arith.constant 0 : index
    %333 = vector.load %arg6[%c0_380, %c0_381, %c0_382, %c0_383, %c0_384] : memref<1x4x8x8x64xf32, #tpu.memory_space<vmem>>, vector<1x4x8x8x64xf32>
    %334 = vector.shape_cast %333 : vector<1x4x8x8x64xf32> to vector<4x8x8x64xf32>
    %335 = vector.shape_cast %332 : vector<4x8x8x64xf32> to vector<1x4x8x8x64xf32>
    tpu.vector_store %arg6[%c0_380, %c0_381, %c0_382, %c0_383, %c0_384], %335 {strides = array<i32>} : memref<1x4x8x8x64xf32, #tpu.memory_space<vmem>>, vector<1x4x8x8x64xf32>,
    return
  }
  func.func @transform_0(%arg0: i32, %arg1: i32) -> (i32, i32, i32, i32, i32) {
    %c0_i32 = arith.constant 0 : i32
    %c0_i32_0 = arith.constant 0 : i32
    %c0_i32_1 = arith.constant 0 : i32
    %c0_i32_2 = arith.constant 0 : i32
    %c0_i32_3 = arith.constant 0 : i32
    return %arg0, %c0_i32, %c0_i32_0, %c0_i32_1, %c0_i32_2 : i32, i32, i32, i32, i32
  }
  func.func @transform_1(%arg0: i32, %arg1: i32) -> (i32, i32) {
    %c0_i32 = arith.constant 0 : i32
    %c0_i32_0 = arith.constant 0 : i32
    %c0_i32_1 = arith.constant 0 : i32
    return %c0_i32, %c0_i32_0 : i32, i32
  }
  func.func @transform_2(%arg0: i32, %arg1: i32) -> (i32, i32) {
    %c0_i32 = arith.constant 0 : i32
    %c0_i32_0 = arith.constant 0 : i32
    %c0_i32_1 = arith.constant 0 : i32
    return %c0_i32, %c0_i32_0 : i32, i32
  }
  func.func @transform_3(%arg0: i32, %arg1: i32) -> (i32, i32) {
    %c0_i32 = arith.constant 0 : i32
    %c0_i32_0 = arith.constant 0 : i32
    %c0_i32_1 = arith.constant 0 : i32
    return %c0_i32, %c0_i32_0 : i32, i32
  }
  func.func @transform_4(%arg0: i32, %arg1: i32) -> (i32, i32, i32, i32, i32) {
    %c0_i32 = arith.constant 0 : i32
    %c0_i32_0 = arith.constant 0 : i32
    %c0_i32_1 = arith.constant 0 : i32
    %c0_i32_2 = arith.constant 0 : i32
    return %arg0, %arg1, %c0_i32, %c0_i32_0, %c0_i32_1 : i32, i32, i32, i32, i32
  }
}

</mosaic_0001>

<bundles_post_ra>
// kernel: tpu_custom_call.1
= control target key start
LH: loop header
LB: loop body
LE: loop exit
PB: predicated region body
PF: predicated region fallthrough
CT: control target
= control target key end

     0   :  { %9 = vsyncpa [#allocation4], 0  ;;  %s11597_s0 = inlined_call_operand.vmem [shape: f32[2,10,10,10,64], index: 0, kind: input, shape index: {}]   ;;  %s11598_s1 = inlined_call_operand.vmem [shape: f32[27,64], index: 1, kind: input, shape index: {}]   ;;  %s11599_s2 = inlined_call_operand.vmem [shape: f32[64,64], index: 2, kind: input, shape index: {}]   ;;  %s11600_s3 = inlined_call_operand.vmem [shape: f32[1,64], index: 3, kind: input, shape index: {}]   ;;  %s11601_s4 = inlined_call_operand.hbm [shape: f32[2,8,8,8,64], index: 4, kind: output, shape index: {}]  }
   0x1   :  { %11 = vsyncpa [#allocation4 + $0x1], 0  ;;  %s6562_s15 = smov 0   ;;  %s6564_s16 = smov 0  }
   0x2   :  { %s6566_s17 = smov 0   ;;  %s6568_s18 = smov 0  }
   0x3   :  { %s6570_s19 = smov 0   ;;  %s6572_s20 = smov 0  }
   0x4   :  { %s6574_s21 = smov 0   ;;  %s6576_s22 = smov 0  }
   0x5 LB: > { %s5181_s23 = sadd.s32 4294967295, %s6532_s22   ;;  %s5182_s24 = sadd.s32 4294967294, %s6532_s22   ;;  %s6532_s22 = sphi %s6576_s22, %s17_s22   ;;  %s6528_s21 = sphi %s6574_s21, %s12008_s21   ;;  %s6524_s20 = sphi %s6572_s20, %s12007_s20   ;;  %s6520_s19 = sphi %s6570_s19, %s12006_s19   ;;  %s6516_s18 = sphi %s6568_s18, %s12005_s18   ;;  %s6512_s17 = sphi %s6566_s17, %s12004_s17   ;;  %s6508_s16 = sphi %s6564_s16, %s12003_s16   ;;  %s6504_s15 = sphi %s6562_s15, %s12002_s15  }
   0x6   : > { %s26_s25 = sadd.s32 1, %s6524_s20  ;;  %s29_s26 = sadd.s32 1, %s6528_s21 }
   0x7   : > { %p27_p0 = scmp.ge.s32.totalorder %s26_s25, 2  ;;  %p137_p1 = scmp.ne.s32.totalorder %s6512_s17, %s6508_s16 }
   0x8   : > { %p138_p2 = scmp.eq.s32.totalorder %s5181_s23, 3  ;;  %p143_p5 = scmp.ne.s32.totalorder %s6508_s16, %s6504_s15 }
   0x9   : > { %s12010_s25 = smov (%p27_p0, %s26_s25), 0  ;;  %s12012_s26 = smov (!%p27_p0, %s29_s26), %s6528_s21 }
   0xa   : > { %s123_s27 = ssub.s32 %s6524_s20, %s12010_s25  ;;  %p6613_p3 = por %p138_p2, %p137_p1 }
   0xb   : > { %p31_p4 = scmp.ge.s32.totalorder %s12012_s26, 2  ;;  %p144_p6 = scmp.eq.s32.totalorder %s5182_s24, 3 }
   0xc   : > { %p5185_p7 = scmp.ge.s32.totalorder %s6532_s22, 1  ;;  %p179_p9 = scmp.lt.s32.totalorder %s6532_s22, 5 }
   0xd   : > { %s12014_s26 = smov (%p31_p4, %s12012_s26), 0  ;;  %p6622_p8 = por %p144_p6, %p143_p5 }
   0xe   : > { %s122_s30 = ssub.s32 %s6528_s21, %s12014_s26  ;;  %s127_s5 = sadd.s32 1, %s6512_s17 }
   0xf   : > { %s124_s6 = sor.u32 %s123_s27, %s122_s30  ;;  %p180_p10 = pnand %p5185_p7, %p179_p9 }
  0x10   : > { %p125_p11 = scmp.eq.s32.totalorder %s124_s6, 0 }
  0x11   : > { %183 = sbr.rel (%p180_p10) target bundleno = 1044 (0x414), region = 36 }
  0x12   : > { %s6631_s7 = scalar_select %p125_p11, %s6512_s17, %s127_s5  }
  0x16   : > { %v4663_v0 = vld [vmem:[%s11599_s2 + $0x38] sm:$0xff]  ;;  %v4662_v1 = vld [vmem:[%s11599_s2 + $0x30] sm:$0xff]  ;;  %p205_p12 = scmp.lt.s32.totalorder %s6520_s19, 1  ;;  %v4661_v2 = vld [vmem:[%s11599_s2 + $0x28] sm:$0xff]  ;;  %s5189_s23 = smul.u32 640, %s6516_s18  ;;  %vm283_vm0 = vcmask 523264  }
  0x17   : > { %6078 = vmatprep.subr.mxu0 %v4663_v0  ;;  %6142 = vmatprep.subr.mxu1 %v4663_v0  ;;  %v4660_v3 = vld [vmem:[%s11599_s2 + $0x20] sm:$0xff]  ;;  %v4659_v4 = vld [vmem:[%s11599_s2 + $0x18] sm:$0xff]  ;;  %v4658_v6 = vld [vmem:[%s11599_s2 + $0x10] sm:$0xff]  ;;  %s6033_s8 = sshll.u32 %s6520_s19, 6 }
  0x18   : > { %6079 = vmatpush3.msra.mxu0 %v4663_v0  ;;  %6150 = vmatpush3.msra.mxu1 %v4663_v0  ;;  %s206_s14 = scalar_select %p205_p12, %s6520_s19, 1  ;;  %v6657_v5 = vld [vmem:[%s11598_s1] ss:$0 sm:$0xff]  ;;  %v4657_v9 = vld [vmem:[%s11599_s2 + $0x8] sm:$0xff]  ;;  %v6679_v12 = vld [vmem:[%s11598_s1 + $0x1] ss:$0 sm:$0xff] }
  0x19   : > { %6080 = vmatprep.subr.mxu0 %v4662_v1  ;;  %6143 = vmatprep.subr.mxu1 %v4662_v1  ;;  %v4656_v11 = vld [vmem:[%s11599_s2] sm:$0xff] }
  0x1a   : > { %6081 = vmatpush3.msra.mxu0 %v4662_v1  ;;  %6151 = vmatpush3.msra.mxu1 %v4662_v1  ;;  %s6158_s30 = smul.u32 1600, %s206_s14  ;;  %v6705_v26 = vld [vmem:[%s11598_s1 + $0x2] ss:$0 sm:$0xff]  ;;  %v6733_v47 = vld [vmem:[%s11598_s1 + $0x3] ss:$0 sm:$0xff]  ;;  %s202_s14 = sand.u32 1, %s6508_s16  }
  0x1b   : > { %6082 = vmatprep.subr.mxu0 %v4661_v2  ;;  %6144 = vmatprep.subr.mxu1 %v4661_v2  ;;  %s5186_s5 = sshll.u32 %s202_s14, 8 }
  0x1c   : > { %6083 = vmatpush3.msra.mxu0 %v4661_v2  ;;  %6152 = vmatpush3.msra.mxu1 %v4661_v2  ;;  %s209_s10 = scalar_lea.vmem %s11597_s0, %s6158_s30  ;;  %s11249_s6 = scalar_lea.vmem [#allocation3], %s5186_s5 }
  0x1d   : > { %6084 = vmatprep.subr.mxu0 %v4660_v3  ;;  %6145 = vmatprep.subr.mxu1 %v4660_v3  ;;  %s6659_s13 = scalar_lea.vmem %s209_s10, %s5189_s23  ;;  %s5073_s11 = sshll.u32 %s11249_s6, 4  ;;  %s11538_s11 = int_to_ptr.vmem [resolvable:$true] %s5073_s11 }
  0x1e   : > { %6085 = vmatpush3.msra.mxu0 %v4660_v3  ;;  %6153 = vmatpush3.msra.mxu1 %v4660_v3  ;;  %v215_v7 = vld [vmem:[%s6659_s13] sm:$0xff]  ;;  %v6670_v10 = vld [vmem:[%s6659_s13 + $0x10] sm:$0xff]  ;;  %s6440_s19 = scalar_lea.vmem %s11538_s11, 4096  ;;  %s6534_s23 = smov [#allocation3]  }
  0x1f   : > { %6086 = vmatprep.subr.mxu0 %v4659_v4  ;;  %6146 = vmatprep.subr.mxu1 %v4659_v4  ;;  %v251_v8 = vmul.f32 %v6657_v5, %v215_v7  ;;  %v317_v13 = vld [vmem:[%s6659_s13 + $0x1] sm:$0xff]  ;;  %v252_v14 = vmul.f32 %v6670_v10, %v6657_v5  ;;  %v6689_v18 = vld [vmem:[%s6659_s13 + $0x11] sm:$0xff]  ;;  %v685_v55 = vmul.f32 %v6733_v47, %v6670_v10  ;;  %p6441_p13 = scmp.ne.s32.totalorder %s11538_s11, %s6440_s19  ;;  %s6444_s30 = sshll.u32 %s6534_s23, 4  ;;  %s6445_s30 = int_to_ptr.vmem [resolvable:$false] %s6444_s30 }
  0x20   : > { %6087 = vmatpush3.msra.mxu0 %v4659_v4  ;;  %6154 = vmatpush3.msra.mxu1 %v4659_v4  ;;  %v5696_v15 = vld [vmem:[%s6659_s13 + $0x140] sm:$0xff]  ;;  %v353_v16 = vmul.f32 %v6679_v12, %v317_v13  ;;  %v6694_v21 = vld [vmem:[%s6659_s13 + $0x150] sm:$0xff]  ;;  %v354_v23 = vmul.f32 %v6689_v18, %v6679_v12  ;;  %s6446_s5 = scalar_lea.vmem %s6445_s30, 8192  ;;  %p6447_p2 = scmp.lt.s32.totalorder %s11538_s11, %s6445_s30 }
  0x21   : > { %6088 = vmatprep.subr.mxu0 %v4658_v6  ;;  %6147 = vmatprep.subr.mxu1 %v4658_v6  ;;  %284 = vst.msk [vmem:[#allocation2] sm:$0xff] %vm283_vm0, %v251_v8  ;;  %v267_v17 = vmul.f32 %v5696_v15, %v6657_v5  ;;  %285 = vst.msk [vmem:[#allocation2 + $0x8] sm:$0xff] %vm283_vm0, %v252_v14  ;;  %v5729_v20 = vld [vmem:[%s6659_s13 + $0x141] sm:$0xff]  ;;  %v268_v25 = vmul.f32 %v6694_v21, %v6657_v5  ;;  %v6710_v30 = vld [vmem:[%s6659_s13 + $0x151] sm:$0xff]  ;;  %p6442_p0 = pnand %p6441_p13, %p6613_p3  ;;  %p6448_p4 = scmp.lt.s32.totalorder %s6446_s5, %s6440_s19 }
  0x22   : > { %6089 = vmatpush3.msra.mxu0 %v4658_v6  ;;  %6155 = vmatpush3.msra.mxu1 %v4658_v6  ;;  %v369_v24 = vmul.f32 %v5729_v20, %v6679_v12  ;;  %v482_v27 = vld [vmem:[%s6659_s13 + $0x2] sm:$0xff]  ;;  %v6716_v35 = vld [vmem:[%s6659_s13 + $0x12] sm:$0xff]  ;;  %v370_v37 = vmul.f32 %v6710_v30, %v6679_v12 }
  0x23   : > { %6090 = vmatprep.subr.mxu0 %v4657_v9  ;;  %6148 = vmatprep.subr.mxu1 %v4657_v9  ;;  %300 = vst.msk [vmem:[#allocation2 + $0x80] sm:$0xff] %vm283_vm0, %v267_v17  ;;  %301 = vst.msk [vmem:[#allocation2 + $0x88] sm:$0xff] %vm283_vm0, %v268_v25  ;;  %v518_v32 = vmul.f32 %v6705_v26, %v482_v27  ;;  %v217_v34 = vld [vmem:[%s6659_s13 + $0x20] sm:$0xff]  ;;  %v519_v41 = vmul.f32 %v6716_v35, %v6705_v26  ;;  %v6736_v49 = vld [vmem:[%s6659_s13 + $0x30] sm:$0xff]  ;;  %p6443_p1 = pneg %p6442_p0  ;;  %p6449_p5 = por %p6448_p4, %p6447_p2 }
  0x24   : > { %6091 = vmatpush3.msra.mxu0 %v4657_v9  ;;  %6156 = vmatpush3.msra.mxu1 %v4657_v9  ;;  %v253_v36 = vmul.f32 %v6657_v5, %v217_v34  ;;  %v5762_v39 = vld [vmem:[%s6659_s13 + $0x142] sm:$0xff]  ;;  %v6742_v53 = vld [vmem:[%s6659_s13 + $0x152] sm:$0xff]  ;;  %v254_v59 = vmul.f32 %v6736_v49, %v6657_v5  ;;  %v701_v9 = vmul.f32 %v6694_v21, %v6733_v47 }
  0x25   : > { %6092 = vmatprep.subr.mxu0 %v4656_v11  ;;  %6149 = vmatprep.subr.mxu1 %v4656_v11  ;;  %v319_v42 = vld [vmem:[%s6659_s13 + $0x21] sm:$0xff]  ;;  %v534_v44 = vmul.f32 %v5762_v39, %v6705_v26  ;;  %v535_v62 = vmul.f32 %v6742_v53, %v6705_v26  ;;  %v234_v63 = vld [vmem:[%s6659_s13 + $0x170] sm:$0xff]  ;;  %p6450_p6 = pnand %p6449_p5, %p6443_p1 }
  0x26   : > { %6093 = vmatpush3.msra.mxu0 %v4656_v11  ;;  %6157 = vmatpush3.msra.mxu1 %v4656_v11  ;;  %286 = vst.msk [vmem:[#allocation2 + $0x10] sm:$0xff] %vm283_vm0, %v253_v36  ;;  %v233_v46 = vld [vmem:[%s6659_s13 + $0x160] sm:$0xff]  ;;  %v355_v50 = vmul.f32 %v6679_v12, %v319_v42  ;;  %287 = vst.msk [vmem:[#allocation2 + $0x18] sm:$0xff] %vm283_vm0, %v254_v59  ;;  %v6760_v1 = vld [vmem:[%s6659_s13 + $0x31] sm:$0xff]  ;;  %v270_v8 = vmul.f32 %v6657_v5, %v234_v63 }
  0x27   : > { %v269_v51 = vmul.f32 %v6657_v5, %v233_v46  ;;  %v335_v58 = vld [vmem:[%s6659_s13 + $0x161] sm:$0xff]  ;;  %v356_v13 = vmul.f32 %v6760_v1, %v6679_v12  ;;  %v336_v21 = vld [vmem:[%s6659_s13 + $0x171] sm:$0xff] }
  0x28   : > { %v385_v19 = vld [vmem:[#allocation2] sm:$0xff]  ;;  %v386_v28 = vld [vmem:[#allocation2 + $0x8] sm:$0xff]  ;;  %v371_v2 = vmul.f32 %v6679_v12, %v335_v58  ;;  %303 = vst.msk [vmem:[#allocation2 + $0x98] sm:$0xff] %vm283_vm0, %v270_v8  ;;  %v372_v36 = vmul.f32 %v6679_v12, %v336_v21 }
  0x29   : > { %v417_v22 = vadd.f32 %v385_v19, %v353_v16  ;;  %v418_v29 = vadd.f32 %v386_v28, %v354_v23  ;;  %302 = vst.msk [vmem:[#allocation2 + $0x90] sm:$0xff] %vm283_vm0, %v269_v51  ;;  %v6752_v60 = vld [vmem:[%s6659_s13 + $0x20] sm:$0xff] }
  0x2a   : > { %v401_v31 = vld [vmem:[#allocation2 + $0x80] sm:$0xff]  ;;  %v402_v43 = vld [vmem:[#allocation2 + $0x88] sm:$0xff]  ;;  %v686_v4 = vmul.f32 %v6752_v60, %v6733_v47 }
  0x2b   : > { %449 = vst.msk [vmem:[#allocation2] sm:$0xff] %vm283_vm0, %v417_v22  ;;  %v433_v33 = vadd.f32 %v401_v31, %v369_v24  ;;  %450 = vst.msk [vmem:[#allocation2 + $0x8] sm:$0xff] %vm283_vm0, %v418_v29  ;;  %v434_v45 = vadd.f32 %v402_v43, %v370_v37  ;;  %v484_v6 = vld [vmem:[%s6659_s13 + $0x22] sm:$0xff]  ;;  %v6801_v37 = vld [vmem:[%s6659_s13 + $0x32] sm:$0xff] }
  0x2c   : > { %v6776_v14 = vld [vmem:[%s11598_s1 + $0x4] ss:$0 sm:$0xff]  ;;  %v520_v16 = vmul.f32 %v6705_v26, %v484_v6 }
  0x2d   : > { %465 = vst.msk [vmem:[#allocation2 + $0x80] sm:$0xff] %vm283_vm0, %v433_v33  ;;  %466 = vst.msk [vmem:[#allocation2 + $0x88] sm:$0xff] %vm283_vm0, %v434_v45  ;;  %v387_v57 = vld [vmem:[#allocation2 + $0x10] sm:$0xff]  ;;  %v6780_v17 = vld [vmem:[%s6659_s13 + $0x40] sm:$0xff]  ;;  %v850_v25 = vmul.f32 %v6776_v14, %v6689_v18  ;;  %v866_v45 = vmul.f32 %v6710_v30, %v6776_v14 }
  0x2e   : > { %v419_v61 = vadd.f32 %v387_v57, %v355_v50  ;;  %v6786_v22 = vld [vmem:[%s6659_s13 + $0x160] sm:$0xff]  ;;  %v388_v24 = vld [vmem:[#allocation2 + $0x18] sm:$0xff]  ;;  %v687_v57 = vmul.f32 %v6736_v49, %v6733_v47 }
  0x2f   : > { %v500_v29 = vld [vmem:[%s6659_s13 + $0x162] sm:$0xff]  ;;  %v420_v31 = vadd.f32 %v388_v24, %v356_v13  ;;  %v702_v18 = vmul.f32 %v6786_v22, %v6733_v47 }
  0x30   : > { %451 = vst.msk [vmem:[#allocation2 + $0x10] sm:$0xff] %vm283_vm0, %v419_v61  ;;  %v403_v11 = vld [vmem:[#allocation2 + $0x90] sm:$0xff]  ;;  %v6796_v33 = vld [vmem:[%s6659_s13 + $0x21] sm:$0xff] }
  0x31   : > { %v435_v19 = vadd.f32 %v403_v11, %v371_v2  ;;  %452 = vst.msk [vmem:[#allocation2 + $0x18] sm:$0xff] %vm283_vm0, %v420_v31  ;;  %v6809_v39 = vld [vmem:[%s6659_s13 + $0x41] sm:$0xff]  ;;  %v851_v43 = vmul.f32 %v6796_v33, %v6776_v14 }
  0x32   : > { %v550_v38 = vld [vmem:[#allocation2] sm:$0xff]  ;;  %v551_v48 = vld [vmem:[#allocation2 + $0x8] sm:$0xff] }
  0x33   : > { %v582_v40 = vadd.f32 %v550_v38, %v518_v32  ;;  %v583_v52 = vadd.f32 %v551_v48, %v519_v41  ;;  %467 = vst.msk [vmem:[#allocation2 + $0x90] sm:$0xff] %vm283_vm0, %v435_v19  ;;  %v255_v32 = vmul.f32 %v6780_v17, %v6657_v5  ;;  %v235_v41 = vld [vmem:[%s6659_s13 + $0x180] sm:$0xff] }
  0x34   : > { %v566_v54 = vld [vmem:[#allocation2 + $0x80] sm:$0xff]  ;;  %v567_v7 = vld [vmem:[#allocation2 + $0x88] sm:$0xff] }
  0x35   : > { %614 = vst.msk [vmem:[#allocation2] sm:$0xff] %vm283_vm0, %v582_v40  ;;  %v598_v56 = vadd.f32 %v566_v54, %v534_v44  ;;  %615 = vst.msk [vmem:[#allocation2 + $0x8] sm:$0xff] %vm283_vm0, %v583_v52  ;;  %v599_v10 = vadd.f32 %v567_v7, %v535_v62  ;;  %v536_v40 = vmul.f32 %v6705_v26, %v500_v29  ;;  %v404_v44 = vld [vmem:[#allocation2 + $0x98] sm:$0xff]  ;;  %v6826_v30 = vld [vmem:[%s11598_s1 + $0x5] ss:$0 sm:$0xff] }
  0x36   : > { %288 = vst.msk [vmem:[#allocation2 + $0x20] sm:$0xff] %vm283_vm0, %v255_v32  ;;  %v436_v48 = vadd.f32 %v404_v44, %v372_v36  ;;  %v521_v52 = vmul.f32 %v6801_v37, %v6705_v26  ;;  %v357_v54 = vmul.f32 %v6809_v39, %v6679_v12  ;;  %v6832_v59 = vld [vmem:[%s6659_s13 + $0x161] sm:$0xff]  ;;  %v501_v62 = vld [vmem:[%s6659_s13 + $0x172] sm:$0xff] }
  0x37   : > { %630 = vst.msk [vmem:[#allocation2 + $0x80] sm:$0xff] %vm283_vm0, %v598_v56  ;;  %631 = vst.msk [vmem:[#allocation2 + $0x88] sm:$0xff] %vm283_vm0, %v599_v10  ;;  %v552_v28 = vld [vmem:[#allocation2 + $0x10] sm:$0xff]  ;;  %v337_v63 = vld [vmem:[%s6659_s13 + $0x181] sm:$0xff] }
  0x38   : > { %v584_v34 = vadd.f32 %v552_v28, %v520_v16  ;;  %468 = vst.msk [vmem:[#allocation2 + $0x98] sm:$0xff] %vm283_vm0, %v436_v48  ;;  %v553_v2 = vld [vmem:[#allocation2 + $0x18] sm:$0xff]  ;;  %v6843_v7 = vld [vmem:[%s6659_s13 + $0x170] sm:$0xff]  ;;  %v6849_v13 = vld [vmem:[%s6659_s13 + $0x22] sm:$0xff]  ;;  %v537_v16 = vmul.f32 %v6705_v26, %v501_v62  ;;  %v373_v19 = vmul.f32 %v6679_v12, %v337_v63 }
  0x39   : > { %v6846_v10 = vld [vmem:[%s6659_s13 + $0x50] sm:$0xff]  ;;  %v703_v21 = vmul.f32 %v6843_v7, %v6733_v47  ;;  %v6889_v48 = vld [vmem:[%s6659_s13 + $0x162] sm:$0xff] }
  0x3a   : > { %616 = vst.msk [vmem:[#allocation2 + $0x10] sm:$0xff] %vm283_vm0, %v584_v34  ;;  %v568_v51 = vld [vmem:[#allocation2 + $0x90] sm:$0xff]  ;;  %v1031_v34 = vmul.f32 %v6742_v53, %v6826_v30  ;;  %v852_v53 = vmul.f32 %v6760_v1, %v6776_v14 }
  0x3b   : > { %v600_v58 = vadd.f32 %v568_v51, %v536_v40  ;;  %v6875_v40 = vld [vmem:[%s6659_s13 + $0x51] sm:$0xff]  ;;  %v6893_v51 = vld [vmem:[%s6659_s13 + $0x180] sm:$0xff] }
  0x3c   : > { %v717_v0 = vld [vmem:[#allocation2] sm:$0xff]  ;;  %v718_v15 = vld [vmem:[#allocation2 + $0x8] sm:$0xff]  ;;  %v6905_v62 = vld [vmem:[%s6659_s13 + $0x171] sm:$0xff] }
  0x3d   : > { %v749_v3 = vadd.f32 %v717_v0, %v685_v55  ;;  %v750_v20 = vadd.f32 %v718_v15, %v686_v4  ;;  %v271_v55 = vmul.f32 %v6657_v5, %v235_v41  ;;  %632 = vst.msk [vmem:[#allocation2 + $0x90] sm:$0xff] %vm283_vm0, %v600_v58  ;;  %v1015_v4 = vmul.f32 %v6826_v30, %v6716_v35 }
  0x3e   : > { %v733_v23 = vld [vmem:[#allocation2 + $0x80] sm:$0xff]  ;;  %v734_v46 = vld [vmem:[#allocation2 + $0x88] sm:$0xff]  ;;  %v867_v35 = vmul.f32 %v6832_v59, %v6776_v14 }
  0x3f   : > { %781 = vst.msk [vmem:[#allocation2] sm:$0xff] %vm283_vm0, %v749_v3  ;;  %v765_v27 = vadd.f32 %v733_v23, %v701_v9  ;;  %782 = vst.msk [vmem:[#allocation2 + $0x8] sm:$0xff] %vm283_vm0, %v750_v20  ;;  %v766_v50 = vadd.f32 %v734_v46, %v702_v18  ;;  %v389_v3 = vld [vmem:[#allocation2 + $0x20] sm:$0xff]  ;;  %v585_v9 = vadd.f32 %v553_v2, %v521_v52  ;;  %v569_v28 = vld [vmem:[#allocation2 + $0x98] sm:$0xff] }
  0x40   : > { %304 = vst.msk [vmem:[#allocation2 + $0xa0] sm:$0xff] %vm283_vm0, %v271_v55  ;;  %v421_v11 = vadd.f32 %v389_v3, %v357_v54  ;;  %v256_v23 = vmul.f32 %v6846_v10, %v6657_v5  ;;  %v601_v31 = vadd.f32 %v569_v28, %v537_v16  ;;  %v502_v55 = vld [vmem:[%s6659_s13 + $0x182] sm:$0xff]  ;;  %v868_v16 = vmul.f32 %v6905_v62, %v6776_v14 }
  0x41   : > { %797 = vst.msk [vmem:[#allocation2 + $0x80] sm:$0xff] %vm283_vm0, %v765_v27  ;;  %798 = vst.msk [vmem:[#allocation2 + $0x88] sm:$0xff] %vm283_vm0, %v766_v50  ;;  %v719_v8 = vld [vmem:[#allocation2 + $0x10] sm:$0xff]  ;;  %v6866_v27 = vld [vmem:[%s6659_s13 + $0x42] sm:$0xff] }
  0x42   : > { %v751_v15 = vadd.f32 %v719_v8, %v687_v57  ;;  %617 = vst.msk [vmem:[#allocation2 + $0x18] sm:$0xff] %vm283_vm0, %v585_v9  ;;  %453 = vst.msk [vmem:[#allocation2 + $0x20] sm:$0xff] %vm283_vm0, %v421_v11  ;;  %v522_v46 = vmul.f32 %v6866_v27, %v6705_v26  ;;  %v538_v8 = vmul.f32 %v6705_v26, %v502_v55  ;;  %v338_v11 = vld [vmem:[%s6659_s13 + $0x191] sm:$0xff]  ;;  %v6928_v28 = vld [vmem:[%s6659_s13 + $0x60] sm:$0xff] }
  0x43   : > { %289 = vst.msk [vmem:[#allocation2 + $0x28] sm:$0xff] %vm283_vm0, %v256_v23  ;;  %633 = vst.msk [vmem:[#allocation2 + $0x98] sm:$0xff] %vm283_vm0, %v601_v31  ;;  %v6925_v23 = vld [vmem:[%s11598_s1 + $0x7] ss:$0 sm:$0xff]  ;;  %v374_v31 = vmul.f32 %v6679_v12, %v338_v11 }
  0x44   : > { %783 = vst.msk [vmem:[#allocation2 + $0x10] sm:$0xff] %vm283_vm0, %v751_v15  ;;  %v735_v18 = vld [vmem:[#allocation2 + $0x90] sm:$0xff]  ;;  %v6967_v55 = vld [vmem:[%s6659_s13 + $0x181] sm:$0xff] }
  0x46   : > { %v882_v38 = vld [vmem:[#allocation2] sm:$0xff]  ;;  %v883_v56 = vld [vmem:[#allocation2 + $0x8] sm:$0xff] }
  0x47   : > { %v914_v42 = vadd.f32 %v882_v38, %v850_v25  ;;  %v915_v61 = vadd.f32 %v883_v56, %v851_v43  ;;  %v1016_v25 = vmul.f32 %v6849_v13, %v6826_v30  ;;  %v405_v32 = vld [vmem:[#allocation2 + $0xa0] sm:$0xff]  ;;  %v688_v38 = vmul.f32 %v6780_v17, %v6733_v47 }
  0x48   : > { %v898_v0 = vld [vmem:[#allocation2 + $0x80] sm:$0xff]  ;;  %v899_v29 = vld [vmem:[#allocation2 + $0x88] sm:$0xff]  ;;  %v437_v41 = vadd.f32 %v405_v32, %v373_v19  ;;  %v358_v56 = vmul.f32 %v6875_v40, %v6679_v12 }
  0x49   : > { %946 = vst.msk [vmem:[#allocation2] sm:$0xff] %vm283_vm0, %v914_v42  ;;  %v930_v6 = vadd.f32 %v898_v0, %v866_v45  ;;  %947 = vst.msk [vmem:[#allocation2 + $0x8] sm:$0xff] %vm283_vm0, %v915_v61  ;;  %v931_v36 = vadd.f32 %v899_v29, %v867_v35  ;;  %v236_v42 = vld [vmem:[%s6659_s13 + $0x190] sm:$0xff]  ;;  %v6881_v43 = vld [vmem:[%s11598_s1 + $0x6] ss:$0 sm:$0xff]  ;;  %v767_v45 = vadd.f32 %v735_v18, %v703_v21 }
  0x4a   : > { %469 = vst.msk [vmem:[#allocation2 + $0xa0] sm:$0xff] %vm283_vm0, %v437_v41  ;;  %v720_v54 = vld [vmem:[#allocation2 + $0x18] sm:$0xff]  ;;  %v272_v57 = vmul.f32 %v6657_v5, %v236_v42  ;;  %v1182_v58 = vmul.f32 %v6881_v43, %v6752_v60  ;;  %v554_v2 = vld [vmem:[#allocation2 + $0x20] sm:$0xff]  ;;  %v1032_v60 = vmul.f32 %v6889_v48, %v6826_v30  ;;  %v390_v9 = vld [vmem:[#allocation2 + $0x28] sm:$0xff]  ;;  %v1198_v32 = vmul.f32 %v6786_v22, %v6881_v43 }
  0x4b   : > { %962 = vst.msk [vmem:[#allocation2 + $0x80] sm:$0xff] %vm283_vm0, %v930_v6  ;;  %963 = vst.msk [vmem:[#allocation2 + $0x88] sm:$0xff] %vm283_vm0, %v931_v36  ;;  %v884_v63 = vld [vmem:[#allocation2 + $0x10] sm:$0xff]  ;;  %v752_v0 = vadd.f32 %v720_v54, %v688_v38  ;;  %v586_v6 = vadd.f32 %v554_v2, %v522_v46  ;;  %v422_v35 = vadd.f32 %v390_v9, %v358_v56  ;;  %v736_v21 = vld [vmem:[#allocation2 + $0x98] sm:$0xff] }
  0x4c   : > { %799 = vst.msk [vmem:[#allocation2 + $0x90] sm:$0xff] %vm283_vm0, %v767_v45  ;;  %v916_v3 = vadd.f32 %v884_v63, %v852_v53  ;;  %305 = vst.msk [vmem:[#allocation2 + $0xa8] sm:$0xff] %vm283_vm0, %v272_v57  ;;  %v6941_v18 = vld [vmem:[%s6659_s13 + $0x52] sm:$0xff]  ;;  %v6946_v41 = vld [vmem:[%s11598_s1 + $0x9] ss:$0 sm:$0xff]  ;;  %v1017_v53 = vmul.f32 %v6801_v37, %v6826_v30  ;;  %v853_v22 = vmul.f32 %v6809_v39, %v6776_v14 }
  0x4d   : > { %784 = vst.msk [vmem:[#allocation2 + $0x18] sm:$0xff] %vm283_vm0, %v752_v0  ;;  %618 = vst.msk [vmem:[#allocation2 + $0x20] sm:$0xff] %vm283_vm0, %v586_v6  ;;  %v5393_v42 = vld [vmem:[%s6659_s13 + $0xa0] sm:$0xff]  ;;  %v6957_v46 = vld [vmem:[%s11598_s1 + $0xa] ss:$0 sm:$0xff]  ;;  %v689_v56 = vmul.f32 %v6846_v10, %v6733_v47  ;;  %v1347_v6 = vmul.f32 %v6925_v23, %v6796_v33 }
  0x4e   : > { %948 = vst.msk [vmem:[#allocation2 + $0x10] sm:$0xff] %vm283_vm0, %v916_v3  ;;  %454 = vst.msk [vmem:[#allocation2 + $0x28] sm:$0xff] %vm283_vm0, %v422_v35  ;;  %v6978_v63 = vld [vmem:[%s11598_s1 + $0xc] ss:$0 sm:$0xff]  ;;  %v6982_v2 = vld [vmem:[%s6659_s13 + $0x190] sm:$0xff]  ;;  %v523_v3 = vmul.f32 %v6941_v18, %v6705_v26 }
  0x4f   : > { %v6995_v9 = vld [vmem:[%s6659_s13 + $0x172] sm:$0xff] }
  0x50   : > { %v1047_v20 = vld [vmem:[#allocation2] sm:$0xff]  ;;  %v1048_v44 = vld [vmem:[#allocation2 + $0x8] sm:$0xff]  ;;  %v7003_v33 = vld [vmem:[%s6659_s13 + $0xb0] sm:$0xff] }
  0x51   : > { %v1079_v24 = vadd.f32 %v1047_v20, %v1015_v4  ;;  %v1080_v50 = vadd.f32 %v1048_v44, %v1016_v25  ;;  %v704_v4 = vmul.f32 %v6893_v51, %v6733_v47  ;;  %v1183_v20 = vmul.f32 %v6881_v43, %v6736_v49  ;;  %v570_v29 = vld [vmem:[#allocation2 + $0xa0] sm:$0xff]  ;;  %v6936_v49 = vld [vmem:[%s11598_s1 + $0x8] ss:$0 sm:$0xff] }
  0x52   : > { %v1063_v52 = vld [vmem:[#allocation2 + $0x80] sm:$0xff]  ;;  %v602_v38 = vadd.f32 %v570_v29, %v538_v8  ;;  %v1199_v29 = vmul.f32 %v6843_v7, %v6881_v43  ;;  %v1033_v7 = vmul.f32 %v6995_v9, %v6826_v30 }
  0x53   : > { %1111 = vst.msk [vmem:[#allocation2] sm:$0xff] %vm283_vm0, %v1079_v24  ;;  %v1095_v61 = vadd.f32 %v1063_v52, %v1031_v34  ;;  %1112 = vst.msk [vmem:[#allocation2 + $0x8] sm:$0xff] %vm283_vm0, %v1080_v50  ;;  %v1064_v24 = vld [vmem:[#allocation2 + $0x88] sm:$0xff]  ;;  %v768_v25 = vadd.f32 %v736_v21, %v704_v4  ;;  %v900_v36 = vld [vmem:[#allocation2 + $0x90] sm:$0xff] }
  0x54   : > { %v1096_v34 = vadd.f32 %v1064_v24, %v1032_v60  ;;  %v932_v45 = vadd.f32 %v900_v36, %v868_v16  ;;  %v5426_v50 = vld [vmem:[%s6659_s13 + $0xa1] sm:$0xff]  ;;  %v6963_v52 = vld [vmem:[%s11598_s1 + $0xb] ss:$0 sm:$0xff]  ;;  %634 = vst.msk [vmem:[#allocation2 + $0xa0] sm:$0xff] %vm283_vm0, %v602_v38  ;;  %v6991_v60 = vld [vmem:[%s11598_s1 + $0xd] ss:$0 sm:$0xff]  ;;  %v7000_v16 = vmul.f32 %v6936_v49, %v6849_v13 }
  0x55   : > { %1127 = vst.msk [vmem:[#allocation2 + $0x80] sm:$0xff] %vm283_vm0, %v1095_v61  ;;  %800 = vst.msk [vmem:[#allocation2 + $0x98] sm:$0xff] %vm283_vm0, %v768_v25  ;;  %v406_v57 = vld [vmem:[#allocation2 + $0xa8] sm:$0xff]  ;;  %v1049_v11 = vld [vmem:[#allocation2 + $0x10] sm:$0xff]  ;;  %v7012_v25 = vmul.f32 %v6946_v41, %v5393_v42  ;;  %v7026_v42 = vmul.f32 %v6957_v46, %v5426_v50  ;;  %v7043_v50 = vmul.f32 %v6978_v63, %v7003_v33 }
  0x56   : > { %1128 = vst.msk [vmem:[#allocation2 + $0x88] sm:$0xff] %vm283_vm0, %v1096_v34  ;;  %v5459_v61 = vld [vmem:[%s6659_s13 + $0xa2] sm:$0xff]  ;;  %964 = vst.msk [vmem:[#allocation2 + $0x90] sm:$0xff] %vm283_vm0, %v932_v45  ;;  %v438_v4 = vadd.f32 %v406_v57, %v374_v31  ;;  %v1081_v35 = vadd.f32 %v1049_v11, %v1017_v53  ;;  %v7017_v13 = vld [vmem:[%s11598_s1 + $0xe] ss:$0 sm:$0xff]  ;;  %v1348_v57 = vmul.f32 %v6925_v23, %v6760_v1 }
  0x57   : > { %v721_v21 = vld [vmem:[#allocation2 + $0x20] sm:$0xff]  ;;  %v555_v34 = vld [vmem:[#allocation2 + $0x28] sm:$0xff]  ;;  %v503_v36 = vld [vmem:[%s6659_s13 + $0x192] sm:$0xff]  ;;  %11631 = vst [vmem:[#allocation7_spill] sm:$0xff] %v7043_v50 }
  0x58   : > { %v7008_v24 = vld [vmem:[%s6659_s13 + $0x61] sm:$0xff]  ;;  %470 = vst.msk [vmem:[#allocation2 + $0xa8] sm:$0xff] %vm283_vm0, %v438_v4  ;;  %v753_v31 = vadd.f32 %v721_v21, %v689_v56  ;;  %v7032_v53 = vld [vmem:[%s6659_s13 + $0xb1] sm:$0xff]  ;;  %1113 = vst.msk [vmem:[#allocation2 + $0x10] sm:$0xff] %vm283_vm0, %v1081_v35  ;;  %v539_v1 = vmul.f32 %v6705_v26, %v503_v36  ;;  %v7067_v35 = vmul.f32 %v6889_v48, %v6936_v49 }
  0x59   : > { %v7035_v45 = vld [vmem:[%s6659_s13 + $0xb2] sm:$0xff]  ;;  %v5409_v56 = vld [vmem:[%s6659_s13 + $0x1e0] sm:$0xff] }
  0x5a   : > { %v1214_v15 = vld [vmem:[#allocation2] sm:$0xff]  ;;  %v1215_v44 = vld [vmem:[#allocation2 + $0x8] sm:$0xff]  ;;  %785 = vst.msk [vmem:[#allocation2 + $0x20] sm:$0xff] %vm283_vm0, %v753_v31  ;;  %v7058_v4 = vmul.f32 %v7017_v13, %v7035_v45 }
  0x5b   : > { %v1246_v19 = vadd.f32 %v1214_v15, %v1182_v58  ;;  %v1247_v54 = vadd.f32 %v1215_v44, %v1183_v20  ;;  %v257_v58 = vmul.f32 %v6928_v28, %v6657_v5  ;;  %v885_v15 = vld [vmem:[#allocation2 + $0x18] sm:$0xff]  ;;  %v869_v20 = vmul.f32 %v6967_v55, %v6776_v14  ;;  %v737_v11 = vld [vmem:[#allocation2 + $0xa0] sm:$0xff] }
  0x5c   : > { %v1230_v0 = vld [vmem:[#allocation2 + $0x80] sm:$0xff]  ;;  %v7029_v44 = vmul.f32 %v6963_v52, %v5459_v61  ;;  %v359_v61 = vmul.f32 %v7008_v24, %v6679_v12  ;;  %11633 = vst [vmem:[#allocation9_spill] sm:$0xff] %v7058_v4  ;;  %v5510_v4 = vld [vmem:[%s6659_s13 + $0x1f0] sm:$0xff] }
  0x5d   : > { %1278 = vst.msk [vmem:[#allocation2] sm:$0xff] %vm283_vm0, %v1246_v19  ;;  %v1262_v8 = vadd.f32 %v1230_v0, %v1198_v32  ;;  %1279 = vst.msk [vmem:[#allocation2 + $0x8] sm:$0xff] %vm283_vm0, %v1247_v54  ;;  %v917_v19 = vadd.f32 %v885_v15, %v853_v22  ;;  %v705_v32 = vmul.f32 %v6982_v2, %v6733_v47  ;;  %v237_v0 = vld [vmem:[%s6659_s13 + $0x1a0] sm:$0xff]  ;;  %v1065_v31 = vld [vmem:[#allocation2 + $0x90] sm:$0xff] }
  0x5e   : > { %290 = vst.msk [vmem:[#allocation2 + $0x30] sm:$0xff] %vm283_vm0, %v257_v58  ;;  %11630 = vst [vmem:[#allocation6_spill] sm:$0xff] %v7029_v44  ;;  %v587_v22 = vadd.f32 %v555_v34, %v523_v3  ;;  %v901_v58 = vld [vmem:[#allocation2 + $0x98] sm:$0xff]  ;;  %v7054_v3 = vmul.f32 %v6991_v60, %v7032_v53  ;;  %v1363_v15 = vmul.f32 %v6832_v59, %v6925_v23  ;;  %v5475_v21 = vld [vmem:[%s6659_s13 + $0x1e2] sm:$0xff] }
  0x5f   : > { %1294 = vst.msk [vmem:[#allocation2 + $0x80] sm:$0xff] %vm283_vm0, %v1262_v8  ;;  %949 = vst.msk [vmem:[#allocation2 + $0x18] sm:$0xff] %vm283_vm0, %v917_v19  ;;  %v933_v8 = vadd.f32 %v901_v58, %v869_v20  ;;  %v5442_v19 = vld [vmem:[%s6659_s13 + $0x1e1] sm:$0xff]  ;;  %v769_v34 = vadd.f32 %v737_v11, %v705_v32  ;;  %v273_v48 = vmul.f32 %v6657_v5, %v237_v0  ;;  %v5543_v11 = vld [vmem:[%s6659_s13 + $0x1f1] sm:$0xff] }
  0x60   : > { %11632 = vst [vmem:[#allocation8_spill] sm:$0xff] %v7054_v3  ;;  %619 = vst.msk [vmem:[#allocation2 + $0x28] sm:$0xff] %vm283_vm0, %v587_v22  ;;  %v1184_v22 = vmul.f32 %v6881_v43, %v6780_v17  ;;  %v5595_v58 = vld [vmem:[%s6659_s13 + $0xc0] sm:$0xff]  ;;  %v854_v17 = vmul.f32 %v6875_v40, %v6776_v14  ;;  %v1185_v44 = vmul.f32 %v6881_v43, %v6846_v10 }
  0x61   : > { %965 = vst.msk [vmem:[#allocation2 + $0x98] sm:$0xff] %vm283_vm0, %v933_v8  ;;  %v7082_v32 = vld [vmem:[%s6659_s13 + $0x182] sm:$0xff]  ;;  %801 = vst.msk [vmem:[#allocation2 + $0xa0] sm:$0xff] %vm283_vm0, %v769_v34  ;;  %v7090_v8 = vmul.f32 %v6957_v46, %v5442_v19  ;;  %v7107_v34 = vmul.f32 %v6978_v63, %v5510_v4  ;;  %v7147_v50 = vmul.f32 %v5595_v58, %v6978_v63 }
  0x62   : > { %306 = vst.msk [vmem:[#allocation2 + $0xb0] sm:$0xff] %vm283_vm0, %v273_v48  ;;  %v7125_v48 = vmul.f32 %v7035_v45, %v6963_v52  ;;  %v1364_v45 = vmul.f32 %v6905_v62, %v6925_v23 }
  0x63   : > { %11635 = vst [vmem:[#allocation11_spill] sm:$0xff] %v7107_v34  ;;  %11638 = vst [vmem:[#allocation14_spill] sm:$0xff] %v7147_v50 }
  0x64   : > { %v1379_v38 = vld [vmem:[#allocation2] sm:$0xff]  ;;  %v1380_v36 = vld [vmem:[#allocation2 + $0x8] sm:$0xff]  ;;  %11637 = vst [vmem:[#allocation13_spill] sm:$0xff] %v7125_v48 }
  0x65   : > { %v1411_v54 = vadd.f32 %v1379_v38, %v1347_v6  ;;  %v1231_v6 = vld [vmem:[#allocation2 + $0x88] sm:$0xff]  ;;  %v7072_v38 = vmul.f32 %v6946_v41, %v5409_v56  ;;  %v391_v59 = vld [vmem:[#allocation2 + $0x30] sm:$0xff]  ;;  %v1018_v56 = vmul.f32 %v6866_v27, %v6826_v30 }
  0x66   : > { %v1263_v20 = vadd.f32 %v1231_v6, %v1199_v29  ;;  %v1412_v29 = vadd.f32 %v1380_v36, %v1348_v57  ;;  %v423_v6 = vadd.f32 %v391_v59, %v359_v61  ;;  %v1395_v0 = vld [vmem:[#allocation2 + $0x80] sm:$0xff]  ;;  %v7093_v57 = vmul.f32 %v6963_v52, %v5475_v21  ;;  %v1216_v59 = vld [vmem:[#allocation2 + $0x10] sm:$0xff] }
  0x67   : > { %1443 = vst.msk [vmem:[#allocation2] sm:$0xff] %vm283_vm0, %v1411_v54  ;;  %v1097_v54 = vadd.f32 %v1065_v31, %v1033_v7  ;;  %v571_v7 = vld [vmem:[#allocation2 + $0xa8] sm:$0xff]  ;;  %v690_v31 = vmul.f32 %v6928_v28, %v6733_v47  ;;  %v1427_v19 = vadd.f32 %v1395_v0, %v1363_v15  ;;  %v7110_v21 = vmul.f32 %v6991_v60, %v5543_v11  ;;  %v1050_v0 = vld [vmem:[#allocation2 + $0x18] sm:$0xff] }
  0x68   : > { %1295 = vst.msk [vmem:[#allocation2 + $0x88] sm:$0xff] %vm283_vm0, %v1263_v20  ;;  %11634 = vst [vmem:[#allocation10_spill] sm:$0xff] %v7093_v57  ;;  %v7098_v20 = vld [vmem:[%s6659_s13 + $0x191] sm:$0xff]  ;;  %v603_v36 = vadd.f32 %v571_v7, %v539_v1  ;;  %v7104_v61 = vld [vmem:[%s6659_s13 + $0xc1] sm:$0xff]  ;;  %v7121_v15 = vmul.f32 %v7032_v53, %v6957_v46  ;;  %v1248_v7 = vadd.f32 %v1216_v59, %v1184_v22 }
  0x69   : > { %1129 = vst.msk [vmem:[#allocation2 + $0x90] sm:$0xff] %vm283_vm0, %v1097_v54  ;;  %11636 = vst [vmem:[#allocation12_spill] sm:$0xff] %v7110_v21  ;;  %v7115_v54 = vmul.f32 %v7003_v33, %v6946_v41  ;;  %v339_v1 = vld [vmem:[%s6659_s13 + $0x1a1] sm:$0xff]  ;;  %v7136_v53 = vld [vmem:[%s11598_s1 + $0xf] ss:$0 sm:$0xff]  ;;  %v1082_v22 = vadd.f32 %v1050_v0, %v1018_v56  ;;  %v870_v3 = vmul.f32 %v7098_v20, %v6776_v14 }
  0x6a   : > { %1444 = vst.msk [vmem:[#allocation2 + $0x8] sm:$0xff] %vm283_vm0, %v1412_v29  ;;  %455 = vst.msk [vmem:[#allocation2 + $0x30] sm:$0xff] %vm283_vm0, %v423_v6  ;;  %v1034_v29 = vmul.f32 %v7082_v32, %v6826_v30  ;;  %v886_v33 = vld [vmem:[#allocation2 + $0x20] sm:$0xff]  ;;  %v722_v34 = vld [vmem:[#allocation2 + $0x28] sm:$0xff]  ;;  %v375_v62 = vmul.f32 %v6679_v12, %v339_v1  ;;  %v1513_v0 = vmul.f32 %v6936_v49, %v6801_v37 }
  0x6b   : > { %v7130_v21 = vld [vmem:[%s6659_s13 + $0x62] sm:$0xff]  ;;  %635 = vst.msk [vmem:[#allocation2 + $0xa8] sm:$0xff] %vm283_vm0, %v603_v36  ;;  %1459 = vst.msk [vmem:[#allocation2 + $0x80] sm:$0xff] %vm283_vm0, %v1427_v19  ;;  %v918_v6 = vadd.f32 %v886_v33, %v854_v17  ;;  %v1200_v19 = vmul.f32 %v6893_v51, %v6881_v43  ;;  %v754_v57 = vadd.f32 %v722_v34, %v690_v31  ;;  %v5576_v17 = vld [vmem:[%s6659_s13 + $0x1f2] sm:$0xff] }
  0x6c   : > { %v7142_v59 = vld [vmem:[%s6659_s13 + $0x1a0] sm:$0xff]  ;;  %1280 = vst.msk [vmem:[#allocation2 + $0x10] sm:$0xff] %vm283_vm0, %v1248_v7  ;;  %v7159_v33 = vmul.f32 %v7104_v61, %v6991_v60  ;;  %1114 = vst.msk [vmem:[#allocation2 + $0x18] sm:$0xff] %vm283_vm0, %v1082_v22  ;;  %v1066_v7 = vld [vmem:[#allocation2 + $0x98] sm:$0xff]  ;;  %v524_v51 = vmul.f32 %v7130_v21, %v6705_v26  ;;  %v7166_v31 = vmul.f32 %v7136_v53, %v5595_v58 }
  0x6d   : > { %950 = vst.msk [vmem:[#allocation2 + $0x20] sm:$0xff] %vm283_vm0, %v918_v6  ;;  %v7169_v34 = vmul.f32 %v5510_v4, %v6946_v41  ;;  %v1098_v37 = vadd.f32 %v1066_v7, %v1034_v29  ;;  %v902_v1 = vld [vmem:[#allocation2 + $0xa0] sm:$0xff]  ;;  %786 = vst.msk [vmem:[#allocation2 + $0x28] sm:$0xff] %vm283_vm0, %v754_v57  ;;  %v706_v22 = vmul.f32 %v7142_v59, %v6733_v47  ;;  %v407_v7 = vld [vmem:[#allocation2 + $0xb0] sm:$0xff] }
  0x6e   : > { %v1544_v36 = vld [vmem:[#allocation2] sm:$0xff]  ;;  %11639 = vst [vmem:[#allocation15_spill] sm:$0xff] %v7159_v33  ;;  %11640 = vst [vmem:[#allocation16_spill] sm:$0xff] %v7166_v31  ;;  %v7182_v58 = vmul.f32 %v7017_v13, %v5576_v17  ;;  %v7185_v4 = vmul.f32 %v5543_v11, %v6957_v46  ;;  %v934_v57 = vadd.f32 %v902_v1, %v870_v3 }
  0x6f   : > { %v1576_v56 = vadd.f32 %v1544_v36, %v7000_v16  ;;  %v1396_v16 = vld [vmem:[#allocation2 + $0x88] sm:$0xff]  ;;  %v7173_v36 = vld [vmem:[%s6659_s13 + $0x70] sm:$0xff]  ;;  %v7188_v33 = vld [vmem:[%s6659_s13 + $0x200] sm:$0xff]  ;;  %1130 = vst.msk [vmem:[#allocation2 + $0x98] sm:$0xff] %vm283_vm0, %v1098_v37  ;;  %v439_v11 = vadd.f32 %v407_v7, %v375_v62  ;;  %v1529_v62 = vmul.f32 %v6995_v9, %v6936_v49 }
  0x70   : > { %v7179_v6 = vld [vmem:[%s6659_s13 + $0xc2] sm:$0xff]  ;;  %11641 = vst [vmem:[#allocation17_spill] sm:$0xff] %v7182_v58  ;;  %v1428_v31 = vadd.f32 %v1396_v16, %v1364_v45  ;;  %v1232_v29 = vld [vmem:[#allocation2 + $0x90] sm:$0xff]  ;;  %v1019_v58 = vmul.f32 %v6941_v18, %v6826_v30  ;;  %966 = vst.msk [vmem:[#allocation2 + $0xa0] sm:$0xff] %vm283_vm0, %v934_v57  ;;  %v258_v10 = vmul.f32 %v7173_v36, %v6657_v5 }
  0x71   : > { %1608 = vst.msk [vmem:[#allocation2] sm:$0xff] %vm283_vm0, %v1576_v56  ;;  %v1545_v50 = vld [vmem:[#allocation2 + $0x8] sm:$0xff]  ;;  %v1349_v56 = vmul.f32 %v6925_v23, %v6809_v39  ;;  %v1264_v48 = vadd.f32 %v1232_v29, %v1200_v19  ;;  %v556_v45 = vld [vmem:[#allocation2 + $0x30] sm:$0xff]  ;;  %v5395_v1 = vld [vmem:[%s6659_s13 + $0xc0] sm:$0xff]  ;;  %v7222_v9 = vmul.f32 %v7179_v6, %v7017_v13 }
  0x72   : > { %v7196_v16 = vld [vmem:[%s6659_s13 + $0x201] sm:$0xff]  ;;  %v1577_v3 = vadd.f32 %v1545_v50, %v1513_v0  ;;  %1460 = vst.msk [vmem:[#allocation2 + $0x88] sm:$0xff] %vm283_vm0, %v1428_v31  ;;  %v588_v19 = vadd.f32 %v556_v45, %v524_v51  ;;  %v7208_v50 = vmul.f32 %v5576_v17, %v6963_v52  ;;  %v7213_v31 = vld [vmem:[%s6659_s13 + $0x192] sm:$0xff]  ;;  %v855_v51 = vmul.f32 %v7008_v24, %v6776_v14 }
  0x73   : > { %v738_v39 = vld [vmem:[#allocation2 + $0xa8] sm:$0xff]  ;;  %v1560_v37 = vld [vmem:[#allocation2 + $0x80] sm:$0xff]  ;;  %1296 = vst.msk [vmem:[#allocation2 + $0x90] sm:$0xff] %vm283_vm0, %v1264_v48  ;;  %471 = vst.msk [vmem:[#allocation2 + $0xb0] sm:$0xff] %vm283_vm0, %v439_v11  ;;  %v7226_v48 = vmul.f32 %v7188_v33, %v6978_v63  ;;  %v7230_v17 = vmul.f32 %v7196_v16, %v6991_v60  ;;  %v7238_v45 = vmul.f32 %v6936_v49, %v6866_v27 }
  0x74   : > { %v5428_v0 = vld [vmem:[%s6659_s13 + $0xc1] sm:$0xff]  ;;  %v770_v29 = vadd.f32 %v738_v39, %v706_v22  ;;  %v1592_v5 = vadd.f32 %v1560_v37, %v7067_v35  ;;  %1609 = vst.msk [vmem:[#allocation2 + $0x8] sm:$0xff] %vm283_vm0, %v1577_v3  ;;  %11642 = vst [vmem:[#allocation18_spill] sm:$0xff] %v7222_v9  ;;  %v1381_v22 = vld [vmem:[#allocation2 + $0x10] sm:$0xff]  ;;  %v7241_v11 = vmul.f32 %v6946_v41, %v5395_v1 }
  0x75   : > { %11643 = vst [vmem:[#allocation19_spill] sm:$0xff] %v7226_v48  ;;  %11644 = vst [vmem:[#allocation20_spill] sm:$0xff] %v7230_v17  ;;  %v5461_v57 = vld [vmem:[%s6659_s13 + $0xc2] sm:$0xff]  ;;  %v1413_v7 = vadd.f32 %v1381_v22, %v1349_v56  ;;  %v1217_v3 = vld [vmem:[#allocation2 + $0x18] sm:$0xff]  ;;  %v1201_v39 = vmul.f32 %v6982_v2, %v6881_v43  ;;  %v7251_v56 = vmul.f32 %v6957_v46, %v5428_v0 }
  0x76   : > { %620 = vst.msk [vmem:[#allocation2 + $0x30] sm:$0xff] %vm283_vm0, %v588_v19  ;;  %v504_v35 = vld [vmem:[%s6659_s13 + $0x1a2] sm:$0xff]  ;;  %291 = vst.msk [vmem:[#allocation2 + $0x38] sm:$0xff] %vm283_vm0, %v258_v10  ;;  %v7246_v9 = vld [vmem:[%s6659_s13 + $0x71] sm:$0xff]  ;;  %v1249_v27 = vadd.f32 %v1217_v3, %v1185_v44  ;;  %v1035_v10 = vmul.f32 %v7213_v31, %v6826_v30  ;;  %v1365_v0 = vmul.f32 %v6967_v55, %v6925_v23 }
  0x77   : > { %v1051_v37 = vld [vmem:[#allocation2 + $0x20] sm:$0xff]  ;;  %802 = vst.msk [vmem:[#allocation2 + $0xa8] sm:$0xff] %vm283_vm0, %v770_v29  ;;  %1624 = vst.msk [vmem:[#allocation2 + $0x80] sm:$0xff] %vm283_vm0, %v1592_v5  ;;  %v887_v2 = vld [vmem:[#allocation2 + $0x28] sm:$0xff]  ;;  %v7263_v29 = vmul.f32 %v6963_v52, %v5461_v57  ;;  %v540_v44 = vmul.f32 %v6705_v26, %v504_v35  ;;  %v691_v55 = vmul.f32 %v7173_v36, %v6733_v47 }
  0x78   : > { %v1083_v19 = vadd.f32 %v1051_v37, %v1019_v58  ;;  %v7254_v1 = vld [vmem:[%s6659_s13 + $0x1a1] sm:$0xff]  ;;  %v7259_v17 = vld [vmem:[%s6659_s13 + $0xd0] sm:$0xff]  ;;  %1445 = vst.msk [vmem:[#allocation2 + $0x10] sm:$0xff] %vm283_vm0, %v1413_v7  ;;  %v919_v5 = vadd.f32 %v887_v2, %v855_v51  ;;  %1281 = vst.msk [vmem:[#allocation2 + $0x18] sm:$0xff] %vm283_vm0, %v1249_v27  ;;  %v360_v26 = vmul.f32 %v7246_v9, %v6679_v12 }
  0x79   : > { %v1712_v22 = vld [vmem:[#allocation2] sm:$0xff]  ;;  %11645 = vst [vmem:[#allocation21_spill] sm:$0xff] %v7263_v29  ;;  %v7273_v37 = vld [vmem:[%s6659_s13 + $0xd1] sm:$0xff]  ;;  %v7277_v48 = vmul.f32 %v7259_v17, %v6978_v63  ;;  %v7300_v12 = vld [vmem:[%s11598_s1 + $0x10] ss:$0 sm:$0xff] }
  0x7a   : > { %v1744_v58 = vadd.f32 %v1712_v22, %v7012_v25  ;;  %v7270_v3 = vld [vmem:[%s6659_s13 + $0x202] sm:$0xff]  ;;  %v1233_v57 = vld [vmem:[#allocation2 + $0x98] sm:$0xff]  ;;  %1115 = vst.msk [vmem:[#allocation2 + $0x20] sm:$0xff] %vm283_vm0, %v1083_v19  ;;  %v7291_v35 = vmul.f32 %v7273_v37, %v6991_v60  ;;  %951 = vst.msk [vmem:[#allocation2 + $0x28] sm:$0xff] %vm283_vm0, %v919_v5  ;;  %v871_v19 = vmul.f32 %v7254_v1, %v6776_v14 }
  0x7b   : > { %11646 = vst [vmem:[#allocation22_spill] sm:$0xff] %v7277_v48  ;;  %v1561_v25 = vld [vmem:[#allocation2 + $0x88] sm:$0xff]  ;;  %v7287_v51 = vmul.f32 %v7270_v3, %v7017_v13  ;;  %v1265_v7 = vadd.f32 %v1233_v57, %v1201_v39  ;;  %v1067_v27 = vld [vmem:[#allocation2 + $0xa0] sm:$0xff]  ;;  %v1397_v22 = vld [vmem:[#allocation2 + $0x90] sm:$0xff]  ;;  %v7308_v39 = vmul.f32 %v7188_v33, %v6946_v41  ;;  %v7312_v48 = vmul.f32 %v7196_v16, %v6957_v46 }
  0x7c   : > { %11648 = vst [vmem:[#allocation24_spill] sm:$0xff] %v7291_v35  ;;  %1776 = vst.msk [vmem:[#allocation2] sm:$0xff] %vm283_vm0, %v1744_v58  ;;  %v1593_v2 = vadd.f32 %v1561_v25, %v1529_v62  ;;  %v1099_v5 = vadd.f32 %v1067_v27, %v1035_v10  ;;  %v572_v57 = vld [vmem:[#allocation2 + $0xb0] sm:$0xff]  ;;  %v1713_v35 = vld [vmem:[#allocation2 + $0x8] sm:$0xff]  ;;  %v1429_v58 = vadd.f32 %v1397_v22, %v1365_v0 }
  0x7d   : > { %11647 = vst [vmem:[#allocation23_spill] sm:$0xff] %v7287_v51  ;;  %v7304_v51 = vmul.f32 %v7082_v32, %v6936_v49  ;;  %11649 = vst [vmem:[#allocation25_spill] sm:$0xff] %v7312_v48  ;;  %v1350_v62 = vmul.f32 %v6925_v23, %v6875_v40  ;;  %v723_v32 = vld [vmem:[#allocation2 + $0x30] sm:$0xff]  ;;  %v604_v25 = vadd.f32 %v572_v57, %v540_v44  ;;  %v392_v29 = vld [vmem:[#allocation2 + $0x38] sm:$0xff] }
  0x7e   : > { %1297 = vst.msk [vmem:[#allocation2 + $0x98] sm:$0xff] %vm283_vm0, %v1265_v7  ;;  %v1745_v10 = vadd.f32 %v1713_v35, %v7115_v54  ;;  %1625 = vst.msk [vmem:[#allocation2 + $0x88] sm:$0xff] %vm283_vm0, %v1593_v2  ;;  %v1186_v0 = vmul.f32 %v6881_v43, %v6928_v28  ;;  %v903_v27 = vld [vmem:[#allocation2 + $0xa8] sm:$0xff]  ;;  %v755_v22 = vadd.f32 %v723_v32, %v691_v55  ;;  %v238_v40 = vld [vmem:[%s6659_s13 + $0x1b0] sm:$0xff] }
  0x7f   : > { %1131 = vst.msk [vmem:[#allocation2 + $0xa0] sm:$0xff] %vm283_vm0, %v1099_v5  ;;  %v424_v48 = vadd.f32 %v392_v29, %v360_v26  ;;  %v7325_v7 = vmul.f32 %v7300_v12, %v7104_v61  ;;  %v1728_v44 = vld [vmem:[#allocation2 + $0x80] sm:$0xff]  ;;  %v7328_v57 = vld [vmem:[%s6659_s13 + $0x210] sm:$0xff]  ;;  %1461 = vst.msk [vmem:[#allocation2 + $0x90] sm:$0xff] %vm283_vm0, %v1429_v58  ;;  %v7336_v28 = vmul.f32 %v7270_v3, %v6963_v52 }
  0x80   : > { %v7331_v54 = vld [vmem:[%s6659_s13 + $0x211] sm:$0xff]  ;;  %v1020_v29 = vmul.f32 %v7130_v21, %v6826_v30  ;;  %v935_v55 = vadd.f32 %v903_v27, %v871_v19  ;;  %636 = vst.msk [vmem:[#allocation2 + $0xb0] sm:$0xff] %vm283_vm0, %v604_v25  ;;  %v1760_v61 = vadd.f32 %v1728_v44, %v7072_v38  ;;  %v7344_v26 = vmul.f32 %v7136_v53, %v7188_v33 }
  0x81   : > { %11650 = vst [vmem:[#allocation26_spill] sm:$0xff] %v7325_v7  ;;  %11651 = vst [vmem:[#allocation27_spill] sm:$0xff] %v7336_v28  ;;  %v7348_v35 = vld [vmem:[%s6659_s13 + $0xd2] sm:$0xff]  ;;  %v7352_v5 = vmul.f32 %v7328_v57, %v6978_v63  ;;  %v7356_v19 = vmul.f32 %v7331_v54, %v6991_v60  ;;  %v1366_v25 = vmul.f32 %v7098_v20, %v6925_v23  ;;  %v1052_v7 = vld [vmem:[#allocation2 + $0x28] sm:$0xff] }
  0x82   : > { %11652 = vst [vmem:[#allocation28_spill] sm:$0xff] %v7344_v26  ;;  %1777 = vst.msk [vmem:[#allocation2 + $0x8] sm:$0xff] %vm283_vm0, %v1745_v10  ;;  %v1546_v2 = vld [vmem:[#allocation2 + $0x10] sm:$0xff]  ;;  %v7366_v33 = vmul.f32 %v7348_v35, %v7017_v13  ;;  %v1382_v32 = vld [vmem:[#allocation2 + $0x18] sm:$0xff] }
  0x83   : > { %11653 = vst [vmem:[#allocation29_spill] sm:$0xff] %v7352_v5  ;;  %11654 = vst [vmem:[#allocation30_spill] sm:$0xff] %v7356_v19  ;;  %v7359_v58 = vld [vmem:[%s6659_s13 + $0x1b0] sm:$0xff]  ;;  %v1578_v38 = vadd.f32 %v1546_v2, %v7238_v45  ;;  %v1218_v10 = vld [vmem:[#allocation2 + $0x20] sm:$0xff]  ;;  %v7383_v45 = vmul.f32 %v7136_v53, %v7259_v17  ;;  %v1414_v20 = vadd.f32 %v1382_v32, %v1350_v62 }
  0x84   : > { %787 = vst.msk [vmem:[#allocation2 + $0x30] sm:$0xff] %vm283_vm0, %v755_v22  ;;  %456 = vst.msk [vmem:[#allocation2 + $0x38] sm:$0xff] %vm283_vm0, %v424_v48  ;;  %v7371_v27 = vld [vmem:[%s6659_s13 + $0x72] sm:$0xff]  ;;  %v7377_v22 = vld [vmem:[%s11598_s1] ss:$0 sm:$0xff]  ;;  %v1250_v44 = vadd.f32 %v1218_v10, %v1186_v0  ;;  %v1084_v62 = vadd.f32 %v1052_v7, %v1020_v29  ;;  %v707_v0 = vmul.f32 %v7359_v58, %v6733_v47 }
  0x85   : > { %11655 = vst [vmem:[#allocation31_spill] sm:$0xff] %v7366_v33  ;;  %967 = vst.msk [vmem:[#allocation2 + $0xa8] sm:$0xff] %vm283_vm0, %v935_v55  ;;  %v274_v48 = vmul.f32 %v7377_v22, %v238_v40  ;;  %v7386_v2 = vld [vmem:[%s6659_s13 + $0x1a2] sm:$0xff]  ;;  %v1202_v55 = vmul.f32 %v7142_v59, %v6881_v43  ;;  %v7393_v40 = vmul.f32 %v6936_v49, %v6941_v18  ;;  %v7404_v32 = vld [vmem:[%s6659_s13 + $0x212] sm:$0xff] }
  0x86   : > { %1792 = vst.msk [vmem:[#allocation2 + $0x80] sm:$0xff] %vm283_vm0, %v1760_v61  ;;  %11656 = vst [vmem:[#allocation32_spill] sm:$0xff] %v7383_v45  ;;  %v1877_v33 = vld [vmem:[#allocation2] sm:$0xff]  ;;  %v7397_v61 = vmul.f32 %v7259_v17, %v6946_v41  ;;  %v7412_v18 = vmul.f32 %v7273_v37, %v6957_v46  ;;  %v1398_v17 = vld [vmem:[#allocation2 + $0x98] sm:$0xff]  ;;  %v856_v47 = vmul.f32 %v7246_v9, %v6776_v14 }
  0x87   : > { %1610 = vst.msk [vmem:[#allocation2 + $0x10] sm:$0xff] %vm283_vm0, %v1578_v38  ;;  %307 = vst.msk [vmem:[#allocation2 + $0xb8] sm:$0xff] %vm283_vm0, %v274_v48  ;;  %v1909_v59 = vadd.f32 %v1877_v33, %v7026_v42  ;;  %v7407_v38 = vld [vmem:[%s6659_s13 + $0xe0] sm:$0xff]  ;;  %v340_v29 = vld [vmem:[%s6659_s13 + $0x1b1] sm:$0xff]  ;;  %v7430_v48 = vmul.f32 %v7348_v35, %v6963_v52  ;;  %v1430_v14 = vadd.f32 %v1398_v17, %v1366_v25 }
  0x88   : > { %1446 = vst.msk [vmem:[#allocation2 + $0x18] sm:$0xff] %vm283_vm0, %v1414_v20  ;;  %11657 = vst [vmem:[#allocation33_spill] sm:$0xff] %v7412_v18  ;;  %v7420_v42 = vld [vmem:[%s11598_s1 + $0x2] ss:$0 sm:$0xff]  ;;  %v1729_v33 = vld [vmem:[#allocation2 + $0x88] sm:$0xff]  ;;  %v7434_v20 = vmul.f32 %v7407_v38, %v6978_v63  ;;  %v1036_v26 = vmul.f32 %v7386_v2, %v6826_v30  ;;  %v7448_v5 = vmul.f32 %v7136_v53, %v7328_v57 }
  0x89   : > { %1282 = vst.msk [vmem:[#allocation2 + $0x20] sm:$0xff] %vm283_vm0, %v1250_v44  ;;  %v525_v7 = vmul.f32 %v7420_v42, %v7371_v27  ;;  %v7426_v10 = vld [vmem:[%s6659_s13 + $0xe1] sm:$0xff]  ;;  %11658 = vst [vmem:[#allocation34_spill] sm:$0xff] %v7430_v48  ;;  %v7443_v45 = vld [vmem:[%s11598_s1 + $0x11] ss:$0 sm:$0xff]  ;;  %v1761_v19 = vadd.f32 %v1729_v33, %v7169_v34  ;;  %v7457_v28 = vmul.f32 %v7404_v32, %v7017_v13 }
  0x8a   : > { %11659 = vst [vmem:[#allocation35_spill] sm:$0xff] %v7434_v20  ;;  %v1234_v44 = vld [vmem:[#allocation2 + $0xa0] sm:$0xff]  ;;  %1116 = vst.msk [vmem:[#allocation2 + $0x28] sm:$0xff] %vm283_vm0, %v1084_v62  ;;  %v1562_v25 = vld [vmem:[#allocation2 + $0x90] sm:$0xff]  ;;  %v7452_v62 = vmul.f32 %v7426_v10, %v6991_v60 }
  0x8b   : > { %1941 = vst.msk [vmem:[#allocation2] sm:$0xff] %vm283_vm0, %v1909_v59  ;;  %11660 = vst [vmem:[#allocation36_spill] sm:$0xff] %v7448_v5  ;;  %v1266_v17 = vadd.f32 %v1234_v44, %v1202_v55  ;;  %v739_v20 = vld [vmem:[#allocation2 + $0xb0] sm:$0xff]  ;;  %v1878_v48 = vld [vmem:[#allocation2 + $0x8] sm:$0xff]  ;;  %v1594_v59 = vadd.f32 %v1562_v25, %v7304_v51  ;;  %v1351_v44 = vmul.f32 %v6925_v23, %v7008_v24 }
  0x8c   : > { %11661 = vst [vmem:[#allocation37_spill] sm:$0xff] %v7452_v62  ;;  %11662 = vst [vmem:[#allocation38_spill] sm:$0xff] %v7457_v28  ;;  %v888_v34 = vld [vmem:[#allocation2 + $0x30] sm:$0xff]  ;;  %v771_v33 = vadd.f32 %v739_v20, %v707_v0  ;;  %v557_v5 = vld [vmem:[#allocation2 + $0x38] sm:$0xff]  ;;  %v1910_v51 = vadd.f32 %v1878_v48, %v7121_v15  ;;  %v1531_v15 = vmul.f32 %v7213_v31, %v6936_v49 }
  0x8d   : > { %1462 = vst.msk [vmem:[#allocation2 + $0x98] sm:$0xff] %vm283_vm0, %v1430_v14  ;;  %v7463_v62 = vld [vmem:[%s11598_s1 + $0x1] ss:$0 sm:$0xff]  ;;  %1793 = vst.msk [vmem:[#allocation2 + $0x88] sm:$0xff] %vm283_vm0, %v1761_v19  ;;  %v1068_v14 = vld [vmem:[#allocation2 + $0xa8] sm:$0xff]  ;;  %v920_v25 = vadd.f32 %v888_v34, %v856_v47  ;;  %v589_v0 = vadd.f32 %v557_v5, %v525_v7  ;;  %v7482_v19 = vmul.f32 %v7328_v57, %v6946_v41 }
  0x8e   : > { %v376_v55 = vmul.f32 %v7463_v62, %v340_v29  ;;  %1298 = vst.msk [vmem:[#allocation2 + $0xa0] sm:$0xff] %vm283_vm0, %v1266_v17  ;;  %v1893_v20 = vld [vmem:[#allocation2 + $0x80] sm:$0xff]  ;;  %1626 = vst.msk [vmem:[#allocation2 + $0x90] sm:$0xff] %vm283_vm0, %v1594_v59  ;;  %v1187_v24 = vmul.f32 %v6881_v43, %v7173_v36  ;;  %v1100_v47 = vadd.f32 %v1068_v14, %v1036_v26  ;;  %v1714_v31 = vld [vmem:[#allocation2 + $0x10] sm:$0xff] }
  0x8f   : > { %v7473_v28 = vld [vmem:[%s6659_s13 + $0x220] sm:$0xff]  ;;  %803 = vst.msk [vmem:[#allocation2 + $0xb0] sm:$0xff] %vm283_vm0, %v771_v33  ;;  %v7489_v5 = vmul.f32 %v7443_v45, %v7179_v6  ;;  %v1925_v7 = vadd.f32 %v1893_v20, %v7090_v8  ;;  %1942 = vst.msk [vmem:[#allocation2 + $0x8] sm:$0xff] %vm283_vm0, %v1910_v51  ;;  %v7495_v57 = vmul.f32 %v7331_v54, %v6957_v46  ;;  %v7502_v26 = vld [vmem:[%s6659_s13 + $0x1b1] sm:$0xff] }
  0x90   : > { %v7476_v18 = vld [vmem:[%s6659_s13 + $0x221] sm:$0xff]  ;;  %v7499_v36 = vmul.f32 %v7404_v32, %v6963_v52  ;;  %952 = vst.msk [vmem:[#allocation2 + $0x30] sm:$0xff] %vm283_vm0, %v920_v25  ;;  %621 = vst.msk [vmem:[#allocation2 + $0x38] sm:$0xff] %vm283_vm0, %v589_v0  ;;  %v408_v6 = vld [vmem:[#allocation2 + $0xb8] sm:$0xff]  ;;  %v1746_v8 = vadd.f32 %v1714_v31, %v7241_v11  ;;  %v7509_v48 = vmul.f32 %v7473_v28, %v6978_v63 }
  0x91   : > { %11663 = vst [vmem:[#allocation39_spill] sm:$0xff] %v7489_v5  ;;  %v1547_v29 = vld [vmem:[#allocation2 + $0x18] sm:$0xff]  ;;  %v7513_v17 = vmul.f32 %v7476_v18, %v6991_v60  ;;  %v1383_v59 = vld [vmem:[#allocation2 + $0x20] sm:$0xff]  ;;  %1132 = vst.msk [vmem:[#allocation2 + $0xa8] sm:$0xff] %vm283_vm0, %v1100_v47  ;;  %v440_v33 = vadd.f32 %v408_v6, %v376_v55  ;;  %v7522_v11 = vmul.f32 %v7300_v12, %v7196_v16 }
  0x92   : > { %v7517_v34 = vld [vmem:[%s6659_s13 + $0x80] sm:$0xff]  ;;  %1957 = vst.msk [vmem:[#allocation2 + $0x80] sm:$0xff] %vm283_vm0, %v1925_v7  ;;  %v1579_v51 = vadd.f32 %v1547_v29, %v7393_v40  ;;  %v1415_v14 = vadd.f32 %v1383_v59, %v1351_v44  ;;  %v1367_v25 = vmul.f32 %v7254_v1, %v6925_v23  ;;  %v1219_v0 = vld [vmem:[#allocation2 + $0x28] sm:$0xff]  ;;  %v7530_v47 = vmul.f32 %v7300_v12, %v7273_v37 }
  0x93   : > { %11664 = vst [vmem:[#allocation40_spill] sm:$0xff] %v7513_v17  ;;  %11665 = vst [vmem:[#allocation41_spill] sm:$0xff] %v7522_v11  ;;  %v223_v20 = vld [vmem:[%s6659_s13 + $0xa0] sm:$0xff]  ;;  %v7535_v16 = vmul.f32 %v7136_v53, %v7407_v38  ;;  %v1251_v55 = vadd.f32 %v1219_v0, %v1187_v24  ;;  %v1021_v24 = vmul.f32 %v7371_v27, %v6826_v30  ;;  %v11670_v17 = vld [vmem:[#allocation13_spill] sm:$0xff] }
  0x94   : > { %v2042_v31 = vld [vmem:[#allocation2] sm:$0xff]  ;;  %11666 = vst [vmem:[#allocation42_spill] sm:$0xff] %v7530_v47  ;;  %1778 = vst.msk [vmem:[#allocation2 + $0x10] sm:$0xff] %vm283_vm0, %v1746_v8  ;;  %v1563_v8 = vld [vmem:[#allocation2 + $0x98] sm:$0xff]  ;;  %v1203_v30 = vmul.f32 %v7359_v58, %v6881_v43  ;;  %v259_v5 = vmul.f32 %v7377_v22, %v223_v20  ;;  %v7590_v43 = vmul.f32 %v7426_v10, %v6957_v46 }
  0x95   : > { %11667 = vst [vmem:[#allocation43_spill] sm:$0xff] %v7535_v16  ;;  %v7538_v40 = vld [vmem:[%s6659_s13 + $0xe2] sm:$0xff]  ;;  %472 = vst.msk [vmem:[#allocation2 + $0xb8] sm:$0xff] %vm283_vm0, %v440_v33  ;;  %v505_v33 = vld [vmem:[%s6659_s13 + $0x1b2] sm:$0xff] }
  0x96   : > { %v7543_v1 = vld [vmem:[%s11598_s1 + $0x4] ss:$0 sm:$0xff]  ;;  %1611 = vst.msk [vmem:[#allocation2 + $0x18] sm:$0xff] %vm283_vm0, %v1579_v51  ;;  %v7552_v6 = vmul.f32 %v7538_v40, %v7017_v13  ;;  %1447 = vst.msk [vmem:[#allocation2 + $0x20] sm:$0xff] %vm283_vm0, %v1415_v14  ;;  %v7560_v29 = vld [vmem:[%s11598_s1 + $0x3] ss:$0 sm:$0xff]  ;;  %v1516_v14 = vmul.f32 %v6936_v49, %v7130_v21  ;;  %v7586_v21 = vmul.f32 %v7407_v38, %v6946_v41 }
  0x97   : > { %v872_v37 = vmul.f32 %v7543_v1, %v7502_v26  ;;  %v11668_v44 = vld [vmem:[#allocation6_spill] sm:$0xff]  ;;  %v692_v59 = vmul.f32 %v7560_v29, %v7517_v34  ;;  %v1894_v51 = vld [vmem:[#allocation2 + $0x88] sm:$0xff]  ;;  %1283 = vst.msk [vmem:[#allocation2 + $0x28] sm:$0xff] %vm283_vm0, %v1251_v55  ;;  %v7582_v16 = vld [vmem:[%s6659_s13 + $0xf0] sm:$0xff]  ;;  %v541_v47 = vmul.f32 %v7420_v42, %v505_v33 }
  0x98   : > { %v2074_v7 = vadd.f32 %v2042_v31, %v11668_v44  ;;  %11669 = vst [vmem:[#allocation6_spill] sm:$0xff] %v7552_v6  ;;  %v7566_v0 = vld [vmem:[%s6659_s13 + $0x222] sm:$0xff]  ;;  %v1595_v31 = vadd.f32 %v1563_v8, %v1531_v15  ;;  %v7578_v6 = vld [vmem:[%s11598_s1 + $0x12] ss:$0 sm:$0xff]  ;;  %v1926_v15 = vadd.f32 %v1894_v51, %v7185_v4  ;;  %v7596_v4 = vmul.f32 %v7538_v40, %v6963_v52  ;;  %v724_v38 = vld [vmem:[#allocation2 + $0x38] sm:$0xff] }
  0x99   : > { %v1399_v44 = vld [vmem:[#allocation2 + $0xa0] sm:$0xff]  ;;  %v1730_v8 = vld [vmem:[#allocation2 + $0x90] sm:$0xff]  ;;  %v2043_v55 = vld [vmem:[#allocation2 + $0x8] sm:$0xff]  ;;  %292 = vst.msk [vmem:[#allocation2 + $0x40] sm:$0xff] %vm283_vm0, %v259_v5  ;;  %v7614_v5 = vmul.f32 %v7582_v16, %v6978_v63 }
  0x9a   : > { %2106 = vst.msk [vmem:[#allocation2] sm:$0xff] %vm283_vm0, %v2074_v7  ;;  %v1431_v58 = vadd.f32 %v1399_v44, %v1367_v25  ;;  %v904_v20 = vld [vmem:[#allocation2 + $0xb0] sm:$0xff]  ;;  %v1762_v7 = vadd.f32 %v1730_v8, %v7308_v39  ;;  %1627 = vst.msk [vmem:[#allocation2 + $0x98] sm:$0xff] %vm283_vm0, %v1595_v31  ;;  %v2075_v25 = vadd.f32 %v2043_v55, %v11670_v17  ;;  %v1235_v44 = vld [vmem:[#allocation2 + $0xa8] sm:$0xff] }
  0x9b   : > { %v1053_v51 = vld [vmem:[#allocation2 + $0x30] sm:$0xff]  ;;  %v936_v11 = vadd.f32 %v904_v20, %v872_v37  ;;  %1958 = vst.msk [vmem:[#allocation2 + $0x88] sm:$0xff] %vm283_vm0, %v1926_v15  ;;  %v7607_v31 = vmul.f32 %v7566_v0, %v7017_v13  ;;  %v756_v8 = vadd.f32 %v724_v38, %v692_v59  ;;  %v325_v33 = vld [vmem:[%s6659_s13 + $0xa1] sm:$0xff]  ;;  %v1352_v15 = vmul.f32 %v6925_v23, %v7246_v9 }
  0x9c   : > { %v7603_v39 = vld [vmem:[%s6659_s13 + $0xf1] sm:$0xff]  ;;  %1463 = vst.msk [vmem:[#allocation2 + $0xa0] sm:$0xff] %vm283_vm0, %v1431_v58  ;;  %v1085_v37 = vadd.f32 %v1053_v51, %v1021_v24  ;;  %v2058_v20 = vld [vmem:[#allocation2 + $0x80] sm:$0xff]  ;;  %1794 = vst.msk [vmem:[#allocation2 + $0x90] sm:$0xff] %vm283_vm0, %v1762_v7  ;;  %v1267_v58 = vadd.f32 %v1235_v44, %v1203_v30  ;;  %v7631_v51 = vmul.f32 %v7300_v12, %v7331_v54 }
  0x9d   : > { %11671 = vst [vmem:[#allocation13_spill] sm:$0xff] %v7607_v31  ;;  %v7618_v17 = vmul.f32 %v7603_v39, %v6991_v60  ;;  %968 = vst.msk [vmem:[#allocation2 + $0xb0] sm:$0xff] %vm283_vm0, %v936_v11  ;;  %v6237_v24 = vld [vmem:[%s6659_s13 + $0x140] sm:$0xff]  ;;  %v1879_v38 = vld [vmem:[#allocation2 + $0x10] sm:$0xff]  ;;  %v7635_v9 = vmul.f32 %v7136_v53, %v7473_v28  ;;  %v1532_v54 = vmul.f32 %v7386_v2, %v6936_v49 }
  0x9e   : > { %v7625_v59 = vmul.f32 %v6237_v24, %v7578_v6  ;;  %v11674_v55 = vld [vmem:[#allocation10_spill] sm:$0xff]  ;;  %2107 = vst.msk [vmem:[#allocation2 + $0x8] sm:$0xff] %vm283_vm0, %v2075_v25  ;;  %v7638_v30 = vld [vmem:[%s6659_s13 + $0x1b2] sm:$0xff]  ;;  %1117 = vst.msk [vmem:[#allocation2 + $0x30] sm:$0xff] %vm283_vm0, %v1085_v37  ;;  %v1911_v44 = vadd.f32 %v1879_v38, %v7251_v56  ;;  %v7653_v37 = vmul.f32 %v7443_v45, %v7270_v3 }
  0x9f   : > { %11672 = vst [vmem:[#allocation44_spill] sm:$0xff] %v7618_v17  ;;  %v2090_v7 = vadd.f32 %v2058_v20, %v11674_v55  ;;  %11675 = vst [vmem:[#allocation10_spill] sm:$0xff] %v7631_v51  ;;  %v573_v11 = vld [vmem:[#allocation2 + $0xb8] sm:$0xff]  ;;  %v1548_v25 = vld [vmem:[#allocation2 + $0x20] sm:$0xff]  ;;  %v7658_v38 = vmul.f32 %v7473_v28, %v6946_v41  ;;  %v7670_v3 = vmul.f32 %v7476_v18, %v6957_v46 }
  0xa0   : > { %11673 = vst [vmem:[#allocation45_spill] sm:$0xff] %v7625_v59  ;;  %11676 = vst [vmem:[#allocation46_spill] sm:$0xff] %v7635_v9  ;;  %v1715_v20 = vld [vmem:[#allocation2 + $0x18] sm:$0xff]  ;;  %v7647_v24 = vld [vmem:[%s6659_s13 + $0x81] sm:$0xff]  ;;  %v605_v55 = vadd.f32 %v573_v11, %v541_v47  ;;  %v361_v59 = vmul.f32 %v7463_v62, %v325_v33  ;;  %v7663_v47 = vmul.f32 %v7300_v12, %v7426_v10 }
  0xa1   : > { %788 = vst.msk [vmem:[#allocation2 + $0x38] sm:$0xff] %vm283_vm0, %v756_v8  ;;  %1299 = vst.msk [vmem:[#allocation2 + $0xa8] sm:$0xff] %vm283_vm0, %v1267_v58  ;;  %v1747_v56 = vadd.f32 %v1715_v20, %v7397_v61  ;;  %v1580_v8 = vadd.f32 %v1548_v25, %v1516_v14  ;;  %v1384_v49 = vld [vmem:[#allocation2 + $0x28] sm:$0xff]  ;;  %v2209_v2 = vld [vmem:[#allocation2] sm:$0xff]  ;;  %v7685_v46 = vmul.f32 %v7566_v0, %v6963_v52 }
  0xa2   : > { %2122 = vst.msk [vmem:[#allocation2 + $0x80] sm:$0xff] %vm283_vm0, %v2090_v7  ;;  %11677 = vst [vmem:[#allocation47_spill] sm:$0xff] %v7653_v37  ;;  %v7666_v33 = vld [vmem:[%s6659_s13 + $0xf2] sm:$0xff]  ;;  %v1416_v61 = vadd.f32 %v1384_v49, %v1352_v15  ;;  %v7675_v41 = vld [vmem:[%s11598_s1 + $0x5] ss:$0 sm:$0xff]  ;;  %v7701_v25 = vmul.f32 %v7443_v45, %v7348_v35  ;;  %v7714_v35 = vmul.f32 %v7136_v53, %v7582_v16 }
  0xa3   : > { %1943 = vst.msk [vmem:[#allocation2 + $0x10] sm:$0xff] %vm283_vm0, %v1911_v44  ;;  %11678 = vst [vmem:[#allocation48_spill] sm:$0xff] %v7663_v47  ;;  %v1037_v28 = vmul.f32 %v7675_v41, %v7638_v30  ;;  %v11679_v10 = vld [vmem:[#allocation7_spill] sm:$0xff]  ;;  %v1731_v58 = vld [vmem:[#allocation2 + $0x98] sm:$0xff]  ;;  %v857_v44 = vmul.f32 %v7543_v1, %v7647_v24 }
  0xa4   : > { %637 = vst.msk [vmem:[#allocation2 + $0xb8] sm:$0xff] %vm283_vm0, %v605_v55  ;;  %v2241_v14 = vadd.f32 %v2209_v2, %v11679_v10  ;;  %1779 = vst.msk [vmem:[#allocation2 + $0x18] sm:$0xff] %vm283_vm0, %v1747_v56  ;;  %v7690_v15 = vld [vmem:[%s11598_s1 + $0x6] ss:$0 sm:$0xff]  ;;  %v2059_v52 = vld [vmem:[#allocation2 + $0x88] sm:$0xff]  ;;  %v1763_v55 = vadd.f32 %v1731_v58, %v7482_v19  ;;  %v7721_v58 = vmul.f32 %v7666_v33, %v7017_v13 }
  0xa5   : > { %1612 = vst.msk [vmem:[#allocation2 + $0x20] sm:$0xff] %vm283_vm0, %v1580_v8  ;;  %v1188_v7 = vmul.f32 %v7690_v15, %v7517_v34  ;;  %v7695_v11 = vld [vmem:[%s6659_s13 + $0x1c0] sm:$0xff]  ;;  %11680 = vst [vmem:[#allocation7_spill] sm:$0xff] %v7701_v25  ;;  %v7705_v56 = vld [vmem:[%s6659_s13 + $0x230] sm:$0xff]  ;;  %v1368_v34 = vmul.f32 %v7502_v26, %v6925_v23  ;;  %v2091_v2 = vadd.f32 %v2059_v52, %v7208_v50 }
  0xa6   : > { %v393_v20 = vld [vmem:[#allocation2 + $0x40] sm:$0xff]  ;;  %1448 = vst.msk [vmem:[#allocation2 + $0x28] sm:$0xff] %vm283_vm0, %v1416_v61  ;;  %2273 = vst.msk [vmem:[#allocation2] sm:$0xff] %vm283_vm0, %v2241_v14  ;;  %v1895_v10 = vld [vmem:[#allocation2 + $0x90] sm:$0xff]  ;;  %v7727_v50 = vmul.f32 %v7705_v56, %v6978_v63  ;;  %v1204_v25 = vmul.f32 %v7690_v15, %v7695_v11 }
  0xa7   : > { %v1564_v8 = vld [vmem:[#allocation2 + $0xa0] sm:$0xff]  ;;  %v425_v49 = vadd.f32 %v393_v20, %v361_v59  ;;  %11681 = vst [vmem:[#allocation49_spill] sm:$0xff] %v7714_v35  ;;  %v7717_v19 = vld [vmem:[%s6659_s13 + $0x231] sm:$0xff]  ;;  %11682 = vst [vmem:[#allocation50_spill] sm:$0xff] %v7721_v58  ;;  %v708_v35 = vmul.f32 %v7560_v29, %v7695_v11 }
  0xa8   : > { %v1596_v61 = vadd.f32 %v1564_v8, %v1532_v54  ;;  %v1069_v47 = vld [vmem:[#allocation2 + $0xb0] sm:$0xff]  ;;  %v2210_v23 = vld [vmem:[#allocation2 + $0x8] sm:$0xff]  ;;  %v11683_v26 = vld [vmem:[#allocation25_spill] sm:$0xff]  ;;  %1795 = vst.msk [vmem:[#allocation2 + $0x98] sm:$0xff] %vm283_vm0, %v1763_v55  ;;  %v7740_v63 = vmul.f32 %v7717_v19, %v6991_v60 }
  0xa9   : > { %v1927_v59 = vadd.f32 %v1895_v10, %v11683_v26  ;;  %v1220_v14 = vld [vmem:[#allocation2 + $0x30] sm:$0xff]  ;;  %v1101_v20 = vadd.f32 %v1069_v47, %v1037_v28  ;;  %v889_v52 = vld [vmem:[#allocation2 + $0x38] sm:$0xff]  ;;  %457 = vst.msk [vmem:[#allocation2 + $0x40] sm:$0xff] %vm283_vm0, %v425_v49  ;;  %v11684_v54 = vld [vmem:[#allocation14_spill] sm:$0xff]  ;;  %v7745_v49 = vmul.f32 %v7443_v45, %v7404_v32 }
  0xaa   : > { %v2242_v8 = vadd.f32 %v2210_v23, %v11684_v54  ;;  %2123 = vst.msk [vmem:[#allocation2 + $0x88] sm:$0xff] %vm283_vm0, %v2091_v2  ;;  %v7735_v10 = vld [vmem:[%s6659_s13 + $0x232] sm:$0xff]  ;;  %1628 = vst.msk [vmem:[#allocation2 + $0xa0] sm:$0xff] %vm283_vm0, %v1596_v61  ;;  %v1400_v47 = vld [vmem:[#allocation2 + $0xa8] sm:$0xff]  ;;  %v1252_v28 = vadd.f32 %v1220_v14, %v1188_v7  ;;  %v921_v55 = vadd.f32 %v889_v52, %v857_v44 }
  0xab   : > { %11685 = vst [vmem:[#allocation25_spill] sm:$0xff] %v7740_v63  ;;  %v490_v26 = vld [vmem:[%s6659_s13 + $0xa2] sm:$0xff]  ;;  %11686 = vst [vmem:[#allocation14_spill] sm:$0xff] %v7745_v49  ;;  %v7750_v2 = vmul.f32 %v7136_v53, %v7705_v56  ;;  %v1432_v44 = vadd.f32 %v1400_v47, %v1368_v34  ;;  %v7769_v23 = vld [vmem:[%s11598_s1 + $0x13] ss:$0 sm:$0xff]  ;;  %v7775_v54 = vmul.f32 %v7300_v12, %v7476_v18 }
  0xac   : > { %v2225_v58 = vld [vmem:[#allocation2 + $0x80] sm:$0xff]  ;;  %1959 = vst.msk [vmem:[#allocation2 + $0x90] sm:$0xff] %vm283_vm0, %v1927_v59  ;;  %v7758_v60 = vld [vmem:[%s11598_s1 + $0x8] ss:$0 sm:$0xff]  ;;  %1133 = vst.msk [vmem:[#allocation2 + $0xb0] sm:$0xff] %vm283_vm0, %v1101_v20 }
  0xad   : > { %11687 = vst [vmem:[#allocation51_spill] sm:$0xff] %v7750_v2  ;;  %v7753_v61 = vld [vmem:[%s6659_s13 + $0x100] sm:$0xff]  ;;  %v1517_v7 = vmul.f32 %v7758_v60, %v7371_v27  ;;  %v11688_v59 = vld [vmem:[#allocation11_spill] sm:$0xff]  ;;  %2274 = vst.msk [vmem:[#allocation2 + $0x8] sm:$0xff] %vm283_vm0, %v2242_v8  ;;  %v7779_v27 = vmul.f32 %v7735_v10, %v7017_v13 }
  0xae   : > { %v7763_v32 = vld [vmem:[%s6659_s13 + $0x82] sm:$0xff]  ;;  %v2257_v14 = vadd.f32 %v2225_v58, %v11688_v59  ;;  %v2044_v52 = vld [vmem:[#allocation2 + $0x10] sm:$0xff]  ;;  %11689 = vst [vmem:[#allocation11_spill] sm:$0xff] %v7775_v54  ;;  %1284 = vst.msk [vmem:[#allocation2 + $0x30] sm:$0xff] %vm283_vm0, %v1252_v28  ;;  %v7897_v17 = vmul.f32 %v7136_v53, %v7753_v61 }
  0xaf   : > { %11690 = vst [vmem:[#allocation52_spill] sm:$0xff] %v7779_v27  ;;  %v7784_v34 = vld [vmem:[%s11598_s1 + $0x9] ss:$0 sm:$0xff]  ;;  %953 = vst.msk [vmem:[#allocation2 + $0x38] sm:$0xff] %vm283_vm0, %v921_v55  ;;  %v740_v18 = vld [vmem:[#allocation2 + $0xb8] sm:$0xff]  ;;  %v526_v55 = vmul.f32 %v7420_v42, %v490_v26 }
  0xb0   : > { %v7788_v20 = vmul.f32 %v7784_v34, %v7582_v16  ;;  %v5712_v58 = vld [vmem:[%s6659_s13 + $0x280] sm:$0xff]  ;;  %v11691_v8 = vld [vmem:[#allocation21_spill] sm:$0xff]  ;;  %v7797_v54 = vld [vmem:[%s11598_s1 + $0xa] ss:$0 sm:$0xff]  ;;  %1464 = vst.msk [vmem:[#allocation2 + $0xa8] sm:$0xff] %vm283_vm0, %v1432_v44  ;;  %v772_v28 = vadd.f32 %v740_v18, %v708_v35 }
  0xb1   : > { %v2076_v47 = vadd.f32 %v2044_v52, %v11691_v8  ;;  %v1880_v13 = vld [vmem:[#allocation2 + $0x18] sm:$0xff]  ;;  %v1716_v59 = vld [vmem:[#allocation2 + $0x20] sm:$0xff]  ;;  %v7801_v16 = vmul.f32 %v7797_v54, %v7603_v39  ;;  %2289 = vst.msk [vmem:[#allocation2 + $0x80] sm:$0xff] %vm283_vm0, %v2257_v14  ;;  %v1549_v2 = vld [vmem:[#allocation2 + $0x28] sm:$0xff] }
  0xb2   : > { %v11692_v52 = vld [vmem:[#allocation33_spill] sm:$0xff]  ;;  %v1748_v27 = vadd.f32 %v1716_v59, %v7586_v21  ;;  %v7809_v49 = vld [vmem:[%s6659_s13 + $0x101] sm:$0xff]  ;;  %v7814_v37 = vld [vmem:[%s11598_s1 + $0xb] ss:$0 sm:$0xff]  ;;  %804 = vst.msk [vmem:[#allocation2 + $0xb8] sm:$0xff] %vm283_vm0, %v772_v28 }
  0xb3   : > { %v1912_v8 = vadd.f32 %v1880_v13, %v11692_v52  ;;  %v7818_v44 = vmul.f32 %v7814_v37, %v7666_v33  ;;  %v7823_v35 = vld [vmem:[%s11598_s1 + $0xc] ss:$0 sm:$0xff]  ;;  %v2374_v26 = vld [vmem:[#allocation2] sm:$0xff]  ;;  %2108 = vst.msk [vmem:[#allocation2 + $0x10] sm:$0xff] %vm283_vm0, %v2076_v47  ;;  %v1581_v13 = vadd.f32 %v1549_v2, %v1517_v7  ;;  %v7837_v59 = vld [vmem:[%s11598_s1 + $0xd] ss:$0 sm:$0xff]  ;;  %v7848_v47 = vmul.f32 %v7578_v6, %v5712_v58 }
  0xb4   : > { %v7827_v21 = vmul.f32 %v7823_v35, %v7753_v61  ;;  %v6245_v14 = vld [vmem:[%s6659_s13 + $0x141] sm:$0xff]  ;;  %v7841_v52 = vmul.f32 %v7837_v59, %v7809_v49  ;;  %v1896_v2 = vld [vmem:[#allocation2 + $0x98] sm:$0xff]  ;;  %1780 = vst.msk [vmem:[#allocation2 + $0x20] sm:$0xff] %vm283_vm0, %v1748_v27  ;;  %v1022_v58 = vmul.f32 %v7675_v41, %v7763_v32  ;;  %v7869_v27 = vmul.f32 %v7443_v45, %v7538_v40  ;;  %v7880_v51 = vld [vmem:[%s6659_s13 + $0x150] sm:$0xff] }
  0xb5   : > { %v7831_v18 = vmul.f32 %v6245_v14, %v7769_v23  ;;  %v11696_v14 = vld [vmem:[#allocation8_spill] sm:$0xff]  ;;  %1944 = vst.msk [vmem:[#allocation2 + $0x18] sm:$0xff] %vm283_vm0, %v1912_v8  ;;  %v7855_v7 = vld [vmem:[%s11598_s1 + $0x7] ss:$0 sm:$0xff]  ;;  %v2226_v8 = vld [vmem:[#allocation2 + $0x88] sm:$0xff]  ;;  %v7884_v31 = vmul.f32 %v7880_v51, %v7578_v6 }
  0xb6   : > { %11693 = vst [vmem:[#allocation21_spill] sm:$0xff] %v7827_v21  ;;  %11695 = vst [vmem:[#allocation53_spill] sm:$0xff] %v7841_v52  ;;  %v1353_v11 = vmul.f32 %v7855_v7, %v7647_v24  ;;  %v7860_v28 = vld [vmem:[%s6659_s13 + $0x1c1] sm:$0xff]  ;;  %v1533_v24 = vmul.f32 %v7758_v60, %v7638_v30  ;;  %v1236_v21 = vld [vmem:[#allocation2 + $0xb0] sm:$0xff] }
  0xb7   : > { %11694 = vst [vmem:[#allocation33_spill] sm:$0xff] %v7831_v18  ;;  %v2406_v18 = vadd.f32 %v2374_v26, %v11696_v14  ;;  %11697 = vst [vmem:[#allocation8_spill] sm:$0xff] %v7848_v47  ;;  %v558_v26 = vld [vmem:[#allocation2 + $0x40] sm:$0xff]  ;;  %v7865_v14 = vld [vmem:[%s6659_s13 + $0x290] sm:$0xff]  ;;  %v1928_v47 = vadd.f32 %v1896_v2, %v7495_v57  ;;  %v7889_v2 = vmul.f32 %v7300_v12, %v7603_v39 }
  0xb8   : > { %11698 = vst [vmem:[#allocation54_spill] sm:$0xff] %v7869_v27  ;;  %v7873_v52 = vld [vmem:[%s6659_s13 + $0x102] sm:$0xff]  ;;  %1613 = vst.msk [vmem:[#allocation2 + $0x28] sm:$0xff] %vm283_vm0, %v1581_v13  ;;  %v590_v63 = vadd.f32 %v558_v26, %v526_v55  ;;  %v2060_v57 = vld [vmem:[#allocation2 + $0x90] sm:$0xff]  ;;  %v873_v39 = vmul.f32 %v7543_v1, %v7860_v28 }
  0xb9   : > { %v1732_v9 = vld [vmem:[#allocation2 + $0xa0] sm:$0xff]  ;;  %2438 = vst.msk [vmem:[#allocation2] sm:$0xff] %vm283_vm0, %v2406_v18  ;;  %11699 = vst [vmem:[#allocation55_spill] sm:$0xff] %v7884_v31  ;;  %v11700_v40 = vld [vmem:[#allocation19_spill] sm:$0xff] }
  0xba   : > { %v2258_v27 = vadd.f32 %v2226_v8, %v11700_v40  ;;  %11701 = vst [vmem:[#allocation19_spill] sm:$0xff] %v7889_v2  ;;  %v1764_v13 = vadd.f32 %v1732_v9, %v7658_v38  ;;  %v5704_v30 = vld [vmem:[%s6659_s13 + $0x1e0] sm:$0xff]  ;;  %v2375_v55 = vld [vmem:[#allocation2 + $0x8] sm:$0xff]  ;;  %1960 = vst.msk [vmem:[#allocation2 + $0x98] sm:$0xff] %vm283_vm0, %v1928_v47  ;;  %v1268_v8 = vadd.f32 %v1236_v21, %v1204_v25 }
  0xbb   : > { %v11702_v26 = vld [vmem:[#allocation27_spill] sm:$0xff]  ;;  %v1385_v31 = vld [vmem:[#allocation2 + $0x30] sm:$0xff]  ;;  %v1054_v40 = vld [vmem:[#allocation2 + $0x38] sm:$0xff]  ;;  %622 = vst.msk [vmem:[#allocation2 + $0x40] sm:$0xff] %vm283_vm0, %v590_v63 }
  0xbc   : > { %v2092_v18 = vadd.f32 %v2060_v57, %v11702_v26  ;;  %11703 = vst [vmem:[#allocation27_spill] sm:$0xff] %v7897_v17  ;;  %v11704_v9 = vld [vmem:[#allocation15_spill] sm:$0xff]  ;;  %2290 = vst.msk [vmem:[#allocation2 + $0x88] sm:$0xff] %vm283_vm0, %v2258_v27  ;;  %v1417_v57 = vadd.f32 %v1385_v31, %v1353_v11  ;;  %v1086_v63 = vadd.f32 %v1054_v40, %v1022_v58  ;;  %v2390_v26 = vld [vmem:[#allocation2 + $0x80] sm:$0xff] }
  0xbd   : > { %v2407_v38 = vadd.f32 %v2375_v55, %v11704_v9  ;;  %1796 = vst.msk [vmem:[#allocation2 + $0xa0] sm:$0xff] %vm283_vm0, %v1764_v13  ;;  %v7908_v47 = vld [vmem:[%s11598_s1 + $0xe] ss:$0 sm:$0xff]  ;;  %v7917_v27 = vmul.f32 %v7300_v12, %v7717_v19  ;;  %v7920_v13 = vld [vmem:[%s6659_s13 + $0x240] sm:$0xff]  ;;  %v7924_v9 = vmul.f32 %v7784_v34, %v7705_v56  ;;  %1300 = vst.msk [vmem:[#allocation2 + $0xb0] sm:$0xff] %vm283_vm0, %v1268_v8 }
  0xbe   : > { %v7912_v25 = vmul.f32 %v7908_v47, %v7873_v52  ;;  %v1565_v21 = vld [vmem:[#allocation2 + $0xa8] sm:$0xff]  ;;  %2124 = vst.msk [vmem:[#allocation2 + $0x90] sm:$0xff] %vm283_vm0, %v2092_v18  ;;  %v275_v31 = vmul.f32 %v7377_v22, %v5704_v30  ;;  %v7934_v11 = vld [vmem:[%s11598_s1 + $0x14] ss:$0 sm:$0xff]  ;;  %v7940_v56 = vmul.f32 %v7865_v14, %v7578_v6  ;;  %v7947_v30 = vmul.f32 %v7797_v54, %v7717_v19 }
  0xbf   : > { %11706 = vst [vmem:[#allocation56_spill] sm:$0xff] %v7917_v27  ;;  %v1597_v55 = vadd.f32 %v1565_v21, %v1533_v24  ;;  %v11707_v58 = vld [vmem:[#allocation12_spill] sm:$0xff]  ;;  %2439 = vst.msk [vmem:[#allocation2 + $0x8] sm:$0xff] %vm283_vm0, %v2407_v38  ;;  %v7943_v8 = vld [vmem:[%s6659_s13 + $0x241] sm:$0xff]  ;;  %v7951_v40 = vmul.f32 %v7814_v37, %v7735_v10  ;;  %v7958_v27 = vmul.f32 %v7136_v53, %v7920_v13 }
  0xc0   : > { %11705 = vst [vmem:[#allocation15_spill] sm:$0xff] %v7912_v25  ;;  %v7928_v25 = vld [vmem:[%s6659_s13 + $0xb0] sm:$0xff]  ;;  %v2422_v18 = vadd.f32 %v2390_v26, %v11707_v58  ;;  %11708 = vst [vmem:[#allocation12_spill] sm:$0xff] %v7940_v56  ;;  %v905_v38 = vld [vmem:[#allocation2 + $0xb8] sm:$0xff] }
  0xc1   : > { %v2211_v24 = vld [vmem:[#allocation2 + $0x10] sm:$0xff]  ;;  %11709 = vst [vmem:[#allocation57_spill] sm:$0xff] %v7951_v40  ;;  %1449 = vst.msk [vmem:[#allocation2 + $0x30] sm:$0xff] %vm283_vm0, %v1417_v57  ;;  %v11710_v21 = vld [vmem:[#allocation22_spill] sm:$0xff]  ;;  %v937_v17 = vadd.f32 %v905_v38, %v873_v39  ;;  %v693_v57 = vmul.f32 %v7560_v29, %v7928_v25  ;;  %v7975_v39 = vmul.f32 %v7823_v35, %v7920_v13 }
  0xc2   : > { %1118 = vst.msk [vmem:[#allocation2 + $0x38] sm:$0xff] %vm283_vm0, %v1086_v63  ;;  %v2243_v26 = vadd.f32 %v2211_v24, %v11710_v21  ;;  %v2045_v58 = vld [vmem:[#allocation2 + $0x18] sm:$0xff]  ;;  %v1881_v56 = vld [vmem:[#allocation2 + $0x20] sm:$0xff]  ;;  %11711 = vst [vmem:[#allocation22_spill] sm:$0xff] %v7958_v27  ;;  %v7969_v24 = vmul.f32 %v7443_v45, %v7566_v0 }
  0xc3   : > { %1629 = vst.msk [vmem:[#allocation2 + $0xa8] sm:$0xff] %vm283_vm0, %v1597_v55  ;;  %v5299_v19 = vld [vmem:[%s6659_s13 + $0x90] sm:$0xff]  ;;  %308 = vst.msk [vmem:[#allocation2 + $0xc0] sm:$0xff] %vm283_vm0, %v275_v31  ;;  %v5745_v63 = vld [vmem:[%s6659_s13 + $0x281] sm:$0xff]  ;;  %v1913_v27 = vadd.f32 %v1881_v56, %v7590_v43  ;;  %v7989_v43 = vmul.f32 %v7837_v59, %v7943_v8  ;;  %v1369_v56 = vmul.f32 %v7855_v7, %v7860_v28 }
  0xc4   : > { %2454 = vst.msk [vmem:[#allocation2 + $0x80] sm:$0xff] %vm283_vm0, %v2422_v18  ;;  %11712 = vst [vmem:[#allocation58_spill] sm:$0xff] %v7969_v24  ;;  %v11713_v21 = vld [vmem:[#allocation34_spill] sm:$0xff]  ;;  %v1717_v55 = vld [vmem:[#allocation2 + $0x28] sm:$0xff] }
  0xc5   : > { %v2077_v53 = vadd.f32 %v2045_v58, %v11713_v21  ;;  %11714 = vst [vmem:[#allocation34_spill] sm:$0xff] %v7975_v39  ;;  %v5737_v38 = vld [vmem:[%s6659_s13 + $0x1e1] sm:$0xff]  ;;  %2275 = vst.msk [vmem:[#allocation2 + $0x10] sm:$0xff] %vm283_vm0, %v2243_v26  ;;  %v1749_v58 = vadd.f32 %v1717_v55, %v7788_v20  ;;  %v11717_v21 = vld [vmem:[#allocation9_spill] sm:$0xff]  ;;  %v1518_v26 = vmul.f32 %v7758_v60, %v7763_v32 }
  0xc6   : > { %v2539_v2 = vld [vmem:[#allocation2] sm:$0xff]  ;;  %11716 = vst [vmem:[#allocation60_spill] sm:$0xff] %v7989_v43  ;;  %969 = vst.msk [vmem:[#allocation2 + $0xb8] sm:$0xff] %vm283_vm0, %v937_v17  ;;  %v1189_v17 = vmul.f32 %v7690_v15, %v5299_v19  ;;  %v8015_v32 = vld [vmem:[%s6659_s13 + $0x151] sm:$0xff]  ;;  %v8033_v39 = vmul.f32 %v7443_v45, %v7666_v33  ;;  %v8043_v33 = vmul.f32 %v7300_v12, %v7809_v49 }
  0xc7   : > { %v6250_v31 = vld [vmem:[%s6659_s13 + $0x142] sm:$0xff]  ;;  %v2571_v24 = vadd.f32 %v2539_v2, %v11717_v21  ;;  %2109 = vst.msk [vmem:[#allocation2 + $0x18] sm:$0xff] %vm283_vm0, %v2077_v53  ;;  %1945 = vst.msk [vmem:[#allocation2 + $0x20] sm:$0xff] %vm283_vm0, %v1913_v27  ;;  %v8008_v2 = vmul.f32 %v7769_v23, %v5745_v63  ;;  %v8019_v19 = vmul.f32 %v8015_v32, %v7769_v23  ;;  %v11721_v43 = vld [vmem:[#allocation20_spill] sm:$0xff] }
  0xc8   : > { %v7980_v18 = vmul.f32 %v6250_v31, %v7934_v11  ;;  %v7984_v0 = vld [vmem:[%s6659_s13 + $0x242] sm:$0xff]  ;;  %v2061_v31 = vld [vmem:[#allocation2 + $0x98] sm:$0xff]  ;;  %1781 = vst.msk [vmem:[#allocation2 + $0x28] sm:$0xff] %vm283_vm0, %v1749_v58  ;;  %v2227_v58 = vld [vmem:[#allocation2 + $0x90] sm:$0xff] }
  0xc9   : > { %v7999_v20 = vmul.f32 %v7908_v47, %v7984_v0  ;;  %v8004_v55 = vld [vmem:[%s6659_s13 + $0x1c2] sm:$0xff]  ;;  %11719 = vst [vmem:[#allocation61_spill] sm:$0xff] %v8008_v2  ;;  %v2093_v21 = vadd.f32 %v2061_v31, %v7499_v36  ;;  %2603 = vst.msk [vmem:[#allocation2] sm:$0xff] %vm283_vm0, %v2571_v24  ;;  %v11723_v31 = vld [vmem:[#allocation29_spill] sm:$0xff] }
  0xca   : > { %11715 = vst [vmem:[#allocation59_spill] sm:$0xff] %v7980_v18  ;;  %v725_v28 = vld [vmem:[#allocation2 + $0x40] sm:$0xff]  ;;  %v2391_v53 = vld [vmem:[#allocation2 + $0x88] sm:$0xff]  ;;  %11720 = vst [vmem:[#allocation62_spill] sm:$0xff] %v8019_v19 }
  0xcb   : > { %11718 = vst [vmem:[#allocation9_spill] sm:$0xff] %v7999_v20  ;;  %v1897_v27 = vld [vmem:[#allocation2 + $0xa0] sm:$0xff]  ;;  %v757_v18 = vadd.f32 %v725_v28, %v693_v57  ;;  %v377_v20 = vmul.f32 %v7463_v62, %v5737_v38  ;;  %v2423_v63 = vadd.f32 %v2391_v53, %v11721_v43  ;;  %v1401_v38 = vld [vmem:[#allocation2 + $0xb0] sm:$0xff]  ;;  %v2540_v24 = vld [vmem:[#allocation2 + $0x8] sm:$0xff]  ;;  %v2259_v28 = vadd.f32 %v2227_v58, %v11723_v31 }
  0xcc   : > { %v8023_v2 = vld [vmem:[%s6659_s13 + $0x160] sm:$0xff]  ;;  %v1929_v57 = vadd.f32 %v1897_v27, %v7670_v3  ;;  %11724 = vst [vmem:[#allocation29_spill] sm:$0xff] %v8033_v39  ;;  %2125 = vst.msk [vmem:[#allocation2 + $0x98] sm:$0xff] %vm283_vm0, %v2093_v21  ;;  %v1550_v43 = vld [vmem:[#allocation2 + $0x30] sm:$0xff]  ;;  %v1433_v53 = vadd.f32 %v1401_v38, %v1369_v56 }
  0xcd   : > { %v8027_v36 = vmul.f32 %v8023_v2, %v7578_v6  ;;  %v1221_v19 = vld [vmem:[#allocation2 + $0x38] sm:$0xff]  ;;  %789 = vst.msk [vmem:[#allocation2 + $0x40] sm:$0xff] %vm283_vm0, %v757_v18  ;;  %v11725_v3 = vld [vmem:[#allocation18_spill] sm:$0xff]  ;;  %2455 = vst.msk [vmem:[#allocation2 + $0x88] sm:$0xff] %vm283_vm0, %v2423_v63  ;;  %v1582_v58 = vadd.f32 %v1550_v43, %v1518_v26 }
  0xce   : > { %v2572_v27 = vadd.f32 %v2540_v24, %v11725_v3  ;;  %11726 = vst [vmem:[#allocation18_spill] sm:$0xff] %v8043_v33  ;;  %1961 = vst.msk [vmem:[#allocation2 + $0xa0] sm:$0xff] %vm283_vm0, %v1929_v57  ;;  %v8047_v21 = vld [vmem:[%s6659_s13 + $0x110] sm:$0xff]  ;;  %v1733_v56 = vld [vmem:[#allocation2 + $0xa8] sm:$0xff]  ;;  %v1253_v38 = vadd.f32 %v1221_v19, %v1189_v17  ;;  %v8071_v19 = vmul.f32 %v7784_v34, %v7753_v61 }
  0xcf   : > { %11722 = vst [vmem:[#allocation20_spill] sm:$0xff] %v8027_v36  ;;  %v1038_v36 = vmul.f32 %v7675_v41, %v8004_v55  ;;  %v409_v31 = vld [vmem:[#allocation2 + $0xc0] sm:$0xff]  ;;  %v8050_v40 = vld [vmem:[%s6659_s13 + $0x291] sm:$0xff]  ;;  %2291 = vst.msk [vmem:[#allocation2 + $0x90] sm:$0xff] %vm283_vm0, %v2259_v28  ;;  %v1765_v17 = vadd.f32 %v1733_v56, %v7924_v9  ;;  %v8083_v9 = vmul.f32 %v7797_v54, %v7809_v49 }
  0xd0   : > { %v2555_v39 = vld [vmem:[#allocation2 + $0x80] sm:$0xff]  ;;  %11727 = vst [vmem:[#allocation63_spill] sm:$0xff] %v8050_v40  ;;  %v8059_v63 = vld [vmem:[%s11598_s1 + $0xf] ss:$0 sm:$0xff]  ;;  %v8066_v26 = vld [vmem:[%s6659_s13 + $0x111] sm:$0xff]  ;;  %v441_v24 = vadd.f32 %v409_v31, %v377_v20  ;;  %v8087_v61 = vmul.f32 %v7814_v37, %v7873_v52 }
  0xd1   : > { %v8053_v18 = vld [vmem:[%s6659_s13 + $0x2a0] sm:$0xff]  ;;  %v8063_v57 = vmul.f32 %v8059_v63, %v8047_v21  ;;  %1465 = vst.msk [vmem:[#allocation2 + $0xb0] sm:$0xff] %vm283_vm0, %v1433_v53  ;;  %v11730_v28 = vld [vmem:[#allocation17_spill] sm:$0xff]  ;;  %2604 = vst.msk [vmem:[#allocation2 + $0x8] sm:$0xff] %vm283_vm0, %v2572_v27 }
  0xd2   : > { %11728 = vst [vmem:[#allocation64_spill] sm:$0xff] %v8053_v18  ;;  %v2587_v43 = vadd.f32 %v2555_v39, %v11730_v28  ;;  %v2376_v3 = vld [vmem:[#allocation2 + $0x10] sm:$0xff]  ;;  %1614 = vst.msk [vmem:[#allocation2 + $0x30] sm:$0xff] %vm283_vm0, %v1582_v58  ;;  %v1070_v39 = vld [vmem:[#allocation2 + $0xb8] sm:$0xff] }
  0xd3   : > { %11729 = vst [vmem:[#allocation65_spill] sm:$0xff] %v8063_v57  ;;  %v8078_v57 = vmul.f32 %v7443_v45, %v7735_v10  ;;  %1285 = vst.msk [vmem:[#allocation2 + $0x38] sm:$0xff] %vm283_vm0, %v1253_v38  ;;  %v8091_v20 = vld [vmem:[%s6659_s13 + $0xb1] sm:$0xff]  ;;  %v2046_v56 = vld [vmem:[#allocation2 + $0x20] sm:$0xff]  ;;  %v8105_v38 = vmul.f32 %v7823_v35, %v8047_v21  ;;  %v1102_v31 = vadd.f32 %v1070_v39, %v1038_v36 }
  0xd4   : > { %v8096_v10 = vld [vmem:[%s11598_s1 + $0x15] ss:$0 sm:$0xff]  ;;  %v2212_v49 = vld [vmem:[#allocation2 + $0x18] sm:$0xff]  ;;  %1797 = vst.msk [vmem:[#allocation2 + $0xa8] sm:$0xff] %vm283_vm0, %v1765_v17  ;;  %v858_v28 = vmul.f32 %v7543_v1, %v8091_v20  ;;  %473 = vst.msk [vmem:[#allocation2 + $0xc0] sm:$0xff] %vm283_vm0, %v441_v24  ;;  %v2078_v33 = vadd.f32 %v2046_v56, %v7596_v4  ;;  %v8120_v36 = vmul.f32 %v7837_v59, %v8066_v26 }
  0xd5   : > { %11731 = vst [vmem:[#allocation17_spill] sm:$0xff] %v8078_v57  ;;  %v11732_v53 = vld [vmem:[#allocation24_spill] sm:$0xff]  ;;  %2619 = vst.msk [vmem:[#allocation2 + $0x80] sm:$0xff] %vm283_vm0, %v2587_v43  ;;  %v11735_v17 = vld [vmem:[#allocation35_spill] sm:$0xff]  ;;  %v8126_v24 = vmul.f32 %v8053_v18, %v7578_v6  ;;  %v8130_v43 = vmul.f32 %v7300_v12, %v7943_v8  ;;  %v1534_v56 = vmul.f32 %v7758_v60, %v8004_v55 }
  0xd6   : > { %v2408_v27 = vadd.f32 %v2376_v3, %v11732_v53  ;;  %v8100_v58 = vld [vmem:[%s6659_s13 + $0x112] sm:$0xff]  ;;  %11733 = vst [vmem:[#allocation24_spill] sm:$0xff] %v8105_v38  ;;  %v5778_v3 = vld [vmem:[%s6659_s13 + $0x282] sm:$0xff]  ;;  %v8114_v53 = vmul.f32 %v8050_v40, %v7769_v23  ;;  %v2244_v57 = vadd.f32 %v2212_v49, %v11735_v17  ;;  %11736 = vst [vmem:[#allocation35_spill] sm:$0xff] %v8120_v36 }
  0xd7   : > { %v1882_v38 = vld [vmem:[#allocation2 + $0x28] sm:$0xff]  ;;  %v5332_v1 = vld [vmem:[%s6659_s13 + $0x91] sm:$0xff]  ;;  %v2706_v39 = vld [vmem:[#allocation2] sm:$0xff]  ;;  %11737 = vst [vmem:[#allocation67_spill] sm:$0xff] %v8126_v24  ;;  %v8143_v36 = vmul.f32 %v7880_v51, %v8096_v10  ;;  %v8153_v55 = vmul.f32 %v7908_v47, %v8100_v58 }
  0xd8   : > { %11734 = vst [vmem:[#allocation66_spill] sm:$0xff] %v8114_v53  ;;  %2440 = vst.msk [vmem:[#allocation2 + $0x10] sm:$0xff] %vm283_vm0, %v2408_v27  ;;  %v1914_v4 = vadd.f32 %v1882_v38, %v7801_v16  ;;  %v8134_v49 = vld [vmem:[%s6659_s13 + $0x250] sm:$0xff]  ;;  %v5770_v17 = vld [vmem:[%s6659_s13 + $0x1e2] sm:$0xff] }
  0xd9   : > { %11738 = vst [vmem:[#allocation68_spill] sm:$0xff] %v8130_v43  ;;  %1134 = vst.msk [vmem:[#allocation2 + $0xb8] sm:$0xff] %vm283_vm0, %v1102_v31  ;;  %v11739_v53 = vld [vmem:[#allocation16_spill] sm:$0xff]  ;;  %v2228_v12 = vld [vmem:[#allocation2 + $0x98] sm:$0xff]  ;;  %v8149_v16 = vmul.f32 %v8059_v63, %v8134_v49 }
  0xda   : > { %v2738_v27 = vadd.f32 %v2706_v39, %v11739_v53  ;;  %11740 = vst [vmem:[#allocation16_spill] sm:$0xff] %v8143_v36  ;;  %2276 = vst.msk [vmem:[#allocation2 + $0x18] sm:$0xff] %vm283_vm0, %v2244_v57  ;;  %v5905_v38 = vld [vmem:[%s6659_s13 + $0x1d0] sm:$0xff]  ;;  %v890_v31 = vld [vmem:[#allocation2 + $0x40] sm:$0xff]  ;;  %v8157_v53 = vmul.f32 %v7934_v11, %v5778_v3  ;;  %v2260_v57 = vadd.f32 %v2228_v12, %v7509_v48 }
  0xdb   : > { %2110 = vst.msk [vmem:[#allocation2 + $0x20] sm:$0xff] %vm283_vm0, %v2078_v33  ;;  %11741 = vst [vmem:[#allocation69_spill] sm:$0xff] %v8149_v16  ;;  %v2556_v51 = vld [vmem:[#allocation2 + $0x88] sm:$0xff]  ;;  %v2062_v39 = vld [vmem:[#allocation2 + $0xa0] sm:$0xff]  ;;  %v1354_v33 = vmul.f32 %v7855_v7, %v5332_v1  ;;  %v922_v36 = vadd.f32 %v890_v31, %v858_v28  ;;  %v542_v3 = vmul.f32 %v7420_v42, %v5770_v17 }
  0xdc   : > { %11742 = vst [vmem:[#allocation70_spill] sm:$0xff] %v8153_v55  ;;  %11743 = vst [vmem:[#allocation71_spill] sm:$0xff] %v8157_v53  ;;  %v11744_v16 = vld [vmem:[#allocation23_spill] sm:$0xff]  ;;  %v2392_v55 = vld [vmem:[#allocation2 + $0x90] sm:$0xff]  ;;  %v2094_v43 = vadd.f32 %v2062_v39, %v7685_v46  ;;  %v260_v48 = vmul.f32 %v7377_v22, %v7928_v25  ;;  %v1205_v31 = vmul.f32 %v7690_v15, %v5905_v38 }
  0xdd   : > { %1946 = vst.msk [vmem:[#allocation2 + $0x28] sm:$0xff] %vm283_vm0, %v1914_v4  ;;  %2770 = vst.msk [vmem:[#allocation2] sm:$0xff] %vm283_vm0, %v2738_v27  ;;  %v2588_v24 = vadd.f32 %v2556_v51, %v11744_v16  ;;  %v1566_v40 = vld [vmem:[#allocation2 + $0xb0] sm:$0xff]  ;;  %v2707_v12 = vld [vmem:[#allocation2 + $0x8] sm:$0xff]  ;;  %v8204_v39 = vmul.f32 %v7443_v45, %v7873_v52 }
  0xde   : > { %v8169_v4 = vld [vmem:[%s6659_s13 + $0x161] sm:$0xff]  ;;  %2292 = vst.msk [vmem:[#allocation2 + $0x98] sm:$0xff] %vm283_vm0, %v2260_v57  ;;  %v1718_v16 = vld [vmem:[#allocation2 + $0x30] sm:$0xff]  ;;  %v1598_v46 = vadd.f32 %v1566_v40, %v1534_v56  ;;  %954 = vst.msk [vmem:[#allocation2 + $0x40] sm:$0xff] %vm283_vm0, %v922_v36 }
  0xdf   : > { %v8173_v28 = vmul.f32 %v8169_v4, %v7769_v23  ;;  %v11746_v1 = vld [vmem:[#allocation30_spill] sm:$0xff]  ;;  %v11747_v42 = vld [vmem:[#allocation32_spill] sm:$0xff]  ;;  %2620 = vst.msk [vmem:[#allocation2 + $0x88] sm:$0xff] %vm283_vm0, %v2588_v24  ;;  %2126 = vst.msk [vmem:[#allocation2 + $0xa0] sm:$0xff] %vm283_vm0, %v2094_v43  ;;  %v1750_v56 = vadd.f32 %v1718_v16, %v8071_v19 }
  0xe0   : > { %v2424_v27 = vadd.f32 %v2392_v55, %v11746_v1  ;;  %v2739_v22 = vadd.f32 %v2707_v12, %v11747_v42  ;;  %v8181_v25 = vld [vmem:[%s6659_s13 + $0x152] sm:$0xff]  ;;  %v1898_v36 = vld [vmem:[#allocation2 + $0xa8] sm:$0xff]  ;;  %v574_v51 = vld [vmem:[#allocation2 + $0xc0] sm:$0xff]  ;;  %293 = vst.msk [vmem:[#allocation2 + $0x48] sm:$0xff] %vm283_vm0, %v260_v48 }
  0xe1   : > { %11745 = vst [vmem:[#allocation23_spill] sm:$0xff] %v8173_v28  ;;  %v8185_v17 = vmul.f32 %v8181_v25, %v7934_v11  ;;  %v8189_v55 = vld [vmem:[%s6659_s13 + $0x170] sm:$0xff]  ;;  %v1386_v38 = vld [vmem:[#allocation2 + $0x38] sm:$0xff]  ;;  %v2722_v57 = vld [vmem:[#allocation2 + $0x80] sm:$0xff]  ;;  %v1930_v48 = vadd.f32 %v1898_v36, %v7947_v30  ;;  %v1702_v30 = vmul.f32 %v7784_v34, %v7920_v13  ;;  %v606_v36 = vadd.f32 %v574_v51, %v542_v3 }
  0xe2   : > { %v8193_v40 = vmul.f32 %v8189_v55, %v7578_v6  ;;  %v8199_v24 = vld [vmem:[%s6659_s13 + $0x2b0] sm:$0xff]  ;;  %2456 = vst.msk [vmem:[#allocation2 + $0x90] sm:$0xff] %vm283_vm0, %v2424_v27  ;;  %11750 = vst [vmem:[#allocation72_spill] sm:$0xff] %v8204_v39  ;;  %v1418_v12 = vadd.f32 %v1386_v38, %v1354_v33  ;;  %v8233_v33 = vmul.f32 %v7797_v54, %v7943_v8  ;;  %v8236_v38 = vld [vmem:[%s6659_s13 + $0x2a1] sm:$0xff] }
  0xe3   : > { %11748 = vst [vmem:[#allocation30_spill] sm:$0xff] %v8185_v17  ;;  %v8209_v43 = vld [vmem:[%s11598_s1 + $0x10] ss:$0 sm:$0xff]  ;;  %1630 = vst.msk [vmem:[#allocation2 + $0xb0] sm:$0xff] %vm283_vm0, %v1598_v46  ;;  %v8218_v1 = vld [vmem:[%s6659_s13 + $0xb2] sm:$0xff]  ;;  %v8245_v13 = vmul.f32 %v7814_v37, %v7984_v0 }
  0xe4   : > { %11749 = vst [vmem:[#allocation32_spill] sm:$0xff] %v8193_v40  ;;  %v8213_v19 = vmul.f32 %v8209_v43, %v8066_v26  ;;  %v11752_v27 = vld [vmem:[#allocation28_spill] sm:$0xff]  ;;  %2771 = vst.msk [vmem:[#allocation2 + $0x8] sm:$0xff] %vm283_vm0, %v2739_v22  ;;  %v1237_v46 = vld [vmem:[#allocation2 + $0xb8] sm:$0xff]  ;;  %v1023_v3 = vmul.f32 %v7675_v41, %v8218_v1 }
  0xe5   : > { %v2754_v52 = vadd.f32 %v2722_v57, %v11752_v27  ;;  %v8222_v16 = vld [vmem:[%s6659_s13 + $0x292] sm:$0xff]  ;;  %1782 = vst.msk [vmem:[#allocation2 + $0x30] sm:$0xff] %vm283_vm0, %v1750_v56  ;;  %v11753_v57 = vld [vmem:[#allocation31_spill] sm:$0xff]  ;;  %1962 = vst.msk [vmem:[#allocation2 + $0xa8] sm:$0xff] %vm283_vm0, %v1930_v48  ;;  %v1269_v8 = vadd.f32 %v1237_v46, %v1205_v31  ;;  %v8254_v48 = vmul.f32 %v8199_v24, %v7578_v6 }
  0xe6   : > { %11751 = vst [vmem:[#allocation73_spill] sm:$0xff] %v8213_v19  ;;  %v2541_v42 = vld [vmem:[#allocation2 + $0x10] sm:$0xff]  ;;  %v2377_v27 = vld [vmem:[#allocation2 + $0x18] sm:$0xff]  ;;  %v2213_v19 = vld [vmem:[#allocation2 + $0x20] sm:$0xff]  ;;  %v362_v31 = vmul.f32 %v7463_v62, %v8091_v20 }
  0xe7   : > { %v8226_v39 = vld [vmem:[%s6659_s13 + $0x251] sm:$0xff]  ;;  %v2573_v22 = vadd.f32 %v2541_v42, %v11753_v57  ;;  %1450 = vst.msk [vmem:[#allocation2 + $0x38] sm:$0xff] %vm283_vm0, %v1418_v12  ;;  %2786 = vst.msk [vmem:[#allocation2 + $0x80] sm:$0xff] %vm283_vm0, %v2754_v52  ;;  %v2245_v57 = vadd.f32 %v2213_v19, %v7614_v5  ;;  %v2047_v40 = vld [vmem:[#allocation2 + $0x28] sm:$0xff]  ;;  %v8264_v12 = vmul.f32 %v8222_v16, %v7934_v11 }
  0xe8   : > { %v8241_v56 = vld [vmem:[%s6659_s13 + $0x252] sm:$0xff]  ;;  %11755 = vst [vmem:[#allocation28_spill] sm:$0xff] %v8254_v48  ;;  %638 = vst.msk [vmem:[#allocation2 + $0xc0] sm:$0xff] %vm283_vm0, %v606_v36  ;;  %v2871_v41 = vld [vmem:[#allocation2] sm:$0xff]  ;;  %v2079_v52 = vadd.f32 %v2047_v40, %v7818_v44  ;;  %v8273_v5 = vmul.f32 %v7823_v35, %v8134_v49  ;;  %v8277_v19 = vmul.f32 %v7837_v59, %v8226_v39 }
  0xe9   : > { %v11754_v51 = vld [vmem:[#allocation37_spill] sm:$0xff]  ;;  %11756 = vst [vmem:[#allocation31_spill] sm:$0xff] %v8264_v12  ;;  %2605 = vst.msk [vmem:[#allocation2 + $0x10] sm:$0xff] %vm283_vm0, %v2573_v22  ;;  %v8269_v46 = vld [vmem:[%s6659_s13 + $0x120] sm:$0xff]  ;;  %v8291_v40 = vmul.f32 %v8236_v38, %v7769_v23 }
  0xea   : > { %v2409_v42 = vadd.f32 %v2377_v27, %v11754_v51  ;;  %v5365_v28 = vld [vmem:[%s6659_s13 + $0x92] sm:$0xff]  ;;  %11757 = vst [vmem:[#allocation37_spill] sm:$0xff] %v8277_v19  ;;  %1301 = vst.msk [vmem:[#allocation2 + $0xb8] sm:$0xff] %vm283_vm0, %v1269_v8  ;;  %v11758_v20 = vld [vmem:[#allocation26_spill] sm:$0xff]  ;;  %v8297_v27 = vmul.f32 %v7443_v45, %v7984_v0  ;;  %v8301_v8 = vmul.f32 %v7908_v47, %v8241_v56 }
  0xeb   : > { %v5938_v53 = vld [vmem:[%s6659_s13 + $0x1d1] sm:$0xff]  ;;  %v2903_v36 = vadd.f32 %v2871_v41, %v11758_v20  ;;  %11759 = vst [vmem:[#allocation26_spill] sm:$0xff] %v8291_v40  ;;  %2277 = vst.msk [vmem:[#allocation2 + $0x20] sm:$0xff] %vm283_vm0, %v2245_v57  ;;  %v1055_v51 = vld [vmem:[#allocation2 + $0x40] sm:$0xff]  ;;  %v1519_v57 = vmul.f32 %v7758_v60, %v5365_v28 }
  0xec   : > { %v8281_v62 = vld [vmem:[%s6659_s13 + $0x1f0] sm:$0xff]  ;;  %2441 = vst.msk [vmem:[#allocation2 + $0x18] sm:$0xff] %vm283_vm0, %v2409_v42  ;;  %v2393_v22 = vld [vmem:[#allocation2 + $0x98] sm:$0xff]  ;;  %11760 = vst [vmem:[#allocation74_spill] sm:$0xff] %v8297_v27  ;;  %v8307_v42 = vmul.f32 %v8059_v63, %v8269_v46  ;;  %v1087_v40 = vadd.f32 %v1055_v51, %v1023_v3 }
  0xed   : > { %v8287_v44 = vld [vmem:[%s11598_s1 + $0x16] ss:$0 sm:$0xff]  ;;  %11761 = vst [vmem:[#allocation75_spill] sm:$0xff] %v8301_v8  ;;  %v2723_v41 = vld [vmem:[#allocation2 + $0x88] sm:$0xff]  ;;  %v2229_v48 = vld [vmem:[#allocation2 + $0xa0] sm:$0xff] }
  0xee   : > { %v11762_v20 = vld [vmem:[#allocation40_spill] sm:$0xff]  ;;  %2111 = vst.msk [vmem:[#allocation2 + $0x28] sm:$0xff] %vm283_vm0, %v2079_v52  ;;  %v394_v45 = vld [vmem:[#allocation2 + $0x48] sm:$0xff]  ;;  %2935 = vst.msk [vmem:[#allocation2] sm:$0xff] %vm283_vm0, %v2903_v36  ;;  %v2261_v17 = vadd.f32 %v2229_v48, %v7727_v50 }
  0xef   : > { %v2425_v12 = vadd.f32 %v2393_v22, %v11762_v20  ;;  %11763 = vst [vmem:[#allocation40_spill] sm:$0xff] %v8307_v42  ;;  %v11764_v0 = vld [vmem:[#allocation36_spill] sm:$0xff]  ;;  %v709_v22 = vmul.f32 %v7560_v29, %v8281_v62  ;;  %v426_v52 = vadd.f32 %v394_v45, %v362_v31  ;;  %v8317_v20 = vmul.f32 %v8015_v32, %v8287_v44  ;;  %v2872_v42 = vld [vmem:[#allocation2 + $0x8] sm:$0xff]  ;;  %v11766_v28 = vld [vmem:[#allocation38_spill] sm:$0xff] }
  0xf0   : > { %v2755_v27 = vadd.f32 %v2723_v41, %v11764_v0  ;;  %v2557_v8 = vld [vmem:[#allocation2 + $0x90] sm:$0xff]  ;;  %v1370_v41 = vmul.f32 %v7855_v7, %v5938_v53  ;;  %1119 = vst.msk [vmem:[#allocation2 + $0x40] sm:$0xff] %vm283_vm0, %v1087_v40  ;;  %v8325_v29 = vmul.f32 %v8096_v10, %v7865_v14  ;;  %v11768_v50 = vld [vmem:[#allocation42_spill] sm:$0xff]  ;;  %2293 = vst.msk [vmem:[#allocation2 + $0xa0] sm:$0xff] %vm283_vm0, %v2261_v17 }
  0xf1   : > { %v1734_v19 = vld [vmem:[#allocation2 + $0xb0] sm:$0xff]  ;;  %11765 = vst [vmem:[#allocation36_spill] sm:$0xff] %v8317_v20  ;;  %v2589_v3 = vadd.f32 %v2557_v8, %v11766_v28  ;;  %2457 = vst.msk [vmem:[#allocation2 + $0x98] sm:$0xff] %vm283_vm0, %v2425_v12  ;;  %v2904_v48 = vadd.f32 %v2872_v42, %v11768_v50  ;;  %v2063_v32 = vld [vmem:[#allocation2 + $0xa8] sm:$0xff]  ;;  %v8332_v31 = vmul.f32 %v8209_v43, %v8226_v39 }
  0xf2   : > { %v1883_v36 = vld [vmem:[#allocation2 + $0x30] sm:$0xff]  ;;  %v1766_v51 = vadd.f32 %v1734_v19, %v1702_v30  ;;  %11767 = vst [vmem:[#allocation38_spill] sm:$0xff] %v8325_v29  ;;  %2787 = vst.msk [vmem:[#allocation2 + $0x88] sm:$0xff] %vm283_vm0, %v2755_v27  ;;  %v1551_v30 = vld [vmem:[#allocation2 + $0x38] sm:$0xff]  ;;  %v8338_v12 = vmul.f32 %v8023_v2, %v8096_v10 }
  0xf3   : > { %11769 = vst [vmem:[#allocation42_spill] sm:$0xff] %v8332_v31  ;;  %v1915_v53 = vadd.f32 %v1883_v36, %v8083_v9  ;;  %458 = vst.msk [vmem:[#allocation2 + $0x48] sm:$0xff] %vm283_vm0, %v426_v52  ;;  %v2887_v14 = vld [vmem:[#allocation2 + $0x80] sm:$0xff]  ;;  %v11772_v40 = vld [vmem:[#allocation57_spill] sm:$0xff]  ;;  %v1583_v27 = vadd.f32 %v1551_v30, %v1519_v57 }
  0xf4   : > { %11770 = vst [vmem:[#allocation76_spill] sm:$0xff] %v8338_v12  ;;  %v8341_v19 = vld [vmem:[%s6659_s13 + $0x162] sm:$0xff]  ;;  %2621 = vst.msk [vmem:[#allocation2 + $0x90] sm:$0xff] %vm283_vm0, %v2589_v3  ;;  %v2095_v9 = vadd.f32 %v2063_v32, %v11772_v40  ;;  %v11773_v45 = vld [vmem:[#allocation41_spill] sm:$0xff] }
  0xf5   : > { %v8345_v17 = vmul.f32 %v8341_v19, %v7934_v11  ;;  %1798 = vst.msk [vmem:[#allocation2 + $0xb0] sm:$0xff] %vm283_vm0, %v1766_v51  ;;  %v8351_v8 = vld [vmem:[%s6659_s13 + $0xc0] sm:$0xff]  ;;  %v2919_v0 = vadd.f32 %v2887_v14, %v11773_v45  ;;  %2936 = vst.msk [vmem:[#allocation2 + $0x8] sm:$0xff] %vm283_vm0, %v2904_v48  ;;  %v8356_v52 = vld [vmem:[%s6659_s13 + $0x2b1] sm:$0xff] }
  0xf6   : > { %v741_v42 = vld [vmem:[#allocation2 + $0xc0] sm:$0xff]  ;;  %v2708_v28 = vld [vmem:[#allocation2 + $0x10] sm:$0xff]  ;;  %1947 = vst.msk [vmem:[#allocation2 + $0x30] sm:$0xff] %vm283_vm0, %v1915_v53  ;;  %v1402_v51 = vld [vmem:[#allocation2 + $0xb8] sm:$0xff]  ;;  %v1190_v53 = vmul.f32 %v7690_v15, %v8351_v8 }
  0xf7   : > { %11771 = vst [vmem:[#allocation77_spill] sm:$0xff] %v8345_v17  ;;  %v8359_v36 = vld [vmem:[%s6659_s13 + $0x171] sm:$0xff]  ;;  %v8366_v50 = vld [vmem:[%s6659_s13 + $0x180] sm:$0xff]  ;;  %v773_v48 = vadd.f32 %v741_v42, %v709_v22  ;;  %v11776_v32 = vld [vmem:[#allocation43_spill] sm:$0xff]  ;;  %v1434_v22 = vadd.f32 %v1402_v51, %v1370_v41 }
  0xf8   : > { %v8363_v3 = vmul.f32 %v8359_v36, %v7769_v23  ;;  %v8370_v57 = vmul.f32 %v8366_v50, %v7578_v6  ;;  %v2740_v30 = vadd.f32 %v2708_v28, %v11776_v32  ;;  %v8375_v14 = vld [vmem:[%s6659_s13 + $0x2c0] sm:$0xff]  ;;  %v2542_v40 = vld [vmem:[#allocation2 + $0x18] sm:$0xff]  ;;  %v8380_v20 = vld [vmem:[%s11598_s1 + $0x11] ss:$0 sm:$0xff]  ;;  %2127 = vst.msk [vmem:[#allocation2 + $0xa8] sm:$0xff] %vm283_vm0, %v2095_v9  ;;  %v8398_v9 = vmul.f32 %v7784_v34, %v8047_v21 }
  0xf9   : > { %v2378_v45 = vld [vmem:[#allocation2 + $0x20] sm:$0xff]  ;;  %1615 = vst.msk [vmem:[#allocation2 + $0x38] sm:$0xff] %vm283_vm0, %v1583_v27  ;;  %2951 = vst.msk [vmem:[#allocation2 + $0x80] sm:$0xff] %vm283_vm0, %v2919_v0  ;;  %v2214_v29 = vld [vmem:[#allocation2 + $0x28] sm:$0xff] }
  0xfa   : > { %11774 = vst [vmem:[#allocation57_spill] sm:$0xff] %v8363_v3  ;;  %11775 = vst [vmem:[#allocation41_spill] sm:$0xff] %v8370_v57  ;;  %v8384_v3 = vmul.f32 %v8380_v20, %v8100_v58  ;;  %v8392_v42 = vld [vmem:[%s6659_s13 + $0x2a2] sm:$0xff]  ;;  %v11779_v57 = vld [vmem:[#allocation44_spill] sm:$0xff] }
  0xfb   : > { %v11778_v28 = vld [vmem:[#allocation6_spill] sm:$0xff]  ;;  %v2410_v17 = vadd.f32 %v2378_v45, %v11779_v57  ;;  %v5971_v27 = vld [vmem:[%s6659_s13 + $0x1d2] sm:$0xff]  ;;  %805 = vst.msk [vmem:[#allocation2 + $0xc0] sm:$0xff] %vm283_vm0, %v773_v48  ;;  %2772 = vst.msk [vmem:[#allocation2 + $0x10] sm:$0xff] %vm283_vm0, %v2740_v30  ;;  %v8412_v57 = vmul.f32 %v8356_v52, %v7769_v23  ;;  %v8420_v48 = vmul.f32 %v7797_v54, %v8066_v26 }
  0xfc   : > { %11777 = vst [vmem:[#allocation43_spill] sm:$0xff] %v8384_v3  ;;  %v2574_v32 = vadd.f32 %v2542_v40, %v11778_v28  ;;  %v8405_v15 = vld [vmem:[%s11598_s1 + $0x2] ss:$0 sm:$0xff]  ;;  %v11781_v21 = vld [vmem:[#allocation21_spill] sm:$0xff]  ;;  %1466 = vst.msk [vmem:[#allocation2 + $0xb8] sm:$0xff] %vm283_vm0, %v1434_v22  ;;  %v8439_v54 = vmul.f32 %v8053_v18, %v8096_v10  ;;  %v8445_v22 = vmul.f32 %v8375_v14, %v7578_v6 }
  0xfd   : > { %v527_v41 = vmul.f32 %v8405_v15, %v8218_v1  ;;  %v3036_v0 = vld [vmem:[#allocation2] sm:$0xff]  ;;  %11780 = vst [vmem:[#allocation6_spill] sm:$0xff] %v8412_v57  ;;  %v2246_v51 = vadd.f32 %v2214_v29, %v11781_v21  ;;  %v5838_v45 = vld [vmem:[%s6659_s13 + $0x1f1] sm:$0xff]  ;;  %v11782_v28 = vld [vmem:[#allocation39_spill] sm:$0xff] }
  0xfe   : > { %v8416_v40 = vld [vmem:[%s6659_s13 + $0x260] sm:$0xff]  ;;  %v3068_v57 = vadd.f32 %v3036_v0, %v11782_v28  ;;  %v8435_v29 = vld [vmem:[%s11598_s1 + $0x17] ss:$0 sm:$0xff]  ;;  %11783 = vst [vmem:[#allocation44_spill] sm:$0xff] %v8439_v54  ;;  %2606 = vst.msk [vmem:[#allocation2 + $0x18] sm:$0xff] %vm283_vm0, %v2574_v32  ;;  %v8453_v28 = vmul.f32 %v8392_v42, %v7934_v11 }
  0xff   : > { %v8427_v1 = vld [vmem:[%s11598_s1] ss:$0 sm:$0xff]  ;;  %v2558_v26 = vld [vmem:[#allocation2 + $0x98] sm:$0xff]  ;;  %2442 = vst.msk [vmem:[#allocation2 + $0x20] sm:$0xff] %vm283_vm0, %v2410_v17  ;;  %11784 = vst [vmem:[#allocation21_spill] sm:$0xff] %v8445_v22  ;;  %v8459_v6 = vmul.f32 %v8059_v63, %v8416_v40 }
 0x100   : > { %v276_v30 = vmul.f32 %v8427_v1, %v8281_v62  ;;  %v8449_v62 = vmul.f32 %v7814_v37, %v8100_v58  ;;  %v1222_v0 = vld [vmem:[#allocation2 + $0x40] sm:$0xff]  ;;  %v2888_v21 = vld [vmem:[#allocation2 + $0x88] sm:$0xff]  ;;  %11785 = vst [vmem:[#allocation39_spill] sm:$0xff] %v8453_v28  ;;  %v11786_v54 = vld [vmem:[#allocation13_spill] sm:$0xff] }
 0x101   : > { %v2590_v32 = vadd.f32 %v2558_v26, %v11786_v54  ;;  %v2394_v3 = vld [vmem:[#allocation2 + $0xa0] sm:$0xff]  ;;  %2278 = vst.msk [vmem:[#allocation2 + $0x28] sm:$0xff] %vm283_vm0, %v2246_v51  ;;  %11787 = vst [vmem:[#allocation13_spill] sm:$0xff] %v8459_v6  ;;  %v1254_v17 = vadd.f32 %v1222_v0, %v1190_v53  ;;  %v559_v22 = vld [vmem:[#allocation2 + $0x48] sm:$0xff] }
 0x102   : > { %309 = vst.msk [vmem:[#allocation2 + $0xc8] sm:$0xff] %vm283_vm0, %v276_v30  ;;  %3100 = vst.msk [vmem:[#allocation2] sm:$0xff] %vm283_vm0, %v3068_v57  ;;  %v11788_v37 = vld [vmem:[#allocation10_spill] sm:$0xff]  ;;  %v2724_v31 = vld [vmem:[#allocation2 + $0x90] sm:$0xff]  ;;  %v591_v53 = vadd.f32 %v559_v22, %v527_v41 }
 0x103   : > { %v2920_v58 = vadd.f32 %v2888_v21, %v11788_v37  ;;  %v11789_v12 = vld [vmem:[#allocation25_spill] sm:$0xff]  ;;  %v5634_v18 = vld [vmem:[%s6659_s13 + $0x121] sm:$0xff]  ;;  %v1899_v54 = vld [vmem:[#allocation2 + $0xb0] sm:$0xff]  ;;  %2622 = vst.msk [vmem:[#allocation2 + $0x98] sm:$0xff] %vm283_vm0, %v2590_v32  ;;  %v8482_v37 = vmul.f32 %v8181_v25, %v8435_v29  ;;  %v8489_v32 = vmul.f32 %v8380_v20, %v8241_v56 }
 0x104   : > { %v2426_v28 = vadd.f32 %v2394_v3, %v11789_v12  ;;  %v8469_v51 = vld [vmem:[%s11598_s1 + $0x4] ss:$0 sm:$0xff]  ;;  %v3037_v0 = vld [vmem:[#allocation2 + $0x8] sm:$0xff]  ;;  %v2048_v57 = vld [vmem:[#allocation2 + $0x30] sm:$0xff]  ;;  %v8475_v21 = vmul.f32 %v8209_v43, %v5634_v18  ;;  %v1931_v12 = vadd.f32 %v1899_v54, %v8233_v33  ;;  %v1535_v3 = vmul.f32 %v7758_v60, %v5971_v27  ;;  %1286 = vst.msk [vmem:[#allocation2 + $0x40] sm:$0xff] %vm283_vm0, %v1254_v17 }
 0x105   : > { %v874_v26 = vmul.f32 %v8469_v51, %v5838_v45  ;;  %v11790_v30 = vld [vmem:[#allocation46_spill] sm:$0xff]  ;;  %11792 = vst [vmem:[#allocation25_spill] sm:$0xff] %v8482_v37  ;;  %v11793_v41 = vld [vmem:[#allocation7_spill] sm:$0xff]  ;;  %2952 = vst.msk [vmem:[#allocation2 + $0x88] sm:$0xff] %vm283_vm0, %v2920_v58  ;;  %v2080_v33 = vadd.f32 %v2048_v57, %v8087_v61  ;;  %v8502_v54 = vmul.f32 %v7823_v35, %v8269_v46 }
 0x106   : > { %v2756_v6 = vadd.f32 %v2724_v31, %v11790_v30  ;;  %11791 = vst [vmem:[#allocation10_spill] sm:$0xff] %v8475_v21  ;;  %v3069_v22 = vadd.f32 %v3037_v0, %v11793_v41  ;;  %2458 = vst.msk [vmem:[#allocation2 + $0xa0] sm:$0xff] %vm283_vm0, %v2426_v28  ;;  %v2230_v31 = vld [vmem:[#allocation2 + $0xa8] sm:$0xff]  ;;  %v1719_v27 = vld [vmem:[#allocation2 + $0x38] sm:$0xff]  ;;  %v8518_v35 = vmul.f32 %v7837_v59, %v5634_v18 }
 0x107   : > { %11794 = vst [vmem:[#allocation46_spill] sm:$0xff] %v8489_v32  ;;  %v8493_v60 = vld [vmem:[%s6659_s13 + $0x122] sm:$0xff]  ;;  %623 = vst.msk [vmem:[#allocation2 + $0x48] sm:$0xff] %vm283_vm0, %v591_v53  ;;  %v1751_v28 = vadd.f32 %v1719_v27, %v8398_v9  ;;  %v8507_v53 = vld [vmem:[%s11598_s1 + $0x1] ss:$0 sm:$0xff] }
 0x108   : > { %v3052_v25 = vld [vmem:[#allocation2 + $0x80] sm:$0xff]  ;;  %2788 = vst.msk [vmem:[#allocation2 + $0x90] sm:$0xff] %vm283_vm0, %v2756_v6  ;;  %1963 = vst.msk [vmem:[#allocation2 + $0xb0] sm:$0xff] %vm283_vm0, %v1931_v12  ;;  %v378_v0 = vmul.f32 %v8507_v53, %v5838_v45  ;;  %v11796_v6 = vld [vmem:[#allocation47_spill] sm:$0xff] }
 0x109   : > { %v11795_v17 = vld [vmem:[#allocation34_spill] sm:$0xff]  ;;  %v3084_v30 = vadd.f32 %v3052_v25, %v11796_v6  ;;  %v11797_v57 = vld [vmem:[#allocation63_spill] sm:$0xff]  ;;  %3101 = vst.msk [vmem:[#allocation2 + $0x8] sm:$0xff] %vm283_vm0, %v3069_v22  ;;  %v2873_v9 = vld [vmem:[#allocation2 + $0x10] sm:$0xff]  ;;  %v8531_v22 = vmul.f32 %v7908_v47, %v8493_v60 }
 0x10a   : > { %v2262_v58 = vadd.f32 %v2230_v31, %v11795_v17  ;;  %v906_v61 = vld [vmem:[#allocation2 + $0xc0] sm:$0xff]  ;;  %v8513_v41 = vmul.f32 %v8287_v44, %v11797_v57  ;;  %2112 = vst.msk [vmem:[#allocation2 + $0x30] sm:$0xff] %vm283_vm0, %v2080_v33  ;;  %11799 = vst [vmem:[#allocation34_spill] sm:$0xff] %v8518_v35  ;;  %v1567_v46 = vld [vmem:[#allocation2 + $0xb8] sm:$0xff] }
 0x10b   : > { %v8521_v12 = vld [vmem:[%s6659_s13 + $0xc1] sm:$0xff]  ;;  %v938_v31 = vadd.f32 %v906_v61, %v874_v26  ;;  %v8524_v45 = vld [vmem:[%s6659_s13 + $0x2b2] sm:$0xff]  ;;  %1783 = vst.msk [vmem:[#allocation2 + $0x38] sm:$0xff] %vm283_vm0, %v1751_v28  ;;  %11801 = vst [vmem:[#allocation47_spill] sm:$0xff] %v8531_v22  ;;  %v1599_v59 = vadd.f32 %v1567_v46, %v1535_v3  ;;  %v8538_v26 = vmul.f32 %v8189_v55, %v8096_v10 }
 0x10c   : > { %11798 = vst [vmem:[#allocation7_spill] sm:$0xff] %v8513_v41  ;;  %v11800_v27 = vld [vmem:[#allocation48_spill] sm:$0xff]  ;;  %v2709_v17 = vld [vmem:[#allocation2 + $0x18] sm:$0xff]  ;;  %v2543_v6 = vld [vmem:[#allocation2 + $0x20] sm:$0xff]  ;;  %v1355_v18 = vmul.f32 %v7855_v7, %v8521_v12  ;;  %v8555_v46 = vmul.f32 %v8169_v4, %v8287_v44 }
 0x10d   : > { %v2905_v25 = vadd.f32 %v2873_v9, %v11800_v27  ;;  %2294 = vst.msk [vmem:[#allocation2 + $0xa8] sm:$0xff] %vm283_vm0, %v2262_v58  ;;  %3116 = vst.msk [vmem:[#allocation2 + $0x80] sm:$0xff] %vm283_vm0, %v3084_v30  ;;  %v8541_v33 = vld [vmem:[%s6659_s13 + $0x2c1] sm:$0xff]  ;;  %v11803_v58 = vld [vmem:[#allocation49_spill] sm:$0xff] }
 0x10e   : > { %11802 = vst [vmem:[#allocation63_spill] sm:$0xff] %v8538_v26  ;;  %v2741_v61 = vadd.f32 %v2709_v17, %v11803_v58  ;;  %v11804_v28 = vld [vmem:[#allocation50_spill] sm:$0xff]  ;;  %v2379_v9 = vld [vmem:[#allocation2 + $0x28] sm:$0xff]  ;;  %970 = vst.msk [vmem:[#allocation2 + $0xc0] sm:$0xff] %vm283_vm0, %v938_v31 }
 0x10f   : > { %v2575_v57 = vadd.f32 %v2543_v6, %v11804_v28  ;;  %v8549_v47 = vld [vmem:[%s11598_s1 + $0x3] ss:$0 sm:$0xff]  ;;  %v410_v3 = vld [vmem:[#allocation2 + $0xc8] sm:$0xff]  ;;  %11805 = vst [vmem:[#allocation48_spill] sm:$0xff] %v8555_v46  ;;  %2937 = vst.msk [vmem:[#allocation2 + $0x10] sm:$0xff] %vm283_vm0, %v2905_v25  ;;  %v8571_v25 = vmul.f32 %v8524_v45, %v7934_v11 }
 0x110   : > { %v694_v7 = vmul.f32 %v8549_v47, %v8351_v8  ;;  %v3204_v30 = vld [vmem:[#allocation2] sm:$0xff]  ;;  %v8559_v27 = vld [vmem:[%s6659_s13 + $0x172] sm:$0xff]  ;;  %1631 = vst.msk [vmem:[#allocation2 + $0xb8] sm:$0xff] %vm283_vm0, %v1599_v59  ;;  %v442_v58 = vadd.f32 %v410_v3, %v378_v0  ;;  %2773 = vst.msk [vmem:[#allocation2 + $0x18] sm:$0xff] %vm283_vm0, %v2741_v61 }
 0x111   : > { %v8563_v31 = vmul.f32 %v8559_v27, %v7934_v11  ;;  %v11807_v17 = vld [vmem:[#allocation53_spill] sm:$0xff]  ;;  %11809 = vst [vmem:[#allocation50_spill] sm:$0xff] %v8571_v25  ;;  %2607 = vst.msk [vmem:[#allocation2 + $0x20] sm:$0xff] %vm283_vm0, %v2575_v57  ;;  %v8575_v41 = vld [vmem:[%s6659_s13 + $0x181] sm:$0xff] }
 0x112   : > { %v2411_v6 = vadd.f32 %v2379_v9, %v11807_v17  ;;  %v11808_v28 = vld [vmem:[#allocation45_spill] sm:$0xff]  ;;  %v8579_v9 = vmul.f32 %v8575_v41, %v7769_v23  ;;  %v8582_v59 = vld [vmem:[%s6659_s13 + $0x190] sm:$0xff]  ;;  %v1387_v3 = vld [vmem:[#allocation2 + $0x40] sm:$0xff]  ;;  %v8596_v17 = vmul.f32 %v8236_v38, %v8287_v44  ;;  %474 = vst.msk [vmem:[#allocation2 + $0xc8] sm:$0xff] %vm283_vm0, %v442_v58 }
 0x113   : > { %11806 = vst [vmem:[#allocation49_spill] sm:$0xff] %v8563_v31  ;;  %v3236_v37 = vadd.f32 %v3204_v30, %v11808_v28  ;;  %v2725_v26 = vld [vmem:[#allocation2 + $0x98] sm:$0xff]  ;;  %v8587_v0 = vld [vmem:[%s11598_s1 + $0x12] ss:$0 sm:$0xff]  ;;  %v3053_v30 = vld [vmem:[#allocation2 + $0x88] sm:$0xff]  ;;  %v8601_v31 = vmul.f32 %v8541_v33, %v7769_v23 }
 0x114   : > { %11810 = vst [vmem:[#allocation53_spill] sm:$0xff] %v8579_v9  ;;  %v8591_v61 = vmul.f32 %v8587_v0, %v8582_v59  ;;  %v5871_v57 = vld [vmem:[%s6659_s13 + $0x1f2] sm:$0xff]  ;;  %11812 = vst [vmem:[#allocation78_spill] sm:$0xff] %v8596_v17  ;;  %v11813_v28 = vld [vmem:[#allocation51_spill] sm:$0xff] }
 0x115   : > { %v2757_v25 = vadd.f32 %v2725_v26, %v11813_v28  ;;  %v2559_v9 = vld [vmem:[#allocation2 + $0xa0] sm:$0xff]  ;;  %11814 = vst [vmem:[#allocation51_spill] sm:$0xff] %v8601_v31  ;;  %2443 = vst.msk [vmem:[#allocation2 + $0x28] sm:$0xff] %vm283_vm0, %v2411_v6  ;;  %v726_v32 = vld [vmem:[#allocation2 + $0x48] sm:$0xff] }
 0x116   : > { %11811 = vst [vmem:[#allocation45_spill] sm:$0xff] %v8591_v61  ;;  %v8605_v22 = vld [vmem:[%s6659_s13 + $0x261] sm:$0xff]  ;;  %v1419_v61 = vadd.f32 %v1387_v3, %v1355_v18  ;;  %3268 = vst.msk [vmem:[#allocation2] sm:$0xff] %vm283_vm0, %v3236_v37  ;;  %v2889_v17 = vld [vmem:[#allocation2 + $0x90] sm:$0xff]  ;;  %v758_v6 = vadd.f32 %v726_v32, %v694_v7  ;;  %v261_v32 = vmul.f32 %v8427_v1, %v8351_v8 }
 0x117   : > { %v11815_v21 = vld [vmem:[#allocation14_spill] sm:$0xff]  ;;  %v8611_v46 = vld [vmem:[%s6659_s13 + $0x2d0] sm:$0xff]  ;;  %v8623_v37 = vld [vmem:[%s11598_s1 + $0x18] ss:$0 sm:$0xff]  ;;  %2789 = vst.msk [vmem:[#allocation2 + $0x98] sm:$0xff] %vm283_vm0, %v2757_v25 }
 0x118   : > { %v3085_v38 = vadd.f32 %v3053_v30, %v11815_v21  ;;  %v11816_v26 = vld [vmem:[#allocation52_spill] sm:$0xff]  ;;  %v8617_v23 = vld [vmem:[%s11598_s1 + $0x5] ss:$0 sm:$0xff]  ;;  %v3205_v21 = vld [vmem:[#allocation2 + $0x8] sm:$0xff]  ;;  %1451 = vst.msk [vmem:[#allocation2 + $0x40] sm:$0xff] %vm283_vm0, %v1419_v61 }
 0x119   : > { %v2591_v28 = vadd.f32 %v2559_v9, %v11816_v26  ;;  %v2064_v35 = vld [vmem:[#allocation2 + $0xb0] sm:$0xff]  ;;  %v1039_v18 = vmul.f32 %v8617_v23, %v5871_v57  ;;  %v11817_v58 = vld [vmem:[#allocation11_spill] sm:$0xff]  ;;  %v1703_v26 = vmul.f32 %v7784_v34, %v8134_v49  ;;  %v8643_v34 = vmul.f32 %v8209_v43, %v8605_v22  ;;  %v1884_v49 = vld [vmem:[#allocation2 + $0x38] sm:$0xff]  ;;  %790 = vst.msk [vmem:[#allocation2 + $0x48] sm:$0xff] %vm283_vm0, %v758_v6 }
 0x11a   : > { %v2921_v3 = vadd.f32 %v2889_v17, %v11817_v58  ;;  %v2215_v9 = vld [vmem:[#allocation2 + $0x30] sm:$0xff]  ;;  %v2096_v30 = vadd.f32 %v2064_v35, %v8245_v13  ;;  %v11818_v7 = vld [vmem:[#allocation55_spill] sm:$0xff]  ;;  %3117 = vst.msk [vmem:[#allocation2 + $0x88] sm:$0xff] %vm283_vm0, %v3085_v38  ;;  %v8637_v17 = vmul.f32 %v8199_v24, %v8096_v10  ;;  %v3220_v8 = vld [vmem:[#allocation2 + $0x80] sm:$0xff]  ;;  %v8659_v6 = vmul.f32 %v8023_v2, %v8623_v37 }
 0x11b   : > { %v3237_v31 = vadd.f32 %v3205_v21, %v11818_v7  ;;  %2623 = vst.msk [vmem:[#allocation2 + $0xa0] sm:$0xff] %vm283_vm0, %v2591_v28  ;;  %v2395_v13 = vld [vmem:[#allocation2 + $0xa8] sm:$0xff]  ;;  %v11820_v35 = vld [vmem:[#allocation24_spill] sm:$0xff]  ;;  %11821 = vst [vmem:[#allocation52_spill] sm:$0xff] %v8643_v34  ;;  %v8650_v21 = vmul.f32 %v8380_v20, %v8493_v60  ;;  %v1916_v28 = vadd.f32 %v1884_v49, %v8420_v48 }
 0x11c   : > { %11819 = vst [vmem:[#allocation14_spill] sm:$0xff] %v8637_v17  ;;  %v2247_v25 = vadd.f32 %v2215_v9, %v11820_v35  ;;  %2953 = vst.msk [vmem:[#allocation2 + $0x90] sm:$0xff] %vm283_vm0, %v2921_v3  ;;  %v11822_v61 = vld [vmem:[#allocation60_spill] sm:$0xff]  ;;  %v1071_v9 = vld [vmem:[#allocation2 + $0xc0] sm:$0xff]  ;;  %v543_v7 = vmul.f32 %v8405_v15, %v5871_v57 }
 0x11d   : > { %v2427_v38 = vadd.f32 %v2395_v13, %v11822_v61  ;;  %11823 = vst [vmem:[#allocation11_spill] sm:$0xff] %v8650_v21  ;;  %2128 = vst.msk [vmem:[#allocation2 + $0xb0] sm:$0xff] %vm283_vm0, %v2096_v30  ;;  %v5602_v58 = vld [vmem:[%s6659_s13 + $0x130] sm:$0xff]  ;;  %v8665_v30 = vmul.f32 %v8587_v0, %v8611_v46  ;;  %v1735_v48 = vld [vmem:[#allocation2 + $0xb8] sm:$0xff]  ;;  %v1103_v57 = vadd.f32 %v1071_v9, %v1039_v18 }
 0x11e   : > { %294 = vst.msk [vmem:[#allocation2 + $0x50] sm:$0xff] %vm283_vm0, %v261_v32  ;;  %11824 = vst [vmem:[#allocation55_spill] sm:$0xff] %v8659_v6  ;;  %v11825_v3 = vld [vmem:[#allocation8_spill] sm:$0xff]  ;;  %v8669_v35 = vld [vmem:[%s6659_s13 + $0xc2] sm:$0xff]  ;;  %v8673_v32 = vmul.f32 %v8435_v29, %v8222_v16 }
 0x11f   : > { %v3252_v13 = vadd.f32 %v3220_v8, %v11825_v3  ;;  %3269 = vst.msk [vmem:[#allocation2 + $0x8] sm:$0xff] %vm283_vm0, %v3237_v31  ;;  %v3038_v60 = vld [vmem:[#allocation2 + $0x10] sm:$0xff]  ;;  %11826 = vst [vmem:[#allocation24_spill] sm:$0xff] %v8665_v30  ;;  %v11828_v2 = vld [vmem:[#allocation54_spill] sm:$0xff]  ;;  %v1767_v31 = vadd.f32 %v1735_v48, %v1703_v26  ;;  %v859_v26 = vmul.f32 %v8469_v51, %v8521_v12 }
 0x120   : > { %2279 = vst.msk [vmem:[#allocation2 + $0x30] sm:$0xff] %vm283_vm0, %v2247_v25  ;;  %11827 = vst [vmem:[#allocation60_spill] sm:$0xff] %v8673_v32  ;;  %v3070_v49 = vadd.f32 %v3038_v60, %v11828_v2  ;;  %v2874_v8 = vld [vmem:[#allocation2 + $0x18] sm:$0xff]  ;;  %v2710_v61 = vld [vmem:[#allocation2 + $0x20] sm:$0xff] }
 0x121   : > { %2459 = vst.msk [vmem:[#allocation2 + $0xa8] sm:$0xff] %vm283_vm0, %v2427_v38  ;;  %1948 = vst.msk [vmem:[#allocation2 + $0x38] sm:$0xff] %vm283_vm0, %v1916_v28  ;;  %v8681_v25 = vld [vmem:[%s11598_s1 + $0x8] ss:$0 sm:$0xff]  ;;  %v8689_v38 = vmul.f32 %v8059_v63, %v5602_v58  ;;  %v3369_v48 = vld [vmem:[#allocation2] sm:$0xff] }
 0x122   : > { %v1520_v18 = vmul.f32 %v8681_v25, %v8669_v35  ;;  %3284 = vst.msk [vmem:[#allocation2 + $0x80] sm:$0xff] %vm283_vm0, %v3252_v13  ;;  %v11829_v16 = vld [vmem:[#allocation19_spill] sm:$0xff]  ;;  %1135 = vst.msk [vmem:[#allocation2 + $0xc0] sm:$0xff] %vm283_vm0, %v1103_v57  ;;  %v8697_v13 = vmul.f32 %v8359_v36, %v8287_v44  ;;  %v8702_v63 = vld [vmem:[%s6659_s13 + $0x200] sm:$0xff]  ;;  %v363_v57 = vmul.f32 %v8507_v53, %v8521_v12 }
 0x123   : > { %v2906_v9 = vadd.f32 %v2874_v8, %v11829_v16  ;;  %v11830_v3 = vld [vmem:[#allocation27_spill] sm:$0xff]  ;;  %11831 = vst [vmem:[#allocation8_spill] sm:$0xff] %v8689_v38  ;;  %3102 = vst.msk [vmem:[#allocation2 + $0x10] sm:$0xff] %vm283_vm0, %v3070_v49  ;;  %v11834_v16 = vld [vmem:[#allocation33_spill] sm:$0xff]  ;;  %v8709_v49 = vmul.f32 %v8341_v19, %v8435_v29 }
 0x124   : > { %v2742_v60 = vadd.f32 %v2710_v61, %v11830_v3  ;;  %v2544_v2 = vld [vmem:[#allocation2 + $0x28] sm:$0xff]  ;;  %11832 = vst [vmem:[#allocation54_spill] sm:$0xff] %v8697_v13  ;;  %1799 = vst.msk [vmem:[#allocation2 + $0xb8] sm:$0xff] %vm283_vm0, %v1767_v31  ;;  %v3401_v3 = vadd.f32 %v3369_v48, %v11834_v16  ;;  %v2890_v31 = vld [vmem:[#allocation2 + $0x98] sm:$0xff] }
 0x125   : > { %v575_v28 = vld [vmem:[#allocation2 + $0xc8] sm:$0xff]  ;;  %11835 = vst [vmem:[#allocation19_spill] sm:$0xff] %v8709_v49  ;;  %2938 = vst.msk [vmem:[#allocation2 + $0x18] sm:$0xff] %vm283_vm0, %v2906_v9  ;;  %v1552_v48 = vld [vmem:[#allocation2 + $0x40] sm:$0xff] }
 0x126   : > { %v11833_v8 = vld [vmem:[#allocation15_spill] sm:$0xff]  ;;  %v607_v58 = vadd.f32 %v575_v28, %v543_v7  ;;  %2774 = vst.msk [vmem:[#allocation2 + $0x20] sm:$0xff] %vm283_vm0, %v2742_v60  ;;  %v8739_v13 = vld [vmem:[%s6659_s13 + $0x191] sm:$0xff]  ;;  %3433 = vst.msk [vmem:[#allocation2] sm:$0xff] %vm283_vm0, %v3401_v3 }
 0x127   : > { %v2576_v61 = vadd.f32 %v2544_v2, %v11833_v8  ;;  %v8714_v2 = vmul.f32 %v8366_v50, %v8096_v10  ;;  %v8718_v7 = vld [vmem:[%s6659_s13 + $0x262] sm:$0xff]  ;;  %v8723_v12 = vld [vmem:[%s11598_s1 + $0xa] ss:$0 sm:$0xff]  ;;  %v11837_v8 = vld [vmem:[#allocation56_spill] sm:$0xff]  ;;  %11839 = vst [vmem:[#allocation33_spill] sm:$0xff] %v8739_v13 }
 0x128   : > { %v8727_v28 = vmul.f32 %v8723_v12, %v8226_v39  ;;  %v3221_v9 = vld [vmem:[#allocation2 + $0x88] sm:$0xff]  ;;  %v2922_v16 = vadd.f32 %v2890_v31, %v11837_v8  ;;  %v8744_v39 = vld [vmem:[%s11598_s1 + $0x13] ss:$0 sm:$0xff]  ;;  %v1584_v31 = vadd.f32 %v1552_v48, %v1520_v18  ;;  %639 = vst.msk [vmem:[#allocation2 + $0xc8] sm:$0xff] %vm283_vm0, %v607_v58  ;;  %v11842_v38 = vld [vmem:[#allocation22_spill] sm:$0xff] }
 0x129   : > { %11836 = vst [vmem:[#allocation27_spill] sm:$0xff] %v8714_v2  ;;  %v8731_v6 = vld [vmem:[%s6659_s13 + $0x182] sm:$0xff]  ;;  %2608 = vst.msk [vmem:[#allocation2 + $0x28] sm:$0xff] %vm283_vm0, %v2576_v61  ;;  %v8748_v32 = vmul.f32 %v8744_v39, %v8739_v13  ;;  %v3054_v61 = vld [vmem:[#allocation2 + $0x90] sm:$0xff] }
 0x12a   : > { %v8735_v60 = vmul.f32 %v8731_v6, %v7934_v11  ;;  %v2726_v2 = vld [vmem:[#allocation2 + $0xa0] sm:$0xff]  ;;  %v891_v8 = vld [vmem:[#allocation2 + $0x48] sm:$0xff]  ;;  %v11841_v11 = vld [vmem:[#allocation12_spill] sm:$0xff]  ;;  %2954 = vst.msk [vmem:[#allocation2 + $0x98] sm:$0xff] %vm283_vm0, %v2922_v16 }
 0x12b   : > { %11840 = vst [vmem:[#allocation56_spill] sm:$0xff] %v8748_v32  ;;  %v2758_v30 = vadd.f32 %v2726_v2, %v11842_v38  ;;  %v2231_v21 = vld [vmem:[#allocation2 + $0xb0] sm:$0xff]  ;;  %v8757_v49 = vld [vmem:[%s11598_s1 + $0x6] ss:$0 sm:$0xff]  ;;  %v923_v48 = vadd.f32 %v891_v8, %v859_v26  ;;  %v3370_v32 = vld [vmem:[#allocation2 + $0x8] sm:$0xff] }
 0x12c   : > { %11838 = vst [vmem:[#allocation15_spill] sm:$0xff] %v8735_v60  ;;  %v3253_v60 = vadd.f32 %v3221_v9, %v11841_v11  ;;  %v1206_v18 = vmul.f32 %v8757_v49, %v8702_v63  ;;  %v395_v58 = vld [vmem:[#allocation2 + $0x50] sm:$0xff]  ;;  %v11843_v3 = vld [vmem:[#allocation58_spill] sm:$0xff]  ;;  %v2263_v38 = vadd.f32 %v2231_v21, %v8273_v5  ;;  %v8767_v2 = vld [vmem:[%s11598_s1 + $0xb] ss:$0 sm:$0xff] }
 0x12d   : > { %v3086_v34 = vadd.f32 %v3054_v61, %v11843_v3  ;;  %v2380_v9 = vld [vmem:[#allocation2 + $0x30] sm:$0xff]  ;;  %v8771_v11 = vmul.f32 %v8767_v2, %v8241_v56  ;;  %1616 = vst.msk [vmem:[#allocation2 + $0x40] sm:$0xff] %vm283_vm0, %v1584_v31  ;;  %v5401_v26 = vld [vmem:[%s6659_s13 + $0x140] sm:$0xff]  ;;  %v427_v8 = vadd.f32 %v395_v58, %v363_v57  ;;  %2790 = vst.msk [vmem:[#allocation2 + $0xa0] sm:$0xff] %vm283_vm0, %v2758_v30 }
 0x12e   : > { %v11844_v17 = vld [vmem:[#allocation62_spill] sm:$0xff]  ;;  %3285 = vst.msk [vmem:[#allocation2 + $0x88] sm:$0xff] %vm283_vm0, %v3253_v60  ;;  %v2560_v5 = vld [vmem:[#allocation2 + $0xa8] sm:$0xff]  ;;  %v2049_v13 = vld [vmem:[#allocation2 + $0x38] sm:$0xff] }
 0x12f   : > { %v3402_v61 = vadd.f32 %v3370_v32, %v11844_v17  ;;  %v8778_v16 = vld [vmem:[%s6659_s13 + $0x2c2] sm:$0xff]  ;;  %v8785_v56 = vld [vmem:[%s11598_s1 + $0xc] ss:$0 sm:$0xff]  ;;  %v8794_v17 = vld [vmem:[%s11598_s1 + $0xd] ss:$0 sm:$0xff]  ;;  %955 = vst.msk [vmem:[#allocation2 + $0x48] sm:$0xff] %vm283_vm0, %v923_v48 }
 0x130   : > { %11845 = vst [vmem:[#allocation12_spill] sm:$0xff] %v8778_v16  ;;  %v11846_v21 = vld [vmem:[#allocation35_spill] sm:$0xff]  ;;  %v8789_v57 = vmul.f32 %v8785_v56, %v8416_v40  ;;  %11847 = vst [vmem:[#allocation22_spill] sm:$0xff] %v8794_v17  ;;  %v8798_v30 = vmul.f32 %v8794_v17, %v8605_v22  ;;  %v3385_v32 = vld [vmem:[#allocation2 + $0x80] sm:$0xff]  ;;  %v2081_v40 = vadd.f32 %v2049_v13, %v8449_v62 }
 0x131   : > { %v2412_v3 = vadd.f32 %v2380_v9, %v11846_v21  ;;  %3118 = vst.msk [vmem:[#allocation2 + $0x90] sm:$0xff] %vm283_vm0, %v3086_v34  ;;  %v11848_v60 = vld [vmem:[#allocation9_spill] sm:$0xff]  ;;  %2295 = vst.msk [vmem:[#allocation2 + $0xb0] sm:$0xff] %vm283_vm0, %v2263_v38  ;;  %v8808_v58 = vld [vmem:[%s11598_s1 + $0xe] ss:$0 sm:$0xff]  ;;  %v710_v9 = vmul.f32 %v8549_v47, %v8702_v63  ;;  %v8822_v62 = vmul.f32 %v8392_v42, %v8435_v29 }
 0x132   : > { %v2592_v31 = vadd.f32 %v2560_v5, %v11848_v60  ;;  %11849 = vst [vmem:[#allocation58_spill] sm:$0xff] %v8808_v58  ;;  %v8812_v22 = vmul.f32 %v8808_v58, %v8718_v7  ;;  %v1238_v48 = vld [vmem:[#allocation2 + $0xc0] sm:$0xff]  ;;  %459 = vst.msk [vmem:[#allocation2 + $0x50] sm:$0xff] %vm283_vm0, %v427_v8  ;;  %v11851_v5 = vld [vmem:[#allocation61_spill] sm:$0xff]  ;;  %v8826_v21 = vmul.f32 %v8375_v14, %v8096_v10 }
 0x133   : > { %v241_v34 = vld [vmem:[%s6659_s13 + $0x200] sm:$0xff]  ;;  %v3417_v38 = vadd.f32 %v3385_v32, %v11851_v5  ;;  %3434 = vst.msk [vmem:[#allocation2 + $0x8] sm:$0xff] %vm283_vm0, %v3402_v61  ;;  %11852 = vst [vmem:[#allocation35_spill] sm:$0xff] %v8822_v62  ;;  %v3206_v13 = vld [vmem:[#allocation2 + $0x10] sm:$0xff]  ;;  %v1270_v8 = vadd.f32 %v1238_v48, %v1206_v18 }
 0x134   : > { %11850 = vst [vmem:[#allocation62_spill] sm:$0xff] %v8812_v22  ;;  %11853 = vst [vmem:[#allocation9_spill] sm:$0xff] %v8826_v21  ;;  %v8829_v60 = vld [vmem:[%s6659_s13 + $0x2d1] sm:$0xff]  ;;  %v8835_v61 = vld [vmem:[%s11598_s1 + $0x19] ss:$0 sm:$0xff] }
 0x135   : > { %11854 = vst [vmem:[#allocation61_spill] sm:$0xff] %v8829_v60  ;;  %2444 = vst.msk [vmem:[#allocation2 + $0x30] sm:$0xff] %vm283_vm0, %v2412_v3  ;;  %v1900_v63 = vld [vmem:[#allocation2 + $0xb8] sm:$0xff]  ;;  %v11855_v32 = vld [vmem:[#allocation20_spill] sm:$0xff]  ;;  %v8877_v58 = vmul.f32 %v8169_v4, %v8835_v61 }
 0x136   : > { %v3238_v42 = vadd.f32 %v3206_v13, %v11855_v32  ;;  %v3039_v5 = vld [vmem:[#allocation2 + $0x18] sm:$0xff]  ;;  %v2875_v62 = vld [vmem:[#allocation2 + $0x20] sm:$0xff]  ;;  %v8841_v10 = vld [vmem:[%s11598_s1 + $0x14] ss:$0 sm:$0xff]  ;;  %2624 = vst.msk [vmem:[#allocation2 + $0xa8] sm:$0xff] %vm283_vm0, %v2592_v31  ;;  %v1932_v18 = vadd.f32 %v1900_v63, %v8727_v28  ;;  %v1024_v28 = vmul.f32 %v8617_v23, %v8669_v35  ;;  %v277_v63 = vmul.f32 %v8427_v1, %v241_v34 }
 0x137   : > { %v8845_v14 = vmul.f32 %v8841_v10, %v8778_v16  ;;  %2113 = vst.msk [vmem:[#allocation2 + $0x38] sm:$0xff] %vm283_vm0, %v2081_v40  ;;  %v8853_v3 = vld [vmem:[%s11598_s1 + $0x9] ss:$0 sm:$0xff]  ;;  %3449 = vst.msk [vmem:[#allocation2 + $0x80] sm:$0xff] %vm283_vm0, %v3417_v38  ;;  %v11857_v13 = vld [vmem:[#allocation29_spill] sm:$0xff] }
 0x138   : > { %v1688_v48 = vmul.f32 %v8853_v3, %v5401_v26  ;;  %v3071_v32 = vadd.f32 %v3039_v5, %v11857_v13  ;;  %v11858_v21 = vld [vmem:[#allocation18_spill] sm:$0xff]  ;;  %v2711_v22 = vld [vmem:[#allocation2 + $0x28] sm:$0xff]  ;;  %v5635_v31 = vld [vmem:[%s6659_s13 + $0x131] sm:$0xff]  ;;  %1302 = vst.msk [vmem:[#allocation2 + $0xc0] sm:$0xff] %vm283_vm0, %v1270_v8  ;;  %v8867_v26 = vmul.f32 %v8356_v52, %v8287_v44  ;;  %v528_v5 = vmul.f32 %v8405_v15, %v8669_v35 }
 0x139   : > { %11856 = vst [vmem:[#allocation20_spill] sm:$0xff] %v8845_v14  ;;  %v2907_v14 = vadd.f32 %v2875_v62, %v11858_v21  ;;  %v742_v40 = vld [vmem:[#allocation2 + $0xc8] sm:$0xff]  ;;  %v3534_v16 = vld [vmem:[#allocation2] sm:$0xff]  ;;  %3270 = vst.msk [vmem:[#allocation2 + $0x10] sm:$0xff] %vm283_vm0, %v3238_v42  ;;  %v8890_v35 = vmul.f32 %v8380_v20, %v8718_v7 }
 0x13a   : > { %11859 = vst [vmem:[#allocation29_spill] sm:$0xff] %v8867_v26  ;;  %v11860_v38 = vld [vmem:[#allocation65_spill] sm:$0xff]  ;;  %1964 = vst.msk [vmem:[#allocation2 + $0xb8] sm:$0xff] %vm283_vm0, %v1932_v18  ;;  %v5939_v21 = vld [vmem:[%s6659_s13 + $0x201] sm:$0xff]  ;;  %v774_v8 = vadd.f32 %v742_v40, %v710_v9 }
 0x13b   : > { %v2743_v62 = vadd.f32 %v2711_v22, %v11860_v38  ;;  %v11861_v13 = vld [vmem:[#allocation59_spill] sm:$0xff]  ;;  %11862 = vst [vmem:[#allocation18_spill] sm:$0xff] %v8877_v58  ;;  %3103 = vst.msk [vmem:[#allocation2 + $0x18] sm:$0xff] %vm283_vm0, %v3071_v32  ;;  %v3055_v52 = vld [vmem:[#allocation2 + $0x98] sm:$0xff] }
 0x13c   : > { %v3566_v34 = vadd.f32 %v3534_v16, %v11861_v13  ;;  %2939 = vst.msk [vmem:[#allocation2 + $0x20] sm:$0xff] %vm283_vm0, %v2907_v14  ;;  %v8882_v22 = vld [vmem:[%s6659_s13 + $0x1a0] sm:$0xff]  ;;  %11864 = vst [vmem:[#allocation59_spill] sm:$0xff] %v8890_v35  ;;  %v5618_v16 = vld [vmem:[%s6659_s13 + $0x270] sm:$0xff]  ;;  %v8899_v14 = vmul.f32 %v8744_v39, %v8829_v60  ;;  %v8902_v13 = vmul.f32 %v8209_v43, %v5635_v31 }
 0x13d   : > { %v8886_v42 = vmul.f32 %v8882_v22, %v8587_v0  ;;  %v1720_v9 = vld [vmem:[#allocation2 + $0x40] sm:$0xff]  ;;  %310 = vst.msk [vmem:[#allocation2 + $0xd0] sm:$0xff] %vm283_vm0, %v277_v63  ;;  %v3386_v18 = vld [vmem:[#allocation2 + $0x88] sm:$0xff]  ;;  %v11865_v32 = vld [vmem:[#allocation17_spill] sm:$0xff] }
 0x13e   : > { %v343_v4 = vld [vmem:[%s6659_s13 + $0x201] sm:$0xff]  ;;  %v3087_v40 = vadd.f32 %v3055_v52, %v11865_v32  ;;  %2775 = vst.msk [vmem:[#allocation2 + $0x28] sm:$0xff] %vm283_vm0, %v2743_v62  ;;  %11866 = vst [vmem:[#allocation17_spill] sm:$0xff] %v8899_v14  ;;  %v1752_v7 = vadd.f32 %v1720_v9, %v1688_v48  ;;  %v3222_v35 = vld [vmem:[#allocation2 + $0x90] sm:$0xff] }
 0x13f   : > { %11863 = vst [vmem:[#allocation65_spill] sm:$0xff] %v8886_v42  ;;  %v2891_v38 = vld [vmem:[#allocation2 + $0xa0] sm:$0xff]  ;;  %11867 = vst [vmem:[#allocation79_spill] sm:$0xff] %v8902_v13  ;;  %v1056_v58 = vld [vmem:[#allocation2 + $0x48] sm:$0xff] }
 0x140   : > { %806 = vst.msk [vmem:[#allocation2 + $0xc8] sm:$0xff] %vm283_vm0, %v774_v8  ;;  %3598 = vst.msk [vmem:[#allocation2] sm:$0xff] %vm283_vm0, %v3566_v34  ;;  %v11868_v63 = vld [vmem:[#allocation66_spill] sm:$0xff]  ;;  %v11869_v52 = vld [vmem:[#allocation68_spill] sm:$0xff]  ;;  %v1088_v31 = vadd.f32 %v1056_v58, %v1024_v28  ;;  %v8926_v58 = vmul.f32 %v8559_v27, %v8435_v29 }
 0x141   : > { %v3418_v42 = vadd.f32 %v3386_v18, %v11868_v63  ;;  %v2923_v32 = vadd.f32 %v2891_v38, %v11869_v52  ;;  %v2396_v26 = vld [vmem:[#allocation2 + $0xb0] sm:$0xff]  ;;  %v8911_v62 = vld [vmem:[%s11598_s1 + $0x7] ss:$0 sm:$0xff]  ;;  %v3535_v34 = vld [vmem:[#allocation2 + $0x8] sm:$0xff]  ;;  %3119 = vst.msk [vmem:[#allocation2 + $0x98] sm:$0xff] %vm283_vm0, %v3087_v40 }
 0x142   : > { %v1371_v43 = vmul.f32 %v8911_v62, %v5939_v21  ;;  %v560_v48 = vld [vmem:[#allocation2 + $0x50] sm:$0xff]  ;;  %v11871_v13 = vld [vmem:[#allocation67_spill] sm:$0xff]  ;;  %v11872_v63 = vld [vmem:[#allocation37_spill] sm:$0xff]  ;;  %1784 = vst.msk [vmem:[#allocation2 + $0x40] sm:$0xff] %vm283_vm0, %v1752_v7 }
 0x143   : > { %v11870_v9 = vld [vmem:[#allocation64_spill] sm:$0xff]  ;;  %v3254_v18 = vadd.f32 %v3222_v35, %v11871_v13  ;;  %v2428_v52 = vadd.f32 %v2396_v26, %v11872_v63  ;;  %v592_v14 = vadd.f32 %v560_v48, %v528_v5  ;;  %v11873_v60 = vld [vmem:[#allocation30_spill] sm:$0xff]  ;;  %3450 = vst.msk [vmem:[#allocation2 + $0x88] sm:$0xff] %vm283_vm0, %v3418_v42  ;;  %2955 = vst.msk [vmem:[#allocation2 + $0xa0] sm:$0xff] %vm283_vm0, %v2923_v32 }
 0x144   : > { %v8916_v8 = vmul.f32 %v8623_v37, %v11870_v9  ;;  %v2545_v38 = vld [vmem:[#allocation2 + $0x30] sm:$0xff]  ;;  %v3567_v17 = vadd.f32 %v3535_v34, %v11873_v60  ;;  %v2727_v28 = vld [vmem:[#allocation2 + $0xa8] sm:$0xff]  ;;  %v11874_v35 = vld [vmem:[#allocation70_spill] sm:$0xff]  ;;  %1120 = vst.msk [vmem:[#allocation2 + $0x48] sm:$0xff] %vm283_vm0, %v1088_v31  ;;  %v875_v9 = vmul.f32 %v8469_v51, %v5939_v21  ;;  %v8951_v31 = vmul.f32 %v8189_v55, %v8623_v37 }
 0x145   : > { %v2577_v13 = vadd.f32 %v2545_v38, %v11874_v35  ;;  %v2216_v40 = vld [vmem:[#allocation2 + $0x38] sm:$0xff]  ;;  %v8933_v26 = vld [vmem:[%s11598_s1 + $0xf] ss:$0 sm:$0xff]  ;;  %v5434_v60 = vld [vmem:[%s6659_s13 + $0x141] sm:$0xff]  ;;  %3286 = vst.msk [vmem:[#allocation2 + $0x90] sm:$0xff] %vm283_vm0, %v3254_v18 }
 0x146   : > { %v8936_v5 = vmul.f32 %v8933_v26, %v5618_v16  ;;  %v3550_v42 = vld [vmem:[#allocation2 + $0x80] sm:$0xff]  ;;  %v11875_v27 = vld [vmem:[#allocation69_spill] sm:$0xff]  ;;  %2460 = vst.msk [vmem:[#allocation2 + $0xb0] sm:$0xff] %vm283_vm0, %v2428_v52  ;;  %v2248_v32 = vadd.f32 %v2216_v40, %v8502_v54  ;;  %624 = vst.msk [vmem:[#allocation2 + $0x50] sm:$0xff] %vm283_vm0, %v592_v14  ;;  %v379_v16 = vmul.f32 %v8507_v53, %v343_v4 }
 0x147   : > { %v2759_v7 = vadd.f32 %v2727_v28, %v11875_v27  ;;  %v1403_v48 = vld [vmem:[#allocation2 + $0xc0] sm:$0xff]  ;;  %v11876_v34 = vld [vmem:[#allocation71_spill] sm:$0xff]  ;;  %3599 = vst.msk [vmem:[#allocation2 + $0x8] sm:$0xff] %vm283_vm0, %v3567_v17  ;;  %v3371_v18 = vld [vmem:[#allocation2 + $0x10] sm:$0xff]  ;;  %v8955_v54 = vmul.f32 %v8575_v41, %v8287_v44 }
 0x148   : > { %v3582_v38 = vadd.f32 %v3550_v42, %v11876_v34  ;;  %2609 = vst.msk [vmem:[#allocation2 + $0x30] sm:$0xff] %vm283_vm0, %v2577_v13  ;;  %v2065_v21 = vld [vmem:[#allocation2 + $0xb8] sm:$0xff]  ;;  %v1435_v14 = vadd.f32 %v1403_v48, %v1371_v43  ;;  %v11877_v4 = vld [vmem:[#allocation23_spill] sm:$0xff]  ;;  %v3040_v28 = vld [vmem:[#allocation2 + $0x20] sm:$0xff]  ;;  %v1853_v43 = vmul.f32 %v8723_v12, %v5434_v60 }
 0x149   : > { %v3403_v63 = vadd.f32 %v3371_v18, %v11877_v4  ;;  %v3207_v52 = vld [vmem:[#allocation2 + $0x18] sm:$0xff]  ;;  %v8962_v17 = vld [vmem:[%s11598_s1 + $0x15] ss:$0 sm:$0xff]  ;;  %2791 = vst.msk [vmem:[#allocation2 + $0xa8] sm:$0xff] %vm283_vm0, %v2759_v7  ;;  %2280 = vst.msk [vmem:[#allocation2 + $0x38] sm:$0xff] %vm283_vm0, %v2248_v32  ;;  %v2097_v41 = vadd.f32 %v2065_v21, %v8771_v11 }
 0x14a   : > { %v8966_v55 = vmul.f32 %v8962_v17, %v8582_v59  ;;  %v5301_v35 = vld [vmem:[%s6659_s13 + $0xd0] sm:$0xff]  ;;  %3614 = vst.msk [vmem:[#allocation2 + $0x80] sm:$0xff] %vm283_vm0, %v3582_v38  ;;  %v2876_v48 = vld [vmem:[#allocation2 + $0x28] sm:$0xff]  ;;  %1467 = vst.msk [vmem:[#allocation2 + $0xc0] sm:$0xff] %vm283_vm0, %v1435_v14 }
 0x14b   : > { %v11878_v13 = vld [vmem:[#allocation32_spill] sm:$0xff]  ;;  %v1191_v11 = vmul.f32 %v8757_v49, %v5301_v35  ;;  %v907_v60 = vld [vmem:[#allocation2 + $0xc8] sm:$0xff]  ;;  %v3701_v34 = vld [vmem:[#allocation2] sm:$0xff]  ;;  %3435 = vst.msk [vmem:[#allocation2 + $0x10] sm:$0xff] %vm283_vm0, %v3403_v63  ;;  %v9001_v63 = vmul.f32 %v8623_v37, %v8199_v24  ;;  %v9013_v24 = vmul.f32 %v8524_v45, %v8435_v29 }
 0x14c   : > { %v3239_v40 = vadd.f32 %v3207_v52, %v11878_v13  ;;  %v11879_v42 = vld [vmem:[#allocation72_spill] sm:$0xff]  ;;  %v8987_v38 = vld [vmem:[%s6659_s13 + $0x2e0] sm:$0xff]  ;;  %v11881_v18 = vld [vmem:[#allocation73_spill] sm:$0xff]  ;;  %2129 = vst.msk [vmem:[#allocation2 + $0xb8] sm:$0xff] %vm283_vm0, %v2097_v41  ;;  %v939_v52 = vadd.f32 %v907_v60, %v875_v9  ;;  %v9006_v9 = vmul.f32 %v8541_v33, %v8287_v44  ;;  %v262_v60 = vmul.f32 %v8427_v1, %v5301_v35 }
 0x14d   : > { %v3072_v27 = vadd.f32 %v3040_v28, %v11879_v42  ;;  %v8977_v59 = vld [vmem:[%s6659_s13 + $0x192] sm:$0xff]  ;;  %v2908_v21 = vadd.f32 %v2876_v48, %v11881_v18  ;;  %v5972_v4 = vld [vmem:[%s6659_s13 + $0x202] sm:$0xff]  ;;  %v695_v28 = vmul.f32 %v8549_v47, %v5301_v35  ;;  %11883 = vst [vmem:[#allocation68_spill] sm:$0xff] %v9001_v63  ;;  %11884 = vst [vmem:[#allocation64_spill] sm:$0xff] %v9013_v24 }
 0x14e   : > { %v8981_v7 = vmul.f32 %v8977_v59, %v8841_v10  ;;  %v411_v32 = vld [vmem:[#allocation2 + $0xd0] sm:$0xff]  ;;  %3271 = vst.msk [vmem:[#allocation2 + $0x18] sm:$0xff] %vm283_vm0, %v3239_v40  ;;  %v3223_v41 = vld [vmem:[#allocation2 + $0x98] sm:$0xff]  ;;  %v508_v48 = vld [vmem:[%s6659_s13 + $0x202] sm:$0xff] }
 0x14f   : > { %v443_v13 = vadd.f32 %v411_v32, %v379_v16  ;;  %v11882_v14 = vld [vmem:[#allocation16_spill] sm:$0xff]  ;;  %3104 = vst.msk [vmem:[#allocation2 + $0x20] sm:$0xff] %vm283_vm0, %v3072_v27  ;;  %v1885_v16 = vld [vmem:[#allocation2 + $0x40] sm:$0xff]  ;;  %v3551_v32 = vld [vmem:[#allocation2 + $0x88] sm:$0xff] }
 0x150   : > { %11880 = vst [vmem:[#allocation66_spill] sm:$0xff] %v8981_v7  ;;  %v3733_v42 = vadd.f32 %v3701_v34, %v11882_v14  ;;  %v8997_v7 = vld [vmem:[%s11598_s1 + $0x1a] ss:$0 sm:$0xff]  ;;  %v11885_v34 = vld [vmem:[#allocation28_spill] sm:$0xff]  ;;  %v3056_v40 = vld [vmem:[#allocation2 + $0xa0] sm:$0xff]  ;;  %v9018_v14 = vmul.f32 %v8962_v17, %v8611_v46  ;;  %v1917_v44 = vadd.f32 %v1885_v16, %v1853_v43 }
 0x151   : > { %v3255_v18 = vadd.f32 %v3223_v41, %v11885_v34  ;;  %2940 = vst.msk [vmem:[#allocation2 + $0x28] sm:$0xff] %vm283_vm0, %v2908_v21  ;;  %v1223_v33 = vld [vmem:[#allocation2 + $0x48] sm:$0xff]  ;;  %v9022_v27 = vld [vmem:[%s6659_s13 + $0xd1] sm:$0xff]  ;;  %971 = vst.msk [vmem:[#allocation2 + $0xc8] sm:$0xff] %vm283_vm0, %v939_v52  ;;  %v1536_v21 = vmul.f32 %v8681_v25, %v5972_v4 }
 0x152   : > { %11886 = vst [vmem:[#allocation67_spill] sm:$0xff] %v9018_v14  ;;  %475 = vst.msk [vmem:[#allocation2 + $0xd0] sm:$0xff] %vm283_vm0, %v443_v13  ;;  %v11887_v1 = vld [vmem:[#allocation31_spill] sm:$0xff]  ;;  %v3387_v35 = vld [vmem:[#allocation2 + $0x90] sm:$0xff]  ;;  %v1255_v43 = vadd.f32 %v1223_v33, %v1191_v11 }
 0x153   : > { %3765 = vst.msk [vmem:[#allocation2] sm:$0xff] %vm283_vm0, %v3733_v42  ;;  %v3583_v45 = vadd.f32 %v3551_v32, %v11887_v1  ;;  %v11888_v41 = vld [vmem:[#allocation74_spill] sm:$0xff]  ;;  %v2561_v46 = vld [vmem:[#allocation2 + $0xb0] sm:$0xff]  ;;  %295 = vst.msk [vmem:[#allocation2 + $0x58] sm:$0xff] %vm283_vm0, %v262_v60  ;;  %v9040_v1 = vmul.f32 %v8587_v0, %v8987_v38  ;;  %v9045_v60 = vmul.f32 %v8341_v19, %v8997_v7 }
 0x154   : > { %v3088_v34 = vadd.f32 %v3056_v40, %v11888_v41  ;;  %v5467_v24 = vld [vmem:[%s6659_s13 + $0x142] sm:$0xff]  ;;  %v727_v16 = vld [vmem:[#allocation2 + $0x50] sm:$0xff]  ;;  %3287 = vst.msk [vmem:[#allocation2 + $0x98] sm:$0xff] %vm283_vm0, %v3255_v18  ;;  %1949 = vst.msk [vmem:[#allocation2 + $0x40] sm:$0xff] %vm283_vm0, %v1917_v44 }
 0x155   : > { %v3702_v14 = vld [vmem:[#allocation2 + $0x8] sm:$0xff]  ;;  %v11889_v52 = vld [vmem:[#allocation26_spill] sm:$0xff]  ;;  %v9035_v13 = vld [vmem:[%s6659_s13 + $0x2d2] sm:$0xff]  ;;  %v759_v11 = vadd.f32 %v727_v16, %v695_v28  ;;  %11891 = vst [vmem:[#allocation37_spill] sm:$0xff] %v9045_v60 }
 0x156   : > { %v3419_v63 = vadd.f32 %v3387_v35, %v11889_v52  ;;  %v2712_v42 = vld [vmem:[#allocation2 + $0x30] sm:$0xff]  ;;  %v11890_v32 = vld [vmem:[#allocation75_spill] sm:$0xff]  ;;  %3615 = vst.msk [vmem:[#allocation2 + $0x88] sm:$0xff] %vm283_vm0, %v3583_v45  ;;  %3120 = vst.msk [vmem:[#allocation2 + $0xa0] sm:$0xff] %vm283_vm0, %v3088_v34 }
 0x157   : > { %v2593_v40 = vadd.f32 %v2561_v46, %v11890_v32  ;;  %v11892_v33 = vld [vmem:[#allocation76_spill] sm:$0xff]  ;;  %v2892_v18 = vld [vmem:[#allocation2 + $0xa8] sm:$0xff]  ;;  %v2381_v28 = vld [vmem:[#allocation2 + $0x38] sm:$0xff]  ;;  %1287 = vst.msk [vmem:[#allocation2 + $0x48] sm:$0xff] %vm283_vm0, %v1255_v43  ;;  %v1040_v32 = vmul.f32 %v8617_v23, %v5972_v4  ;;  %v364_v4 = vmul.f32 %v8507_v53, %v9022_v27 }
 0x158   : > { %v3734_v35 = vadd.f32 %v3702_v14, %v11892_v33  ;;  %v11893_v41 = vld [vmem:[#allocation40_spill] sm:$0xff]  ;;  %v9052_v52 = vld [vmem:[%s6659_s13 + $0x1a1] sm:$0xff]  ;;  %3451 = vst.msk [vmem:[#allocation2 + $0x90] sm:$0xff] %vm283_vm0, %v3419_v63  ;;  %791 = vst.msk [vmem:[#allocation2 + $0x50] sm:$0xff] %vm283_vm0, %v759_v11  ;;  %v544_v33 = vmul.f32 %v8405_v15, %v508_v48  ;;  %v9071_v63 = vmul.f32 %v8841_v10, %v9035_v13 }
 0x159   : > { %v2744_v46 = vadd.f32 %v2712_v42, %v11893_v41  ;;  %v9056_v0 = vmul.f32 %v9052_v52, %v8744_v39  ;;  %v5668_v44 = vld [vmem:[%s6659_s13 + $0x132] sm:$0xff]  ;;  %v3717_v19 = vld [vmem:[#allocation2 + $0x80] sm:$0xff]  ;;  %2625 = vst.msk [vmem:[#allocation2 + $0xb0] sm:$0xff] %vm283_vm0, %v2593_v40 }
 0x15a   : > { %v11894_v14 = vld [vmem:[#allocation42_spill] sm:$0xff]  ;;  %3766 = vst.msk [vmem:[#allocation2 + $0x8] sm:$0xff] %vm283_vm0, %v3734_v35  ;;  %v3536_v43 = vld [vmem:[#allocation2 + $0x10] sm:$0xff]  ;;  %v2232_v40 = vld [vmem:[#allocation2 + $0xb8] sm:$0xff]  ;;  %v9080_v35 = vmul.f32 %v8380_v20, %v5668_v44  ;;  %v1356_v20 = vmul.f32 %v8911_v62, %v9022_v27 }
 0x15b   : > { %v2924_v45 = vadd.f32 %v2892_v18, %v11894_v14  ;;  %v11895_v34 = vld [vmem:[#allocation34_spill] sm:$0xff]  ;;  %2776 = vst.msk [vmem:[#allocation2 + $0x30] sm:$0xff] %vm283_vm0, %v2744_v46  ;;  %v11897_v11 = vld [vmem:[#allocation77_spill] sm:$0xff]  ;;  %v2018_v46 = vmul.f32 %v8767_v2, %v5467_v24  ;;  %v576_v44 = vld [vmem:[#allocation2 + $0xd0] sm:$0xff] }
 0x15c   : > { %v2413_v16 = vadd.f32 %v2381_v28, %v11895_v34  ;;  %v1568_v42 = vld [vmem:[#allocation2 + $0xc0] sm:$0xff]  ;;  %v3568_v15 = vadd.f32 %v3536_v43, %v11897_v11  ;;  %v3372_v48 = vld [vmem:[#allocation2 + $0x18] sm:$0xff]  ;;  %11898 = vst [vmem:[#allocation30_spill] sm:$0xff] %v9080_v35  ;;  %v11903_v43 = vld [vmem:[#allocation43_spill] sm:$0xff] }
 0x15d   : > { %v11896_v41 = vld [vmem:[#allocation38_spill] sm:$0xff]  ;;  %v1600_v18 = vadd.f32 %v1568_v42, %v1536_v21  ;;  %2956 = vst.msk [vmem:[#allocation2 + $0xa8] sm:$0xff] %vm283_vm0, %v2924_v45  ;;  %v5651_v14 = vld [vmem:[%s6659_s13 + $0x271] sm:$0xff] }
 0x15e   : > { %v3749_v60 = vadd.f32 %v3717_v19, %v11896_v41  ;;  %v3208_v28 = vld [vmem:[#allocation2 + $0x20] sm:$0xff]  ;;  %2445 = vst.msk [vmem:[#allocation2 + $0x38] sm:$0xff] %vm283_vm0, %v2413_v16  ;;  %v2264_v19 = vadd.f32 %v2232_v40, %v8789_v57  ;;  %v11900_v34 = vld [vmem:[#allocation57_spill] sm:$0xff]  ;;  %v3041_v16 = vld [vmem:[#allocation2 + $0x28] sm:$0xff] }
 0x15f   : > { %v6290_v53 = vld [vmem:[%s6659_s13 + $0x2a1] sm:$0xff]  ;;  %v3404_v42 = vadd.f32 %v3372_v48, %v11900_v34  ;;  %v11901_v45 = vld [vmem:[#allocation41_spill] sm:$0xff]  ;;  %1632 = vst.msk [vmem:[#allocation2 + $0xc0] sm:$0xff] %vm283_vm0, %v1600_v18  ;;  %3600 = vst.msk [vmem:[#allocation2 + $0x10] sm:$0xff] %vm283_vm0, %v3568_v15  ;;  %v3073_v40 = vadd.f32 %v3041_v16, %v11903_v43  ;;  %v608_v18 = vadd.f32 %v576_v44, %v544_v33 }
 0x160   : > { %3781 = vst.msk [vmem:[#allocation2 + $0x80] sm:$0xff] %vm283_vm0, %v3749_v60  ;;  %v9088_v21 = vmul.f32 %v6290_v53, %v8835_v61  ;;  %v3240_v41 = vadd.f32 %v3208_v28, %v11901_v45  ;;  %v1072_v57 = vld [vmem:[#allocation2 + $0xc8] sm:$0xff]  ;;  %v3866_v24 = vld [vmem:[#allocation2] sm:$0xff]  ;;  %v9098_v60 = vmul.f32 %v8366_v50, %v8623_v37  ;;  %2296 = vst.msk [vmem:[#allocation2 + $0xb8] sm:$0xff] %vm283_vm0, %v2264_v19 }
 0x161   : > { %v5417_v11 = vld [vmem:[%s6659_s13 + $0x280] sm:$0xff]  ;;  %v1104_v48 = vadd.f32 %v1072_v57, %v1040_v32  ;;  %v396_v28 = vld [vmem:[#allocation2 + $0x58] sm:$0xff]  ;;  %v11904_v53 = vld [vmem:[#allocation36_spill] sm:$0xff]  ;;  %3436 = vst.msk [vmem:[#allocation2 + $0x18] sm:$0xff] %vm283_vm0, %v3404_v42  ;;  %v860_v19 = vmul.f32 %v8469_v51, %v9022_v27  ;;  %v9119_v42 = vmul.f32 %v8359_v36, %v8835_v61  ;;  %v9123_v57 = vmul.f32 %v8731_v6, %v8435_v29 }
 0x162   : > { %11899 = vst [vmem:[#allocation70_spill] sm:$0xff] %v9088_v21  ;;  %11902 = vst [vmem:[#allocation69_spill] sm:$0xff] %v9098_v60  ;;  %v3898_v34 = vadd.f32 %v3866_v24, %v11904_v53  ;;  %v3388_v45 = vld [vmem:[#allocation2 + $0x98] sm:$0xff]  ;;  %v9109_v50 = vld [vmem:[%s11598_s1 + $0x10] ss:$0 sm:$0xff]  ;;  %v428_v16 = vadd.f32 %v396_v28, %v364_v4 }
 0x163   : > { %3272 = vst.msk [vmem:[#allocation2 + $0x20] sm:$0xff] %vm283_vm0, %v3240_v41  ;;  %v9112_v15 = vmul.f32 %v9109_v50, %v5651_v14  ;;  %v2050_v32 = vld [vmem:[#allocation2 + $0x40] sm:$0xff]  ;;  %v5907_v33 = vld [vmem:[%s6659_s13 + $0x210] sm:$0xff]  ;;  %v3718_v41 = vld [vmem:[#allocation2 + $0x88] sm:$0xff] }
 0x164   : > { %11906 = vst [vmem:[#allocation23_spill] sm:$0xff] %v9123_v57  ;;  %v11907_v44 = vld [vmem:[#allocation6_spill] sm:$0xff]  ;;  %3105 = vst.msk [vmem:[#allocation2 + $0x28] sm:$0xff] %vm283_vm0, %v3073_v40  ;;  %v2082_v14 = vadd.f32 %v2050_v32, %v2018_v46  ;;  %v9128_v53 = vld [vmem:[%s6659_s13 + $0x150] sm:$0xff]  ;;  %v1704_v40 = vmul.f32 %v8853_v3, %v5417_v11 }
 0x165   : > { %11905 = vst [vmem:[#allocation71_spill] sm:$0xff] %v9112_v15  ;;  %v3420_v24 = vadd.f32 %v3388_v45, %v11907_v44  ;;  %v3224_v43 = vld [vmem:[#allocation2 + $0xa0] sm:$0xff]  ;;  %v1388_v51 = vld [vmem:[#allocation2 + $0x48] sm:$0xff]  ;;  %v9131_v27 = vld [vmem:[%s6659_s13 + $0xd2] sm:$0xff] }
 0x166   : > { %1136 = vst.msk [vmem:[#allocation2 + $0xc8] sm:$0xff] %vm283_vm0, %v1104_v48  ;;  %640 = vst.msk [vmem:[#allocation2 + $0xd0] sm:$0xff] %vm283_vm0, %v608_v18  ;;  %v11908_v36 = vld [vmem:[#allocation44_spill] sm:$0xff]  ;;  %v11909_v4 = vld [vmem:[#allocation21_spill] sm:$0xff]  ;;  %v1420_v46 = vadd.f32 %v1388_v51, %v1356_v20  ;;  %v9154_v20 = vmul.f32 %v8962_v17, %v8882_v22  ;;  %v9164_v22 = vmul.f32 %v8785_v56, %v9128_v53 }
 0x167   : > { %3930 = vst.msk [vmem:[#allocation2] sm:$0xff] %vm283_vm0, %v3898_v34  ;;  %v3750_v29 = vadd.f32 %v3718_v41, %v11908_v36  ;;  %v3552_v6 = vld [vmem:[#allocation2 + $0x90] sm:$0xff]  ;;  %v3256_v28 = vadd.f32 %v3224_v43, %v11909_v4  ;;  %460 = vst.msk [vmem:[#allocation2 + $0x58] sm:$0xff] %vm283_vm0, %v428_v16  ;;  %v3867_v44 = vld [vmem:[#allocation2 + $0x8] sm:$0xff]  ;;  %v1207_v56 = vmul.f32 %v8757_v49, %v5907_v33 }
 0x168   : > { %v2728_v45 = vld [vmem:[#allocation2 + $0xb0] sm:$0xff]  ;;  %v11910_v57 = vld [vmem:[#allocation39_spill] sm:$0xff]  ;;  %3452 = vst.msk [vmem:[#allocation2 + $0x98] sm:$0xff] %vm283_vm0, %v3420_v24  ;;  %v11911_v18 = vld [vmem:[#allocation33_spill] sm:$0xff] }
 0x169   : > { %v242_v32 = vld [vmem:[%s6659_s13 + $0x210] sm:$0xff]  ;;  %v3584_v15 = vadd.f32 %v3552_v6, %v11910_v57  ;;  %11913 = vst [vmem:[#allocation72_spill] sm:$0xff] %v9154_v20  ;;  %v11914_v16 = vld [vmem:[#allocation13_spill] sm:$0xff]  ;;  %2114 = vst.msk [vmem:[#allocation2 + $0x40] sm:$0xff] %vm283_vm0, %v2082_v14 }
 0x16a   : > { %v9146_v48 = vld [vmem:[%s11598_s1 + $0x16] ss:$0 sm:$0xff]  ;;  %v2760_v41 = vadd.f32 %v2728_v45, %v11914_v16  ;;  %3782 = vst.msk [vmem:[#allocation2 + $0x88] sm:$0xff] %vm283_vm0, %v3750_v29  ;;  %3288 = vst.msk [vmem:[#allocation2 + $0xa0] sm:$0xff] %vm283_vm0, %v3256_v28  ;;  %v3057_v51 = vld [vmem:[#allocation2 + $0xa8] sm:$0xff] }
 0x16b   : > { %v9150_v34 = vmul.f32 %v9146_v48, %v11911_v18  ;;  %v2877_v11 = vld [vmem:[#allocation2 + $0x30] sm:$0xff]  ;;  %v11916_v36 = vld [vmem:[#allocation10_spill] sm:$0xff]  ;;  %v2546_v4 = vld [vmem:[#allocation2 + $0x38] sm:$0xff]  ;;  %1452 = vst.msk [vmem:[#allocation2 + $0x48] sm:$0xff] %vm283_vm0, %v1420_v46 }
 0x16c   : > { %v892_v57 = vld [vmem:[#allocation2 + $0x50] sm:$0xff]  ;;  %v2909_v6 = vadd.f32 %v2877_v11, %v11916_v36  ;;  %v3882_v45 = vld [vmem:[#allocation2 + $0x80] sm:$0xff]  ;;  %3616 = vst.msk [vmem:[#allocation2 + $0x90] sm:$0xff] %vm283_vm0, %v3584_v15  ;;  %2792 = vst.msk [vmem:[#allocation2 + $0xb0] sm:$0xff] %vm283_vm0, %v2760_v41 }
 0x16d   : > { %11912 = vst [vmem:[#allocation32_spill] sm:$0xff] %v9150_v34  ;;  %v11915_v24 = vld [vmem:[#allocation48_spill] sm:$0xff]  ;;  %v924_v14 = vadd.f32 %v892_v57, %v860_v19  ;;  %v11918_v28 = vld [vmem:[#allocation47_spill] sm:$0xff]  ;;  %v1736_v16 = vld [vmem:[#allocation2 + $0xc0] sm:$0xff] }
 0x16e   : > { %v3899_v43 = vadd.f32 %v3867_v44, %v11915_v24  ;;  %v11917_v44 = vld [vmem:[#allocation46_spill] sm:$0xff]  ;;  %v2578_v18 = vadd.f32 %v2546_v4, %v11918_v28  ;;  %v9172_v11 = vld [vmem:[%s6659_s13 + $0x151] sm:$0xff]  ;;  %v711_v24 = vmul.f32 %v8549_v47, %v5907_v33  ;;  %v11919_v46 = vld [vmem:[#allocation7_spill] sm:$0xff]  ;;  %2941 = vst.msk [vmem:[#allocation2 + $0x30] sm:$0xff] %vm283_vm0, %v2909_v6 }
 0x16f   : > { %v3089_v29 = vadd.f32 %v3057_v51, %v11917_v44  ;;  %v3914_v36 = vadd.f32 %v3882_v45, %v11919_v46  ;;  %v3703_v19 = vld [vmem:[#allocation2 + $0x10] sm:$0xff]  ;;  %v2397_v15 = vld [vmem:[#allocation2 + $0xb8] sm:$0xff]  ;;  %v9183_v41 = vld [vmem:[%s6659_s13 + $0x160] sm:$0xff]  ;;  %v1768_v51 = vadd.f32 %v1736_v16, %v1704_v40  ;;  %956 = vst.msk [vmem:[#allocation2 + $0x50] sm:$0xff] %vm283_vm0, %v924_v14 }
 0x170   : > { %3931 = vst.msk [vmem:[#allocation2 + $0x8] sm:$0xff] %vm283_vm0, %v3899_v43  ;;  %v9180_v57 = vld [vmem:[%s6659_s13 + $0x152] sm:$0xff]  ;;  %11921 = vst [vmem:[#allocation16_spill] sm:$0xff] %v9183_v41  ;;  %v9189_v47 = vld [vmem:[%s11598_s1 + $0x2] ss:$0 sm:$0xff]  ;;  %v2429_v14 = vadd.f32 %v2397_v15, %v8798_v30 }
 0x171   : > { %11920 = vst [vmem:[#allocation73_spill] sm:$0xff] %v9180_v57  ;;  %v529_v33 = vmul.f32 %v9189_v47, %v9131_v27  ;;  %v9196_v43 = vld [vmem:[%s11598_s1] ss:$0 sm:$0xff]  ;;  %v11922_v4 = vld [vmem:[#allocation63_spill] sm:$0xff]  ;;  %v3537_v40 = vld [vmem:[#allocation2 + $0x18] sm:$0xff] }
 0x172   : > { %v278_v6 = vmul.f32 %v9196_v43, %v242_v32  ;;  %v3735_v45 = vadd.f32 %v3703_v19, %v11922_v4  ;;  %v3373_v44 = vld [vmem:[#allocation2 + $0x20] sm:$0xff]  ;;  %3121 = vst.msk [vmem:[#allocation2 + $0xa8] sm:$0xff] %vm283_vm0, %v3089_v29  ;;  %2610 = vst.msk [vmem:[#allocation2 + $0x38] sm:$0xff] %vm283_vm0, %v2578_v18  ;;  %v11925_v32 = vld [vmem:[#allocation49_spill] sm:$0xff] }
 0x173   : > { %v11923_v28 = vld [vmem:[#allocation22_spill] sm:$0xff]  ;;  %3946 = vst.msk [vmem:[#allocation2 + $0x80] sm:$0xff] %vm283_vm0, %v3914_v36  ;;  %v3569_v19 = vadd.f32 %v3537_v40, %v11925_v32  ;;  %v9217_v29 = vld [vmem:[%s11598_s1 + $0x17] ss:$0 sm:$0xff]  ;;  %v11928_v15 = vld [vmem:[#allocation53_spill] sm:$0xff]  ;;  %v1521_v36 = vmul.f32 %v8681_v25, %v9131_v27 }
 0x174   : > { %v9205_v16 = vmul.f32 %v11923_v28, %v9172_v11  ;;  %v11924_v46 = vld [vmem:[#allocation58_spill] sm:$0xff]  ;;  %v11926_v18 = vld [vmem:[#allocation12_spill] sm:$0xff]  ;;  %v3405_v4 = vadd.f32 %v3373_v44, %v11928_v15  ;;  %v3209_v28 = vld [vmem:[#allocation2 + $0x28] sm:$0xff]  ;;  %1800 = vst.msk [vmem:[#allocation2 + $0xc0] sm:$0xff] %vm283_vm0, %v1768_v51  ;;  %v9233_v44 = vmul.f32 %v8933_v26, %v9183_v41  ;;  %v1025_v26 = vmul.f32 %v8617_v23, %v9131_v27 }
 0x175   : > { %v9209_v20 = vmul.f32 %v11924_v46, %v9180_v57  ;;  %v5450_v34 = vld [vmem:[%s6659_s13 + $0x281] sm:$0xff]  ;;  %v9221_v30 = vmul.f32 %v9217_v29, %v11926_v18  ;;  %v743_v46 = vld [vmem:[#allocation2 + $0xd0] sm:$0xff]  ;;  %311 = vst.msk [vmem:[#allocation2 + $0xd8] sm:$0xff] %vm283_vm0, %v278_v6  ;;  %3767 = vst.msk [vmem:[#allocation2 + $0x10] sm:$0xff] %vm283_vm0, %v3735_v45 }
 0x176   : > { %v1239_v40 = vld [vmem:[#allocation2 + $0xc8] sm:$0xff]  ;;  %v4031_v32 = vld [vmem:[#allocation2] sm:$0xff]  ;;  %v11929_v18 = vld [vmem:[#allocation45_spill] sm:$0xff]  ;;  %2461 = vst.msk [vmem:[#allocation2 + $0xb8] sm:$0xff] %vm283_vm0, %v2429_v14  ;;  %v775_v15 = vadd.f32 %v743_v46, %v711_v24 }
 0x177   : > { %11927 = vst [vmem:[#allocation28_spill] sm:$0xff] %v9221_v30  ;;  %v3241_v30 = vadd.f32 %v3209_v28, %v11929_v18  ;;  %v1271_v51 = vadd.f32 %v1239_v40, %v1207_v56  ;;  %v561_v57 = vld [vmem:[#allocation2 + $0x58] sm:$0xff]  ;;  %3601 = vst.msk [vmem:[#allocation2 + $0x18] sm:$0xff] %vm283_vm0, %v3569_v19  ;;  %v9244_v14 = vld [vmem:[%s6659_s13 + $0x2e1] sm:$0xff] }
 0x178   : > { %v344_v25 = vld [vmem:[%s6659_s13 + $0x211] sm:$0xff]  ;;  %3437 = vst.msk [vmem:[#allocation2 + $0x20] sm:$0xff] %vm283_vm0, %v3405_v4  ;;  %v2217_v28 = vld [vmem:[#allocation2 + $0x40] sm:$0xff]  ;;  %v593_v56 = vadd.f32 %v561_v57, %v529_v33  ;;  %v3883_v24 = vld [vmem:[#allocation2 + $0x88] sm:$0xff]  ;;  %v1869_v4 = vmul.f32 %v8723_v12, %v5450_v34 }
 0x179   : > { %v11930_v60 = vld [vmem:[#allocation25_spill] sm:$0xff]  ;;  %v11931_v40 = vld [vmem:[#allocation50_spill] sm:$0xff]  ;;  %3273 = vst.msk [vmem:[#allocation2 + $0x28] sm:$0xff] %vm283_vm0, %v3241_v30  ;;  %v2249_v19 = vadd.f32 %v2217_v28, %v9164_v22  ;;  %v1553_v18 = vld [vmem:[#allocation2 + $0x48] sm:$0xff] }
 0x17a   : > { %v4063_v21 = vadd.f32 %v4031_v32, %v11930_v60  ;;  %v6296_v35 = vld [vmem:[%s6659_s13 + $0x2b1] sm:$0xff]  ;;  %v3389_v46 = vld [vmem:[#allocation2 + $0xa0] sm:$0xff]  ;;  %1303 = vst.msk [vmem:[#allocation2 + $0xc8] sm:$0xff] %vm283_vm0, %v1271_v51  ;;  %807 = vst.msk [vmem:[#allocation2 + $0xd0] sm:$0xff] %vm283_vm0, %v775_v15 }
 0x17b   : > { %v9239_v6 = vmul.f32 %v6296_v35, %v8835_v61  ;;  %v3553_v45 = vld [vmem:[#allocation2 + $0x98] sm:$0xff]  ;;  %v11933_v23 = vld [vmem:[#allocation78_spill] sm:$0xff]  ;;  %v3719_v57 = vld [vmem:[#allocation2 + $0x90] sm:$0xff]  ;;  %625 = vst.msk [vmem:[#allocation2 + $0x58] sm:$0xff] %vm283_vm0, %v593_v56 }
 0x17c   : > { %v3585_v60 = vadd.f32 %v3553_v45, %v11931_v40  ;;  %v11932_v32 = vld [vmem:[#allocation61_spill] sm:$0xff]  ;;  %4095 = vst.msk [vmem:[#allocation2] sm:$0xff] %vm283_vm0, %v4063_v21  ;;  %v3915_v27 = vadd.f32 %v3883_v24, %v11933_v23  ;;  %v11934_v33 = vld [vmem:[#allocation51_spill] sm:$0xff]  ;;  %v2893_v40 = vld [vmem:[#allocation2 + $0xb0] sm:$0xff] }
 0x17d   : > { %v9251_v35 = vmul.f32 %v9146_v48, %v11932_v32  ;;  %v3421_v45 = vadd.f32 %v3389_v46, %v11934_v33  ;;  %v1585_v32 = vadd.f32 %v1553_v18, %v1521_v36  ;;  %v5940_v30 = vld [vmem:[%s6659_s13 + $0x211] sm:$0xff]  ;;  %v9266_v12 = vld [vmem:[%s11598_s1 + $0x1] ss:$0 sm:$0xff]  ;;  %v4032_v22 = vld [vmem:[#allocation2 + $0x8] sm:$0xff]  ;;  %v9278_v46 = vmul.f32 %v8744_v39, %v9244_v14  ;;  %2281 = vst.msk [vmem:[#allocation2 + $0x40] sm:$0xff] %vm283_vm0, %v2249_v19 }
 0x17e   : > { %v380_v34 = vmul.f32 %v9266_v12, %v344_v25  ;;  %v11935_v21 = vld [vmem:[#allocation14_spill] sm:$0xff]  ;;  %3617 = vst.msk [vmem:[#allocation2 + $0x98] sm:$0xff] %vm283_vm0, %v3585_v60  ;;  %v3042_v36 = vld [vmem:[#allocation2 + $0x30] sm:$0xff]  ;;  %v11938_v18 = vld [vmem:[#allocation19_spill] sm:$0xff] }
 0x17f   : > { %v3751_v51 = vadd.f32 %v3719_v57, %v11935_v21  ;;  %v6298_v15 = vld [vmem:[%s6659_s13 + $0x2c0] sm:$0xff]  ;;  %v11936_v56 = vld [vmem:[#allocation52_spill] sm:$0xff]  ;;  %11937 = vst [vmem:[#allocation31_spill] sm:$0xff] %v9278_v46  ;;  %v4064_v23 = vadd.f32 %v4032_v22, %v11938_v18  ;;  %3947 = vst.msk [vmem:[#allocation2 + $0x88] sm:$0xff] %vm283_vm0, %v3915_v27 }
 0x180   : > { %v9272_v28 = vmul.f32 %v6298_v15, %v8623_v37  ;;  %v2925_v24 = vadd.f32 %v2893_v40, %v11936_v56  ;;  %v1057_v25 = vld [vmem:[#allocation2 + $0x50] sm:$0xff]  ;;  %3453 = vst.msk [vmem:[#allocation2 + $0xa0] sm:$0xff] %vm283_vm0, %v3421_v45  ;;  %v3225_v37 = vld [vmem:[#allocation2 + $0xa8] sm:$0xff]  ;;  %v2713_v39 = vld [vmem:[#allocation2 + $0x38] sm:$0xff] }
 0x181   : > { %v11939_v57 = vld [vmem:[#allocation11_spill] sm:$0xff]  ;;  %1617 = vst.msk [vmem:[#allocation2 + $0x48] sm:$0xff] %vm283_vm0, %v1585_v32  ;;  %v1089_v19 = vadd.f32 %v1057_v25, %v1025_v26  ;;  %v9294_v21 = vld [vmem:[%s6659_s13 + $0xe0] sm:$0xff]  ;;  %3783 = vst.msk [vmem:[#allocation2 + $0x90] sm:$0xff] %vm283_vm0, %v3751_v51 }
 0x182   : > { %v3074_v60 = vadd.f32 %v3042_v36, %v11939_v57  ;;  %v9286_v33 = vld [vmem:[%s6659_s13 + $0x1a2] sm:$0xff]  ;;  %v11942_v27 = vld [vmem:[#allocation24_spill] sm:$0xff]  ;;  %2957 = vst.msk [vmem:[#allocation2 + $0xb0] sm:$0xff] %vm283_vm0, %v2925_v24  ;;  %v412_v25 = vld [vmem:[#allocation2 + $0xd8] sm:$0xff] }
 0x183   : > { %11940 = vst [vmem:[#allocation74_spill] sm:$0xff] %v9286_v33  ;;  %v9290_v40 = vmul.f32 %v9286_v33, %v8841_v10  ;;  %v4047_v22 = vld [vmem:[#allocation2 + $0x80] sm:$0xff]  ;;  %v3257_v45 = vadd.f32 %v3225_v37, %v11942_v27  ;;  %v11943_v15 = vld [vmem:[#allocation8_spill] sm:$0xff]  ;;  %v1372_v10 = vmul.f32 %v8911_v62, %v5940_v30  ;;  %4096 = vst.msk [vmem:[#allocation2 + $0x8] sm:$0xff] %vm283_vm0, %v4064_v23 }
 0x184   : > { %v2745_v36 = vadd.f32 %v2713_v39, %v11943_v15  ;;  %v1901_v56 = vld [vmem:[#allocation2 + $0xc0] sm:$0xff]  ;;  %v11944_v18 = vld [vmem:[#allocation60_spill] sm:$0xff]  ;;  %3106 = vst.msk [vmem:[#allocation2 + $0x30] sm:$0xff] %vm283_vm0, %v3074_v60  ;;  %v2562_v24 = vld [vmem:[#allocation2 + $0xb8] sm:$0xff]  ;;  %v444_v23 = vadd.f32 %v412_v25, %v380_v34 }
 0x185   : > { %11941 = vst [vmem:[#allocation26_spill] sm:$0xff] %v9290_v40  ;;  %v9304_v32 = vld [vmem:[%s11598_s1 + $0x4] ss:$0 sm:$0xff]  ;;  %v4079_v57 = vadd.f32 %v4047_v22, %v11944_v18  ;;  %v3868_v51 = vld [vmem:[#allocation2 + $0x10] sm:$0xff]  ;;  %v1933_v39 = vadd.f32 %v1901_v56, %v1869_v4  ;;  %1121 = vst.msk [vmem:[#allocation2 + $0x50] sm:$0xff] %vm283_vm0, %v1089_v19  ;;  %v9323_v4 = vmul.f32 %v8962_v17, %v8987_v38 }
 0x186   : > { %v876_v26 = vmul.f32 %v9304_v32, %v5940_v30  ;;  %v5684_v37 = vld [vmem:[%s6659_s13 + $0x272] sm:$0xff]  ;;  %v9315_v30 = vld [vmem:[%s11598_s1 + $0x3] ss:$0 sm:$0xff]  ;;  %3289 = vst.msk [vmem:[#allocation2 + $0xa8] sm:$0xff] %vm283_vm0, %v3257_v45  ;;  %2777 = vst.msk [vmem:[#allocation2 + $0x38] sm:$0xff] %vm283_vm0, %v2745_v36 }
 0x187   : > { %v696_v22 = vmul.f32 %v9315_v30, %v9294_v21  ;;  %v11945_v27 = vld [vmem:[#allocation54_spill] sm:$0xff]  ;;  %v3704_v18 = vld [vmem:[#allocation2 + $0x18] sm:$0xff]  ;;  %11946 = vst [vmem:[#allocation75_spill] sm:$0xff] %v9323_v4  ;;  %v9327_v19 = vld [vmem:[%s6659_s13 + $0x1b0] sm:$0xff] }
 0x188   : > { %v3900_v15 = vadd.f32 %v3868_v51, %v11945_v27  ;;  %v3538_v60 = vld [vmem:[#allocation2 + $0x20] sm:$0xff]  ;;  %11947 = vst [vmem:[#allocation76_spill] sm:$0xff] %v9327_v19  ;;  %v9332_v56 = vld [vmem:[%s11598_s1 + $0x12] ss:$0 sm:$0xff]  ;;  %4111 = vst.msk [vmem:[#allocation2 + $0x80] sm:$0xff] %vm283_vm0, %v4079_v57 }
 0x189   : > { %11948 = vst [vmem:[#allocation40_spill] sm:$0xff] %v9332_v56  ;;  %v9336_v34 = vmul.f32 %v9332_v56, %v9327_v19  ;;  %v11950_v25 = vld [vmem:[#allocation62_spill] sm:$0xff]  ;;  %v11951_v27 = vld [vmem:[#allocation27_spill] sm:$0xff]  ;;  %1965 = vst.msk [vmem:[#allocation2 + $0xc0] sm:$0xff] %vm283_vm0, %v1933_v39 }
 0x18a   : > { %v2594_v45 = vadd.f32 %v2562_v24, %v11950_v25  ;;  %v5483_v51 = vld [vmem:[%s6659_s13 + $0x282] sm:$0xff]  ;;  %v3736_v41 = vadd.f32 %v3704_v18, %v11951_v27  ;;  %v908_v24 = vld [vmem:[#allocation2 + $0xd0] sm:$0xff]  ;;  %476 = vst.msk [vmem:[#allocation2 + $0xd8] sm:$0xff] %vm283_vm0, %v444_v23  ;;  %3932 = vst.msk [vmem:[#allocation2 + $0x10] sm:$0xff] %vm283_vm0, %v3900_v15 }
 0x18b   : > { %11949 = vst [vmem:[#allocation42_spill] sm:$0xff] %v9336_v34  ;;  %v6304_v38 = vld [vmem:[%s6659_s13 + $0x2a2] sm:$0xff]  ;;  %v1689_v34 = vmul.f32 %v8853_v3, %v9128_v53  ;;  %v11954_v18 = vld [vmem:[#allocation56_spill] sm:$0xff]  ;;  %v728_v23 = vld [vmem:[#allocation2 + $0x58] sm:$0xff] }
 0x18c   : > { %v9343_v36 = vmul.f32 %v6304_v38, %v8997_v7  ;;  %v11952_v33 = vld [vmem:[#allocation15_spill] sm:$0xff]  ;;  %v4198_v57 = vld [vmem:[#allocation2] sm:$0xff]  ;;  %2626 = vst.msk [vmem:[#allocation2 + $0xb8] sm:$0xff] %vm283_vm0, %v2594_v45  ;;  %v9361_v3 = vld [vmem:[%s11598_s1 + $0x11] ss:$0 sm:$0xff]  ;;  %v1192_v45 = vmul.f32 %v8757_v49, %v9294_v21 }
 0x18d   : > { %v3570_v4 = vadd.f32 %v3538_v60, %v11952_v33  ;;  %v3374_v40 = vld [vmem:[#allocation2 + $0x28] sm:$0xff]  ;;  %11955 = vst [vmem:[#allocation38_spill] sm:$0xff] %v9361_v3  ;;  %v9364_v53 = vmul.f32 %v9361_v3, %v5684_v37  ;;  %v509_v15 = vld [vmem:[%s6659_s13 + $0x212] sm:$0xff]  ;;  %3768 = vst.msk [vmem:[#allocation2 + $0x18] sm:$0xff] %vm283_vm0, %v3736_v41 }
 0x18e   : > { %v1404_v46 = vld [vmem:[#allocation2 + $0xc8] sm:$0xff]  ;;  %v3406_v33 = vadd.f32 %v3374_v40, %v11954_v18  ;;  %v2382_v40 = vld [vmem:[#allocation2 + $0x40] sm:$0xff]  ;;  %v760_v18 = vadd.f32 %v728_v23, %v696_v22  ;;  %v3884_v22 = vld [vmem:[#allocation2 + $0x90] sm:$0xff] }
 0x18f   : > { %v6305_v25 = vld [vmem:[%s6659_s13 + $0x181] sm:$0xff]  ;;  %v1436_v39 = vadd.f32 %v1404_v46, %v1372_v10  ;;  %3602 = vst.msk [vmem:[#allocation2 + $0x20] sm:$0xff] %vm283_vm0, %v3570_v4  ;;  %v11957_v10 = vld [vmem:[#allocation9_spill] sm:$0xff]  ;;  %v2414_v41 = vadd.f32 %v2382_v40, %v9205_v16  ;;  %v2034_v4 = vmul.f32 %v8767_v2, %v5483_v51  ;;  %v3058_v23 = vld [vmem:[#allocation2 + $0xb0] sm:$0xff]  ;;  %v545_v16 = vmul.f32 %v9189_v47, %v509_v15 }
 0x190   : > { %v9354_v38 = vmul.f32 %v6305_v25, %v8835_v61  ;;  %v11956_v60 = vld [vmem:[#allocation55_spill] sm:$0xff]  ;;  %v3720_v61 = vld [vmem:[#allocation2 + $0x98] sm:$0xff]  ;;  %v940_v25 = vadd.f32 %v908_v24, %v876_v26  ;;  %3438 = vst.msk [vmem:[#allocation2 + $0x28] sm:$0xff] %vm283_vm0, %v3406_v33  ;;  %v11959_v24 = vld [vmem:[#allocation20_spill] sm:$0xff] }
 0x191   : > { %v4230_v27 = vadd.f32 %v4198_v57, %v11956_v60  ;;  %v4048_v46 = vld [vmem:[#allocation2 + $0x88] sm:$0xff]  ;;  %v3752_v3 = vadd.f32 %v3720_v61, %v11957_v10  ;;  %v3554_v57 = vld [vmem:[#allocation2 + $0xa0] sm:$0xff]  ;;  %1468 = vst.msk [vmem:[#allocation2 + $0xc8] sm:$0xff] %vm283_vm0, %v1436_v39  ;;  %v5973_v10 = vld [vmem:[%s6659_s13 + $0x212] sm:$0xff] }
 0x192   : > { %11953 = vst [vmem:[#allocation34_spill] sm:$0xff] %v9354_v38  ;;  %v6307_v38 = vld [vmem:[%s6659_s13 + $0x172] sm:$0xff]  ;;  %v1721_v60 = vld [vmem:[#allocation2 + $0x48] sm:$0xff]  ;;  %972 = vst.msk [vmem:[#allocation2 + $0xd0] sm:$0xff] %vm283_vm0, %v940_v25 }
 0x193   : > { %v9374_v37 = vmul.f32 %v6307_v38, %v8997_v7  ;;  %4262 = vst.msk [vmem:[#allocation2] sm:$0xff] %vm283_vm0, %v4230_v27  ;;  %v11958_v49 = vld [vmem:[#allocation35_spill] sm:$0xff]  ;;  %v3586_v38 = vadd.f32 %v3554_v57, %v11959_v24  ;;  %v1753_v61 = vadd.f32 %v1721_v60, %v1689_v34  ;;  %792 = vst.msk [vmem:[#allocation2 + $0x58] sm:$0xff] %vm283_vm0, %v760_v18  ;;  %v11960_v51 = vld [vmem:[#allocation29_spill] sm:$0xff] }
 0x194   : > { %v4080_v26 = vadd.f32 %v4048_v46, %v11958_v49  ;;  %v4199_v2 = vld [vmem:[#allocation2 + $0x8] sm:$0xff]  ;;  %v3916_v33 = vadd.f32 %v3884_v22, %v11960_v51  ;;  %v6308_v39 = vld [vmem:[%s6659_s13 + $0x190] sm:$0xff]  ;;  %v9393_v27 = vld [vmem:[%s11598_s1 + $0x18] ss:$0 sm:$0xff]  ;;  %3784 = vst.msk [vmem:[#allocation2 + $0x98] sm:$0xff] %vm283_vm0, %v3752_v3  ;;  %v263_v46 = vmul.f32 %v9196_v43, %v9294_v21  ;;  %v9407_v60 = vmul.f32 %v9217_v29, %v8977_v59 }
 0x195   : > { %v9396_v40 = vmul.f32 %v9393_v27, %v6308_v39  ;;  %v3210_v34 = vld [vmem:[#allocation2 + $0x30] sm:$0xff]  ;;  %v11961_v25 = vld [vmem:[#allocation59_spill] sm:$0xff]  ;;  %2446 = vst.msk [vmem:[#allocation2 + $0x40] sm:$0xff] %vm283_vm0, %v2414_v41  ;;  %v4231_v57 = vadd.f32 %v4199_v2, %v8951_v31  ;;  %3618 = vst.msk [vmem:[#allocation2 + $0xa0] sm:$0xff] %vm283_vm0, %v3586_v38 }
 0x196   : > { %v3090_v18 = vadd.f32 %v3058_v23, %v11961_v25  ;;  %v1224_v15 = vld [vmem:[#allocation2 + $0x50] sm:$0xff]  ;;  %4112 = vst.msk [vmem:[#allocation2 + $0x88] sm:$0xff] %vm283_vm0, %v4080_v26  ;;  %v3390_v3 = vld [vmem:[#allocation2 + $0xa8] sm:$0xff]  ;;  %v11962_v49 = vld [vmem:[#allocation65_spill] sm:$0xff] }
 0x197   : > { %v3242_v22 = vadd.f32 %v3210_v34, %v11962_v49  ;;  %v2878_v24 = vld [vmem:[#allocation2 + $0x38] sm:$0xff]  ;;  %1785 = vst.msk [vmem:[#allocation2 + $0x48] sm:$0xff] %vm283_vm0, %v1753_v61  ;;  %v1256_v41 = vadd.f32 %v1224_v15, %v1192_v45  ;;  %v5335_v23 = vld [vmem:[%s6659_s13 + $0xe1] sm:$0xff]  ;;  %3948 = vst.msk [vmem:[#allocation2 + $0x90] sm:$0xff] %vm283_vm0, %v3916_v33 }
 0x198   : > { %v4214_v51 = vld [vmem:[#allocation2 + $0x80] sm:$0xff]  ;;  %v11963_v31 = vld [vmem:[#allocation17_spill] sm:$0xff]  ;;  %3122 = vst.msk [vmem:[#allocation2 + $0xb0] sm:$0xff] %vm283_vm0, %v3090_v18  ;;  %v11964_v59 = vld [vmem:[#allocation79_spill] sm:$0xff]  ;;  %v861_v49 = vmul.f32 %v9304_v32, %v5335_v23 }
 0x199   : > { %v3422_v21 = vadd.f32 %v3390_v3, %v11963_v31  ;;  %v2910_v26 = vadd.f32 %v2878_v24, %v11964_v59  ;;  %v2066_v2 = vld [vmem:[#allocation2 + $0xc0] sm:$0xff]  ;;  %v9420_v38 = vld [vmem:[%s11598_s1 + $0x8] ss:$0 sm:$0xff]  ;;  %v577_v39 = vld [vmem:[#allocation2 + $0xd8] sm:$0xff]  ;;  %296 = vst.msk [vmem:[#allocation2 + $0x60] sm:$0xff] %vm283_vm0, %v263_v46  ;;  %v4246_v34 = vadd.f32 %v4214_v51, %v8916_v8 }
 0x19a   : > { %v1537_v61 = vmul.f32 %v9420_v38, %v5973_v10  ;;  %v9426_v45 = vld [vmem:[%s11598_s1 + $0x5] ss:$0 sm:$0xff]  ;;  %4263 = vst.msk [vmem:[#allocation2 + $0x8] sm:$0xff] %vm283_vm0, %v4231_v57  ;;  %v4033_v25 = vld [vmem:[#allocation2 + $0x10] sm:$0xff]  ;;  %3274 = vst.msk [vmem:[#allocation2 + $0x30] sm:$0xff] %vm283_vm0, %v3242_v22  ;;  %v2098_v3 = vadd.f32 %v2066_v2, %v2034_v4  ;;  %v9445_v22 = vmul.f32 %v9146_v48, %v9052_v52 }
 0x19b   : > { %v1041_v33 = vmul.f32 %v9426_v45, %v5973_v10  ;;  %v2729_v18 = vld [vmem:[#allocation2 + $0xb8] sm:$0xff]  ;;  %v9434_v15 = vld [vmem:[%s6659_s13 + $0x161] sm:$0xff]  ;;  %1288 = vst.msk [vmem:[#allocation2 + $0x50] sm:$0xff] %vm283_vm0, %v1256_v41  ;;  %v609_v10 = vadd.f32 %v577_v39, %v545_v16  ;;  %v4065_v24 = vadd.f32 %v4033_v25, %v8926_v58  ;;  %v6312_v8 = vld [vmem:[%s6659_s13 + $0x2d0] sm:$0xff] }
 0x19c   : > { %11965 = vst [vmem:[#allocation77_spill] sm:$0xff] %v9434_v15  ;;  %v3869_v46 = vld [vmem:[#allocation2 + $0x18] sm:$0xff]  ;;  %v9441_v57 = vmul.f32 %v6312_v8, %v9393_v27  ;;  %v3705_v51 = vld [vmem:[#allocation2 + $0x20] sm:$0xff]  ;;  %3454 = vst.msk [vmem:[#allocation2 + $0xa8] sm:$0xff] %vm283_vm0, %v3422_v21  ;;  %v2761_v4 = vadd.f32 %v2729_v18, %v8936_v5  ;;  %v9458_v52 = vmul.f32 %v9109_v50, %v9434_v15 }
 0x19d   : > { %2942 = vst.msk [vmem:[#allocation2 + $0x38] sm:$0xff] %vm283_vm0, %v2910_v26  ;;  %v9451_v16 = vld [vmem:[%s6659_s13 + $0x220] sm:$0xff]  ;;  %4278 = vst.msk [vmem:[#allocation2 + $0x80] sm:$0xff] %vm283_vm0, %v4246_v34  ;;  %v3901_v58 = vadd.f32 %v3869_v46, %v8955_v54  ;;  %v3737_v41 = vadd.f32 %v3705_v51, %v8966_v55  ;;  %v3539_v31 = vld [vmem:[#allocation2 + $0x28] sm:$0xff] }
 0x19e   : > { %2130 = vst.msk [vmem:[#allocation2 + $0xc0] sm:$0xff] %vm283_vm0, %v2098_v3  ;;  %v9462_v21 = vld [vmem:[%s6659_s13 + $0x290] sm:$0xff]  ;;  %v9467_v5 = vld [vmem:[%s11598_s1 + $0xa] ss:$0 sm:$0xff]  ;;  %641 = vst.msk [vmem:[#allocation2 + $0xd8] sm:$0xff] %vm283_vm0, %v609_v10 }
 0x19f   : > { %v1854_v59 = vmul.f32 %v9467_v5, %v9172_v11  ;;  %v1569_v54 = vld [vmem:[#allocation2 + $0xc8] sm:$0xff]  ;;  %v4363_v55 = vld [vmem:[#allocation2] sm:$0xff]  ;;  %v6314_v26 = vld [vmem:[%s6659_s13 + $0x2b2] sm:$0xff]  ;;  %4097 = vst.msk [vmem:[#allocation2 + $0x10] sm:$0xff] %vm283_vm0, %v4065_v24  ;;  %v365_v11 = vmul.f32 %v9266_v12, %v5335_v23  ;;  %v1357_v24 = vmul.f32 %v8911_v62, %v5335_v23 }
 0x1a0   : > { %v9474_v50 = vmul.f32 %v6314_v26, %v8997_v7  ;;  %v11966_v2 = vld [vmem:[#allocation66_spill] sm:$0xff]  ;;  %2793 = vst.msk [vmem:[#allocation2 + $0xb8] sm:$0xff] %vm283_vm0, %v2761_v4  ;;  %v1601_v34 = vadd.f32 %v1569_v54, %v1537_v61  ;;  %v1073_v25 = vld [vmem:[#allocation2 + $0xd0] sm:$0xff]  ;;  %v893_v18 = vld [vmem:[#allocation2 + $0x58] sm:$0xff] }
 0x1a1   : > { %v3571_v39 = vadd.f32 %v3539_v31, %v11966_v2  ;;  %v11967_v3 = vld [vmem:[#allocation18_spill] sm:$0xff]  ;;  %3933 = vst.msk [vmem:[#allocation2 + $0x18] sm:$0xff] %vm283_vm0, %v3901_v58  ;;  %v3885_v10 = vld [vmem:[#allocation2 + $0x98] sm:$0xff]  ;;  %3769 = vst.msk [vmem:[#allocation2 + $0x20] sm:$0xff] %vm283_vm0, %v3737_v41  ;;  %v1105_v31 = vadd.f32 %v1073_v25, %v1041_v33  ;;  %v925_v26 = vadd.f32 %v893_v18, %v861_v49 }
 0x1a2   : > { %v4395_v46 = vadd.f32 %v4363_v55, %v11967_v3  ;;  %v9484_v8 = vld [vmem:[%s6659_s13 + $0x2e2] sm:$0xff]  ;;  %v3917_v61 = vadd.f32 %v3885_v10, %v9006_v9  ;;  %v9490_v2 = vmul.f32 %v9217_v29, %v9035_v13  ;;  %v9497_v41 = vld [vmem:[%s11598_s1 + $0xc] ss:$0 sm:$0xff]  ;;  %1633 = vst.msk [vmem:[#allocation2 + $0xc8] sm:$0xff] %vm283_vm0, %v1601_v34  ;;  %v11968_v9 = vld [vmem:[#allocation68_spill] sm:$0xff]  ;;  %v712_v25 = vmul.f32 %v9315_v30, %v9451_v16 }
 0x1a3   : > { %v2547_v51 = vld [vmem:[#allocation2 + $0x40] sm:$0xff]  ;;  %v4215_v4 = vld [vmem:[#allocation2 + $0x88] sm:$0xff]  ;;  %3603 = vst.msk [vmem:[#allocation2 + $0x28] sm:$0xff] %vm283_vm0, %v3571_v39  ;;  %v2201_v62 = vmul.f32 %v9497_v41, %v9462_v21  ;;  %v4049_v33 = vld [vmem:[#allocation2 + $0x90] sm:$0xff] }
 0x1a4   : > { %v3721_v54 = vld [vmem:[#allocation2 + $0xa0] sm:$0xff]  ;;  %v2579_v58 = vadd.f32 %v2547_v51, %v9209_v20  ;;  %v1886_v23 = vld [vmem:[#allocation2 + $0x48] sm:$0xff]  ;;  %4427 = vst.msk [vmem:[#allocation2] sm:$0xff] %vm283_vm0, %v4395_v46  ;;  %v4247_v13 = vadd.f32 %v4215_v4, %v11968_v9  ;;  %v3226_v20 = vld [vmem:[#allocation2 + $0xb0] sm:$0xff] }
 0x1a5   : > { %v11969_v49 = vld [vmem:[#allocation67_spill] sm:$0xff]  ;;  %v1918_v39 = vadd.f32 %v1886_v23, %v1854_v59  ;;  %1137 = vst.msk [vmem:[#allocation2 + $0xd0] sm:$0xff] %vm283_vm0, %v1105_v31  ;;  %957 = vst.msk [vmem:[#allocation2 + $0x58] sm:$0xff] %vm283_vm0, %v925_v26  ;;  %v397_v18 = vld [vmem:[#allocation2 + $0x60] sm:$0xff]  ;;  %v3258_v31 = vadd.f32 %v3226_v20, %v9040_v1 }
 0x1a6   : > { %v3753_v55 = vadd.f32 %v3721_v54, %v11969_v49  ;;  %v4364_v3 = vld [vmem:[#allocation2 + $0x8] sm:$0xff]  ;;  %v11970_v10 = vld [vmem:[#allocation64_spill] sm:$0xff]  ;;  %v9514_v46 = vld [vmem:[%s11598_s1 + $0x19] ss:$0 sm:$0xff]  ;;  %3949 = vst.msk [vmem:[#allocation2 + $0x98] sm:$0xff] %vm283_vm0, %v3917_v61  ;;  %v429_v54 = vadd.f32 %v397_v18, %v365_v11 }
 0x1a7   : > { %v4081_v34 = vadd.f32 %v4049_v33, %v11970_v10  ;;  %v6316_v51 = vld [vmem:[%s6659_s13 + $0x2c1] sm:$0xff]  ;;  %v3375_v59 = vld [vmem:[#allocation2 + $0x30] sm:$0xff]  ;;  %2611 = vst.msk [vmem:[#allocation2 + $0x40] sm:$0xff] %vm283_vm0, %v2579_v58  ;;  %v4396_v23 = vadd.f32 %v4364_v3, %v9119_v42  ;;  %4279 = vst.msk [vmem:[#allocation2 + $0x88] sm:$0xff] %vm283_vm0, %v4247_v13 }
 0x1a8   : > { %v9517_v4 = vmul.f32 %v9514_v46, %v6316_v51  ;;  %v1389_v26 = vld [vmem:[#allocation2 + $0x50] sm:$0xff]  ;;  %3785 = vst.msk [vmem:[#allocation2 + $0xa0] sm:$0xff] %vm283_vm0, %v3753_v55  ;;  %v3555_v9 = vld [vmem:[#allocation2 + $0xa8] sm:$0xff]  ;;  %v3407_v33 = vadd.f32 %v3375_v59, %v9056_v0  ;;  %v3043_v58 = vld [vmem:[#allocation2 + $0x38] sm:$0xff]  ;;  %v9540_v0 = vmul.f32 %v9327_v19, %v8962_v17 }
 0x1a9   : > { %v9529_v61 = vld [vmem:[%s11598_s1 + $0x14] ss:$0 sm:$0xff]  ;;  %1950 = vst.msk [vmem:[#allocation2 + $0x48] sm:$0xff] %vm283_vm0, %v1918_v39  ;;  %v1421_v42 = vadd.f32 %v1389_v26, %v1357_v24  ;;  %v4379_v11 = vld [vmem:[#allocation2 + $0x80] sm:$0xff]  ;;  %4113 = vst.msk [vmem:[#allocation2 + $0x90] sm:$0xff] %vm283_vm0, %v4081_v34  ;;  %v3587_v13 = vadd.f32 %v3555_v9, %v9071_v63 }
 0x1aa   : > { %11971 = vst [vmem:[#allocation57_spill] sm:$0xff] %v9529_v61  ;;  %v9533_v1 = vmul.f32 %v9529_v61, %v9484_v8  ;;  %3290 = vst.msk [vmem:[#allocation2 + $0xb0] sm:$0xff] %vm283_vm0, %v3258_v31  ;;  %v11972_v49 = vld [vmem:[#allocation30_spill] sm:$0xff]  ;;  %v9547_v39 = vld [vmem:[%s11598_s1 + $0x9] ss:$0 sm:$0xff] }
 0x1ab   : > { %v3075_v55 = vadd.f32 %v3043_v58, %v11972_v49  ;;  %v2233_v20 = vld [vmem:[#allocation2 + $0xc0] sm:$0xff]  ;;  %v1705_v24 = vmul.f32 %v9547_v39, %v9462_v21  ;;  %v744_v18 = vld [vmem:[#allocation2 + $0xd8] sm:$0xff]  ;;  %461 = vst.msk [vmem:[#allocation2 + $0x60] sm:$0xff] %vm283_vm0, %v429_v54  ;;  %4428 = vst.msk [vmem:[#allocation2 + $0x8] sm:$0xff] %vm283_vm0, %v4396_v23 }
 0x1ac   : > { %v11973_v63 = vld [vmem:[#allocation70_spill] sm:$0xff]  ;;  %v4200_v17 = vld [vmem:[#allocation2 + $0x10] sm:$0xff]  ;;  %3439 = vst.msk [vmem:[#allocation2 + $0x30] sm:$0xff] %vm283_vm0, %v3407_v33  ;;  %v2894_v10 = vld [vmem:[#allocation2 + $0xb8] sm:$0xff]  ;;  %v2265_v34 = vadd.f32 %v2233_v20, %v2201_v62  ;;  %v776_v31 = vadd.f32 %v744_v18, %v712_v25  ;;  %v9568_v62 = vmul.f32 %v9146_v48, %v9244_v14 }
 0x1ad   : > { %v4411_v3 = vadd.f32 %v4379_v11, %v11973_v63  ;;  %1453 = vst.msk [vmem:[#allocation2 + $0x50] sm:$0xff] %vm283_vm0, %v1421_v42  ;;  %v5368_v51 = vld [vmem:[%s6659_s13 + $0xe2] sm:$0xff]  ;;  %v11974_v26 = vld [vmem:[#allocation69_spill] sm:$0xff]  ;;  %3619 = vst.msk [vmem:[#allocation2 + $0xa8] sm:$0xff] %vm283_vm0, %v3587_v13 }
 0x1ae   : > { %v9560_v21 = vld [vmem:[%s11598_s1 + $0x6] ss:$0 sm:$0xff]  ;;  %v4232_v54 = vadd.f32 %v4200_v17, %v11974_v26  ;;  %v4034_v23 = vld [vmem:[#allocation2 + $0x18] sm:$0xff]  ;;  %v9571_v33 = vld [vmem:[%s6659_s13 + $0x2f0] sm:$0xff]  ;;  %3107 = vst.msk [vmem:[#allocation2 + $0x38] sm:$0xff] %vm283_vm0, %v3075_v55  ;;  %v1026_v25 = vmul.f32 %v9426_v45, %v5368_v51 }
 0x1af   : > { %v1208_v59 = vmul.f32 %v9560_v21, %v9451_v16  ;;  %v3870_v9 = vld [vmem:[#allocation2 + $0x20] sm:$0xff]  ;;  %v11975_v58 = vld [vmem:[#allocation71_spill] sm:$0xff]  ;;  %4443 = vst.msk [vmem:[#allocation2 + $0x80] sm:$0xff] %vm283_vm0, %v4411_v3  ;;  %v11977_v13 = vld [vmem:[#allocation32_spill] sm:$0xff] }
 0x1b0   : > { %v2926_v42 = vadd.f32 %v2894_v10, %v11975_v58  ;;  %v9576_v16 = vld [vmem:[%s6659_s13 + $0x221] sm:$0xff]  ;;  %v3902_v20 = vadd.f32 %v3870_v9, %v11977_v13  ;;  %v9583_v14 = vld [vmem:[%s6659_s13 + $0x1b1] sm:$0xff]  ;;  %2297 = vst.msk [vmem:[#allocation2 + $0xc0] sm:$0xff] %vm283_vm0, %v2265_v34  ;;  %v9601_v3 = vld [vmem:[%s11598_s1 + $0xb] ss:$0 sm:$0xff] }
 0x1b1   : > { %v11976_v11 = vld [vmem:[#allocation23_spill] sm:$0xff]  ;;  %v9588_v55 = vld [vmem:[%s11598_s1 + $0x13] ss:$0 sm:$0xff]  ;;  %11979 = vst [vmem:[#allocation43_spill] sm:$0xff] %v9601_v3  ;;  %v11980_v10 = vld [vmem:[#allocation73_spill] sm:$0xff] }
 0x1b2   : > { %v4066_v49 = vadd.f32 %v4034_v23, %v11976_v11  ;;  %v3706_v18 = vld [vmem:[#allocation2 + $0x28] sm:$0xff]  ;;  %11978 = vst [vmem:[#allocation41_spill] sm:$0xff] %v9588_v55  ;;  %v9592_v63 = vmul.f32 %v9588_v55, %v9583_v14  ;;  %v9596_v17 = vld [vmem:[%s6659_s13 + $0x291] sm:$0xff]  ;;  %v2019_v26 = vmul.f32 %v9601_v3, %v11980_v10  ;;  %808 = vst.msk [vmem:[#allocation2 + $0xd8] sm:$0xff] %vm283_vm0, %v776_v31 }
 0x1b3   : > { %v1737_v23 = vld [vmem:[#allocation2 + $0xc8] sm:$0xff]  ;;  %v4528_v9 = vld [vmem:[#allocation2] sm:$0xff]  ;;  %4264 = vst.msk [vmem:[#allocation2 + $0x10] sm:$0xff] %vm283_vm0, %v4232_v54  ;;  %v11981_v11 = vld [vmem:[#allocation72_spill] sm:$0xff]  ;;  %v530_v10 = vmul.f32 %v9189_v47, %v5368_v51 }
 0x1b4   : > { %v6324_v58 = vld [vmem:[%s6659_s13 + $0x182] sm:$0xff]  ;;  %v3738_v13 = vadd.f32 %v3706_v18, %v11981_v11  ;;  %2958 = vst.msk [vmem:[#allocation2 + $0xb8] sm:$0xff] %vm283_vm0, %v2926_v42  ;;  %v1769_v19 = vadd.f32 %v1737_v23, %v1705_v24  ;;  %v1240_v55 = vld [vmem:[#allocation2 + $0xd0] sm:$0xff]  ;;  %v1058_v15 = vld [vmem:[#allocation2 + $0x58] sm:$0xff]  ;;  %v1522_v18 = vmul.f32 %v9420_v38, %v5368_v51 }
 0x1b5   : > { %v9609_v34 = vmul.f32 %v6324_v58, %v8997_v7  ;;  %v11982_v61 = vld [vmem:[#allocation37_spill] sm:$0xff]  ;;  %4098 = vst.msk [vmem:[#allocation2 + $0x18] sm:$0xff] %vm283_vm0, %v4066_v49  ;;  %3934 = vst.msk [vmem:[#allocation2 + $0x20] sm:$0xff] %vm283_vm0, %v3902_v20  ;;  %v9619_v7 = vmul.f32 %v9332_v56, %v9571_v33  ;;  %v2714_v54 = vld [vmem:[#allocation2 + $0x40] sm:$0xff]  ;;  %v1272_v42 = vadd.f32 %v1240_v55, %v1208_v59 }
 0x1b6   : > { %v4560_v3 = vadd.f32 %v4528_v9, %v11982_v61  ;;  %v4050_v31 = vld [vmem:[#allocation2 + $0x98] sm:$0xff]  ;;  %v243_v24 = vld [vmem:[%s6659_s13 + $0x220] sm:$0xff]  ;;  %v4380_v23 = vld [vmem:[#allocation2 + $0x88] sm:$0xff]  ;;  %3770 = vst.msk [vmem:[#allocation2 + $0x28] sm:$0xff] %vm283_vm0, %v3738_v13  ;;  %v2746_v61 = vadd.f32 %v2714_v54, %v9233_v44  ;;  %v1090_v59 = vadd.f32 %v1058_v15, %v1026_v25  ;;  %v877_v54 = vmul.f32 %v9304_v32, %v9576_v16 }
 0x1b7   : > { %v11983_v58 = vld [vmem:[#allocation28_spill] sm:$0xff]  ;;  %v3886_v47 = vld [vmem:[#allocation2 + $0xa0] sm:$0xff]  ;;  %v9629_v49 = vld [vmem:[%s11598_s1 + $0xd] ss:$0 sm:$0xff]  ;;  %1801 = vst.msk [vmem:[#allocation2 + $0xc8] sm:$0xff] %vm283_vm0, %v1769_v19  ;;  %v4412_v55 = vadd.f32 %v4380_v23, %v9239_v6 }
 0x1b8   : > { %v4082_v11 = vadd.f32 %v4050_v31, %v11983_v58  ;;  %v2366_v20 = vmul.f32 %v9629_v49, %v9596_v17  ;;  %v2051_v51 = vld [vmem:[#allocation2 + $0x48] sm:$0xff]  ;;  %4592 = vst.msk [vmem:[#allocation2] sm:$0xff] %vm283_vm0, %v4560_v3  ;;  %v4216_v9 = vld [vmem:[#allocation2 + $0x90] sm:$0xff]  ;;  %v3918_v44 = vadd.f32 %v3886_v47, %v9251_v35  ;;  %1304 = vst.msk [vmem:[#allocation2 + $0xd0] sm:$0xff] %vm283_vm0, %v1272_v42 }
 0x1b9   : > { %v3391_v13 = vld [vmem:[#allocation2 + $0xb0] sm:$0xff]  ;;  %v2083_v31 = vadd.f32 %v2051_v51, %v2019_v26  ;;  %v562_v58 = vld [vmem:[#allocation2 + $0x60] sm:$0xff]  ;;  %v4529_v56 = vld [vmem:[#allocation2 + $0x8] sm:$0xff]  ;;  %v4248_v19 = vadd.f32 %v4216_v9, %v9272_v28  ;;  %2778 = vst.msk [vmem:[#allocation2 + $0x40] sm:$0xff] %vm283_vm0, %v2746_v61 }
 0x1ba   : > { %v6326_v15 = vld [vmem:[%s6659_s13 + $0x191] sm:$0xff]  ;;  %4114 = vst.msk [vmem:[#allocation2 + $0x98] sm:$0xff] %vm283_vm0, %v4082_v11  ;;  %v11984_v35 = vld [vmem:[#allocation31_spill] sm:$0xff]  ;;  %1122 = vst.msk [vmem:[#allocation2 + $0x58] sm:$0xff] %vm283_vm0, %v1090_v59  ;;  %v594_v42 = vadd.f32 %v562_v58, %v530_v10  ;;  %v4561_v23 = vadd.f32 %v4529_v56, %v9374_v37 }
 0x1bb   : > { %v9643_v25 = vmul.f32 %v6326_v15, %v9514_v46  ;;  %v3540_v6 = vld [vmem:[#allocation2 + $0x30] sm:$0xff]  ;;  %v3423_v3 = vadd.f32 %v3391_v13, %v11984_v35  ;;  %4444 = vst.msk [vmem:[#allocation2 + $0x88] sm:$0xff] %vm283_vm0, %v4412_v55  ;;  %v6327_v28 = vld [vmem:[%s6659_s13 + $0x1a0] sm:$0xff]  ;;  %3950 = vst.msk [vmem:[#allocation2 + $0xa0] sm:$0xff] %vm283_vm0, %v3918_v44  ;;  %v1870_v44 = vmul.f32 %v9467_v5, %v9596_v17 }
 0x1bc   : > { %v1554_v26 = vld [vmem:[#allocation2 + $0x50] sm:$0xff]  ;;  %v9653_v47 = vmul.f32 %v6327_v28, %v9393_v27  ;;  %v3722_v11 = vld [vmem:[#allocation2 + $0xa8] sm:$0xff]  ;;  %v11985_v51 = vld [vmem:[#allocation26_spill] sm:$0xff]  ;;  %2115 = vst.msk [vmem:[#allocation2 + $0x48] sm:$0xff] %vm283_vm0, %v2083_v31  ;;  %v279_v31 = vmul.f32 %v9196_v43, %v243_v24 }
 0x1bd   : > { %v3572_v9 = vadd.f32 %v3540_v6, %v11985_v51  ;;  %v3211_v13 = vld [vmem:[#allocation2 + $0x38] sm:$0xff]  ;;  %v1586_v61 = vadd.f32 %v1554_v26, %v1522_v18  ;;  %v4544_v15 = vld [vmem:[#allocation2 + $0x80] sm:$0xff]  ;;  %4280 = vst.msk [vmem:[#allocation2 + $0x90] sm:$0xff] %vm283_vm0, %v4248_v19  ;;  %v11986_v10 = vld [vmem:[#allocation75_spill] sm:$0xff] }
 0x1be   : > { %v3754_v56 = vadd.f32 %v3722_v11, %v11986_v10  ;;  %3455 = vst.msk [vmem:[#allocation2 + $0xb0] sm:$0xff] %vm283_vm0, %v3423_v3  ;;  %v11987_v37 = vld [vmem:[#allocation42_spill] sm:$0xff]  ;;  %v909_v58 = vld [vmem:[#allocation2 + $0xd8] sm:$0xff]  ;;  %626 = vst.msk [vmem:[#allocation2 + $0x60] sm:$0xff] %vm283_vm0, %v594_v42  ;;  %v4576_v18 = vadd.f32 %v4544_v15, %v9343_v36 }
 0x1bf   : > { %v3243_v59 = vadd.f32 %v3211_v13, %v11987_v37  ;;  %v2398_v55 = vld [vmem:[#allocation2 + $0xc0] sm:$0xff]  ;;  %4593 = vst.msk [vmem:[#allocation2 + $0x8] sm:$0xff] %vm283_vm0, %v4561_v23  ;;  %v4365_v19 = vld [vmem:[#allocation2 + $0x10] sm:$0xff]  ;;  %3604 = vst.msk [vmem:[#allocation2 + $0x30] sm:$0xff] %vm283_vm0, %v3572_v9  ;;  %v941_v3 = vadd.f32 %v909_v58, %v877_v54 }
 0x1c0   : > { %v3059_v6 = vld [vmem:[#allocation2 + $0xb8] sm:$0xff]  ;;  %v2430_v35 = vadd.f32 %v2398_v55, %v2366_v20  ;;  %1618 = vst.msk [vmem:[#allocation2 + $0x50] sm:$0xff] %vm283_vm0, %v1586_v61  ;;  %v9673_v17 = vld [vmem:[%s11598_s1 + $0x7] ss:$0 sm:$0xff]  ;;  %v9678_v36 = vld [vmem:[%s6659_s13 + $0xf0] sm:$0xff] }
 0x1c1   : > { %v1373_v24 = vmul.f32 %v9673_v17, %v9576_v16  ;;  %v11988_v26 = vld [vmem:[#allocation34_spill] sm:$0xff]  ;;  %v4201_v23 = vld [vmem:[#allocation2 + $0x18] sm:$0xff]  ;;  %3786 = vst.msk [vmem:[#allocation2 + $0xa8] sm:$0xff] %vm283_vm0, %v3754_v56  ;;  %3275 = vst.msk [vmem:[#allocation2 + $0x38] sm:$0xff] %vm283_vm0, %v3243_v59  ;;  %v3091_v51 = vadd.f32 %v3059_v6, %v9364_v53  ;;  %v1193_v54 = vmul.f32 %v9560_v21, %v9678_v36 }
 0x1c2   : > { %v4397_v42 = vadd.f32 %v4365_v19, %v11988_v26  ;;  %v4035_v28 = vld [vmem:[#allocation2 + $0x20] sm:$0xff]  ;;  %v9692_v16 = vld [vmem:[%s6659_s13 + $0x292] sm:$0xff]  ;;  %312 = vst.msk [vmem:[#allocation2 + $0xe0] sm:$0xff] %vm283_vm0, %v279_v31  ;;  %4608 = vst.msk [vmem:[#allocation2 + $0x80] sm:$0xff] %vm283_vm0, %v4576_v18  ;;  %v4233_v13 = vadd.f32 %v4201_v23, %v9396_v40  ;;  %v697_v6 = vmul.f32 %v9315_v30, %v9678_v36 }
 0x1c3   : > { %v11989_v11 = vld [vmem:[#allocation74_spill] sm:$0xff]  ;;  %v4067_v61 = vadd.f32 %v4035_v28, %v9407_v60  ;;  %v3871_v15 = vld [vmem:[#allocation2 + $0x28] sm:$0xff]  ;;  %2462 = vst.msk [vmem:[#allocation2 + $0xc0] sm:$0xff] %vm283_vm0, %v2430_v35  ;;  %v11992_v56 = vld [vmem:[#allocation16_spill] sm:$0xff] }
 0x1c4   : > { %v9683_v20 = vmul.f32 %v11989_v11, %v9217_v29  ;;  %v9689_v9 = vld [vmem:[%s6659_s13 + $0x162] sm:$0xff]  ;;  %v9704_v53 = vld [vmem:[%s11598_s1 + $0xe] ss:$0 sm:$0xff]  ;;  %v2186_v37 = vmul.f32 %v9497_v41, %v11992_v56  ;;  %973 = vst.msk [vmem:[#allocation2 + $0xd8] sm:$0xff] %vm283_vm0, %v941_v3  ;;  %4429 = vst.msk [vmem:[#allocation2 + $0x10] sm:$0xff] %vm283_vm0, %v4397_v42  ;;  %v3903_v31 = vadd.f32 %v3871_v15, %v9445_v22 }
 0x1c5   : > { %11990 = vst [vmem:[#allocation36_spill] sm:$0xff] %v9689_v9  ;;  %11991 = vst [vmem:[#allocation6_spill] sm:$0xff] %v9704_v53  ;;  %v9708_v10 = vmul.f32 %v9704_v53, %v9692_v16  ;;  %v1902_v59 = vld [vmem:[#allocation2 + $0xc8] sm:$0xff]  ;;  %v4624_v60 = vld [vmem:[#allocation2] sm:$0xff]  ;;  %v1690_v30 = vmul.f32 %v9547_v39, %v11992_v56 }
 0x1c6   : > { %v9713_v40 = vld [vmem:[%s6659_s13 + $0x222] sm:$0xff]  ;;  %v6330_v55 = vld [vmem:[%s6659_s13 + $0x2d1] sm:$0xff]  ;;  %3123 = vst.msk [vmem:[#allocation2 + $0xb8] sm:$0xff] %vm283_vm0, %v3091_v51  ;;  %v1934_v18 = vadd.f32 %v1902_v59, %v1870_v44  ;;  %6094 = vmatprep.mubr.msk.f32.mxu0 %vm283_vm0, %v4624_v60  ;;  %4265 = vst.msk [vmem:[#allocation2 + $0x18] sm:$0xff] %vm283_vm0, %v4233_v13 }
 0x1c7   : > { %v9719_v58 = vmul.f32 %v6330_v55, %v9514_v46  ;;  %v1405_v19 = vld [vmem:[#allocation2 + $0xd0] sm:$0xff]  ;;  %v345_v35 = vld [vmem:[%s6659_s13 + $0x221] sm:$0xff]  ;;  %v4217_v3 = vld [vmem:[#allocation2 + $0x98] sm:$0xff]  ;;  %4099 = vst.msk [vmem:[#allocation2 + $0x20] sm:$0xff] %vm283_vm0, %v4067_v61 }
 0x1c8   : > { %v6331_v26 = vld [vmem:[%s6659_s13 + $0x2e0] sm:$0xff]  ;;  %v1437_v28 = vadd.f32 %v1405_v19, %v1373_v24  ;;  %v1225_v11 = vld [vmem:[#allocation2 + $0x58] sm:$0xff]  ;;  %v4545_v51 = vld [vmem:[#allocation2 + $0x88] sm:$0xff]  ;;  %v4249_v59 = vadd.f32 %v4217_v3, %v9441_v57  ;;  %3935 = vst.msk [vmem:[#allocation2 + $0x28] sm:$0xff] %vm283_vm0, %v3903_v31  ;;  %v1042_v57 = vmul.f32 %v9426_v45, %v9713_v40 }
 0x1c9   : > { %v9731_v42 = vmul.f32 %v6331_v26, %v9393_v27  ;;  %v2879_v22 = vld [vmem:[#allocation2 + $0x40] sm:$0xff]  ;;  %v9743_v13 = vld [vmem:[%s11598_s1 + $0x1a] ss:$0 sm:$0xff]  ;;  %v2218_v56 = vld [vmem:[#allocation2 + $0x48] sm:$0xff]  ;;  %1966 = vst.msk [vmem:[#allocation2 + $0xc8] sm:$0xff] %vm283_vm0, %v1934_v18  ;;  %v1257_v24 = vadd.f32 %v1225_v11, %v1193_v54  ;;  %v4577_v19 = vadd.f32 %v4545_v51, %v9474_v50  ;;  %v9788_v51 = vmul.f32 %v9217_v29, %v9484_v8 }
 0x1ca   : > { %v11993_v44 = vld [vmem:[#allocation38_spill] sm:$0xff]  ;;  %v2911_v55 = vadd.f32 %v2879_v22, %v9458_v52  ;;  %v4381_v26 = vld [vmem:[#allocation2 + $0x90] sm:$0xff]  ;;  %1469 = vst.msk [vmem:[#allocation2 + $0xd0] sm:$0xff] %vm283_vm0, %v1437_v28  ;;  %v4625_v31 = vld [vmem:[#allocation2 + $0x8] sm:$0xff] }
 0x1cb   : > { %v9735_v23 = vmul.f32 %v11993_v44, %v9689_v9  ;;  %v6332_v15 = vld [vmem:[%s6659_s13 + $0x2c2] sm:$0xff]  ;;  %v3556_v53 = vld [vmem:[#allocation2 + $0xb0] sm:$0xff]  ;;  %v2250_v9 = vadd.f32 %v2218_v56, %v2186_v37  ;;  %v4413_v52 = vadd.f32 %v4381_v26, %v9517_v4  ;;  %4281 = vst.msk [vmem:[#allocation2 + $0x98] sm:$0xff] %vm283_vm0, %v4249_v59  ;;  %1289 = vst.msk [vmem:[#allocation2 + $0x58] sm:$0xff] %vm283_vm0, %v1257_v24  ;;  %6095 = vmatmul.mubr.msk.f32.vlgmr.msra.gmra.mxu0 %vm283_vm0, %v4625_v31 }
 0x1cc   : > { %v9746_v61 = vmul.f32 %v9743_v13, %v6332_v15  ;;  %v4051_v60 = vld [vmem:[#allocation2 + $0xa0] sm:$0xff]  ;;  %v3707_v18 = vld [vmem:[#allocation2 + $0x30] sm:$0xff]  ;;  %v3588_v54 = vadd.f32 %v3556_v53, %v9533_v1  ;;  %2943 = vst.msk [vmem:[#allocation2 + $0x40] sm:$0xff] %vm283_vm0, %v2911_v55  ;;  %v381_v37 = vmul.f32 %v9266_v12, %v345_v35  ;;  %4609 = vst.msk [vmem:[#allocation2 + $0x88] sm:$0xff] %vm283_vm0, %v4577_v19 }
 0x1cd   : > { %v4083_v44 = vadd.f32 %v4051_v60, %v9490_v2  ;;  %v729_v3 = vld [vmem:[#allocation2 + $0x60] sm:$0xff]  ;;  %v1722_v50 = vld [vmem:[#allocation2 + $0x50] sm:$0xff]  ;;  %v3887_v4 = vld [vmem:[#allocation2 + $0xa8] sm:$0xff]  ;;  %v3739_v22 = vadd.f32 %v3707_v18, %v9540_v0  ;;  %v9769_v1 = vmul.f32 %v9583_v14, %v9146_v48  ;;  %2282 = vst.msk [vmem:[#allocation2 + $0x48] sm:$0xff] %vm283_vm0, %v2250_v9 }
 0x1ce   : > { %v761_v2 = vadd.f32 %v729_v3, %v697_v6  ;;  %v9774_v53 = vld [vmem:[%s11598_s1 + $0x15] ss:$0 sm:$0xff]  ;;  %v3376_v35 = vld [vmem:[#allocation2 + $0x38] sm:$0xff]  ;;  %v1754_v28 = vadd.f32 %v1722_v50, %v1690_v30  ;;  %v4640_v0 = vld [vmem:[#allocation2 + $0x80] sm:$0xff]  ;;  %4445 = vst.msk [vmem:[#allocation2 + $0x90] sm:$0xff] %vm283_vm0, %v4413_v52  ;;  %v3919_v48 = vadd.f32 %v3887_v4, %v9568_v62 }
 0x1cf   : > { %4115 = vst.msk [vmem:[#allocation2 + $0xa0] sm:$0xff] %vm283_vm0, %v4083_v44  ;;  %v9778_v6 = vmul.f32 %v9774_v53, %v9571_v33  ;;  %v9782_v11 = vld [vmem:[%s6659_s13 + $0xf1] sm:$0xff]  ;;  %3620 = vst.msk [vmem:[#allocation2 + $0xb0] sm:$0xff] %vm283_vm0, %v3588_v54  ;;  %v3408_v15 = vadd.f32 %v3376_v35, %v9592_v63  ;;  %v2563_v59 = vld [vmem:[#allocation2 + $0xc0] sm:$0xff]  ;;  %6118 = vmatprep.mubr.msk.f32.mxu1 %vm283_vm0, %v4640_v0 }
 0x1d0   : > { %v9793_v60 = vld [vmem:[%s6659_s13 + $0x2a0] sm:$0xff]  ;;  %v11994_v9 = vld [vmem:[#allocation43_spill] sm:$0xff]  ;;  %v1074_v55 = vld [vmem:[#allocation2 + $0xd8] sm:$0xff]  ;;  %793 = vst.msk [vmem:[#allocation2 + $0x60] sm:$0xff] %vm283_vm0, %v761_v2  ;;  %v2595_v19 = vadd.f32 %v2563_v59, %v9708_v10  ;;  %v1358_v10 = vmul.f32 %v9673_v17, %v9782_v11  ;;  %v862_v0 = vmul.f32 %v9304_v32, %v9782_v11 }
 0x1d1   : > { %v2035_v30 = vmul.f32 %v11994_v9, %v9692_v16  ;;  %v4530_v62 = vld [vmem:[#allocation2 + $0x10] sm:$0xff]  ;;  %3771 = vst.msk [vmem:[#allocation2 + $0x30] sm:$0xff] %vm283_vm0, %v3739_v22  ;;  %v11995_v56 = vld [vmem:[#allocation57_spill] sm:$0xff]  ;;  %1786 = vst.msk [vmem:[#allocation2 + $0x50] sm:$0xff] %vm283_vm0, %v1754_v28  ;;  %v1538_v16 = vmul.f32 %v9420_v38, %v9713_v40  ;;  %v1106_v26 = vadd.f32 %v1074_v55, %v1042_v57 }
 0x1d2   : > { %v9801_v29 = vld [vmem:[%s6659_s13 + $0x1b2] sm:$0xff]  ;;  %v413_v44 = vld [vmem:[#allocation2 + $0xe0] sm:$0xff]  ;;  %v4562_v3 = vadd.f32 %v4530_v62, %v9609_v34  ;;  %3951 = vst.msk [vmem:[#allocation2 + $0xa8] sm:$0xff] %vm283_vm0, %v3919_v48  ;;  %3440 = vst.msk [vmem:[#allocation2 + $0x38] sm:$0xff] %vm283_vm0, %v3408_v15  ;;  %v264_v15 = vmul.f32 %v9196_v43, %v9678_v36 }
 0x1d3   : > { %v9805_v63 = vmul.f32 %v9801_v29, %v11995_v56  ;;  %v3227_v24 = vld [vmem:[#allocation2 + $0xb8] sm:$0xff]  ;;  %v4202_v52 = vld [vmem:[#allocation2 + $0x20] sm:$0xff]  ;;  %v445_v50 = vadd.f32 %v413_v44, %v381_v37  ;;  %v4036_v34 = vld [vmem:[#allocation2 + $0x28] sm:$0xff]  ;;  %2627 = vst.msk [vmem:[#allocation2 + $0xc0] sm:$0xff] %vm283_vm0, %v2595_v19 }
 0x1d4   : > { %v4366_v31 = vld [vmem:[#allocation2 + $0x18] sm:$0xff]  ;;  %v3259_v54 = vadd.f32 %v3227_v24, %v9619_v7  ;;  %v4234_v57 = vadd.f32 %v4202_v52, %v9653_v47  ;;  %v9826_v2 = vld [vmem:[%s11598_s1 + $0xf] ss:$0 sm:$0xff]  ;;  %1138 = vst.msk [vmem:[#allocation2 + $0xd8] sm:$0xff] %vm283_vm0, %v1106_v26  ;;  %4594 = vst.msk [vmem:[#allocation2 + $0x10] sm:$0xff] %vm283_vm0, %v4562_v3  ;;  %v4068_v47 = vadd.f32 %v4036_v34, %v9683_v20 }
 0x1d5   : > { %v9814_v18 = vld [vmem:[%s6659_s13 + $0x2f1] sm:$0xff]  ;;  %v4398_v40 = vadd.f32 %v4366_v31, %v9643_v25  ;;  %v9830_v7 = vmul.f32 %v9826_v2, %v9793_v60  ;;  %v2067_v25 = vld [vmem:[#allocation2 + $0xc8] sm:$0xff]  ;;  %477 = vst.msk [vmem:[#allocation2 + $0xe0] sm:$0xff] %vm283_vm0, %v445_v50  ;;  %v3044_v32 = vld [vmem:[#allocation2 + $0x40] sm:$0xff] }
 0x1d6   : > { %v11996_v4 = vld [vmem:[#allocation77_spill] sm:$0xff]  ;;  %3291 = vst.msk [vmem:[#allocation2 + $0xb8] sm:$0xff] %vm283_vm0, %v3259_v54  ;;  %v2099_v22 = vadd.f32 %v2067_v25, %v2035_v30  ;;  %v1570_v35 = vld [vmem:[#allocation2 + $0xd0] sm:$0xff]  ;;  %v510_v48 = vld [vmem:[%s6659_s13 + $0x222] sm:$0xff]  ;;  %v3076_v52 = vadd.f32 %v3044_v32, %v9735_v23 }
 0x1d7   : > { %v2351_v37 = vmul.f32 %v9629_v49, %v11996_v4  ;;  %v9839_v28 = vld [vmem:[%s6659_s13 + $0x230] sm:$0xff]  ;;  %4430 = vst.msk [vmem:[#allocation2 + $0x18] sm:$0xff] %vm283_vm0, %v4398_v40  ;;  %v4382_v30 = vld [vmem:[#allocation2 + $0x98] sm:$0xff]  ;;  %4266 = vst.msk [vmem:[#allocation2 + $0x20] sm:$0xff] %vm283_vm0, %v4234_v57  ;;  %v1855_v24 = vmul.f32 %v9467_v5, %v11996_v4  ;;  %v1602_v19 = vadd.f32 %v1570_v35, %v1538_v16 }
 0x1d8   : > { %v6337_v59 = vld [vmem:[%s6659_s13 + $0x192] sm:$0xff]  ;;  %v4641_v43 = vld [vmem:[#allocation2 + $0x88] sm:$0xff]  ;;  %v4414_v36 = vadd.f32 %v4382_v30, %v9719_v58  ;;  %v4218_v31 = vld [vmem:[#allocation2 + $0xa0] sm:$0xff]  ;;  %4100 = vst.msk [vmem:[#allocation2 + $0x28] sm:$0xff] %vm283_vm0, %v4068_v47  ;;  %v1209_v23 = vmul.f32 %v9560_v21, %v9839_v28 }
 0x1d9   : > { %v9850_v20 = vmul.f32 %v6337_v59, %v9743_v13  ;;  %v11997_v55 = vld [vmem:[#allocation41_spill] sm:$0xff]  ;;  %v6338_v44 = vld [vmem:[%s6659_s13 + $0x1a1] sm:$0xff]  ;;  %2131 = vst.msk [vmem:[#allocation2 + $0xc8] sm:$0xff] %vm283_vm0, %v2099_v22  ;;  %297 = vst.msk [vmem:[#allocation2 + $0x68] sm:$0xff] %vm283_vm0, %v264_v15  ;;  %6119 = vmatmul.mubr.msk.f32.vlgmr.msra.gmra.mxu1 %vm283_vm0, %v4641_v43  ;;  %v4250_v58 = vadd.f32 %v4218_v31, %v9731_v42 }
 0x1da   : > { %v9855_v62 = vmul.f32 %v11997_v55, %v9814_v18  ;;  %v1390_v26 = vld [vmem:[#allocation2 + $0x58] sm:$0xff]  ;;  %v9862_v3 = vmul.f32 %v6338_v44, %v9514_v46  ;;  %v2383_v54 = vld [vmem:[#allocation2 + $0x48] sm:$0xff]  ;;  %v4546_v16 = vld [vmem:[#allocation2 + $0x90] sm:$0xff]  ;;  %1634 = vst.msk [vmem:[#allocation2 + $0xd0] sm:$0xff] %vm283_vm0, %v1602_v19 }
 0x1db   : > { %v1422_v50 = vadd.f32 %v1390_v26, %v1358_v10  ;;  %v11998_v40 = vld [vmem:[#allocation76_spill] sm:$0xff]  ;;  %v2415_v4 = vadd.f32 %v2383_v54, %v2351_v37  ;;  %v894_v10 = vld [vmem:[#allocation2 + $0x60] sm:$0xff]  ;;  %v4578_v25 = vadd.f32 %v4546_v16, %v9746_v61  ;;  %4446 = vst.msk [vmem:[#allocation2 + $0x98] sm:$0xff] %vm283_vm0, %v4414_v36  ;;  %3108 = vst.msk [vmem:[#allocation2 + $0x40] sm:$0xff] %vm283_vm0, %v3076_v52 }
 0x1dc   : > { %v9872_v57 = vmul.f32 %v9393_v27, %v11998_v40  ;;  %v3723_v34 = vld [vmem:[#allocation2 + $0xb0] sm:$0xff]  ;;  %v926_v37 = vadd.f32 %v894_v10, %v862_v0  ;;  %v9885_v35 = vld [vmem:[%s11598_s1 + $0x2] ss:$0 sm:$0xff]  ;;  %4282 = vst.msk [vmem:[#allocation2 + $0xa0] sm:$0xff] %vm283_vm0, %v4250_v58  ;;  %v3541_v32 = vld [vmem:[#allocation2 + $0x38] sm:$0xff]  ;;  %v1706_v58 = vmul.f32 %v9547_v39, %v9793_v60 }
 0x1dd   : > { %v3872_v47 = vld [vmem:[#allocation2 + $0x30] sm:$0xff]  ;;  %v3755_v42 = vadd.f32 %v3723_v34, %v9778_v6  ;;  %1454 = vst.msk [vmem:[#allocation2 + $0x58] sm:$0xff] %vm283_vm0, %v1422_v50  ;;  %v546_v15 = vmul.f32 %v9885_v35, %v510_v48  ;;  %v4052_v6 = vld [vmem:[#allocation2 + $0xa8] sm:$0xff]  ;;  %v6341_v0 = vld [vmem:[%s6659_s13 + $0x1e0] sm:$0xff]  ;;  %v3573_v36 = vadd.f32 %v3541_v32, %v9805_v63 }
 0x1de   : > { %v1887_v22 = vld [vmem:[#allocation2 + $0x50] sm:$0xff]  ;;  %v3904_v30 = vadd.f32 %v3872_v47, %v9769_v1  ;;  %2447 = vst.msk [vmem:[#allocation2 + $0x48] sm:$0xff] %vm283_vm0, %v2415_v4  ;;  %4610 = vst.msk [vmem:[#allocation2 + $0x90] sm:$0xff] %vm283_vm0, %v4578_v25  ;;  %v4084_v48 = vadd.f32 %v4052_v6, %v9788_v51  ;;  %v2730_v44 = vld [vmem:[#allocation2 + $0xc0] sm:$0xff]  ;;  %v2202_v1 = vmul.f32 %v9497_v41, %v9793_v60 }
 0x1df   : > { %v6340_v61 = vld [vmem:[%s6659_s13 + $0x2d2] sm:$0xff]  ;;  %v1919_v43 = vadd.f32 %v1887_v22, %v1855_v24  ;;  %3787 = vst.msk [vmem:[#allocation2 + $0xb0] sm:$0xff] %vm283_vm0, %v3755_v42  ;;  %958 = vst.msk [vmem:[#allocation2 + $0x60] sm:$0xff] %vm283_vm0, %v926_v37  ;;  %v366_v24 = vmul.f32 %v9266_v12, %v9782_v11  ;;  %v6342_v50 = vld [vmem:[%s6659_s13 + $0x2e1] sm:$0xff]  ;;  %v2762_v63 = vadd.f32 %v2730_v44, %v9830_v7 }
 0x1e0   : > { %v9890_v59 = vmul.f32 %v6340_v61, %v9743_v13  ;;  %v11999_v19 = vld [vmem:[#allocation40_spill] sm:$0xff]  ;;  %v1241_v52 = vld [vmem:[#allocation2 + $0xd8] sm:$0xff]  ;;  %v4351_v51 = vmul.f32 %v6342_v50, %v9514_v46  ;;  %3936 = vst.msk [vmem:[#allocation2 + $0x30] sm:$0xff] %vm283_vm0, %v3904_v30  ;;  %v578_v34 = vld [vmem:[#allocation2 + $0xe0] sm:$0xff] }
 0x1e1   : > { %v9896_v26 = vmul.f32 %v6341_v0, %v11999_v19  ;;  %v9906_v31 = vld [vmem:[%s6659_s13 + $0xf2] sm:$0xff]  ;;  %1951 = vst.msk [vmem:[#allocation2 + $0x50] sm:$0xff] %vm283_vm0, %v1919_v43  ;;  %v1273_v40 = vadd.f32 %v1241_v52, %v1209_v23  ;;  %v4367_v11 = vld [vmem:[#allocation2 + $0x20] sm:$0xff]  ;;  %4116 = vst.msk [vmem:[#allocation2 + $0xa8] sm:$0xff] %vm283_vm0, %v4084_v48  ;;  %v610_v10 = vadd.f32 %v578_v34, %v546_v15 }
 0x1e2   : > { %v4626_v54 = vld [vmem:[#allocation2 + $0x10] sm:$0xff]  ;;  %v3392_v16 = vld [vmem:[#allocation2 + $0xb8] sm:$0xff]  ;;  %3605 = vst.msk [vmem:[#allocation2 + $0x38] sm:$0xff] %vm283_vm0, %v3573_v36  ;;  %v1523_v23 = vmul.f32 %v9420_v38, %v9906_v31  ;;  %v4399_v47 = vadd.f32 %v4367_v11, %v9862_v3  ;;  %v4203_v42 = vld [vmem:[#allocation2 + $0x28] sm:$0xff]  ;;  %v1027_v19 = vmul.f32 %v9426_v45, %v9906_v31 }
 0x1e3   : > { %6097 = vmatprep.mubr.msk.f32.mxu0 %vm283_vm0, %v4626_v54  ;;  %v4531_v12 = vld [vmem:[#allocation2 + $0x18] sm:$0xff]  ;;  %v9923_v4 = vld [vmem:[%s11598_s1 + $0x16] ss:$0 sm:$0xff]  ;;  %v3424_v60 = vadd.f32 %v3392_v16, %v9855_v62  ;;  %v9936_v22 = vld [vmem:[%s11598_s1 + $0x17] ss:$0 sm:$0xff]  ;;  %2794 = vst.msk [vmem:[#allocation2 + $0xc0] sm:$0xff] %vm283_vm0, %v2762_v63  ;;  %v4235_v6 = vadd.f32 %v4203_v42, %v9872_v57  ;;  %v4187_v57 = vmul.f32 %v9393_v27, %v9571_v33 }
 0x1e4   : > { %v3856_v7 = vmul.f32 %v9923_v4, %v9814_v18  ;;  %v4563_v25 = vadd.f32 %v4531_v12, %v9850_v20  ;;  %v4005_v37 = vmul.f32 %v9936_v22, %v9801_v29  ;;  %v9942_v62 = vld [vmem:[%s6659_s13 + $0x2a1] sm:$0xff]  ;;  %v12000_v38 = vld [vmem:[#allocation36_spill] sm:$0xff]  ;;  %1305 = vst.msk [vmem:[#allocation2 + $0xd8] sm:$0xff] %vm283_vm0, %v1273_v40  ;;  %642 = vst.msk [vmem:[#allocation2 + $0xe0] sm:$0xff] %vm283_vm0, %v610_v10 }
 0x1e5   : > { %v12001_v15 = vld [vmem:[#allocation6_spill] sm:$0xff]  ;;  %v2234_v20 = vld [vmem:[#allocation2 + $0xc8] sm:$0xff]  ;;  %v9949_v30 = vld [vmem:[%s6659_s13 + $0x2f2] sm:$0xff]  ;;  %3456 = vst.msk [vmem:[#allocation2 + $0xb8] sm:$0xff] %vm283_vm0, %v3424_v60  ;;  %v2020_v45 = vmul.f32 %v11994_v9, %v12000_v38 }
 0x1e6   : > { %v2516_v61 = vmul.f32 %v12001_v15, %v12000_v38  ;;  %v398_v3 = vld [vmem:[#allocation2 + $0x68] sm:$0xff]  ;;  %v2266_v32 = vadd.f32 %v2234_v20, %v2202_v1  ;;  %v1738_v0 = vld [vmem:[#allocation2 + $0xd0] sm:$0xff]  ;;  %4595 = vst.msk [vmem:[#allocation2 + $0x18] sm:$0xff] %vm283_vm0, %v4563_v25  ;;  %v4547_v36 = vld [vmem:[#allocation2 + $0x98] sm:$0xff]  ;;  %v3525_v42 = vmul.f32 %v11995_v56, %v9949_v30 }
 0x1e7   : > { %v430_v43 = vadd.f32 %v398_v3, %v366_v24  ;;  %v244_v48 = vld [vmem:[%s6659_s13 + $0x230] sm:$0xff]  ;;  %4431 = vst.msk [vmem:[#allocation2 + $0x20] sm:$0xff] %vm283_vm0, %v4399_v47  ;;  %v9961_v44 = vld [vmem:[%s6659_s13 + $0x1c0] sm:$0xff]  ;;  %v1770_v24 = vadd.f32 %v1738_v0, %v1706_v58  ;;  %v1555_v54 = vld [vmem:[#allocation2 + $0x58] sm:$0xff]  ;;  %v4579_v50 = vadd.f32 %v4547_v36, %v9890_v59 }
 0x1e8   : > { %v3676_v1 = vmul.f32 %v9961_v44, %v9774_v53  ;;  %v3212_v52 = vld [vmem:[#allocation2 + $0x40] sm:$0xff]  ;;  %4267 = vst.msk [vmem:[#allocation2 + $0x28] sm:$0xff] %vm283_vm0, %v4235_v6  ;;  %v9973_v27 = vld [vmem:[%s11598_s1 + $0x10] ss:$0 sm:$0xff]  ;;  %v2548_v40 = vld [vmem:[#allocation2 + $0x48] sm:$0xff]  ;;  %v1587_v58 = vadd.f32 %v1555_v54, %v1523_v23  ;;  %v2367_v54 = vmul.f32 %v9629_v49, %v9942_v62 }
 0x1e9   : > { %v4383_v16 = vld [vmem:[#allocation2 + $0xa0] sm:$0xff]  ;;  %v3244_v63 = vadd.f32 %v3212_v52, %v9896_v26  ;;  %v2863_v33 = vmul.f32 %v9973_v27, %v9942_v62  ;;  %2298 = vst.msk [vmem:[#allocation2 + $0xc8] sm:$0xff] %vm283_vm0, %v2266_v32  ;;  %v9979_v34 = vld [vmem:[%s6659_s13 + $0x231] sm:$0xff]  ;;  %462 = vst.msk [vmem:[#allocation2 + $0x68] sm:$0xff] %vm283_vm0, %v430_v43  ;;  %v2580_v26 = vadd.f32 %v2548_v40, %v2516_v61 }
 0x1ea   : > { %v4642_v59 = vld [vmem:[#allocation2 + $0x90] sm:$0xff]  ;;  %v4415_v12 = vadd.f32 %v4383_v16, %v4351_v51  ;;  %1802 = vst.msk [vmem:[#allocation2 + $0xd0] sm:$0xff] %vm283_vm0, %v1770_v24  ;;  %v1374_v60 = vmul.f32 %v9673_v17, %v9979_v34  ;;  %v1059_v10 = vld [vmem:[#allocation2 + $0x60] sm:$0xff]  ;;  %4611 = vst.msk [vmem:[#allocation2 + $0x98] sm:$0xff] %vm283_vm0, %v4579_v50  ;;  %v4336_v32 = vmul.f32 %v9583_v14, %v9514_v46 }
 0x1eb   : > { %v3888_v11 = vld [vmem:[#allocation2 + $0xb0] sm:$0xff]  ;;  %v9988_v25 = vld [vmem:[%s11598_s1] ss:$0 sm:$0xff]  ;;  %6121 = vmatprep.mubr.msk.f32.mxu1 %vm283_vm0, %v4642_v59  ;;  %3276 = vst.msk [vmem:[#allocation2 + $0x40] sm:$0xff] %vm283_vm0, %v3244_v63  ;;  %1619 = vst.msk [vmem:[#allocation2 + $0x58] sm:$0xff] %vm283_vm0, %v1587_v58  ;;  %v1091_v61 = vadd.f32 %v1059_v10, %v1027_v19 }
 0x1ec   : > { %v280_v23 = vmul.f32 %v9988_v25, %v244_v48  ;;  %v4037_v51 = vld [vmem:[#allocation2 + $0x30] sm:$0xff]  ;;  %v3920_v47 = vadd.f32 %v3888_v11, %v3856_v7  ;;  %v10000_v20 = vld [vmem:[%s11598_s1 + $0x3] ss:$0 sm:$0xff]  ;;  %4447 = vst.msk [vmem:[#allocation2 + $0xa0] sm:$0xff] %vm283_vm0, %v4415_v12  ;;  %v4219_v0 = vld [vmem:[#allocation2 + $0xa8] sm:$0xff] }
 0x1ed   : > { %v2052_v38 = vld [vmem:[#allocation2 + $0x50] sm:$0xff]  ;;  %v713_v3 = vmul.f32 %v10000_v20, %v9839_v28  ;;  %v6349_v6 = vld [vmem:[%s6659_s13 + $0x1a2] sm:$0xff]  ;;  %v4069_v43 = vadd.f32 %v4037_v51, %v4005_v37  ;;  %v3708_v19 = vld [vmem:[#allocation2 + $0x38] sm:$0xff]  ;;  %2612 = vst.msk [vmem:[#allocation2 + $0x48] sm:$0xff] %vm283_vm0, %v2580_v26  ;;  %v4251_v28 = vadd.f32 %v4219_v0, %v4187_v57  ;;  %v531_v37 = vmul.f32 %v9885_v35, %v9906_v31 }
 0x1ee   : > { %v4500_v7 = vmul.f32 %v6349_v6, %v9743_v13  ;;  %v5604_v48 = vld [vmem:[%s6659_s13 + $0x170] sm:$0xff]  ;;  %v2084_v36 = vadd.f32 %v2052_v38, %v2020_v45  ;;  %313 = vst.msk [vmem:[#allocation2 + $0xe8] sm:$0xff] %vm283_vm0, %v280_v23  ;;  %3952 = vst.msk [vmem:[#allocation2 + $0xb0] sm:$0xff] %vm283_vm0, %v3920_v47  ;;  %v3740_v52 = vadd.f32 %v3708_v19, %v3676_v1  ;;  %v2895_v24 = vld [vmem:[#allocation2 + $0xc0] sm:$0xff] }
 0x1ef   : > { %v1406_v14 = vld [vmem:[#allocation2 + $0xd8] sm:$0xff]  ;;  %1123 = vst.msk [vmem:[#allocation2 + $0x60] sm:$0xff] %vm283_vm0, %v1091_v61  ;;  %4101 = vst.msk [vmem:[#allocation2 + $0x30] sm:$0xff] %vm283_vm0, %v4069_v43  ;;  %v6350_v16 = vld [vmem:[%s6659_s13 + $0x1e1] sm:$0xff]  ;;  %v2927_v63 = vadd.f32 %v2895_v24, %v2863_v33  ;;  %v1871_v1 = vmul.f32 %v9467_v5, %v9942_v62  ;;  %v4516_v31 = vmul.f32 %v9743_v13, %v9484_v8 }
 0x1f0   : > { %v346_v50 = vld [vmem:[%s6659_s13 + $0x231] sm:$0xff]  ;;  %v3345_v57 = vmul.f32 %v6350_v16, %v11997_v55  ;;  %2116 = vst.msk [vmem:[#allocation2 + $0x50] sm:$0xff] %vm283_vm0, %v2084_v36  ;;  %v1438_v40 = vadd.f32 %v1406_v14, %v1374_v60  ;;  %v745_v58 = vld [vmem:[#allocation2 + $0xe0] sm:$0xff]  ;;  %4283 = vst.msk [vmem:[#allocation2 + $0xa8] sm:$0xff] %vm283_vm0, %v4251_v28  ;;  %v1691_v55 = vmul.f32 %v9547_v39, %v5604_v48 }
 0x1f1   : > { %v3557_v45 = vld [vmem:[#allocation2 + $0xb8] sm:$0xff]  ;;  %v4532_v12 = vld [vmem:[#allocation2 + $0x20] sm:$0xff]  ;;  %3772 = vst.msk [vmem:[#allocation2 + $0x38] sm:$0xff] %vm283_vm0, %v3740_v52  ;;  %v777_v26 = vadd.f32 %v745_v58, %v713_v3  ;;  %v4368_v62 = vld [vmem:[#allocation2 + $0x28] sm:$0xff]  ;;  %v4021_v60 = vmul.f32 %v9936_v22, %v9949_v30  ;;  %v2683_v10 = vmul.f32 %v9826_v2, %v5604_v48 }
 0x1f2   : > { %v4627_v59 = vld [vmem:[#allocation2 + $0x18] sm:$0xff]  ;;  %v3589_v11 = vadd.f32 %v3557_v45, %v3525_v42  ;;  %v10031_v33 = vld [vmem:[%s6659_s13 + $0x100] sm:$0xff]  ;;  %v4564_v5 = vadd.f32 %v4532_v12, %v4500_v7  ;;  %2959 = vst.msk [vmem:[#allocation2 + $0xc0] sm:$0xff] %vm283_vm0, %v2927_v63  ;;  %v2399_v23 = vld [vmem:[#allocation2 + $0xc8] sm:$0xff]  ;;  %v4400_v42 = vadd.f32 %v4368_v62, %v4336_v32  ;;  %v4352_v32 = vmul.f32 %v9514_v46, %v9814_v18 }
 0x1f3   : > { %6098 = vmatmul.mubr.msk.f32.gmra.mxu0 %vm283_vm0, %v4627_v59  ;;  %v10038_v8 = vld [vmem:[%s6659_s13 + $0x2a2] sm:$0xff]  ;;  %1470 = vst.msk [vmem:[#allocation2 + $0xd8] sm:$0xff] %vm283_vm0, %v1438_v40  ;;  %v10045_v51 = vld [vmem:[%s11598_s1 + $0x1] ss:$0 sm:$0xff]  ;;  %v2431_v61 = vadd.f32 %v2399_v23, %v2367_v54  ;;  %v1903_v3 = vld [vmem:[#allocation2 + $0xd0] sm:$0xff]  ;;  %v1194_v7 = vmul.f32 %v9560_v21, %v10031_v33  ;;  %v2187_v21 = vmul.f32 %v9497_v41, %v5604_v48 }
 0x1f4   : > { %v563_v39 = vld [vmem:[#allocation2 + $0x68] sm:$0xff]  ;;  %v382_v47 = vmul.f32 %v10045_v51, %v346_v50  ;;  %v10049_v38 = vld [vmem:[%s6659_s13 + $0x300] sm:$0xff]  ;;  %3621 = vst.msk [vmem:[#allocation2 + $0xb8] sm:$0xff] %vm283_vm0, %v3589_v11  ;;  %v10053_v6 = vld [vmem:[%s6659_s13 + $0x232] sm:$0xff]  ;;  %v1935_v52 = vadd.f32 %v1903_v3, %v1871_v1  ;;  %v4501_v62 = vmul.f32 %v9801_v29, %v9743_v13  ;;  %v698_v29 = vmul.f32 %v10000_v20, %v10031_v33 }
 0x1f5   : > { %809 = vst.msk [vmem:[#allocation2 + $0xe0] sm:$0xff] %vm283_vm0, %v777_v26  ;;  %v595_v0 = vadd.f32 %v563_v39, %v531_v37  ;;  %v4643_v43 = vld [vmem:[#allocation2 + $0x98] sm:$0xff]  ;;  %4596 = vst.msk [vmem:[#allocation2 + $0x20] sm:$0xff] %vm283_vm0, %v4564_v5  ;;  %v3377_v28 = vld [vmem:[#allocation2 + $0x40] sm:$0xff] }
 0x1f6   : > { %v10064_v19 = vld [vmem:[%s11598_s1 + $0x18] ss:$0 sm:$0xff]  ;;  %6122 = vmatmul.mubr.msk.f32.gmra.mxu1 %vm283_vm0, %v4643_v43  ;;  %v4548_v54 = vld [vmem:[#allocation2 + $0xa0] sm:$0xff]  ;;  %4432 = vst.msk [vmem:[#allocation2 + $0x28] sm:$0xff] %vm283_vm0, %v4400_v42  ;;  %v3409_v18 = vadd.f32 %v3377_v28, %v3345_v57  ;;  %v2715_v48 = vld [vmem:[#allocation2 + $0x48] sm:$0xff]  ;;  %v265_v43 = vmul.f32 %v9988_v25, %v10031_v33  ;;  %v2036_v28 = vmul.f32 %v11994_v9, %v10038_v8 }
 0x1f7   : > { %v4172_v36 = vmul.f32 %v10064_v19, %v9961_v44  ;;  %v1723_v24 = vld [vmem:[#allocation2 + $0x58] sm:$0xff]  ;;  %v10072_v14 = vld [vmem:[%s6659_s13 + $0x1c1] sm:$0xff]  ;;  %v10079_v44 = vld [vmem:[%s11598_s1 + $0x11] ss:$0 sm:$0xff]  ;;  %2463 = vst.msk [vmem:[#allocation2 + $0xc8] sm:$0xff] %vm283_vm0, %v2431_v61  ;;  %v4580_v45 = vadd.f32 %v4548_v54, %v4516_v31  ;;  %v2747_v63 = vadd.f32 %v2715_v48, %v2683_v10  ;;  %v3692_v31 = vmul.f32 %v9774_v53, %v10049_v38 }
 0x1f8   : > { %v3841_v46 = vmul.f32 %v10072_v14, %v9923_v4  ;;  %v3028_v41 = vmul.f32 %v10079_v44, %v10038_v8  ;;  %v1755_v37 = vadd.f32 %v1723_v24, %v1691_v55  ;;  %627 = vst.msk [vmem:[#allocation2 + $0x68] sm:$0xff] %vm283_vm0, %v595_v0  ;;  %v414_v50 = vld [vmem:[#allocation2 + $0xe8] sm:$0xff]  ;;  %v4053_v16 = vld [vmem:[#allocation2 + $0xb0] sm:$0xff]  ;;  %1967 = vst.msk [vmem:[#allocation2 + $0xd0] sm:$0xff] %vm283_vm0, %v1935_v52 }
 0x1f9   : > { %v10089_v57 = vld [vmem:[%s11598_s1 + $0x8] ss:$0 sm:$0xff]  ;;  %v1226_v40 = vld [vmem:[#allocation2 + $0x60] sm:$0xff]  ;;  %v446_v58 = vadd.f32 %v414_v50, %v382_v47  ;;  %v4204_v59 = vld [vmem:[#allocation2 + $0x30] sm:$0xff]  ;;  %v4085_v12 = vadd.f32 %v4053_v16, %v4021_v60  ;;  %3441 = vst.msk [vmem:[#allocation2 + $0x40] sm:$0xff] %vm283_vm0, %v3409_v18  ;;  %v2532_v47 = vmul.f32 %v12001_v15, %v10038_v8 }
 0x1fa   : > { %v1539_v1 = vmul.f32 %v10089_v57, %v10053_v6  ;;  %v2219_v11 = vld [vmem:[#allocation2 + $0x50] sm:$0xff]  ;;  %1787 = vst.msk [vmem:[#allocation2 + $0x58] sm:$0xff] %vm283_vm0, %v1755_v37  ;;  %v1258_v55 = vadd.f32 %v1226_v40, %v1194_v7  ;;  %v10100_v26 = vld [vmem:[%s11598_s1 + $0x4] ss:$0 sm:$0xff]  ;;  %4612 = vst.msk [vmem:[#allocation2 + $0xa0] sm:$0xff] %vm283_vm0, %v4580_v45  ;;  %v4236_v10 = vadd.f32 %v4204_v59, %v4172_v36 }
 0x1fb   : > { %v878_v5 = vmul.f32 %v10100_v26, %v9979_v34  ;;  %v4384_v60 = vld [vmem:[#allocation2 + $0xa8] sm:$0xff]  ;;  %v3873_v23 = vld [vmem:[#allocation2 + $0x38] sm:$0xff]  ;;  %2779 = vst.msk [vmem:[#allocation2 + $0x48] sm:$0xff] %vm283_vm0, %v2747_v63  ;;  %v2251_v42 = vadd.f32 %v2219_v11, %v2187_v21  ;;  %478 = vst.msk [vmem:[#allocation2 + $0xe8] sm:$0xff] %vm283_vm0, %v446_v58 }
 0x1fc   : > { %v5637_v39 = vld [vmem:[%s6659_s13 + $0x171] sm:$0xff]  ;;  %v4416_v61 = vadd.f32 %v4384_v60, %v4352_v32  ;;  %4117 = vst.msk [vmem:[#allocation2 + $0xb0] sm:$0xff] %vm283_vm0, %v4085_v12  ;;  %v3905_v34 = vadd.f32 %v3873_v23, %v3841_v46  ;;  %v3060_v3 = vld [vmem:[#allocation2 + $0xc0] sm:$0xff]  ;;  %1290 = vst.msk [vmem:[#allocation2 + $0x60] sm:$0xff] %vm283_vm0, %v1258_v55 }
 0x1fd   : > { %v1571_v7 = vld [vmem:[#allocation2 + $0xd8] sm:$0xff]  ;;  %4268 = vst.msk [vmem:[#allocation2 + $0x30] sm:$0xff] %vm283_vm0, %v4236_v10  ;;  %v3092_v32 = vadd.f32 %v3060_v3, %v3028_v41  ;;  %2283 = vst.msk [vmem:[#allocation2 + $0x50] sm:$0xff] %vm283_vm0, %v2251_v42  ;;  %v910_v52 = vld [vmem:[#allocation2 + $0xe0] sm:$0xff]  ;;  %v2848_v37 = vmul.f32 %v9973_v27, %v5637_v39  ;;  %v2352_v60 = vmul.f32 %v9629_v49, %v5637_v39 }
 0x1fe   : > { %v511_v0 = vld [vmem:[%s6659_s13 + $0x232] sm:$0xff]  ;;  %v1603_v21 = vadd.f32 %v1571_v7, %v1539_v1  ;;  %v4628_v24 = vld [vmem:[#allocation2 + $0x20] sm:$0xff]  ;;  %4448 = vst.msk [vmem:[#allocation2 + $0xa8] sm:$0xff] %vm283_vm0, %v4416_v61  ;;  %3937 = vst.msk [vmem:[#allocation2 + $0x38] sm:$0xff] %vm283_vm0, %v3905_v34  ;;  %v942_v8 = vadd.f32 %v910_v52, %v878_v5 }
 0x1ff   : > { %v3724_v36 = vld [vmem:[#allocation2 + $0xb8] sm:$0xff]  ;;  %v6357_v46 = vld [vmem:[%s6659_s13 + $0x1e2] sm:$0xff]  ;;  %v10130_v18 = vld [vmem:[%s11598_s1 + $0xa] ss:$0 sm:$0xff]  ;;  %298 = vst.msk [vmem:[#allocation2 + $0x70] sm:$0xff] %vm283_vm0, %v265_v43  ;;  %6100 = vmatprep.mubr.msk.f32.mxu0 %vm283_vm0, %v4628_v24  ;;  %v547_v16 = vmul.f32 %v9885_v35, %v511_v0 }
 0x200   : > { %v3756_v54 = vadd.f32 %v3724_v36, %v3692_v31  ;;  %v3510_v33 = vmul.f32 %v6357_v46, %v11995_v56  ;;  %v1856_v41 = vmul.f32 %v10130_v18, %v5637_v39  ;;  %v10134_v9 = vld [vmem:[%s6659_s13 + $0x101] sm:$0xff]  ;;  %v4188_v56 = vmul.f32 %v10064_v19, %v10049_v38  ;;  %3124 = vst.msk [vmem:[#allocation2 + $0xc0] sm:$0xff] %vm283_vm0, %v3092_v32  ;;  %v10147_v58 = vld [vmem:[%s6659_s13 + $0x2b0] sm:$0xff]  ;;  %v10157_v11 = vld [vmem:[%s11598_s1 + $0x19] ss:$0 sm:$0xff] }
 0x201   : > { %v4533_v48 = vld [vmem:[#allocation2 + $0x28] sm:$0xff]  ;;  %1635 = vst.msk [vmem:[#allocation2 + $0xd8] sm:$0xff] %vm283_vm0, %v1603_v21  ;;  %v5720_v1 = vld [vmem:[%s6659_s13 + $0x320] sm:$0xff]  ;;  %v2068_v38 = vld [vmem:[#allocation2 + $0xd0] sm:$0xff]  ;;  %v1359_v59 = vmul.f32 %v9673_v17, %v10134_v9  ;;  %v4517_v31 = vmul.f32 %v9743_v13, %v9949_v30  ;;  %v4337_v55 = vmul.f32 %v10157_v11, %v10072_v14  ;;  %v367_v49 = vmul.f32 %v10045_v51, %v10134_v9 }
 0x202   : > { %v2564_v50 = vld [vmem:[#allocation2 + $0xc8] sm:$0xff]  ;;  %v4565_v63 = vadd.f32 %v4533_v48, %v4501_v62  ;;  %3788 = vst.msk [vmem:[#allocation2 + $0xb8] sm:$0xff] %vm283_vm0, %v3756_v54  ;;  %974 = vst.msk [vmem:[#allocation2 + $0xe0] sm:$0xff] %vm283_vm0, %v942_v8  ;;  %v3542_v62 = vld [vmem:[#allocation2 + $0x40] sm:$0xff]  ;;  %v2100_v17 = vadd.f32 %v2068_v38, %v2036_v28 }
 0x203   : > { %v730_v45 = vld [vmem:[#allocation2 + $0x68] sm:$0xff]  ;;  %v2596_v40 = vadd.f32 %v2564_v50, %v2532_v47  ;;  %v1888_v10 = vld [vmem:[#allocation2 + $0x58] sm:$0xff]  ;;  %v4644_v23 = vld [vmem:[#allocation2 + $0xa0] sm:$0xff]  ;;  %v3574_v42 = vadd.f32 %v3542_v62, %v3510_v33  ;;  %v2699_v50 = vmul.f32 %v9826_v2, %v10147_v58 }
 0x204   : > { %v762_v12 = vadd.f32 %v730_v45, %v698_v29  ;;  %v10162_v5 = vld [vmem:[%s6659_s13 + $0x301] sm:$0xff]  ;;  %4597 = vst.msk [vmem:[#allocation2 + $0x28] sm:$0xff] %vm283_vm0, %v4565_v63  ;;  %v1920_v14 = vadd.f32 %v1888_v10, %v1856_v41  ;;  %6124 = vmatprep.mubr.msk.f32.mxu1 %vm283_vm0, %v4644_v23  ;;  %v4220_v39 = vld [vmem:[#allocation2 + $0xb0] sm:$0xff]  ;;  %2132 = vst.msk [vmem:[#allocation2 + $0xd0] sm:$0xff] %vm283_vm0, %v2100_v17 }
 0x205   : > { %v10167_v30 = vld [vmem:[%s6659_s13 + $0x1c2] sm:$0xff]  ;;  %2628 = vst.msk [vmem:[#allocation2 + $0xc8] sm:$0xff] %vm283_vm0, %v2596_v40  ;;  %v10179_v3 = vld [vmem:[%s11598_s1 + $0x12] ss:$0 sm:$0xff]  ;;  %v4252_v52 = vadd.f32 %v4220_v39, %v4188_v56  ;;  %v3857_v24 = vmul.f32 %v9923_v4, %v10162_v5  ;;  %3606 = vst.msk [vmem:[#allocation2 + $0x40] sm:$0xff] %vm283_vm0, %v3574_v42 }
 0x206   : > { %v4006_v47 = vmul.f32 %v10167_v30, %v9936_v22  ;;  %v2880_v61 = vld [vmem:[#allocation2 + $0x48] sm:$0xff]  ;;  %794 = vst.msk [vmem:[#allocation2 + $0x68] sm:$0xff] %vm283_vm0, %v762_v12  ;;  %v3196_v7 = vmul.f32 %v10179_v3, %v5720_v1  ;;  %v10183_v0 = vld [vmem:[%s6659_s13 + $0x172] sm:$0xff]  ;;  %v1391_v32 = vld [vmem:[#allocation2 + $0x60] sm:$0xff] }
 0x207   : > { %v579_v34 = vld [vmem:[#allocation2 + $0xe8] sm:$0xff]  ;;  %v2912_v29 = vadd.f32 %v2880_v61, %v2848_v37  ;;  %v4369_v21 = vld [vmem:[#allocation2 + $0x30] sm:$0xff]  ;;  %1952 = vst.msk [vmem:[#allocation2 + $0x58] sm:$0xff] %vm283_vm0, %v1920_v14  ;;  %v1423_v46 = vadd.f32 %v1391_v32, %v1359_v59  ;;  %v10200_v33 = vld [vmem:[%s11598_s1 + $0x5] ss:$0 sm:$0xff]  ;;  %v863_v59 = vmul.f32 %v10100_v26, %v10134_v9  ;;  %v4353_v32 = vmul.f32 %v10157_v11, %v10162_v5 }
 0x208   : > { %v10189_v43 = vld [vmem:[%s11598_s1 + $0x9] ss:$0 sm:$0xff]  ;;  %v611_v28 = vadd.f32 %v579_v34, %v547_v16  ;;  %v2384_v54 = vld [vmem:[#allocation2 + $0x50] sm:$0xff]  ;;  %v1043_v41 = vmul.f32 %v10200_v33, %v10053_v6  ;;  %v245_v8 = vld [vmem:[%s6659_s13 + $0x240] sm:$0xff]  ;;  %v4401_v56 = vadd.f32 %v4369_v21, %v4337_v55  ;;  %4284 = vst.msk [vmem:[#allocation2 + $0xb0] sm:$0xff] %vm283_vm0, %v4252_v52 }
 0x209   : > { %v1707_v36 = vmul.f32 %v10189_v43, %v10147_v58  ;;  %v4549_v48 = vld [vmem:[#allocation2 + $0xa8] sm:$0xff]  ;;  %v4038_v37 = vld [vmem:[#allocation2 + $0x38] sm:$0xff]  ;;  %2944 = vst.msk [vmem:[#allocation2 + $0x48] sm:$0xff] %vm283_vm0, %v2912_v29  ;;  %v2416_v45 = vadd.f32 %v2384_v54, %v2352_v60  ;;  %v399_v16 = vld [vmem:[#allocation2 + $0x70] sm:$0xff]  ;;  %v281_v9 = vmul.f32 %v9988_v25, %v245_v8 }
 0x20a   : > { %643 = vst.msk [vmem:[#allocation2 + $0xe8] sm:$0xff] %vm283_vm0, %v611_v28  ;;  %v4581_v63 = vadd.f32 %v4549_v48, %v4517_v31  ;;  %v4070_v1 = vadd.f32 %v4038_v37, %v4006_v47  ;;  %v3228_v40 = vld [vmem:[#allocation2 + $0xc0] sm:$0xff]  ;;  %v1739_v6 = vld [vmem:[#allocation2 + $0xd8] sm:$0xff]  ;;  %1455 = vst.msk [vmem:[#allocation2 + $0x60] sm:$0xff] %vm283_vm0, %v1423_v46  ;;  %v431_v12 = vadd.f32 %v399_v16, %v367_v49 }
 0x20b   : > { %v10212_v38 = vld [vmem:[%s6659_s13 + $0x240] sm:$0xff]  ;;  %4433 = vst.msk [vmem:[#allocation2 + $0x30] sm:$0xff] %vm283_vm0, %v4401_v56  ;;  %v3889_v55 = vld [vmem:[#allocation2 + $0xb8] sm:$0xff]  ;;  %v3260_v31 = vadd.f32 %v3228_v40, %v3196_v7  ;;  %2448 = vst.msk [vmem:[#allocation2 + $0x50] sm:$0xff] %vm283_vm0, %v2416_v45  ;;  %v1771_v17 = vadd.f32 %v1739_v6, %v1707_v36  ;;  %v2517_v56 = vmul.f32 %v12001_v15, %v10183_v0 }
 0x20c   : > { %v10221_v62 = vld [vmem:[%s11598_s1 + $0xc] ss:$0 sm:$0xff]  ;;  %v1075_v10 = vld [vmem:[#allocation2 + $0xe0] sm:$0xff]  ;;  %4613 = vst.msk [vmem:[#allocation2 + $0xa8] sm:$0xff] %vm283_vm0, %v4581_v63  ;;  %4102 = vst.msk [vmem:[#allocation2 + $0x38] sm:$0xff] %vm283_vm0, %v4070_v1  ;;  %v3921_v23 = vadd.f32 %v3889_v55, %v3857_v24  ;;  %v714_v36 = vmul.f32 %v10000_v20, %v10212_v38 }
 0x20d   : > { %v2203_v60 = vmul.f32 %v10221_v62, %v10147_v58  ;;  %v10229_v47 = vld [vmem:[%s6659_s13 + $0x1f0] sm:$0xff]  ;;  %v5753_v61 = vld [vmem:[%s6659_s13 + $0x321] sm:$0xff]  ;;  %v10237_v58 = vld [vmem:[%s11598_s1 + $0xb] ss:$0 sm:$0xff]  ;;  %v1107_v49 = vadd.f32 %v1075_v10, %v1043_v41  ;;  %463 = vst.msk [vmem:[#allocation2 + $0x70] sm:$0xff] %vm283_vm0, %v431_v12  ;;  %v4502_v41 = vmul.f32 %v10167_v30, %v9743_v13 }
 0x20e   : > { %v3677_v42 = vmul.f32 %v10229_v47, %v9774_v53  ;;  %v2021_v14 = vmul.f32 %v10237_v58, %v10183_v0  ;;  %v10242_v34 = vld [vmem:[%s6659_s13 + $0x102] sm:$0xff]  ;;  %3292 = vst.msk [vmem:[#allocation2 + $0xc0] sm:$0xff] %vm283_vm0, %v3260_v31  ;;  %v3013_v53 = vmul.f32 %v10079_v44, %v10183_v0  ;;  %1803 = vst.msk [vmem:[#allocation2 + $0xd8] sm:$0xff] %vm283_vm0, %v1771_v17  ;;  %v10260_v52 = vld [vmem:[%s6659_s13 + $0x2b1] sm:$0xff] }
 0x20f   : > { %v4629_v39 = vld [vmem:[#allocation2 + $0x28] sm:$0xff]  ;;  %314 = vst.msk [vmem:[#allocation2 + $0xf0] sm:$0xff] %vm283_vm0, %v281_v9  ;;  %3953 = vst.msk [vmem:[#allocation2 + $0xb8] sm:$0xff] %vm283_vm0, %v3921_v23  ;;  %v2235_v24 = vld [vmem:[#allocation2 + $0xd0] sm:$0xff]  ;;  %v1524_v54 = vmul.f32 %v10089_v57, %v10242_v34  ;;  %v532_v15 = vmul.f32 %v9885_v35, %v10242_v34  ;;  %v1872_v12 = vmul.f32 %v10130_v18, %v10260_v52 }
 0x210   : > { %v2731_v7 = vld [vmem:[#allocation2 + $0xc8] sm:$0xff]  ;;  %6101 = vmatmul.mubr.msk.f32.gmra.mxu0 %vm283_vm0, %v4629_v39  ;;  %1139 = vst.msk [vmem:[#allocation2 + $0xe0] sm:$0xff] %vm283_vm0, %v1107_v49  ;;  %v6367_v8 = vld [vmem:[%s6659_s13 + $0x1d0] sm:$0xff]  ;;  %v3709_v48 = vld [vmem:[#allocation2 + $0x40] sm:$0xff]  ;;  %v2267_v37 = vadd.f32 %v2235_v24, %v2203_v60 }
 0x211   : > { %v895_v29 = vld [vmem:[#allocation2 + $0x68] sm:$0xff]  ;;  %v2763_v21 = vadd.f32 %v2731_v7, %v2699_v50  ;;  %v4173_v5 = vmul.f32 %v6367_v8, %v10064_v19  ;;  %v2053_v50 = vld [vmem:[#allocation2 + $0x58] sm:$0xff]  ;;  %v3741_v16 = vadd.f32 %v3709_v48, %v3677_v42  ;;  %v10275_v63 = vld [vmem:[%s11598_s1 + $0x13] ss:$0 sm:$0xff] }
 0x212   : > { %v10256_v28 = vld [vmem:[%s6659_s13 + $0x302] sm:$0xff]  ;;  %v927_v46 = vadd.f32 %v895_v29, %v863_v59  ;;  %v3361_v1 = vmul.f32 %v10275_v63, %v5753_v61  ;;  %v2085_v30 = vadd.f32 %v2053_v50, %v2021_v14  ;;  %v4385_v0 = vld [vmem:[#allocation2 + $0xb0] sm:$0xff]  ;;  %2299 = vst.msk [vmem:[#allocation2 + $0xd0] sm:$0xff] %vm283_vm0, %v2267_v37  ;;  %v2864_v29 = vmul.f32 %v9973_v27, %v10260_v52 }
 0x213   : > { %v347_v45 = vld [vmem:[%s6659_s13 + $0x241] sm:$0xff]  ;;  %2795 = vst.msk [vmem:[#allocation2 + $0xc8] sm:$0xff] %vm283_vm0, %v2763_v21  ;;  %v4022_v6 = vmul.f32 %v9936_v22, %v10256_v28  ;;  %v10288_v31 = vld [vmem:[%s6659_s13 + $0x110] sm:$0xff]  ;;  %v4417_v10 = vadd.f32 %v4385_v0, %v4353_v32  ;;  %3773 = vst.msk [vmem:[#allocation2 + $0x40] sm:$0xff] %vm283_vm0, %v3741_v16 }
 0x214   : > { %v3045_v13 = vld [vmem:[#allocation2 + $0x48] sm:$0xff]  ;;  %959 = vst.msk [vmem:[#allocation2 + $0x68] sm:$0xff] %vm283_vm0, %v927_v46  ;;  %v1556_v55 = vld [vmem:[#allocation2 + $0x60] sm:$0xff]  ;;  %v4534_v17 = vld [vmem:[#allocation2 + $0x30] sm:$0xff]  ;;  %v383_v49 = vmul.f32 %v10045_v51, %v347_v45  ;;  %v266_v8 = vmul.f32 %v9988_v25, %v10288_v31 }
 0x215   : > { %v746_v40 = vld [vmem:[#allocation2 + $0xe8] sm:$0xff]  ;;  %v3077_v59 = vadd.f32 %v3045_v13, %v3013_v53  ;;  %v2549_v9 = vld [vmem:[#allocation2 + $0x50] sm:$0xff]  ;;  %2117 = vst.msk [vmem:[#allocation2 + $0x58] sm:$0xff] %vm283_vm0, %v2085_v30  ;;  %v1588_v23 = vadd.f32 %v1556_v55, %v1524_v54  ;;  %v10298_v61 = vld [vmem:[%s11598_s1 + $0x6] ss:$0 sm:$0xff]  ;;  %v4566_v53 = vadd.f32 %v4534_v17, %v4502_v41  ;;  %v1028_v54 = vmul.f32 %v10200_v33, %v10242_v34 }
 0x216   : > { %v778_v60 = vadd.f32 %v746_v40, %v714_v36  ;;  %v10293_v42 = vld [vmem:[%s6659_s13 + $0x241] sm:$0xff]  ;;  %v1210_v14 = vmul.f32 %v10298_v61, %v10212_v38  ;;  %v4205_v7 = vld [vmem:[#allocation2 + $0x38] sm:$0xff]  ;;  %v2581_v36 = vadd.f32 %v2549_v9, %v2517_v56  ;;  %v564_v32 = vld [vmem:[#allocation2 + $0x70] sm:$0xff]  ;;  %4449 = vst.msk [vmem:[#allocation2 + $0xb0] sm:$0xff] %vm283_vm0, %v4417_v10 }
 0x217   : > { %v4645_v39 = vld [vmem:[#allocation2 + $0xa8] sm:$0xff]  ;;  %3109 = vst.msk [vmem:[#allocation2 + $0x48] sm:$0xff] %vm283_vm0, %v3077_v59  ;;  %v4237_v38 = vadd.f32 %v4205_v7, %v4173_v5  ;;  %v3393_v21 = vld [vmem:[#allocation2 + $0xc0] sm:$0xff]  ;;  %v1904_v24 = vld [vmem:[#allocation2 + $0xd8] sm:$0xff]  ;;  %v596_v46 = vadd.f32 %v564_v32, %v532_v15 }
 0x218   : > { %810 = vst.msk [vmem:[#allocation2 + $0xe8] sm:$0xff] %vm283_vm0, %v778_v60  ;;  %6125 = vmatmul.mubr.msk.f32.gmra.mxu1 %vm283_vm0, %v4645_v39  ;;  %1620 = vst.msk [vmem:[#allocation2 + $0x60] sm:$0xff] %vm283_vm0, %v1588_v23  ;;  %v415_v41 = vld [vmem:[#allocation2 + $0xf0] sm:$0xff]  ;;  %v4054_v48 = vld [vmem:[#allocation2 + $0xb8] sm:$0xff]  ;;  %v3425_v37 = vadd.f32 %v3393_v21, %v3361_v1  ;;  %v1936_v16 = vadd.f32 %v1904_v24, %v1872_v12  ;;  %v879_v12 = vmul.f32 %v10100_v26, %v10293_v42 }
 0x219   : > { %4598 = vst.msk [vmem:[#allocation2 + $0x30] sm:$0xff] %vm283_vm0, %v4566_v53  ;;  %v10316_v56 = vld [vmem:[%s6659_s13 + $0x1f1] sm:$0xff]  ;;  %2613 = vst.msk [vmem:[#allocation2 + $0x50] sm:$0xff] %vm283_vm0, %v2581_v36  ;;  %v5605_v50 = vld [vmem:[%s6659_s13 + $0x180] sm:$0xff]  ;;  %v4086_v30 = vadd.f32 %v4054_v48, %v4022_v6  ;;  %v447_v15 = vadd.f32 %v415_v41, %v383_v49  ;;  %v699_v41 = vmul.f32 %v10000_v20, %v10288_v31 }
 0x21a   : > { %v3842_v5 = vmul.f32 %v10316_v56, %v9923_v4  ;;  %v10325_v34 = vld [vmem:[%s11598_s1 + $0xd] ss:$0 sm:$0xff]  ;;  %v1242_v13 = vld [vmem:[#allocation2 + $0xe0] sm:$0xff]  ;;  %4269 = vst.msk [vmem:[#allocation2 + $0x38] sm:$0xff] %vm283_vm0, %v4237_v38  ;;  %v2188_v4 = vmul.f32 %v10221_v62, %v5605_v50  ;;  %628 = vst.msk [vmem:[#allocation2 + $0x70] sm:$0xff] %vm283_vm0, %v596_v46  ;;  %v1692_v23 = vmul.f32 %v10189_v43, %v5605_v50 }
 0x21b   : > { %v2368_v45 = vmul.f32 %v10325_v34, %v10260_v52  ;;  %v5786_v40 = vld [vmem:[%s6659_s13 + $0x322] sm:$0xff]  ;;  %v1274_v1 = vadd.f32 %v1242_v13, %v1210_v14  ;;  %299 = vst.msk [vmem:[#allocation2 + $0x78] sm:$0xff] %vm283_vm0, %v266_v8  ;;  %3457 = vst.msk [vmem:[#allocation2 + $0xc0] sm:$0xff] %vm283_vm0, %v3425_v37  ;;  %v3181_v52 = vmul.f32 %v10229_v47, %v10179_v3  ;;  %v10339_v59 = vld [vmem:[%s6659_s13 + $0x111] sm:$0xff] }
 0x21c   : > { %v2896_v0 = vld [vmem:[#allocation2 + $0xc8] sm:$0xff]  ;;  %1968 = vst.msk [vmem:[#allocation2 + $0xd8] sm:$0xff] %vm283_vm0, %v1936_v16  ;;  %v10346_v55 = vld [vmem:[%s11598_s1 + $0x1a] ss:$0 sm:$0xff]  ;;  %4118 = vst.msk [vmem:[#allocation2 + $0xb8] sm:$0xff] %vm283_vm0, %v4086_v30  ;;  %v368_v8 = vmul.f32 %v10045_v51, %v10339_v59 }
 0x21d   : > { %v1060_v6 = vld [vmem:[#allocation2 + $0x68] sm:$0xff]  ;;  %v4518_v60 = vmul.f32 %v10346_v55, %v10256_v28  ;;  %v5921_v47 = vld [vmem:[%s6659_s13 + $0x310] sm:$0xff]  ;;  %v2928_v17 = vadd.f32 %v2896_v0, %v2864_v29  ;;  %1306 = vst.msk [vmem:[#allocation2 + $0xe0] sm:$0xff] %vm283_vm0, %v1274_v1  ;;  %479 = vst.msk [vmem:[#allocation2 + $0xf0] sm:$0xff] %vm283_vm0, %v447_v15  ;;  %v2684_v29 = vmul.f32 %v9826_v2, %v5605_v50 }
 0x21e   : > { %v10353_v10 = vld [vmem:[%s6659_s13 + $0x2b2] sm:$0xff]  ;;  %v1092_v14 = vadd.f32 %v1060_v6, %v1028_v54  ;;  %v3874_v53 = vld [vmem:[#allocation2 + $0x40] sm:$0xff]  ;;  %v3213_v24 = vld [vmem:[#allocation2 + $0x48] sm:$0xff]  ;;  %v4189_v2 = vmul.f32 %v10064_v19, %v5921_v47 }
 0x21f   : > { %v2400_v9 = vld [vmem:[#allocation2 + $0xd0] sm:$0xff]  ;;  %v2220_v32 = vld [vmem:[#allocation2 + $0x58] sm:$0xff]  ;;  %v512_v38 = vld [vmem:[%s6659_s13 + $0x242] sm:$0xff]  ;;  %v3906_v21 = vadd.f32 %v3874_v53, %v3842_v5  ;;  %2960 = vst.msk [vmem:[#allocation2 + $0xc8] sm:$0xff] %vm283_vm0, %v2928_v17  ;;  %v3245_v37 = vadd.f32 %v3213_v24, %v3181_v52  ;;  %v2037_v5 = vmul.f32 %v10237_v58, %v10353_v10  ;;  %v3029_v6 = vmul.f32 %v10079_v44, %v10353_v10 }
 0x220   : > { %v6373_v49 = vld [vmem:[%s6659_s13 + $0x1d1] sm:$0xff]  ;;  %v2432_v36 = vadd.f32 %v2400_v9, %v2368_v45  ;;  %v2252_v54 = vadd.f32 %v2220_v32, %v2188_v4  ;;  %1124 = vst.msk [vmem:[#allocation2 + $0x68] sm:$0xff] %vm283_vm0, %v1092_v14  ;;  %v911_v46 = vld [vmem:[#allocation2 + $0xe8] sm:$0xff]  ;;  %v1724_v50 = vld [vmem:[#allocation2 + $0x60] sm:$0xff]  ;;  %v548_v52 = vmul.f32 %v9885_v35, %v512_v38  ;;  %v1195_v14 = vmul.f32 %v10298_v61, %v10288_v31 }
 0x221   : > { %v4338_v39 = vmul.f32 %v6373_v49, %v10157_v11  ;;  %v10363_v28 = vld [vmem:[%s11598_s1 + $0x14] ss:$0 sm:$0xff]  ;;  %v943_v45 = vadd.f32 %v911_v46, %v879_v12  ;;  %3938 = vst.msk [vmem:[#allocation2 + $0x40] sm:$0xff] %vm283_vm0, %v3906_v21  ;;  %v10381_v4 = vld [vmem:[%s6659_s13 + $0x242] sm:$0xff]  ;;  %v4370_v0 = vld [vmem:[#allocation2 + $0x38] sm:$0xff] }
 0x222   : > { %v3526_v7 = vmul.f32 %v10363_v28, %v5786_v40  ;;  %v4550_v48 = vld [vmem:[#allocation2 + $0xb0] sm:$0xff]  ;;  %2464 = vst.msk [vmem:[#allocation2 + $0xd0] sm:$0xff] %vm283_vm0, %v2432_v36  ;;  %2284 = vst.msk [vmem:[#allocation2 + $0x58] sm:$0xff] %vm283_vm0, %v2252_v54  ;;  %v1756_v40 = vadd.f32 %v1724_v50, %v1692_v23  ;;  %v10386_v1 = vld [vmem:[%s11598_s1 + $0x7] ss:$0 sm:$0xff] }
 0x223   : > { %v4630_v16 = vld [vmem:[#allocation2 + $0x30] sm:$0xff]  ;;  %v4582_v13 = vadd.f32 %v4550_v48, %v4518_v60  ;;  %v1375_v15 = vmul.f32 %v10386_v1, %v10293_v42  ;;  %3277 = vst.msk [vmem:[#allocation2 + $0x48] sm:$0xff] %vm283_vm0, %v3245_v37  ;;  %v5638_v60 = vld [vmem:[%s6659_s13 + $0x181] sm:$0xff]  ;;  %975 = vst.msk [vmem:[#allocation2 + $0xe8] sm:$0xff] %vm283_vm0, %v943_v45  ;;  %v4402_v42 = vadd.f32 %v4370_v0, %v4338_v39 }
 0x224   : > { %v2716_v30 = vld [vmem:[#allocation2 + $0x50] sm:$0xff]  ;;  %6103 = vmatprep.mubr.msk.f32.mxu0 %vm283_vm0, %v4630_v16  ;;  %v400_v17 = vld [vmem:[#allocation2 + $0x78] sm:$0xff]  ;;  %v3558_v9 = vld [vmem:[#allocation2 + $0xc0] sm:$0xff]  ;;  %1788 = vst.msk [vmem:[#allocation2 + $0x60] sm:$0xff] %vm283_vm0, %v1756_v40 }
 0x225   : > { %v2748_v12 = vadd.f32 %v2716_v30, %v2684_v29  ;;  %v731_v47 = vld [vmem:[#allocation2 + $0x70] sm:$0xff]  ;;  %4614 = vst.msk [vmem:[#allocation2 + $0xb0] sm:$0xff] %vm283_vm0, %v4582_v13  ;;  %v2069_v23 = vld [vmem:[#allocation2 + $0xd8] sm:$0xff]  ;;  %v432_v53 = vadd.f32 %v400_v17, %v368_v8  ;;  %v3590_v21 = vadd.f32 %v3558_v9, %v3526_v7  ;;  %v10411_v39 = vld [vmem:[%s11598_s1 + $0xe] ss:$0 sm:$0xff] }
 0x226   : > { %v763_v49 = vadd.f32 %v731_v47, %v699_v41  ;;  %v246_v36 = vld [vmem:[%s6659_s13 + $0x250] sm:$0xff]  ;;  %v4221_v32 = vld [vmem:[#allocation2 + $0xb8] sm:$0xff]  ;;  %v2533_v31 = vmul.f32 %v10411_v39, %v10353_v10  ;;  %v2101_v24 = vadd.f32 %v2069_v23, %v2037_v5  ;;  %v1407_v54 = vld [vmem:[#allocation2 + $0xe0] sm:$0xff]  ;;  %4434 = vst.msk [vmem:[#allocation2 + $0x38] sm:$0xff] %vm283_vm0, %v4402_v42  ;;  %v3346_v10 = vmul.f32 %v10316_v56, %v10275_v63 }
 0x227   : > { %v10403_v29 = vld [vmem:[%s6659_s13 + $0x1f2] sm:$0xff]  ;;  %2780 = vst.msk [vmem:[#allocation2 + $0x50] sm:$0xff] %vm283_vm0, %v2748_v12  ;;  %v4253_v41 = vadd.f32 %v4221_v32, %v4189_v2  ;;  %v1439_v7 = vadd.f32 %v1407_v54, %v1375_v15  ;;  %464 = vst.msk [vmem:[#allocation2 + $0x78] sm:$0xff] %vm283_vm0, %v432_v53  ;;  %v3061_v48 = vld [vmem:[#allocation2 + $0xc8] sm:$0xff]  ;;  %v1044_v5 = vmul.f32 %v10200_v33, %v10381_v4 }
 0x228   : > { %v4007_v38 = vmul.f32 %v10403_v29, %v9936_v22  ;;  %v580_v46 = vld [vmem:[#allocation2 + $0xf0] sm:$0xff]  ;;  %v2353_v22 = vmul.f32 %v10325_v34, %v5638_v60  ;;  %795 = vst.msk [vmem:[#allocation2 + $0x70] sm:$0xff] %vm283_vm0, %v763_v49  ;;  %3622 = vst.msk [vmem:[#allocation2 + $0xc0] sm:$0xff] %vm283_vm0, %v3590_v21  ;;  %v1227_v2 = vld [vmem:[#allocation2 + $0x68] sm:$0xff]  ;;  %v282_v50 = vmul.f32 %v9988_v25, %v246_v36 }
 0x229   : > { %v612_v8 = vadd.f32 %v580_v46, %v548_v52  ;;  %2133 = vst.msk [vmem:[#allocation2 + $0xd8] sm:$0xff] %vm283_vm0, %v2101_v24  ;;  %v10424_v37 = vld [vmem:[%s6659_s13 + $0x112] sm:$0xff]  ;;  %4285 = vst.msk [vmem:[#allocation2 + $0xb8] sm:$0xff] %vm283_vm0, %v4253_v41  ;;  %v3093_v16 = vadd.f32 %v3061_v48, %v3029_v6  ;;  %v10432_v30 = vld [vmem:[%s6659_s13 + $0x2c0] sm:$0xff]  ;;  %v1857_v56 = vmul.f32 %v10130_v18, %v5638_v60 }
 0x22a   : > { %v5821_v45 = vld [vmem:[%s6659_s13 + $0x330] sm:$0xff]  ;;  %1471 = vst.msk [vmem:[#allocation2 + $0xe0] sm:$0xff] %vm283_vm0, %v1439_v7  ;;  %v1259_v40 = vadd.f32 %v1227_v2, %v1195_v14  ;;  %v4039_v12 = vld [vmem:[#allocation2 + $0x40] sm:$0xff]  ;;  %v2849_v6 = vmul.f32 %v9973_v27, %v5638_v60  ;;  %v2385_v17 = vld [vmem:[#allocation2 + $0x58] sm:$0xff]  ;;  %v864_v49 = vmul.f32 %v10100_v26, %v10339_v59  ;;  %v533_v53 = vmul.f32 %v9885_v35, %v10424_v37 }
 0x22b   : > { %v2565_v13 = vld [vmem:[#allocation2 + $0xd0] sm:$0xff]  ;;  %644 = vst.msk [vmem:[#allocation2 + $0xf0] sm:$0xff] %vm283_vm0, %v612_v8  ;;  %315 = vst.msk [vmem:[#allocation2 + $0xf8] sm:$0xff] %vm283_vm0, %v282_v50  ;;  %v4071_v42 = vadd.f32 %v4039_v12, %v4007_v38  ;;  %v3378_v9 = vld [vmem:[#allocation2 + $0x48] sm:$0xff]  ;;  %v2417_v23 = vadd.f32 %v2385_v17, %v2353_v22  ;;  %v2204_v21 = vmul.f32 %v10221_v62, %v10432_v30 }
 0x22c   : > { %v10437_v15 = vld [vmem:[%s6659_s13 + $0x250] sm:$0xff]  ;;  %v2597_v47 = vadd.f32 %v2565_v13, %v2533_v31  ;;  %3125 = vst.msk [vmem:[#allocation2 + $0xc8] sm:$0xff] %vm283_vm0, %v3093_v16  ;;  %1291 = vst.msk [vmem:[#allocation2 + $0x68] sm:$0xff] %vm283_vm0, %v1259_v40  ;;  %v1076_v14 = vld [vmem:[#allocation2 + $0xe8] sm:$0xff]  ;;  %v3410_v38 = vadd.f32 %v3378_v9, %v3346_v10  ;;  %v1540_v41 = vmul.f32 %v10089_v57, %v10381_v4 }
 0x22d   : > { %v6378_v52 = vld [vmem:[%s6659_s13 + $0x1d2] sm:$0xff]  ;;  %v1889_v31 = vld [vmem:[#allocation2 + $0x60] sm:$0xff]  ;;  %v1108_v24 = vadd.f32 %v1076_v14, %v1044_v5  ;;  %4103 = vst.msk [vmem:[#allocation2 + $0x40] sm:$0xff] %vm283_vm0, %v4071_v42  ;;  %2449 = vst.msk [vmem:[#allocation2 + $0x58] sm:$0xff] %vm283_vm0, %v2417_v23  ;;  %v715_v22 = vmul.f32 %v10000_v20, %v10437_v15  ;;  %v3197_v8 = vmul.f32 %v10179_v3, %v5821_v45 }
 0x22e   : > { %v4503_v25 = vmul.f32 %v6378_v52, %v10346_v55  ;;  %v5954_v0 = vld [vmem:[%s6659_s13 + $0x311] sm:$0xff]  ;;  %2629 = vst.msk [vmem:[#allocation2 + $0xd0] sm:$0xff] %vm283_vm0, %v2597_v47  ;;  %v1921_v46 = vadd.f32 %v1889_v31, %v1857_v56  ;;  %3442 = vst.msk [vmem:[#allocation2 + $0x48] sm:$0xff] %vm283_vm0, %v3410_v38  ;;  %v5671_v13 = vld [vmem:[%s6659_s13 + $0x182] sm:$0xff]  ;;  %v1360_v56 = vmul.f32 %v10386_v1, %v10339_v59 }
 0x22f   : > { %v348_v36 = vld [vmem:[%s6659_s13 + $0x251] sm:$0xff]  ;;  %v4354_v35 = vmul.f32 %v10157_v11, %v5954_v0  ;;  %1140 = vst.msk [vmem:[#allocation2 + $0xe8] sm:$0xff] %vm283_vm0, %v1108_v24  ;;  %v3725_v16 = vld [vmem:[#allocation2 + $0xc0] sm:$0xff] }
 0x230   : > { %v4646_v27 = vld [vmem:[#allocation2 + $0xb0] sm:$0xff]  ;;  %v4535_v7 = vld [vmem:[#allocation2 + $0x38] sm:$0xff]  ;;  %v384_v5 = vmul.f32 %v10045_v51, %v348_v36  ;;  %1953 = vst.msk [vmem:[#allocation2 + $0x60] sm:$0xff] %vm283_vm0, %v1921_v46  ;;  %v10486_v51 = vld [vmem:[%s11598_s1 + $0xf] ss:$0 sm:$0xff] }
 0x231   : > { %v10455_v60 = vld [vmem:[%s11598_s1 + $0x15] ss:$0 sm:$0xff]  ;;  %6127 = vmatprep.mubr.msk.f32.mxu1 %vm283_vm0, %v4646_v27  ;;  %v565_v2 = vld [vmem:[#allocation2 + $0x78] sm:$0xff]  ;;  %v4567_v50 = vadd.f32 %v4535_v7, %v4503_v25  ;;  %v2700_v25 = vmul.f32 %v10486_v51, %v10432_v30  ;;  %v1572_v47 = vld [vmem:[#allocation2 + $0xe0] sm:$0xff]  ;;  %v1211_v27 = vmul.f32 %v10298_v61, %v10437_v15 }
 0x232   : > { %v3693_v32 = vmul.f32 %v10455_v60, %v5821_v45  ;;  %v2881_v54 = vld [vmem:[#allocation2 + $0x50] sm:$0xff]  ;;  %v2236_v4 = vld [vmem:[#allocation2 + $0xd8] sm:$0xff]  ;;  %v597_v52 = vadd.f32 %v565_v2, %v533_v53  ;;  %v10478_v45 = vld [vmem:[%s6659_s13 + $0x200] sm:$0xff]  ;;  %v1604_v9 = vadd.f32 %v1572_v47, %v1540_v41 }
 0x233   : > { %v2913_v10 = vadd.f32 %v2881_v54, %v2849_v6  ;;  %v896_v48 = vld [vmem:[#allocation2 + $0x70] sm:$0xff]  ;;  %v4386_v0 = vld [vmem:[#allocation2 + $0xb8] sm:$0xff]  ;;  %v4174_v12 = vmul.f32 %v10478_v45, %v10064_v19  ;;  %v2268_v59 = vadd.f32 %v2236_v4, %v2204_v21  ;;  %4599 = vst.msk [vmem:[#allocation2 + $0x38] sm:$0xff] %vm283_vm0, %v4567_v50  ;;  %v2518_v19 = vmul.f32 %v10411_v39, %v5671_v13  ;;  %v3229_v53 = vld [vmem:[#allocation2 + $0xc8] sm:$0xff] }
 0x234   : > { %v928_v40 = vadd.f32 %v896_v48, %v864_v49  ;;  %v3757_v6 = vadd.f32 %v3725_v16, %v3693_v32  ;;  %v747_v17 = vld [vmem:[#allocation2 + $0xf0] sm:$0xff]  ;;  %v4418_v42 = vadd.f32 %v4386_v0, %v4354_v35  ;;  %629 = vst.msk [vmem:[#allocation2 + $0x78] sm:$0xff] %vm283_vm0, %v597_v52  ;;  %v416_v14 = vld [vmem:[#allocation2 + $0xf8] sm:$0xff]  ;;  %v3511_v49 = vmul.f32 %v10403_v29, %v10363_v28  ;;  %v1392_v36 = vld [vmem:[#allocation2 + $0x68] sm:$0xff] }
 0x235   : > { %2945 = vst.msk [vmem:[#allocation2 + $0x50] sm:$0xff] %vm283_vm0, %v2913_v10  ;;  %v779_v23 = vadd.f32 %v747_v17, %v715_v22  ;;  %2300 = vst.msk [vmem:[#allocation2 + $0xd8] sm:$0xff] %vm283_vm0, %v2268_v59  ;;  %v10501_v32 = vld [vmem:[%s6659_s13 + $0x120] sm:$0xff]  ;;  %v448_v38 = vadd.f32 %v416_v14, %v384_v5  ;;  %v5854_v21 = vld [vmem:[%s6659_s13 + $0x331] sm:$0xff]  ;;  %v3261_v31 = vadd.f32 %v3229_v53, %v3197_v8 }
 0x236   : > { %960 = vst.msk [vmem:[#allocation2 + $0x70] sm:$0xff] %vm283_vm0, %v928_v40  ;;  %3789 = vst.msk [vmem:[#allocation2 + $0xc0] sm:$0xff] %vm283_vm0, %v3757_v6  ;;  %v2732_v24 = vld [vmem:[#allocation2 + $0xd0] sm:$0xff]  ;;  %v10506_v35 = vld [vmem:[%s6659_s13 + $0x2c1] sm:$0xff]  ;;  %v2022_v29 = vmul.f32 %v10237_v58, %v5671_v13  ;;  %v1424_v54 = vadd.f32 %v1392_v36, %v1360_v56  ;;  %v3014_v22 = vmul.f32 %v10079_v44, %v5671_v13 }
 0x237   : > { %4450 = vst.msk [vmem:[#allocation2 + $0xb8] sm:$0xff] %vm283_vm0, %v4418_v42  ;;  %1636 = vst.msk [vmem:[#allocation2 + $0xe0] sm:$0xff] %vm283_vm0, %v1604_v9  ;;  %v10511_v46 = vld [vmem:[%s6659_s13 + $0x251] sm:$0xff]  ;;  %v4206_v41 = vld [vmem:[#allocation2 + $0x40] sm:$0xff]  ;;  %v2764_v7 = vadd.f32 %v2732_v24, %v2700_v25  ;;  %v1029_v50 = vmul.f32 %v10200_v33, %v10424_v37  ;;  %v700_v16 = vmul.f32 %v10000_v20, %v10501_v32 }
 0x238   : > { %811 = vst.msk [vmem:[#allocation2 + $0xf0] sm:$0xff] %vm283_vm0, %v779_v23  ;;  %v5987_v15 = vld [vmem:[%s6659_s13 + $0x312] sm:$0xff]  ;;  %480 = vst.msk [vmem:[#allocation2 + $0xf8] sm:$0xff] %vm283_vm0, %v448_v38  ;;  %v4238_v8 = vadd.f32 %v4206_v41, %v4174_v12  ;;  %v3543_v48 = vld [vmem:[#allocation2 + $0x48] sm:$0xff]  ;;  %v2369_v40 = vmul.f32 %v10325_v34, %v10506_v35  ;;  %v1708_v25 = vmul.f32 %v10189_v43, %v10432_v30 }
 0x239   : > { %v2550_v10 = vld [vmem:[#allocation2 + $0x58] sm:$0xff]  ;;  %3293 = vst.msk [vmem:[#allocation2 + $0xc8] sm:$0xff] %vm283_vm0, %v3261_v31  ;;  %1456 = vst.msk [vmem:[#allocation2 + $0x68] sm:$0xff] %vm283_vm0, %v1424_v54  ;;  %v1243_v5 = vld [vmem:[#allocation2 + $0xe8] sm:$0xff]  ;;  %v3575_v56 = vadd.f32 %v3543_v48, %v3511_v49  ;;  %v4519_v12 = vmul.f32 %v10346_v55, %v5987_v15  ;;  %v880_v59 = vmul.f32 %v10100_v26, %v10511_v46 }
 0x23a   : > { %v2582_v2 = vadd.f32 %v2550_v10, %v2518_v19  ;;  %v513_v4 = vld [vmem:[%s6659_s13 + $0x252] sm:$0xff]  ;;  %2796 = vst.msk [vmem:[#allocation2 + $0xd0] sm:$0xff] %vm283_vm0, %v2764_v7  ;;  %v2054_v52 = vld [vmem:[#allocation2 + $0x60] sm:$0xff]  ;;  %v1275_v0 = vadd.f32 %v1243_v5, %v1211_v27  ;;  %4270 = vst.msk [vmem:[#allocation2 + $0x40] sm:$0xff] %vm283_vm0, %v4238_v8  ;;  %v3362_v14 = vmul.f32 %v10275_v63, %v5854_v21 }
 0x23b   : > { %v10527_v44 = vld [vmem:[%s11598_s1 + $0x16] ss:$0 sm:$0xff]  ;;  %v2086_v6 = vadd.f32 %v2054_v52, %v2022_v29  ;;  %v4631_v47 = vld [vmem:[#allocation2 + $0x38] sm:$0xff]  ;;  %3607 = vst.msk [vmem:[#allocation2 + $0x48] sm:$0xff] %vm283_vm0, %v3575_v56  ;;  %v6383_v9 = vld [vmem:[%s11598_s1 + $0x2] ss:$0 sm:$0xff]  ;;  %v1525_v36 = vmul.f32 %v10089_v57, %v10424_v37  ;;  %v3678_v48 = vmul.f32 %v10478_v45, %v10455_v60 }
 0x23c   : > { %v3858_v13 = vmul.f32 %v10527_v44, %v5854_v21  ;;  %v3046_v20 = vld [vmem:[#allocation2 + $0x50] sm:$0xff]  ;;  %2614 = vst.msk [vmem:[#allocation2 + $0x58] sm:$0xff] %vm283_vm0, %v2582_v2  ;;  %1307 = vst.msk [vmem:[#allocation2 + $0xe8] sm:$0xff] %vm283_vm0, %v1275_v0  ;;  %v732_v19 = vld [vmem:[#allocation2 + $0x78] sm:$0xff]  ;;  %v549_v23 = vmul.f32 %v6383_v9, %v513_v4  ;;  %6104 = vmatmul.mubr.msk.f32.gmra.mxu0 %vm283_vm0, %v4631_v47 }
 0x23d   : > { %v3078_v17 = vadd.f32 %v3046_v20, %v3014_v22  ;;  %v1061_v42 = vld [vmem:[#allocation2 + $0x70] sm:$0xff]  ;;  %v3890_v30 = vld [vmem:[#allocation2 + $0xc0] sm:$0xff]  ;;  %v2401_v53 = vld [vmem:[#allocation2 + $0xd8] sm:$0xff]  ;;  %2118 = vst.msk [vmem:[#allocation2 + $0x60] sm:$0xff] %vm283_vm0, %v2086_v6  ;;  %v764_v38 = vadd.f32 %v732_v19, %v700_v16  ;;  %v3182_v6 = vmul.f32 %v10478_v45, %v10179_v3  ;;  %v1196_v19 = vmul.f32 %v10298_v61, %v10501_v32 }
 0x23e   : > { %v10548_v49 = vld [vmem:[%s6659_s13 + $0x190] sm:$0xff]  ;;  %v1093_v27 = vadd.f32 %v1061_v42, %v1029_v50  ;;  %v4551_v31 = vld [vmem:[#allocation2 + $0xb8] sm:$0xff]  ;;  %v10554_v24 = vld [vmem:[%s6659_s13 + $0x201] sm:$0xff]  ;;  %v3922_v54 = vadd.f32 %v3890_v30, %v3858_v13  ;;  %v2433_v57 = vadd.f32 %v2401_v53, %v2369_v40  ;;  %v1376_v50 = vmul.f32 %v10386_v1, %v10511_v46 }
 0x23f   : > { %v4339_v29 = vmul.f32 %v10554_v24, %v10157_v11  ;;  %3110 = vst.msk [vmem:[#allocation2 + $0x50] sm:$0xff] %vm283_vm0, %v3078_v17  ;;  %v10562_v21 = vld [vmem:[%s11598_s1 + $0x10] ss:$0 sm:$0xff]  ;;  %v1740_v37 = vld [vmem:[#allocation2 + $0xe0] sm:$0xff]  ;;  %v4583_v22 = vadd.f32 %v4551_v31, %v4519_v12  ;;  %v2685_v7 = vmul.f32 %v10486_v51, %v10548_v49  ;;  %796 = vst.msk [vmem:[#allocation2 + $0x78] sm:$0xff] %vm283_vm0, %v764_v38 }
 0x240   : > { %v2865_v15 = vmul.f32 %v10562_v21, %v10506_v35  ;;  %v912_v41 = vld [vmem:[#allocation2 + $0xf0] sm:$0xff]  ;;  %v1772_v11 = vadd.f32 %v1740_v37, %v1708_v25  ;;  %1125 = vst.msk [vmem:[#allocation2 + $0x70] sm:$0xff] %vm283_vm0, %v1093_v27  ;;  %v581_v8 = vld [vmem:[#allocation2 + $0xf8] sm:$0xff]  ;;  %3954 = vst.msk [vmem:[#allocation2 + $0xc0] sm:$0xff] %vm283_vm0, %v3922_v54  ;;  %v2189_v52 = vmul.f32 %v10221_v62, %v10548_v49 }
 0x241   : > { %v944_v10 = vadd.f32 %v912_v41, %v880_v59  ;;  %v3394_v2 = vld [vmem:[#allocation2 + $0xc8] sm:$0xff]  ;;  %2465 = vst.msk [vmem:[#allocation2 + $0xd8] sm:$0xff] %vm283_vm0, %v2433_v57  ;;  %v613_v4 = vadd.f32 %v581_v8, %v549_v23  ;;  %4615 = vst.msk [vmem:[#allocation2 + $0xb8] sm:$0xff] %vm283_vm0, %v4583_v22  ;;  %v2897_v56 = vld [vmem:[#allocation2 + $0xd0] sm:$0xff]  ;;  %v1873_v38 = vmul.f32 %v10130_v18, %v10506_v35 }
 0x242   : > { %v1557_v5 = vld [vmem:[#allocation2 + $0x68] sm:$0xff]  ;;  %v3426_v13 = vadd.f32 %v3394_v2, %v3362_v14  ;;  %1804 = vst.msk [vmem:[#allocation2 + $0xe0] sm:$0xff] %vm283_vm0, %v1772_v11  ;;  %v10587_v12 = vld [vmem:[%s6659_s13 + $0x252] sm:$0xff]  ;;  %v4371_v46 = vld [vmem:[#allocation2 + $0x40] sm:$0xff]  ;;  %v2929_v25 = vadd.f32 %v2897_v56, %v2865_v15 }
 0x243   : > { %v10577_v16 = vld [vmem:[%s6659_s13 + $0x121] sm:$0xff]  ;;  %v1589_v0 = vadd.f32 %v1557_v5, %v1525_v36  ;;  %976 = vst.msk [vmem:[#allocation2 + $0xf0] sm:$0xff] %vm283_vm0, %v944_v10  ;;  %v5887_v20 = vld [vmem:[%s6659_s13 + $0x332] sm:$0xff]  ;;  %645 = vst.msk [vmem:[#allocation2 + $0xf8] sm:$0xff] %vm283_vm0, %v613_v4  ;;  %v4403_v47 = vadd.f32 %v4371_v46, %v4339_v29  ;;  %v1045_v31 = vmul.f32 %v10200_v33, %v10587_v12 }
 0x244   : > { %v10581_v40 = vld [vmem:[%s6659_s13 + $0x2c2] sm:$0xff]  ;;  %v2717_v59 = vld [vmem:[#allocation2 + $0x58] sm:$0xff]  ;;  %3458 = vst.msk [vmem:[#allocation2 + $0xc8] sm:$0xff] %vm283_vm0, %v3426_v13  ;;  %v865_v45 = vmul.f32 %v10100_v26, %v10577_v16  ;;  %v10606_v23 = vld [vmem:[%s11598_s1 + $0x17] ss:$0 sm:$0xff]  ;;  %v3527_v22 = vmul.f32 %v10363_v28, %v5887_v20 }
 0x245   : > { %v3710_v17 = vld [vmem:[#allocation2 + $0x48] sm:$0xff]  ;;  %v2749_v62 = vadd.f32 %v2717_v59, %v2685_v7  ;;  %1621 = vst.msk [vmem:[#allocation2 + $0x68] sm:$0xff] %vm283_vm0, %v1589_v0  ;;  %v10599_v9 = vld [vmem:[%s6659_s13 + $0x260] sm:$0xff]  ;;  %v4023_v30 = vmul.f32 %v10606_v23, %v5887_v20  ;;  %2961 = vst.msk [vmem:[#allocation2 + $0xd0] sm:$0xff] %vm283_vm0, %v2929_v25  ;;  %v2534_v53 = vmul.f32 %v10411_v39, %v10581_v40 }
 0x246   : > { %v1408_v42 = vld [vmem:[#allocation2 + $0xe8] sm:$0xff]  ;;  %v3742_v14 = vadd.f32 %v3710_v17, %v3678_v48  ;;  %v2221_v36 = vld [vmem:[#allocation2 + $0x60] sm:$0xff]  ;;  %4435 = vst.msk [vmem:[#allocation2 + $0x40] sm:$0xff] %vm283_vm0, %v4403_v47  ;;  %v3214_v27 = vld [vmem:[#allocation2 + $0x50] sm:$0xff]  ;;  %v1693_v7 = vmul.f32 %v10189_v43, %v10548_v49  ;;  %v3843_v20 = vmul.f32 %v10554_v24, %v10527_v44 }
 0x247   : > { %v1440_v32 = vadd.f32 %v1408_v42, %v1376_v50  ;;  %2781 = vst.msk [vmem:[#allocation2 + $0x58] sm:$0xff] %vm283_vm0, %v2749_v62  ;;  %v2253_v26 = vadd.f32 %v2221_v36, %v2189_v52  ;;  %v3246_v29 = vadd.f32 %v3214_v27, %v3182_v6  ;;  %v1228_v54 = vld [vmem:[#allocation2 + $0x70] sm:$0xff]  ;;  %v897_v15 = vld [vmem:[#allocation2 + $0x78] sm:$0xff]  ;;  %v6387_v57 = vld [vmem:[%s11598_s1 + $0x3] ss:$0 sm:$0xff]  ;;  %v3347_v36 = vmul.f32 %v10554_v24, %v10275_v63 }
 0x248   : > { %3774 = vst.msk [vmem:[#allocation2 + $0x48] sm:$0xff] %vm283_vm0, %v3742_v14  ;;  %v716_v37 = vmul.f32 %v6387_v57, %v10599_v9  ;;  %v4055_v41 = vld [vmem:[#allocation2 + $0xc0] sm:$0xff]  ;;  %v10626_v18 = vld [vmem:[%s6659_s13 + $0x191] sm:$0xff]  ;;  %v1260_v11 = vadd.f32 %v1228_v54, %v1196_v19  ;;  %v929_v10 = vadd.f32 %v897_v15, %v865_v45  ;;  %v10656_v59 = vld [vmem:[%s11598_s1 + $0x8] ss:$0 sm:$0xff]  ;;  %v1361_v54 = vmul.f32 %v10386_v1, %v10577_v16 }
 0x249   : > { %1472 = vst.msk [vmem:[#allocation2 + $0xe8] sm:$0xff] %vm283_vm0, %v1440_v32  ;;  %v2566_v35 = vld [vmem:[#allocation2 + $0xd8] sm:$0xff]  ;;  %2285 = vst.msk [vmem:[#allocation2 + $0x60] sm:$0xff] %vm283_vm0, %v2253_v26  ;;  %v4087_v48 = vadd.f32 %v4055_v41, %v4023_v30  ;;  %v10635_v2 = vld [vmem:[%s11598_s1 + $0x11] ss:$0 sm:$0xff]  ;;  %v2850_v56 = vmul.f32 %v10562_v21, %v10626_v18  ;;  %v1541_v47 = vmul.f32 %v10656_v59, %v10587_v12 }
 0x24a   : > { %v4647_v8 = vld [vmem:[#allocation2 + $0xb8] sm:$0xff]  ;;  %3278 = vst.msk [vmem:[#allocation2 + $0x50] sm:$0xff] %vm283_vm0, %v3246_v29  ;;  %v3030_v5 = vmul.f32 %v10635_v2, %v10581_v40  ;;  %v2598_v50 = vadd.f32 %v2566_v35, %v2534_v53  ;;  %v1905_v4 = vld [vmem:[#allocation2 + $0xe0] sm:$0xff]  ;;  %v1077_v13 = vld [vmem:[#allocation2 + $0xf0] sm:$0xff]  ;;  %v2354_v30 = vmul.f32 %v10325_v34, %v10626_v18 }
 0x24b   : > { %6128 = vmatmul.mubr.msk.f32.gmra.mxu1 %vm283_vm0, %v4647_v8  ;;  %v10641_v43 = vld [vmem:[%s6659_s13 + $0x202] sm:$0xff]  ;;  %v1937_v52 = vadd.f32 %v1905_v4, %v1873_v38  ;;  %1292 = vst.msk [vmem:[#allocation2 + $0x70] sm:$0xff] %vm283_vm0, %v1260_v11  ;;  %v1109_v0 = vadd.f32 %v1077_v13, %v1045_v31  ;;  %961 = vst.msk [vmem:[#allocation2 + $0x78] sm:$0xff] %vm283_vm0, %v929_v10  ;;  %v748_v46 = vld [vmem:[#allocation2 + $0xf8] sm:$0xff]  ;;  %v2038_v11 = vmul.f32 %v10237_v58, %v10581_v40 }
 0x24c   : > { %v4504_v49 = vmul.f32 %v10641_v43, %v10346_v55  ;;  %4119 = vst.msk [vmem:[#allocation2 + $0xc0] sm:$0xff] %vm283_vm0, %v4087_v48  ;;  %v3559_v6 = vld [vmem:[#allocation2 + $0xc8] sm:$0xff]  ;;  %2630 = vst.msk [vmem:[#allocation2 + $0xd8] sm:$0xff] %vm283_vm0, %v2598_v50  ;;  %v780_v62 = vadd.f32 %v748_v46, %v716_v37  ;;  %v5922_v42 = vld [vmem:[%s6659_s13 + $0x340] sm:$0xff]  ;;  %v1212_v10 = vmul.f32 %v10298_v61, %v10599_v9 }
 0x24d   : > { %v1725_v25 = vld [vmem:[#allocation2 + $0x68] sm:$0xff]  ;;  %v3591_v19 = vadd.f32 %v3559_v6, %v3527_v22  ;;  %v3062_v45 = vld [vmem:[#allocation2 + $0xd0] sm:$0xff]  ;;  %1969 = vst.msk [vmem:[#allocation2 + $0xe0] sm:$0xff] %vm283_vm0, %v1937_v52  ;;  %1141 = vst.msk [vmem:[#allocation2 + $0xf0] sm:$0xff] %vm283_vm0, %v1109_v0  ;;  %v3694_v58 = vmul.f32 %v10455_v60, %v5922_v42  ;;  %v3198_v46 = vmul.f32 %v10179_v3, %v5922_v42 }
 0x24e   : > { %v10661_v17 = vld [vmem:[%s6659_s13 + $0x122] sm:$0xff]  ;;  %v1757_v14 = vadd.f32 %v1725_v25, %v1693_v7  ;;  %v3094_v12 = vadd.f32 %v3062_v45, %v3030_v5  ;;  %v2882_v32 = vld [vmem:[#allocation2 + $0x58] sm:$0xff]  ;;  %v10671_v27 = vld [vmem:[%s6659_s13 + $0x2d0] sm:$0xff]  ;;  %812 = vst.msk [vmem:[#allocation2 + $0xf8] sm:$0xff] %vm283_vm0, %v780_v62  ;;  %v4008_v3 = vmul.f32 %v10641_v43, %v10606_v23 }
 0x24f   : > { %v4536_v53 = vld [vmem:[#allocation2 + $0x40] sm:$0xff]  ;;  %v3875_v38 = vld [vmem:[#allocation2 + $0x48] sm:$0xff]  ;;  %3623 = vst.msk [vmem:[#allocation2 + $0xc8] sm:$0xff] %vm283_vm0, %v3591_v19  ;;  %v2914_v31 = vadd.f32 %v2882_v32, %v2850_v56  ;;  %v1030_v24 = vmul.f32 %v10200_v33, %v10661_v17  ;;  %v10686_v57 = vld [vmem:[%s11598_s1 + $0x18] ss:$0 sm:$0xff]  ;;  %v2701_v22 = vmul.f32 %v10486_v51, %v10671_v27 }
 0x250   : > { %v4568_v26 = vadd.f32 %v4536_v53, %v4504_v49  ;;  %1789 = vst.msk [vmem:[#allocation2 + $0x68] sm:$0xff] %vm283_vm0, %v1757_v14  ;;  %v1573_v29 = vld [vmem:[#allocation2 + $0xe8] sm:$0xff]  ;;  %v4190_v37 = vmul.f32 %v10686_v57, %v5922_v42  ;;  %v3907_v41 = vadd.f32 %v3875_v38, %v3843_v20  ;;  %3126 = vst.msk [vmem:[#allocation2 + $0xd0] sm:$0xff] %vm283_vm0, %v3094_v12  ;;  %v2386_v35 = vld [vmem:[#allocation2 + $0x60] sm:$0xff] }
 0x251   : > { %v10679_v15 = vld [vmem:[%s6659_s13 + $0x261] sm:$0xff]  ;;  %v1605_v16 = vadd.f32 %v1573_v29, %v1541_v47  ;;  %v3379_v7 = vld [vmem:[#allocation2 + $0x50] sm:$0xff]  ;;  %2946 = vst.msk [vmem:[#allocation2 + $0x58] sm:$0xff] %vm283_vm0, %v2914_v31  ;;  %v2418_v33 = vadd.f32 %v2386_v35, %v2354_v30  ;;  %v10709_v9 = vld [vmem:[%s11598_s1 + $0xa] ss:$0 sm:$0xff] }
 0x252   : > { %4600 = vst.msk [vmem:[#allocation2 + $0x40] sm:$0xff] %vm283_vm0, %v4568_v26  ;;  %3939 = vst.msk [vmem:[#allocation2 + $0x48] sm:$0xff] %vm283_vm0, %v3907_v41  ;;  %v3411_v8 = vadd.f32 %v3379_v7, %v3347_v36  ;;  %v1393_v48 = vld [vmem:[#allocation2 + $0x70] sm:$0xff]  ;;  %v1062_v5 = vld [vmem:[#allocation2 + $0x78] sm:$0xff]  ;;  %v1858_v49 = vmul.f32 %v10709_v9, %v10626_v18 }
 0x253   : > { %1637 = vst.msk [vmem:[#allocation2 + $0xe8] sm:$0xff] %vm283_vm0, %v1605_v16  ;;  %v6392_v50 = vld [vmem:[%s11598_s1 + $0x4] ss:$0 sm:$0xff]  ;;  %v2733_v40 = vld [vmem:[#allocation2 + $0xd8] sm:$0xff]  ;;  %2450 = vst.msk [vmem:[#allocation2 + $0x60] sm:$0xff] %vm283_vm0, %v2418_v33  ;;  %v1425_v56 = vadd.f32 %v1393_v48, %v1361_v54  ;;  %v1094_v52 = vadd.f32 %v1062_v5, %v1030_v24  ;;  %v3512_v24 = vmul.f32 %v10641_v43, %v10363_v28 }
 0x254   : > { %v881_v4 = vmul.f32 %v6392_v50, %v10679_v15  ;;  %v4222_v13 = vld [vmem:[#allocation2 + $0xc0] sm:$0xff]  ;;  %3443 = vst.msk [vmem:[#allocation2 + $0x50] sm:$0xff] %vm283_vm0, %v3411_v8  ;;  %v10716_v20 = vld [vmem:[%s6659_s13 + $0x192] sm:$0xff]  ;;  %v2765_v6 = vadd.f32 %v2733_v40, %v2701_v22  ;;  %v10729_v14 = vld [vmem:[%s11598_s1 + $0x9] ss:$0 sm:$0xff]  ;;  %v1526_v33 = vmul.f32 %v10656_v59, %v10661_v17  ;;  %v1377_v40 = vmul.f32 %v10386_v1, %v10679_v15 }
 0x255   : > { %v4254_v0 = vadd.f32 %v4222_v13, %v4190_v37  ;;  %v2070_v25 = vld [vmem:[#allocation2 + $0xe0] sm:$0xff]  ;;  %v1244_v47 = vld [vmem:[#allocation2 + $0xf0] sm:$0xff]  ;;  %v3015_v62 = vmul.f32 %v10635_v2, %v10716_v20  ;;  %1457 = vst.msk [vmem:[#allocation2 + $0x70] sm:$0xff] %vm283_vm0, %v1425_v56  ;;  %1126 = vst.msk [vmem:[#allocation2 + $0x78] sm:$0xff] %vm283_vm0, %v1094_v52  ;;  %v1709_v53 = vmul.f32 %v10729_v14, %v10671_v27 }
 0x256   : > { %v2102_v19 = vadd.f32 %v2070_v25, %v2038_v11  ;;  %v1276_v18 = vadd.f32 %v1244_v47, %v1212_v10  ;;  %v913_v45 = vld [vmem:[#allocation2 + $0xf8] sm:$0xff]  ;;  %v3726_v42 = vld [vmem:[#allocation2 + $0xc8] sm:$0xff]  ;;  %2797 = vst.msk [vmem:[#allocation2 + $0xd8] sm:$0xff] %vm283_vm0, %v2765_v6  ;;  %v5307_v36 = vld [vmem:[%s6659_s13 + $0x130] sm:$0xff]  ;;  %v2519_v31 = vmul.f32 %v10411_v39, %v10716_v20 }
 0x257   : > { %4286 = vst.msk [vmem:[#allocation2 + $0xc0] sm:$0xff] %vm283_vm0, %v4254_v0  ;;  %v1890_v30 = vld [vmem:[#allocation2 + $0x68] sm:$0xff]  ;;  %v945_v12 = vadd.f32 %v913_v45, %v881_v4  ;;  %v3758_v26 = vadd.f32 %v3726_v42, %v3694_v58  ;;  %v3230_v38 = vld [vmem:[#allocation2 + $0xd0] sm:$0xff]  ;;  %v1197_v43 = vmul.f32 %v10298_v61, %v5307_v36  ;;  %v10757_v10 = vld [vmem:[%s11598_s1 + $0x19] ss:$0 sm:$0xff] }
 0x258   : > { %v5955_v32 = vld [vmem:[%s6659_s13 + $0x341] sm:$0xff]  ;;  %2134 = vst.msk [vmem:[#allocation2 + $0xe0] sm:$0xff] %vm283_vm0, %v2102_v19  ;;  %v1922_v29 = vadd.f32 %v1890_v30, %v1858_v49  ;;  %1308 = vst.msk [vmem:[#allocation2 + $0xf0] sm:$0xff] %vm283_vm0, %v1276_v18  ;;  %v3262_v37 = vadd.f32 %v3230_v38, %v3198_v46  ;;  %v3047_v41 = vld [vmem:[#allocation2 + $0x58] sm:$0xff] }
 0x259   : > { %v4632_v54 = vld [vmem:[#allocation2 + $0x40] sm:$0xff]  ;;  %v10742_v22 = vld [vmem:[%s6659_s13 + $0x2d1] sm:$0xff]  ;;  %977 = vst.msk [vmem:[#allocation2 + $0xf8] sm:$0xff] %vm283_vm0, %v945_v12  ;;  %v4040_v35 = vld [vmem:[#allocation2 + $0x48] sm:$0xff]  ;;  %v3079_v16 = vadd.f32 %v3047_v41, %v3015_v62  ;;  %v4355_v8 = vmul.f32 %v10757_v10, %v5955_v32  ;;  %v3363_v45 = vmul.f32 %v10275_v63, %v5955_v32 }
 0x25a   : > { %6106 = vmatprep.mubr.msk.f32.mxu0 %vm283_vm0, %v4632_v54  ;;  %3790 = vst.msk [vmem:[#allocation2 + $0xc8] sm:$0xff] %vm283_vm0, %v3758_v26  ;;  %1954 = vst.msk [vmem:[#allocation2 + $0x68] sm:$0xff] %vm283_vm0, %v1922_v29  ;;  %v1741_v7 = vld [vmem:[#allocation2 + $0xe8] sm:$0xff]  ;;  %v4072_v48 = vadd.f32 %v4040_v35, %v4008_v3  ;;  %v2866_v5 = vmul.f32 %v10562_v21, %v10742_v22  ;;  %v2551_v50 = vld [vmem:[#allocation2 + $0x60] sm:$0xff]  ;;  %v1874_v54 = vmul.f32 %v10709_v9, %v10742_v22 }
 0x25b   : > { %v10751_v11 = vld [vmem:[%s6659_s13 + $0x262] sm:$0xff]  ;;  %3294 = vst.msk [vmem:[#allocation2 + $0xd0] sm:$0xff] %vm283_vm0, %v3262_v37  ;;  %v1773_v4 = vadd.f32 %v1741_v7, %v1709_v53  ;;  %v3544_v17 = vld [vmem:[#allocation2 + $0x50] sm:$0xff]  ;;  %3111 = vst.msk [vmem:[#allocation2 + $0x58] sm:$0xff] %vm283_vm0, %v3079_v16  ;;  %v2583_v13 = vadd.f32 %v2551_v50, %v2519_v31 }
 0x25c   : > { %v10767_v61 = vld [vmem:[%s11598_s1 + $0xc] ss:$0 sm:$0xff]  ;;  %4104 = vst.msk [vmem:[#allocation2 + $0x48] sm:$0xff] %vm283_vm0, %v4072_v48  ;;  %v3576_v49 = vadd.f32 %v3544_v17, %v3512_v24  ;;  %v1558_v56 = vld [vmem:[#allocation2 + $0x70] sm:$0xff]  ;;  %v1229_v52 = vld [vmem:[#allocation2 + $0x78] sm:$0xff] }
 0x25d   : > { %v2205_v58 = vmul.f32 %v10767_v61, %v10671_v27  ;;  %1805 = vst.msk [vmem:[#allocation2 + $0xe8] sm:$0xff] %vm283_vm0, %v1773_v4  ;;  %v6397_v0 = vld [vmem:[%s11598_s1 + $0x5] ss:$0 sm:$0xff]  ;;  %v3859_v27 = vmul.f32 %v10527_v44, %v5955_v32  ;;  %v2898_v25 = vld [vmem:[#allocation2 + $0xd8] sm:$0xff]  ;;  %2615 = vst.msk [vmem:[#allocation2 + $0x60] sm:$0xff] %vm283_vm0, %v2583_v13  ;;  %v1590_v62 = vadd.f32 %v1558_v56, %v1526_v33 }
 0x25e   : > { %v1046_v46 = vmul.f32 %v6397_v0, %v10751_v11  ;;  %v4387_v6 = vld [vmem:[#allocation2 + $0xc0] sm:$0xff]  ;;  %v10784_v15 = vld [vmem:[%s11598_s1 + $0xb] ss:$0 sm:$0xff]  ;;  %v1261_v19 = vadd.f32 %v1229_v52, %v1197_v43  ;;  %3608 = vst.msk [vmem:[#allocation2 + $0x50] sm:$0xff] %vm283_vm0, %v3576_v49  ;;  %v2930_v3 = vadd.f32 %v2898_v25, %v2866_v5  ;;  %v10793_v53 = vld [vmem:[%s11598_s1 + $0x12] ss:$0 sm:$0xff]  ;;  %v2370_v25 = vmul.f32 %v10325_v34, %v10742_v22 }
 0x25f   : > { %v2023_v47 = vmul.f32 %v10784_v15, %v10716_v20  ;;  %v4419_v18 = vadd.f32 %v4387_v6, %v4355_v8  ;;  %v2237_v42 = vld [vmem:[#allocation2 + $0xe0] sm:$0xff]  ;;  %v1409_v30 = vld [vmem:[#allocation2 + $0xf0] sm:$0xff]  ;;  %1622 = vst.msk [vmem:[#allocation2 + $0x70] sm:$0xff] %vm283_vm0, %v1590_v62 }
 0x260   : > { %v6400_v36 = vld [vmem:[%s6659_s13 + $0x210] sm:$0xff]  ;;  %v5607_v20 = vld [vmem:[%s6659_s13 + $0x1a0] sm:$0xff]  ;;  %v2269_v26 = vadd.f32 %v2237_v42, %v2205_v58  ;;  %v1441_v38 = vadd.f32 %v1409_v30, %v1377_v40  ;;  %1293 = vst.msk [vmem:[#allocation2 + $0x78] sm:$0xff] %vm283_vm0, %v1261_v19  ;;  %v1078_v63 = vld [vmem:[#allocation2 + $0xf8] sm:$0xff] }
 0x261   : > { %v3183_v12 = vmul.f32 %v6400_v36, %v10793_v53  ;;  %4451 = vst.msk [vmem:[#allocation2 + $0xc0] sm:$0xff] %vm283_vm0, %v4419_v18  ;;  %v4175_v32 = vmul.f32 %v6400_v36, %v10686_v57  ;;  %v3891_v31 = vld [vmem:[#allocation2 + $0xc8] sm:$0xff]  ;;  %2962 = vst.msk [vmem:[#allocation2 + $0xd8] sm:$0xff] %vm283_vm0, %v2930_v3  ;;  %v5340_v24 = vld [vmem:[%s6659_s13 + $0x131] sm:$0xff]  ;;  %v1110_v37 = vadd.f32 %v1078_v63, %v1046_v46 }
 0x262   : > { %v2055_v29 = vld [vmem:[#allocation2 + $0x68] sm:$0xff]  ;;  %v3923_v41 = vadd.f32 %v3891_v31, %v3859_v27  ;;  %v3395_v35 = vld [vmem:[#allocation2 + $0xd0] sm:$0xff]  ;;  %v2686_v16 = vmul.f32 %v10486_v51, %v5607_v20  ;;  %2301 = vst.msk [vmem:[#allocation2 + $0xe0] sm:$0xff] %vm283_vm0, %v2269_v26  ;;  %1473 = vst.msk [vmem:[#allocation2 + $0xf0] sm:$0xff] %vm283_vm0, %v1441_v38  ;;  %v3679_v43 = vmul.f32 %v6400_v36, %v10455_v60 }
 0x263   : > { %v2087_v7 = vadd.f32 %v2055_v29, %v2023_v47  ;;  %v5988_v33 = vld [vmem:[%s6659_s13 + $0x342] sm:$0xff]  ;;  %v3427_v8 = vadd.f32 %v3395_v35, %v3363_v45  ;;  %v3215_v48 = vld [vmem:[#allocation2 + $0x58] sm:$0xff]  ;;  %1142 = vst.msk [vmem:[#allocation2 + $0xf8] sm:$0xff] %vm283_vm0, %v1110_v37  ;;  %v1694_v13 = vmul.f32 %v10729_v14, %v5607_v20  ;;  %v1362_v58 = vmul.f32 %v10386_v1, %v5340_v24  ;;  %v5913_v40 = vld [vmem:[%s6659_s13 + $0x270] sm:$0xff] }
 0x264   : > { %v10812_v5 = vld [vmem:[%s6659_s13 + $0x2d2] sm:$0xff]  ;;  %v4207_v50 = vld [vmem:[#allocation2 + $0x48] sm:$0xff]  ;;  %3955 = vst.msk [vmem:[#allocation2 + $0xc8] sm:$0xff] %vm283_vm0, %v3923_v41  ;;  %v3247_v4 = vadd.f32 %v3215_v48, %v3183_v12  ;;  %v4520_v49 = vmul.f32 %v10346_v55, %v5988_v33  ;;  %v2718_v0 = vld [vmem:[#allocation2 + $0x60] sm:$0xff]  ;;  %v1542_v47 = vmul.f32 %v10656_v59, %v10751_v11  ;;  %v4024_v34 = vmul.f32 %v10606_v23, %v5988_v33 }
 0x265   : > { %2119 = vst.msk [vmem:[#allocation2 + $0x68] sm:$0xff] %vm283_vm0, %v2087_v7  ;;  %v1906_v17 = vld [vmem:[#allocation2 + $0xe8] sm:$0xff]  ;;  %v4239_v56 = vadd.f32 %v4207_v50, %v4175_v32  ;;  %3459 = vst.msk [vmem:[#allocation2 + $0xd0] sm:$0xff] %vm283_vm0, %v3427_v8  ;;  %v3031_v52 = vmul.f32 %v10635_v2, %v10812_v5  ;;  %v3711_v6 = vld [vmem:[#allocation2 + $0x50] sm:$0xff]  ;;  %v2750_v27 = vadd.f32 %v2718_v0, %v2686_v16 }
 0x266   : > { %v1938_v46 = vadd.f32 %v1906_v17, %v1874_v54  ;;  %3279 = vst.msk [vmem:[#allocation2 + $0x58] sm:$0xff] %vm283_vm0, %v3247_v4  ;;  %v3743_v55 = vadd.f32 %v3711_v6, %v3679_v43  ;;  %v1726_v62 = vld [vmem:[#allocation2 + $0x70] sm:$0xff]  ;;  %v6401_v18 = vld [vmem:[%s11598_s1 + $0x6] ss:$0 sm:$0xff]  ;;  %v2190_v11 = vmul.f32 %v10767_v61, %v5607_v20  ;;  %v3528_v12 = vmul.f32 %v10363_v28, %v5988_v33 }
 0x267   : > { %4271 = vst.msk [vmem:[#allocation2 + $0x48] sm:$0xff] %vm283_vm0, %v4239_v56  ;;  %v1394_v19 = vld [vmem:[#allocation2 + $0x78] sm:$0xff]  ;;  %v1213_v45 = vmul.f32 %v6401_v18, %v5913_v40  ;;  %2782 = vst.msk [vmem:[#allocation2 + $0x60] sm:$0xff] %vm283_vm0, %v2750_v27  ;;  %v1758_v42 = vadd.f32 %v1726_v62, %v1694_v13  ;;  %v10842_v32 = vld [vmem:[%s11598_s1 + $0x13] ss:$0 sm:$0xff]  ;;  %v2039_v16 = vmul.f32 %v10784_v15, %v10812_v5 }
 0x268   : > { %1970 = vst.msk [vmem:[#allocation2 + $0xe8] sm:$0xff] %vm283_vm0, %v1938_v46  ;;  %v4552_v3 = vld [vmem:[#allocation2 + $0xc0] sm:$0xff]  ;;  %v3063_v22 = vld [vmem:[#allocation2 + $0xd8] sm:$0xff]  ;;  %v1426_v30 = vadd.f32 %v1394_v19, %v1362_v58  ;;  %3775 = vst.msk [vmem:[#allocation2 + $0x50] sm:$0xff] %vm283_vm0, %v3743_v55  ;;  %v2535_v18 = vmul.f32 %v10411_v39, %v10812_v5 }
 0x269   : > { %v4584_v36 = vadd.f32 %v4552_v3, %v4520_v49  ;;  %v3095_v26 = vadd.f32 %v3063_v22, %v3031_v52  ;;  %v2402_v38 = vld [vmem:[#allocation2 + $0xe0] sm:$0xff]  ;;  %v1574_v63 = vld [vmem:[#allocation2 + $0xf0] sm:$0xff]  ;;  %1790 = vst.msk [vmem:[#allocation2 + $0x70] sm:$0xff] %vm283_vm0, %v1758_v42  ;;  %v10884_v39 = vld [vmem:[%s11598_s1 + $0xd] ss:$0 sm:$0xff] }
 0x26a   : > { %v6403_v31 = vld [vmem:[%s6659_s13 + $0x211] sm:$0xff]  ;;  %v5640_v20 = vld [vmem:[%s6659_s13 + $0x1a1] sm:$0xff]  ;;  %v2434_v54 = vadd.f32 %v2402_v38, %v2370_v25  ;;  %v1606_v24 = vadd.f32 %v1574_v63, %v1542_v47  ;;  %1458 = vst.msk [vmem:[#allocation2 + $0x78] sm:$0xff] %vm283_vm0, %v1426_v30 }
 0x26b   : > { %v3348_v29 = vmul.f32 %v6403_v31, %v10842_v32  ;;  %v1245_v28 = vld [vmem:[#allocation2 + $0xf8] sm:$0xff]  ;;  %4616 = vst.msk [vmem:[#allocation2 + $0xc0] sm:$0xff] %vm283_vm0, %v4584_v36  ;;  %v4340_v37 = vmul.f32 %v6403_v31, %v10757_v10  ;;  %v4056_v41 = vld [vmem:[#allocation2 + $0xc8] sm:$0xff]  ;;  %3127 = vst.msk [vmem:[#allocation2 + $0xd8] sm:$0xff] %vm283_vm0, %v3095_v26  ;;  %v2851_v50 = vmul.f32 %v10562_v21, %v5640_v20 }
 0x26c   : > { %v2222_v35 = vld [vmem:[#allocation2 + $0x68] sm:$0xff]  ;;  %v5373_v7 = vld [vmem:[%s6659_s13 + $0x132] sm:$0xff]  ;;  %v1277_v33 = vadd.f32 %v1245_v28, %v1213_v45  ;;  %v4088_v43 = vadd.f32 %v4056_v41, %v4024_v34  ;;  %2466 = vst.msk [vmem:[#allocation2 + $0xe0] sm:$0xff] %vm283_vm0, %v2434_v54  ;;  %1638 = vst.msk [vmem:[#allocation2 + $0xf0] sm:$0xff] %vm283_vm0, %v1606_v24  ;;  %v3844_v17 = vmul.f32 %v6403_v31, %v10527_v44 }
 0x26d   : > { %v5923_v8 = vld [vmem:[%s6659_s13 + $0x350] sm:$0xff]  ;;  %v2254_v4 = vadd.f32 %v2222_v35, %v2190_v11  ;;  %v3380_v58 = vld [vmem:[#allocation2 + $0x58] sm:$0xff]  ;;  %v10861_v40 = vld [vmem:[%s6659_s13 + $0x2e0] sm:$0xff]  ;;  %v1859_v0 = vmul.f32 %v10709_v9, %v5640_v20  ;;  %v1527_v46 = vmul.f32 %v10656_v59, %v5373_v7  ;;  %v2355_v5 = vmul.f32 %v10884_v39, %v5640_v20 }
 0x26e   : > { %v3560_v48 = vld [vmem:[#allocation2 + $0xd0] sm:$0xff]  ;;  %1309 = vst.msk [vmem:[#allocation2 + $0xf8] sm:$0xff] %vm283_vm0, %v1277_v33  ;;  %v4372_v49 = vld [vmem:[#allocation2 + $0x48] sm:$0xff]  ;;  %4120 = vst.msk [vmem:[#allocation2 + $0xc8] sm:$0xff] %vm283_vm0, %v4088_v43  ;;  %v3412_v56 = vadd.f32 %v3380_v58, %v3348_v29  ;;  %v3199_v25 = vmul.f32 %v10793_v53, %v5923_v8  ;;  %v1710_v45 = vmul.f32 %v10729_v14, %v10861_v40 }
 0x26f   : > { %v3592_v13 = vadd.f32 %v3560_v48, %v3528_v12  ;;  %2286 = vst.msk [vmem:[#allocation2 + $0x68] sm:$0xff] %vm283_vm0, %v2254_v4  ;;  %v2071_v52 = vld [vmem:[#allocation2 + $0xe8] sm:$0xff]  ;;  %v5946_v6 = vld [vmem:[%s6659_s13 + $0x271] sm:$0xff]  ;;  %v4404_v27 = vadd.f32 %v4372_v49, %v4340_v37  ;;  %v2883_v47 = vld [vmem:[#allocation2 + $0x60] sm:$0xff]  ;;  %v4191_v30 = vmul.f32 %v10686_v57, %v5923_v8  ;;  %v2206_v43 = vmul.f32 %v10767_v61, %v10861_v40 }
 0x270   : > { %v2103_v55 = vadd.f32 %v2071_v52, %v2039_v16  ;;  %v3876_v62 = vld [vmem:[#allocation2 + $0x50] sm:$0xff]  ;;  %3444 = vst.msk [vmem:[#allocation2 + $0x58] sm:$0xff] %vm283_vm0, %v3412_v56  ;;  %v2915_v19 = vadd.f32 %v2883_v47, %v2851_v50  ;;  %v1378_v11 = vmul.f32 %v10386_v1, %v5946_v6  ;;  %v3695_v1 = vmul.f32 %v10455_v60, %v5923_v8  ;;  %v5673_v24 = vld [vmem:[%s6659_s13 + $0x1a2] sm:$0xff]  ;;  %v10903_v41 = vld [vmem:[%s11598_s1 + $0x1a] ss:$0 sm:$0xff] }
 0x271   : > { %3624 = vst.msk [vmem:[#allocation2 + $0xd0] sm:$0xff] %vm283_vm0, %v3592_v13  ;;  %4436 = vst.msk [vmem:[#allocation2 + $0x48] sm:$0xff] %vm283_vm0, %v4404_v27  ;;  %v3908_v3 = vadd.f32 %v3876_v62, %v3844_v17  ;;  %v1891_v34 = vld [vmem:[#allocation2 + $0x70] sm:$0xff]  ;;  %v1559_v22 = vld [vmem:[#allocation2 + $0x78] sm:$0xff]  ;;  %v3016_v17 = vmul.f32 %v10635_v2, %v5673_v24  ;;  %v2024_v27 = vmul.f32 %v10784_v15, %v5673_v24 }
 0x272   : > { %2135 = vst.msk [vmem:[#allocation2 + $0xe8] sm:$0xff] %vm283_vm0, %v2103_v55  ;;  %v4648_v42 = vld [vmem:[#allocation2 + $0xc0] sm:$0xff]  ;;  %v3231_v36 = vld [vmem:[#allocation2 + $0xd8] sm:$0xff]  ;;  %2947 = vst.msk [vmem:[#allocation2 + $0x60] sm:$0xff] %vm283_vm0, %v2915_v19  ;;  %v1923_v12 = vadd.f32 %v1891_v34, %v1859_v0  ;;  %v1591_v26 = vadd.f32 %v1559_v22, %v1527_v46  ;;  %v2702_v34 = vmul.f32 %v10486_v51, %v10861_v40 }
 0x273   : > { %6130 = vmatprep.mubr.msk.f32.mxu1 %vm283_vm0, %v4648_v42  ;;  %3940 = vst.msk [vmem:[#allocation2 + $0x50] sm:$0xff] %vm283_vm0, %v3908_v3  ;;  %v3263_v38 = vadd.f32 %v3231_v36, %v3199_v25  ;;  %v2567_v63 = vld [vmem:[#allocation2 + $0xe0] sm:$0xff]  ;;  %v1742_v31 = vld [vmem:[#allocation2 + $0xf0] sm:$0xff]  ;;  %v10942_v51 = vld [vmem:[%s11598_s1 + $0xe] ss:$0 sm:$0xff] }
 0x274   : > { %v10893_v29 = vld [vmem:[%s11598_s1 + $0x14] ss:$0 sm:$0xff]  ;;  %v2599_v28 = vadd.f32 %v2567_v63, %v2535_v18  ;;  %1955 = vst.msk [vmem:[#allocation2 + $0x70] sm:$0xff] %vm283_vm0, %v1923_v12  ;;  %v1774_v37 = vadd.f32 %v1742_v31, %v1710_v45  ;;  %1623 = vst.msk [vmem:[#allocation2 + $0x78] sm:$0xff] %vm283_vm0, %v1591_v26  ;;  %v10918_v52 = vld [vmem:[%s6659_s13 + $0x2e1] sm:$0xff]  ;;  %v2520_v40 = vmul.f32 %v10942_v51, %v5673_v24 }
 0x275   : > { %v6406_v54 = vld [vmem:[%s6659_s13 + $0x212] sm:$0xff]  ;;  %v4223_v16 = vld [vmem:[#allocation2 + $0xc8] sm:$0xff]  ;;  %3295 = vst.msk [vmem:[#allocation2 + $0xd8] sm:$0xff] %vm283_vm0, %v3263_v38  ;;  %v1875_v22 = vmul.f32 %v10709_v9, %v10918_v52 }
 0x276   : > { %v3513_v20 = vmul.f32 %v6406_v54, %v10893_v29  ;;  %v1410_v60 = vld [vmem:[#allocation2 + $0xf8] sm:$0xff]  ;;  %v4505_v35 = vmul.f32 %v10903_v41, %v6406_v54  ;;  %v2387_v7 = vld [vmem:[#allocation2 + $0x68] sm:$0xff]  ;;  %v10908_v33 = vld [vmem:[%s6659_s13 + $0x1b0] sm:$0xff]  ;;  %v4255_v48 = vadd.f32 %v4223_v16, %v4191_v30  ;;  %2631 = vst.msk [vmem:[#allocation2 + $0xe0] sm:$0xff] %vm283_vm0, %v2599_v28  ;;  %v4009_v58 = vmul.f32 %v6406_v54, %v10606_v23 }
 0x277   : > { %v1442_v8 = vadd.f32 %v1410_v60, %v1378_v11  ;;  %v5956_v50 = vld [vmem:[%s6659_s13 + $0x351] sm:$0xff]  ;;  %v2419_v13 = vadd.f32 %v2387_v7, %v2355_v5  ;;  %1806 = vst.msk [vmem:[#allocation2 + $0xf0] sm:$0xff] %vm283_vm0, %v1774_v37  ;;  %v1695_v25 = vmul.f32 %v10729_v14, %v10908_v33 }
 0x278   : > { %v3727_v4 = vld [vmem:[#allocation2 + $0xd0] sm:$0xff]  ;;  %v3545_v56 = vld [vmem:[#allocation2 + $0x58] sm:$0xff]  ;;  %v4537_v0 = vld [vmem:[#allocation2 + $0x48] sm:$0xff]  ;;  %4287 = vst.msk [vmem:[#allocation2 + $0xc8] sm:$0xff] %vm283_vm0, %v4255_v48  ;;  %v3364_v62 = vmul.f32 %v10842_v32, %v5956_v50  ;;  %v4356_v5 = vmul.f32 %v10757_v10, %v5956_v50  ;;  %v3860_v38 = vmul.f32 %v10527_v44, %v5956_v50 }
 0x279   : > { %v3759_v49 = vadd.f32 %v3727_v4, %v3695_v1  ;;  %1474 = vst.msk [vmem:[#allocation2 + $0xf8] sm:$0xff] %vm283_vm0, %v1442_v8  ;;  %v3577_v46 = vadd.f32 %v3545_v56, %v3513_v20  ;;  %2451 = vst.msk [vmem:[#allocation2 + $0x68] sm:$0xff] %vm283_vm0, %v2419_v13  ;;  %v2238_v6 = vld [vmem:[#allocation2 + $0xe8] sm:$0xff]  ;;  %v5979_v47 = vld [vmem:[%s6659_s13 + $0x272] sm:$0xff]  ;;  %v4569_v55 = vadd.f32 %v4537_v0, %v4505_v35 }
 0x27a   : > { %v3048_v19 = vld [vmem:[#allocation2 + $0x60] sm:$0xff]  ;;  %v2270_v18 = vadd.f32 %v2238_v6, %v2206_v43  ;;  %v4041_v45 = vld [vmem:[#allocation2 + $0x50] sm:$0xff]  ;;  %v1543_v36 = vmul.f32 %v10656_v59, %v5979_v47  ;;  %v2371_v43 = vmul.f32 %v10884_v39, %v10918_v52  ;;  %v2191_v47 = vmul.f32 %v10767_v61, %v10908_v33 }
 0x27b   : > { %3791 = vst.msk [vmem:[#allocation2 + $0xd0] sm:$0xff] %vm283_vm0, %v3759_v49  ;;  %3609 = vst.msk [vmem:[#allocation2 + $0x58] sm:$0xff] %vm283_vm0, %v3577_v46  ;;  %v3080_v3 = vadd.f32 %v3048_v19, %v3016_v17  ;;  %v4073_v11 = vadd.f32 %v4041_v45, %v4009_v58  ;;  %v2056_v42 = vld [vmem:[#allocation2 + $0x70] sm:$0xff]  ;;  %v1727_v30 = vld [vmem:[#allocation2 + $0x78] sm:$0xff] }
 0x27c   : > { %4601 = vst.msk [vmem:[#allocation2 + $0x48] sm:$0xff] %vm283_vm0, %v4569_v55  ;;  %2302 = vst.msk [vmem:[#allocation2 + $0xe8] sm:$0xff] %vm283_vm0, %v2270_v18  ;;  %v3396_v12 = vld [vmem:[#allocation2 + $0xd8] sm:$0xff]  ;;  %v2088_v26 = vadd.f32 %v2056_v42, %v2024_v27  ;;  %v1759_v1 = vadd.f32 %v1727_v30, %v1695_v25  ;;  %v10950_v54 = vld [vmem:[%s11598_s1 + $0x15] ss:$0 sm:$0xff] }
 0x27d   : > { %3112 = vst.msk [vmem:[#allocation2 + $0x60] sm:$0xff] %vm283_vm0, %v3080_v3  ;;  %4105 = vst.msk [vmem:[#allocation2 + $0x50] sm:$0xff] %vm283_vm0, %v4073_v11  ;;  %v3428_v59 = vadd.f32 %v3396_v12, %v3364_v62  ;;  %v2734_v63 = vld [vmem:[#allocation2 + $0xe0] sm:$0xff]  ;;  %v10958_v7 = vld [vmem:[%s6659_s13 + $0x1b1] sm:$0xff] }
 0x27e   : > { %v1907_v31 = vld [vmem:[#allocation2 + $0xf0] sm:$0xff]  ;;  %v6410_v20 = vld [vmem:[%s6659_s13 + $0x220] sm:$0xff]  ;;  %v2766_v24 = vadd.f32 %v2734_v63, %v2702_v34  ;;  %2120 = vst.msk [vmem:[#allocation2 + $0x70] sm:$0xff] %vm283_vm0, %v2088_v26  ;;  %1791 = vst.msk [vmem:[#allocation2 + $0x78] sm:$0xff] %vm283_vm0, %v1759_v1  ;;  %v1860_v55 = vmul.f32 %v10709_v9, %v10958_v7  ;;  %v2867_v34 = vmul.f32 %v10562_v21, %v10918_v52 }
 0x27f   : > { %v3680_v28 = vmul.f32 %v6410_v20, %v10950_v54  ;;  %v1939_v37 = vadd.f32 %v1907_v31, %v1875_v22  ;;  %v4388_v35 = vld [vmem:[#allocation2 + $0xc8] sm:$0xff]  ;;  %3460 = vst.msk [vmem:[#allocation2 + $0xd8] sm:$0xff] %vm283_vm0, %v3428_v59  ;;  %v5989_v50 = vld [vmem:[%s6659_s13 + $0x352] sm:$0xff]  ;;  %v3184_v17 = vmul.f32 %v6410_v20, %v10793_v53  ;;  %v4176_v58 = vmul.f32 %v6410_v20, %v10686_v57 }
 0x280   : > { %v1575_v60 = vld [vmem:[#allocation2 + $0xf8] sm:$0xff]  ;;  %v2552_v16 = vld [vmem:[#allocation2 + $0x68] sm:$0xff]  ;;  %v4420_v48 = vadd.f32 %v4388_v35, %v4356_v5  ;;  %2798 = vst.msk [vmem:[#allocation2 + $0xe0] sm:$0xff] %vm283_vm0, %v2766_v24  ;;  %v10974_v25 = vld [vmem:[%s6659_s13 + $0x2f0] sm:$0xff]  ;;  %v3529_v62 = vmul.f32 %v10893_v29, %v5989_v50  ;;  %v4521_v5 = vmul.f32 %v10903_v41, %v5989_v50 }
 0x281   : > { %v1607_v8 = vadd.f32 %v1575_v60, %v1543_v36  ;;  %v2584_v13 = vadd.f32 %v2552_v16, %v2520_v40  ;;  %1971 = vst.msk [vmem:[#allocation2 + $0xf0] sm:$0xff] %vm283_vm0, %v1939_v37  ;;  %v10968_v0 = vld [vmem:[%s6659_s13 + $0x2e2] sm:$0xff]  ;;  %v1711_v36 = vmul.f32 %v10729_v14, %v10974_v25  ;;  %v10996_v52 = vld [vmem:[%s11598_s1 + $0xf] ss:$0 sm:$0xff]  ;;  %v4025_v14 = vmul.f32 %v10606_v23, %v5989_v50  ;;  %v11008_v35 = vld [vmem:[%s6659_s13 + $0x1b2] sm:$0xff] }
 0x282   : > { %v3892_v4 = vld [vmem:[#allocation2 + $0xd0] sm:$0xff]  ;;  %v3712_v56 = vld [vmem:[#allocation2 + $0x58] sm:$0xff]  ;;  %4452 = vst.msk [vmem:[#allocation2 + $0xc8] sm:$0xff] %vm283_vm0, %v4420_v48  ;;  %v2040_v22 = vmul.f32 %v10784_v15, %v10968_v0  ;;  %v2687_v40 = vmul.f32 %v10996_v52, %v10908_v33  ;;  %v6412_v31 = vld [vmem:[%s6659_s13 + $0x221] sm:$0xff]  ;;  %v2536_v16 = vmul.f32 %v10942_v51, %v10968_v0 }
 0x283   : > { %v3924_v49 = vadd.f32 %v3892_v4, %v3860_v38  ;;  %1639 = vst.msk [vmem:[#allocation2 + $0xf8] sm:$0xff] %vm283_vm0, %v1607_v8  ;;  %v4633_v46 = vld [vmem:[#allocation2 + $0x48] sm:$0xff]  ;;  %v3744_v6 = vadd.f32 %v3712_v56, %v3680_v28  ;;  %2616 = vst.msk [vmem:[#allocation2 + $0x68] sm:$0xff] %vm283_vm0, %v2584_v13  ;;  %v3845_v20 = vmul.f32 %v6412_v31, %v10527_v44 }
 0x284   : > { %v2403_v27 = vld [vmem:[#allocation2 + $0xe8] sm:$0xff]  ;;  %6107 = vmatmul.mubr.msk.f32.gmra.mxu0 %vm283_vm0, %v4633_v46  ;;  %v3216_v19 = vld [vmem:[#allocation2 + $0x60] sm:$0xff]  ;;  %v4208_v45 = vld [vmem:[#allocation2 + $0x50] sm:$0xff]  ;;  %v3349_v48 = vmul.f32 %v6412_v31, %v10842_v32  ;;  %v4341_v4 = vmul.f32 %v6412_v31, %v10757_v10  ;;  %v2703_v31 = vmul.f32 %v10996_v52, %v10974_v25 }
 0x285   : > { %3956 = vst.msk [vmem:[#allocation2 + $0xd0] sm:$0xff] %vm283_vm0, %v3924_v49  ;;  %v2435_v18 = vadd.f32 %v2403_v27, %v2371_v43  ;;  %3776 = vst.msk [vmem:[#allocation2 + $0x58] sm:$0xff] %vm283_vm0, %v3744_v6  ;;  %v3248_v3 = vadd.f32 %v3216_v19, %v3184_v17  ;;  %v4240_v11 = vadd.f32 %v4208_v45, %v4176_v58  ;;  %v2223_v42 = vld [vmem:[#allocation2 + $0x70] sm:$0xff]  ;;  %v1892_v30 = vld [vmem:[#allocation2 + $0x78] sm:$0xff] }
 0x286   : > { %v3561_v12 = vld [vmem:[#allocation2 + $0xd8] sm:$0xff]  ;;  %v2255_v26 = vadd.f32 %v2223_v42, %v2191_v47  ;;  %v1924_v1 = vadd.f32 %v1892_v30, %v1860_v55  ;;  %v11019_v58 = vld [vmem:[%s6659_s13 + $0x360] sm:$0xff]  ;;  %v2356_v6 = vmul.f32 %v10884_v39, %v10958_v7  ;;  %v2025_v27 = vmul.f32 %v10784_v15, %v11008_v35 }
 0x287   : > { %2467 = vst.msk [vmem:[#allocation2 + $0xe8] sm:$0xff] %vm283_vm0, %v2435_v18  ;;  %3280 = vst.msk [vmem:[#allocation2 + $0x60] sm:$0xff] %vm283_vm0, %v3248_v3  ;;  %v3593_v38 = vadd.f32 %v3561_v12, %v3529_v62  ;;  %v2899_v59 = vld [vmem:[#allocation2 + $0xe0] sm:$0xff]  ;;  %v11023_v46 = vld [vmem:[%s6659_s13 + $0x2f1] sm:$0xff]  ;;  %v3696_v47 = vmul.f32 %v10950_v54, %v11019_v58  ;;  %v3032_v45 = vmul.f32 %v10635_v2, %v10968_v0 }
 0x288   : > { %4272 = vst.msk [vmem:[#allocation2 + $0x50] sm:$0xff] %vm283_vm0, %v4240_v11  ;;  %v2072_v63 = vld [vmem:[#allocation2 + $0xf0] sm:$0xff]  ;;  %v2931_v28 = vadd.f32 %v2899_v59, %v2867_v34  ;;  %2287 = vst.msk [vmem:[#allocation2 + $0x70] sm:$0xff] %vm283_vm0, %v2255_v26  ;;  %v2207_v3 = vmul.f32 %v10767_v61, %v10974_v25  ;;  %v1876_v42 = vmul.f32 %v10709_v9, %v11023_v46  ;;  %v11063_v25 = vld [vmem:[%s6659_s13 + $0x361] sm:$0xff] }
 0x289   : > { %v2104_v24 = vadd.f32 %v2072_v63, %v2040_v22  ;;  %1956 = vst.msk [vmem:[#allocation2 + $0x78] sm:$0xff] %vm283_vm0, %v1924_v1  ;;  %v4553_v37 = vld [vmem:[#allocation2 + $0xc8] sm:$0xff]  ;;  %3625 = vst.msk [vmem:[#allocation2 + $0xd8] sm:$0xff] %vm283_vm0, %v3593_v38  ;;  %v4192_v12 = vmul.f32 %v10686_v57, %v11019_v58 }
 0x28a   : > { %v1743_v33 = vld [vmem:[#allocation2 + $0xf8] sm:$0xff]  ;;  %v2719_v60 = vld [vmem:[#allocation2 + $0x68] sm:$0xff]  ;;  %v4585_v44 = vadd.f32 %v4553_v37, %v4521_v5  ;;  %2963 = vst.msk [vmem:[#allocation2 + $0xe0] sm:$0xff] %vm283_vm0, %v2931_v28 }
 0x28b   : > { %v1775_v43 = vadd.f32 %v1743_v33, %v1711_v36  ;;  %v2751_v50 = vadd.f32 %v2719_v60, %v2687_v40  ;;  %2136 = vst.msk [vmem:[#allocation2 + $0xf0] sm:$0xff] %vm283_vm0, %v2104_v24  ;;  %v2852_v36 = vmul.f32 %v10562_v21, %v10958_v7 }
 0x28c   : > { %v4057_v8 = vld [vmem:[#allocation2 + $0xd0] sm:$0xff]  ;;  %v3877_v13 = vld [vmem:[#allocation2 + $0x58] sm:$0xff]  ;;  %4617 = vst.msk [vmem:[#allocation2 + $0xc8] sm:$0xff] %vm283_vm0, %v4585_v44 }
 0x28d   : > { %v4089_v17 = vadd.f32 %v4057_v8, %v4025_v14  ;;  %1807 = vst.msk [vmem:[#allocation2 + $0xf8] sm:$0xff] %vm283_vm0, %v1775_v43  ;;  %v3909_v49 = vadd.f32 %v3877_v13, %v3845_v20  ;;  %2783 = vst.msk [vmem:[#allocation2 + $0x68] sm:$0xff] %vm283_vm0, %v2751_v50  ;;  %v6413_v14 = vld [vmem:[%s6659_s13 + $0x222] sm:$0xff]  ;;  %v11067_v8 = vld [vmem:[%s6659_s13 + $0x2f2] sm:$0xff] }
 0x28e   : > { %v2568_v56 = vld [vmem:[#allocation2 + $0xe8] sm:$0xff]  ;;  %v3381_v55 = vld [vmem:[#allocation2 + $0x60] sm:$0xff]  ;;  %v4010_v9 = vmul.f32 %v6413_v14, %v10606_v23  ;;  %v3514_v24 = vmul.f32 %v6413_v14, %v10893_v29  ;;  %v4506_v37 = vmul.f32 %v6413_v14, %v10903_v41 }
 0x28f   : > { %4121 = vst.msk [vmem:[#allocation2 + $0xd0] sm:$0xff] %vm283_vm0, %v4089_v17  ;;  %v2600_v62 = vadd.f32 %v2568_v56, %v2536_v16  ;;  %v4373_v19 = vld [vmem:[#allocation2 + $0x50] sm:$0xff]  ;;  %3941 = vst.msk [vmem:[#allocation2 + $0x58] sm:$0xff] %vm283_vm0, %v3909_v49  ;;  %v3413_v18 = vadd.f32 %v3381_v55, %v3349_v48  ;;  %v11054_v20 = vld [vmem:[%s6659_s13 + $0x1c0] sm:$0xff]  ;;  %v2521_v48 = vmul.f32 %v10942_v51, %v11008_v35 }
 0x290   : > { %v4405_v34 = vadd.f32 %v4373_v19, %v4341_v4  ;;  %v2388_v22 = vld [vmem:[#allocation2 + $0x70] sm:$0xff]  ;;  %v2057_v11 = vld [vmem:[#allocation2 + $0x78] sm:$0xff]  ;;  %v2192_v50 = vmul.f32 %v10767_v61, %v11054_v20 }
 0x291   : > { %2632 = vst.msk [vmem:[#allocation2 + $0xe8] sm:$0xff] %vm283_vm0, %v2600_v62  ;;  %v3728_v30 = vld [vmem:[#allocation2 + $0xd8] sm:$0xff]  ;;  %3445 = vst.msk [vmem:[#allocation2 + $0x60] sm:$0xff] %vm283_vm0, %v3413_v18  ;;  %v2420_v5 = vadd.f32 %v2388_v22, %v2356_v6  ;;  %v2089_v0 = vadd.f32 %v2057_v11, %v2025_v27  ;;  %v3064_v26 = vld [vmem:[#allocation2 + $0xe0] sm:$0xff]  ;;  %v3200_v27 = vmul.f32 %v10793_v53, %v11019_v58 }
 0x292   : > { %4437 = vst.msk [vmem:[#allocation2 + $0x50] sm:$0xff] %vm283_vm0, %v4405_v34  ;;  %v3760_v40 = vadd.f32 %v3728_v30, %v3696_v47  ;;  %v2239_v1 = vld [vmem:[#allocation2 + $0xf0] sm:$0xff]  ;;  %v3096_v38 = vadd.f32 %v3064_v26, %v3032_v45  ;;  %v2372_v47 = vmul.f32 %v10884_v39, %v11023_v46  ;;  %v2041_v18 = vmul.f32 %v10784_v15, %v11067_v8 }
 0x293   : > { %2452 = vst.msk [vmem:[#allocation2 + $0x70] sm:$0xff] %vm283_vm0, %v2420_v5  ;;  %v2271_v59 = vadd.f32 %v2239_v1, %v2207_v3  ;;  %2121 = vst.msk [vmem:[#allocation2 + $0x78] sm:$0xff] %vm283_vm0, %v2089_v0  ;;  %v4649_v7 = vld [vmem:[#allocation2 + $0xc8] sm:$0xff]  ;;  %v11077_v4 = vld [vmem:[%s11598_s1 + $0x16] ss:$0 sm:$0xff]  ;;  %v3017_v3 = vmul.f32 %v10635_v2, %v11008_v35  ;;  %v4357_v22 = vmul.f32 %v10757_v10, %v11063_v25 }
 0x294   : > { %v1908_v21 = vld [vmem:[#allocation2 + $0xf8] sm:$0xff]  ;;  %3792 = vst.msk [vmem:[#allocation2 + $0xd8] sm:$0xff] %vm283_vm0, %v3760_v40  ;;  %v2884_v63 = vld [vmem:[#allocation2 + $0x68] sm:$0xff]  ;;  %6131 = vmatmul.mubr.msk.f32.gmra.mxu1 %vm283_vm0, %v4649_v7  ;;  %3128 = vst.msk [vmem:[#allocation2 + $0xe0] sm:$0xff] %vm283_vm0, %v3096_v38  ;;  %v3861_v17 = vmul.f32 %v11077_v4, %v11063_v25 }
 0x295   : > { %v1940_v28 = vadd.f32 %v1908_v21, %v1876_v42  ;;  %v2916_v33 = vadd.f32 %v2884_v63, %v2852_v36  ;;  %2303 = vst.msk [vmem:[#allocation2 + $0xf0] sm:$0xff] %vm283_vm0, %v2271_v59  ;;  %v6415_v36 = vld [vmem:[%s6659_s13 + $0x230] sm:$0xff]  ;;  %v11115_v21 = vld [vmem:[%s6659_s13 + $0x362] sm:$0xff]  ;;  %v2688_v63 = vmul.f32 %v10996_v52, %v11054_v20 }
 0x296   : > { %v4224_v23 = vld [vmem:[#allocation2 + $0xd0] sm:$0xff]  ;;  %v4042_v16 = vld [vmem:[#allocation2 + $0x58] sm:$0xff]  ;;  %v4177_v15 = vmul.f32 %v6415_v36, %v10686_v57  ;;  %v11108_v57 = vld [vmem:[%s6659_s13 + $0x1c1] sm:$0xff]  ;;  %v3681_v14 = vmul.f32 %v6415_v36, %v10950_v54 }
 0x297   : > { %v4256_v60 = vadd.f32 %v4224_v23, %v4192_v12  ;;  %1972 = vst.msk [vmem:[#allocation2 + $0xf8] sm:$0xff] %vm283_vm0, %v1940_v28  ;;  %v4074_v43 = vadd.f32 %v4042_v16, %v4010_v9  ;;  %2948 = vst.msk [vmem:[#allocation2 + $0x68] sm:$0xff] %vm283_vm0, %v2916_v33  ;;  %v11103_v12 = vld [vmem:[%s11598_s1 + $0x10] ss:$0 sm:$0xff]  ;;  %v2357_v28 = vmul.f32 %v10884_v39, %v11108_v57  ;;  %v11127_v23 = vld [vmem:[%s11598_s1 + $0x17] ss:$0 sm:$0xff] }
 0x298   : > { %v2735_v44 = vld [vmem:[#allocation2 + $0xe8] sm:$0xff]  ;;  %v3546_v13 = vld [vmem:[#allocation2 + $0x60] sm:$0xff]  ;;  %v2868_v40 = vmul.f32 %v11103_v12, %v11023_v46  ;;  %v3365_v16 = vmul.f32 %v10842_v32, %v11063_v25  ;;  %v4522_v25 = vmul.f32 %v10903_v41, %v11115_v21 }
 0x299   : > { %4288 = vst.msk [vmem:[#allocation2 + $0xd0] sm:$0xff] %vm283_vm0, %v4256_v60  ;;  %v2767_v49 = vadd.f32 %v2735_v44, %v2703_v31  ;;  %v4538_v56 = vld [vmem:[#allocation2 + $0x50] sm:$0xff]  ;;  %4106 = vst.msk [vmem:[#allocation2 + $0x58] sm:$0xff] %vm283_vm0, %v4074_v43  ;;  %v3578_v6 = vadd.f32 %v3546_v13, %v3514_v24  ;;  %v5625_v31 = vld [vmem:[%s6659_s13 + $0x300] sm:$0xff]  ;;  %v4026_v24 = vmul.f32 %v11127_v23, %v11115_v21 }
 0x29a   : > { %v4570_v55 = vadd.f32 %v4538_v56, %v4506_v37  ;;  %v2553_v62 = vld [vmem:[#allocation2 + $0x70] sm:$0xff]  ;;  %v2224_v19 = vld [vmem:[#allocation2 + $0x78] sm:$0xff]  ;;  %v2537_v43 = vmul.f32 %v10942_v51, %v11067_v8  ;;  %v3185_v13 = vmul.f32 %v6415_v36, %v10793_v53 }
 0x29b   : > { %2799 = vst.msk [vmem:[#allocation2 + $0xe8] sm:$0xff] %vm283_vm0, %v2767_v49  ;;  %v3893_v45 = vld [vmem:[#allocation2 + $0xd8] sm:$0xff]  ;;  %3610 = vst.msk [vmem:[#allocation2 + $0x60] sm:$0xff] %vm283_vm0, %v3578_v6  ;;  %v2585_v34 = vadd.f32 %v2553_v62, %v2521_v48  ;;  %v2256_v58 = vadd.f32 %v2224_v19, %v2192_v50  ;;  %v3232_v42 = vld [vmem:[#allocation2 + $0xe0] sm:$0xff]  ;;  %v2208_v50 = vmul.f32 %v10767_v61, %v5625_v31 }
 0x29c   : > { %4602 = vst.msk [vmem:[#allocation2 + $0x50] sm:$0xff] %vm283_vm0, %v4570_v55  ;;  %v3925_v11 = vadd.f32 %v3893_v45, %v3861_v17  ;;  %v2404_v30 = vld [vmem:[#allocation2 + $0xf0] sm:$0xff]  ;;  %v3264_v5 = vadd.f32 %v3232_v42, %v3200_v27 }
 0x29d   : > { %2617 = vst.msk [vmem:[#allocation2 + $0x70] sm:$0xff] %vm283_vm0, %v2585_v34  ;;  %v2436_v0 = vadd.f32 %v2404_v30, %v2372_v47  ;;  %2288 = vst.msk [vmem:[#allocation2 + $0x78] sm:$0xff] %vm283_vm0, %v2256_v58  ;;  %v6418_v55 = vld [vmem:[%s6659_s13 + $0x231] sm:$0xff]  ;;  %v5675_v58 = vld [vmem:[%s6659_s13 + $0x1c2] sm:$0xff] }
 0x29e   : > { %v2073_v2 = vld [vmem:[#allocation2 + $0xf8] sm:$0xff]  ;;  %3957 = vst.msk [vmem:[#allocation2 + $0xd8] sm:$0xff] %vm283_vm0, %v3925_v11  ;;  %v3049_v35 = vld [vmem:[#allocation2 + $0x68] sm:$0xff]  ;;  %3296 = vst.msk [vmem:[#allocation2 + $0xe0] sm:$0xff] %vm283_vm0, %v3264_v5  ;;  %v4342_v62 = vmul.f32 %v6418_v55, %v10757_v10  ;;  %v3846_v42 = vmul.f32 %v6418_v55, %v11077_v4 }
 0x29f   : > { %v2105_v26 = vadd.f32 %v2073_v2, %v2041_v18  ;;  %v3081_v9 = vadd.f32 %v3049_v35, %v3017_v3  ;;  %2468 = vst.msk [vmem:[#allocation2 + $0xf0] sm:$0xff] %vm283_vm0, %v2436_v0  ;;  %v11151_v3 = vld [vmem:[%s11598_s1 + $0x11] ss:$0 sm:$0xff]  ;;  %v2853_v2 = vmul.f32 %v11103_v12, %v11108_v57  ;;  %v5658_v35 = vld [vmem:[%s6659_s13 + $0x301] sm:$0xff]  ;;  %v3530_v57 = vmul.f32 %v10893_v29, %v11115_v21  ;;  %v6421_v21 = vld [vmem:[%s6659_s13 + $0x232] sm:$0xff] }
 0x2a0   : > { %v4389_v1 = vld [vmem:[#allocation2 + $0xd0] sm:$0xff]  ;;  %v4209_v59 = vld [vmem:[#allocation2 + $0x58] sm:$0xff]  ;;  %v3033_v34 = vmul.f32 %v11151_v3, %v11067_v8 }
 0x2a1   : > { %v4421_v38 = vadd.f32 %v4389_v1, %v4357_v22  ;;  %2137 = vst.msk [vmem:[#allocation2 + $0xf8] sm:$0xff] %vm283_vm0, %v2105_v26  ;;  %v4241_v7 = vadd.f32 %v4209_v59, %v4177_v15  ;;  %3113 = vst.msk [vmem:[#allocation2 + $0x68] sm:$0xff] %vm283_vm0, %v3081_v9  ;;  %v5925_v0 = vld [vmem:[%s6659_s13 + $0x370] sm:$0xff]  ;;  %v11170_v26 = vld [vmem:[%s11598_s1 + $0x18] ss:$0 sm:$0xff]  ;;  %v2704_v59 = vmul.f32 %v10996_v52, %v5625_v31 }
 0x2a2   : > { %v2900_v46 = vld [vmem:[#allocation2 + $0xe8] sm:$0xff]  ;;  %v3713_v33 = vld [vmem:[#allocation2 + $0x60] sm:$0xff]  ;;  %v4193_v1 = vmul.f32 %v11170_v26, %v5925_v0  ;;  %v4507_v31 = vmul.f32 %v6421_v21, %v10903_v41 }
 0x2a3   : > { %4453 = vst.msk [vmem:[#allocation2 + $0xd0] sm:$0xff] %vm283_vm0, %v4421_v38  ;;  %v2932_v37 = vadd.f32 %v2900_v46, %v2868_v40  ;;  %v4634_v60 = vld [vmem:[#allocation2 + $0x50] sm:$0xff]  ;;  %4273 = vst.msk [vmem:[#allocation2 + $0x58] sm:$0xff] %vm283_vm0, %v4241_v7  ;;  %v3745_v20 = vadd.f32 %v3713_v33, %v3681_v14  ;;  %v2522_v40 = vmul.f32 %v10942_v51, %v5675_v58 }
 0x2a4   : > { %6109 = vmatprep.mubr.msk.f32.mxu0 %vm283_vm0, %v4634_v60  ;;  %v2720_v44 = vld [vmem:[#allocation2 + $0x70] sm:$0xff]  ;;  %v2389_v48 = vld [vmem:[#allocation2 + $0x78] sm:$0xff] }
 0x2a5   : > { %2964 = vst.msk [vmem:[#allocation2 + $0xe8] sm:$0xff] %vm283_vm0, %v2932_v37  ;;  %v4058_v17 = vld [vmem:[#allocation2 + $0xd8] sm:$0xff]  ;;  %3777 = vst.msk [vmem:[#allocation2 + $0x60] sm:$0xff] %vm283_vm0, %v3745_v20  ;;  %v2752_v49 = vadd.f32 %v2720_v44, %v2688_v63  ;;  %v2421_v56 = vadd.f32 %v2389_v48, %v2357_v28  ;;  %v3397_v27 = vld [vmem:[#allocation2 + $0xe0] sm:$0xff]  ;;  %v2373_v63 = vmul.f32 %v10884_v39, %v5658_v35 }
 0x2a6   : > { %v4090_v6 = vadd.f32 %v4058_v17, %v4026_v24  ;;  %v2569_v47 = vld [vmem:[#allocation2 + $0xf0] sm:$0xff]  ;;  %v3429_v19 = vadd.f32 %v3397_v27, %v3365_v16  ;;  %v3350_v24 = vmul.f32 %v6418_v55, %v10842_v32  ;;  %v3018_v55 = vmul.f32 %v11151_v3, %v5675_v58 }
 0x2a7   : > { %2784 = vst.msk [vmem:[#allocation2 + $0x70] sm:$0xff] %vm283_vm0, %v2752_v49  ;;  %v2601_v61 = vadd.f32 %v2569_v47, %v2537_v43  ;;  %2453 = vst.msk [vmem:[#allocation2 + $0x78] sm:$0xff] %vm283_vm0, %v2421_v56  ;;  %v5610_v17 = vld [vmem:[%s6659_s13 + $0x1d0] sm:$0xff]  ;;  %v4011_v56 = vmul.f32 %v6421_v21, %v11127_v23 }
 0x2a8   : > { %v2240_v18 = vld [vmem:[#allocation2 + $0xf8] sm:$0xff]  ;;  %4122 = vst.msk [vmem:[#allocation2 + $0xd8] sm:$0xff] %vm283_vm0, %v4090_v6  ;;  %v3217_v45 = vld [vmem:[#allocation2 + $0x68] sm:$0xff]  ;;  %3461 = vst.msk [vmem:[#allocation2 + $0xe0] sm:$0xff] %vm283_vm0, %v3429_v19  ;;  %v2689_v19 = vmul.f32 %v10996_v52, %v5610_v17 }
 0x2a9   : > { %v2272_v22 = vadd.f32 %v2240_v18, %v2208_v50  ;;  %v3249_v30 = vadd.f32 %v3217_v45, %v3185_v13  ;;  %2633 = vst.msk [vmem:[#allocation2 + $0xf0] sm:$0xff] %vm283_vm0, %v2601_v61  ;;  %v3201_v50 = vmul.f32 %v10793_v53, %v5925_v0  ;;  %v5958_v47 = vld [vmem:[%s6659_s13 + $0x371] sm:$0xff] }
 0x2aa   : > { %v4554_v11 = vld [vmem:[#allocation2 + $0xd0] sm:$0xff]  ;;  %v4374_v15 = vld [vmem:[#allocation2 + $0x58] sm:$0xff]  ;;  %v4358_v61 = vmul.f32 %v10757_v10, %v5958_v47  ;;  %v3515_v10 = vmul.f32 %v6421_v21, %v10893_v29 }
 0x2ab   : > { %v4586_v36 = vadd.f32 %v4554_v11, %v4522_v25  ;;  %2304 = vst.msk [vmem:[#allocation2 + $0xf8] sm:$0xff] %vm283_vm0, %v2272_v22  ;;  %v4406_v5 = vadd.f32 %v4374_v15, %v4342_v62  ;;  %3281 = vst.msk [vmem:[#allocation2 + $0x68] sm:$0xff] %vm283_vm0, %v3249_v30  ;;  %v5691_v62 = vld [vmem:[%s6659_s13 + $0x302] sm:$0xff]  ;;  %v3697_v22 = vmul.f32 %v10950_v54, %v5925_v0  ;;  %v5626_v21 = vld [vmem:[%s6659_s13 + $0x310] sm:$0xff] }
 0x2ac   : > { %v3065_v8 = vld [vmem:[#allocation2 + $0xe8] sm:$0xff]  ;;  %v3878_v14 = vld [vmem:[#allocation2 + $0x60] sm:$0xff]  ;;  %v2869_v11 = vmul.f32 %v11103_v12, %v5658_v35  ;;  %v2538_v58 = vmul.f32 %v10942_v51, %v5691_v62  ;;  %v3034_v17 = vmul.f32 %v11151_v3, %v5691_v62 }
 0x2ad   : > { %4618 = vst.msk [vmem:[#allocation2 + $0xd0] sm:$0xff] %vm283_vm0, %v4586_v36  ;;  %v3097_v9 = vadd.f32 %v3065_v8, %v3033_v34  ;;  %4438 = vst.msk [vmem:[#allocation2 + $0x58] sm:$0xff] %vm283_vm0, %v4406_v5  ;;  %v3910_v38 = vadd.f32 %v3878_v14, %v3846_v42  ;;  %v3366_v14 = vmul.f32 %v10842_v32, %v5958_v47 }
 0x2ae   : > { %v2885_v7 = vld [vmem:[#allocation2 + $0x70] sm:$0xff]  ;;  %v2554_v46 = vld [vmem:[#allocation2 + $0x78] sm:$0xff] }
 0x2af   : > { %3129 = vst.msk [vmem:[#allocation2 + $0xe8] sm:$0xff] %vm283_vm0, %v3097_v9  ;;  %v4225_v28 = vld [vmem:[#allocation2 + $0xd8] sm:$0xff]  ;;  %3942 = vst.msk [vmem:[#allocation2 + $0x60] sm:$0xff] %vm283_vm0, %v3910_v38  ;;  %v2917_v33 = vadd.f32 %v2885_v7, %v2853_v2  ;;  %v2586_v37 = vadd.f32 %v2554_v46, %v2522_v40  ;;  %v3562_v20 = vld [vmem:[#allocation2 + $0xe0] sm:$0xff] }
 0x2b0   : > { %v4257_v60 = vadd.f32 %v4225_v28, %v4193_v1  ;;  %v2736_v16 = vld [vmem:[#allocation2 + $0xf0] sm:$0xff]  ;;  %v3594_v43 = vadd.f32 %v3562_v20, %v3530_v57  ;;  %v6422_v57 = vld [vmem:[%s6659_s13 + $0x240] sm:$0xff] }
 0x2b1   : > { %2949 = vst.msk [vmem:[#allocation2 + $0x70] sm:$0xff] %vm283_vm0, %v2917_v33  ;;  %v2768_v44 = vadd.f32 %v2736_v16, %v2704_v59  ;;  %2618 = vst.msk [vmem:[#allocation2 + $0x78] sm:$0xff] %vm283_vm0, %v2586_v37  ;;  %v5643_v9 = vld [vmem:[%s6659_s13 + $0x1d1] sm:$0xff]  ;;  %v4178_v59 = vmul.f32 %v6422_v57, %v11170_v26  ;;  %v11220_v28 = vld [vmem:[%s11600_s3] ss:$0 sm:$0xff] }
 0x2b2   : > { %v2405_v39 = vld [vmem:[#allocation2 + $0xf8] sm:$0xff]  ;;  %4289 = vst.msk [vmem:[#allocation2 + $0xd8] sm:$0xff] %vm283_vm0, %v4257_v60  ;;  %v3382_v48 = vld [vmem:[#allocation2 + $0x68] sm:$0xff]  ;;  %3626 = vst.msk [vmem:[#allocation2 + $0xe0] sm:$0xff] %vm283_vm0, %v3594_v43  ;;  %v2854_v16 = vmul.f32 %v11103_v12, %v5643_v9 }
 0x2b3   : > { %v2437_v13 = vadd.f32 %v2405_v39, %v2373_v63  ;;  %v3414_v25 = vadd.f32 %v3382_v48, %v3350_v24  ;;  %2800 = vst.msk [vmem:[#allocation2 + $0xf0] sm:$0xff] %vm283_vm0, %v2768_v44  ;;  %v6096_v63 = vpop.f32.mrf.mxu0  ;;  %v6120_v24 = vpop.f32.mrf.mxu1  ;;  %v11224_v33 = vld [vmem:[%s6659_s13 + $0x372] sm:$0xff]  ;;  %v3862_v48 = vmul.f32 %v11077_v4, %v5958_v47  ;;  %v3682_v47 = vmul.f32 %v6422_v57, %v10950_v54 }
 0x2b4   : > { %v4650_v49 = vld [vmem:[#allocation2 + $0xd0] sm:$0xff]  ;;  %v4539_v6 = vld [vmem:[#allocation2 + $0x58] sm:$0xff]  ;;  %v4919_v43 = vadd.f32 %v6120_v24, %v11220_v28  ;;  %v4523_v44 = vmul.f32 %v10903_v41, %v11224_v33 }
 0x2b5   : > { %6133 = vmatprep.mubr.msk.f32.mxu1 %vm283_vm0, %v4650_v49  ;;  %2469 = vst.msk [vmem:[#allocation2 + $0xf8] sm:$0xff] %vm283_vm0, %v2437_v13  ;;  %v4571_v27 = vadd.f32 %v4539_v6, %v4507_v31  ;;  %3446 = vst.msk [vmem:[#allocation2 + $0x68] sm:$0xff] %vm283_vm0, %v3414_v25  ;;  %v11230_v60 = vld [vmem:[%s11598_s1 + $0x12] ss:$0 sm:$0xff]  ;;  %v4839_v31 = vadd.f32 %v6096_v63, %v11220_v28  ;;  %v4833_v13 = vpop.f32.mrf.mxu0  ;;  %v4913_v49 = vpop.f32.mrf.mxu1 }
 0x2b6   : > { %v3233_v53 = vld [vmem:[#allocation2 + $0xe8] sm:$0xff]  ;;  %v4043_v18 = vld [vmem:[#allocation2 + $0x60] sm:$0xff]  ;;  %v3186_v20 = vmul.f32 %v11230_v60, %v6422_v57  ;;  %v5009_v6 = vmax.f32 %v4919_v43, 0.0  ;;  %v5659_v57 = vld [vmem:[%s6659_s13 + $0x311] sm:$0xff] }
 0x2b7   : > { %v3265_v45 = vadd.f32 %v3233_v53, %v3201_v50  ;;  %4603 = vst.msk [vmem:[#allocation2 + $0x58] sm:$0xff] %vm283_vm0, %v4571_v27  ;;  %v4075_v34 = vadd.f32 %v4043_v18, %v4011_v56  ;;  %v4993_v25 = vmax.f32 %v4839_v31, 0.0  ;;  %v4834_v27 = vadd.f32 %v11220_v28, %v4833_v13 }
 0x2b8   : > { %v3050_v42 = vld [vmem:[#allocation2 + $0x70] sm:$0xff]  ;;  %v2721_v30 = vld [vmem:[#allocation2 + $0x78] sm:$0xff]  ;;  %5041 = vst.msk [vmem:[%s11249_s6 + $0x88] sm:$0xff] %vm283_vm0, %v5009_v6 }
 0x2b9   : > { %3297 = vst.msk [vmem:[#allocation2 + $0xe8] sm:$0xff] %vm283_vm0, %v3265_v45  ;;  %v4390_v36 = vld [vmem:[#allocation2 + $0xd8] sm:$0xff]  ;;  %4107 = vst.msk [vmem:[#allocation2 + $0x60] sm:$0xff] %vm283_vm0, %v4075_v34  ;;  %v3082_v15 = vadd.f32 %v3050_v42, %v3018_v55  ;;  %v2753_v5 = vadd.f32 %v2721_v30, %v2689_v19  ;;  %v3729_v2 = vld [vmem:[#allocation2 + $0xe0] sm:$0xff]  ;;  %v2705_v19 = vmul.f32 %v10996_v52, %v5626_v21  ;;  %v4992_v52 = vmax.f32 %v4834_v27, 0.0  ;;  %v6123_v21 = vpop.f32.mrf.mxu1 }
 0x2ba   : > { %v4422_v8 = vadd.f32 %v4390_v36, %v4358_v61  ;;  %v2901_v0 = vld [vmem:[#allocation2 + $0xf0] sm:$0xff]  ;;  %v3761_v40 = vadd.f32 %v3729_v2, %v3697_v22  ;;  %v4914_v61 = vadd.f32 %v11220_v28, %v4913_v49  ;;  %5025 = vst.msk [vmem:[%s11249_s6 + $0x8] sm:$0xff] %vm283_vm0, %v4993_v25  ;;  %v11268_v2 = vld [vmem:[%s11598_s1 + $0x19] ss:$0 sm:$0xff] }
 0x2bb   : > { %3114 = vst.msk [vmem:[#allocation2 + $0x70] sm:$0xff] %vm283_vm0, %v3082_v15  ;;  %v2933_v35 = vadd.f32 %v2901_v0, %v2869_v11  ;;  %2785 = vst.msk [vmem:[#allocation2 + $0x78] sm:$0xff] %vm283_vm0, %v2753_v5  ;;  %v3531_v15 = vmul.f32 %v10893_v29, %v11224_v33  ;;  %v5676_v5 = vld [vmem:[%s6659_s13 + $0x1d2] sm:$0xff]  ;;  %v6425_v0 = vld [vmem:[%s6659_s13 + $0x241] sm:$0xff]  ;;  %v4923_v49 = vpop.f32.mrf.mxu1 }
 0x2bc   : > { %v2570_v51 = vld [vmem:[#allocation2 + $0xf8] sm:$0xff]  ;;  %4454 = vst.msk [vmem:[#allocation2 + $0xd8] sm:$0xff] %vm283_vm0, %v4422_v8  ;;  %v3547_v1 = vld [vmem:[#allocation2 + $0x68] sm:$0xff]  ;;  %3793 = vst.msk [vmem:[#allocation2 + $0xe0] sm:$0xff] %vm283_vm0, %v3761_v40  ;;  %v5008_v42 = vmax.f32 %v4914_v61, 0.0  ;;  %v4343_v40 = vmul.f32 %v6425_v0, %v11268_v2  ;;  %v3351_v9 = vmul.f32 %v6425_v0, %v10842_v32  ;;  %v4924_v6 = vadd.f32 %v11220_v28, %v4923_v49 }
 0x2bd   : > { %v2602_v38 = vadd.f32 %v2570_v51, %v2538_v58  ;;  %v3579_v7 = vadd.f32 %v3547_v1, %v3515_v10  ;;  %2965 = vst.msk [vmem:[#allocation2 + $0xf0] sm:$0xff] %vm283_vm0, %v2933_v35  ;;  %5024 = vst.msk [vmem:[%s11249_s6] sm:$0xff] %vm283_vm0, %v4992_v52  ;;  %v11275_v51 = vld [vmem:[%s6659_s13 + $0x380] sm:$0xff]  ;;  %v6099_v1 = vpop.f32.mrf.mxu0 }
 0x2be   : > { %v4635_v46 = vld [vmem:[#allocation2 + $0x58] sm:$0xff]  ;;  %5040 = vst.msk [vmem:[%s11249_s6 + $0x80] sm:$0xff] %vm283_vm0, %v5008_v42  ;;  %v3698_v61 = vmul.f32 %v10950_v54, %v11275_v51  ;;  %v6427_v42 = vld [vmem:[%s6659_s13 + $0x250] sm:$0xff] }
 0x2bf   : > { %2634 = vst.msk [vmem:[#allocation2 + $0xf8] sm:$0xff] %vm283_vm0, %v2602_v38  ;;  %6110 = vmatmul.mubr.msk.f32.gmra.mxu0 %vm283_vm0, %v4635_v46  ;;  %3611 = vst.msk [vmem:[#allocation2 + $0x68] sm:$0xff] %vm283_vm0, %v3579_v7  ;;  %v3019_v38 = vmul.f32 %v11151_v3, %v5676_v5  ;;  %v4027_v46 = vmul.f32 %v11127_v23, %v11224_v33  ;;  %v4843_v24 = vpop.f32.mrf.mxu0  ;;  %v11323_v5 = vld [vmem:[%s11598_s1 + $0x13] ss:$0 sm:$0xff] }
 0x2c0   : > { %v3398_v37 = vld [vmem:[#allocation2 + $0xe8] sm:$0xff]  ;;  %v4210_v39 = vld [vmem:[#allocation2 + $0x60] sm:$0xff]  ;;  %v4844_v32 = vadd.f32 %v11220_v28, %v4843_v24 }
 0x2c1   : > { %v3430_v50 = vadd.f32 %v3398_v37, %v3366_v14  ;;  %v4242_v56 = vadd.f32 %v4210_v39, %v4178_v59  ;;  %v4849_v59 = vadd.f32 %v6099_v1, %v11220_v28  ;;  %v4929_v39 = vadd.f32 %v6123_v21, %v11220_v28  ;;  %v5992_v24 = vld [vmem:[%s6659_s13 + $0x382] sm:$0xff]  ;;  %v6429_v21 = vld [vmem:[%s6659_s13 + $0x251] sm:$0xff] }
 0x2c2   : > { %v3218_v53 = vld [vmem:[#allocation2 + $0x70] sm:$0xff]  ;;  %v2886_v55 = vld [vmem:[#allocation2 + $0x78] sm:$0xff]  ;;  %v4994_v13 = vmax.f32 %v4844_v32, 0.0  ;;  %v3352_v32 = vmul.f32 %v6429_v21, %v11323_v5 }
 0x2c3   : > { %3462 = vst.msk [vmem:[#allocation2 + $0xe8] sm:$0xff] %vm283_vm0, %v3430_v50  ;;  %v4555_v18 = vld [vmem:[#allocation2 + $0xd8] sm:$0xff]  ;;  %4274 = vst.msk [vmem:[#allocation2 + $0x60] sm:$0xff] %vm283_vm0, %v4242_v56  ;;  %v3250_v62 = vadd.f32 %v3218_v53, %v3186_v20  ;;  %v2918_v45 = vadd.f32 %v2886_v55, %v2854_v16  ;;  %v3894_v22 = vld [vmem:[#allocation2 + $0xe0] sm:$0xff]  ;;  %v3202_v20 = vmul.f32 %v11230_v60, %v11275_v51  ;;  %v4995_v16 = vmax.f32 %v4849_v59, 0.0 }
 0x2c4   : > { %v4587_v34 = vadd.f32 %v4555_v18, %v4523_v44  ;;  %v3066_v11 = vld [vmem:[#allocation2 + $0xf0] sm:$0xff]  ;;  %v3926_v30 = vadd.f32 %v3894_v22, %v3862_v48  ;;  %v2870_v44 = vmul.f32 %v11103_v12, %v5659_v57  ;;  %v3847_v48 = vmul.f32 %v6425_v0, %v11077_v4  ;;  %5026 = vst.msk [vmem:[%s11249_s6 + $0x10] sm:$0xff] %vm283_vm0, %v4994_v13 }
 0x2c5   : > { %3282 = vst.msk [vmem:[#allocation2 + $0x70] sm:$0xff] %vm283_vm0, %v3250_v62  ;;  %v3098_v58 = vadd.f32 %v3066_v11, %v3034_v17  ;;  %2950 = vst.msk [vmem:[#allocation2 + $0x78] sm:$0xff] %vm283_vm0, %v2918_v45  ;;  %v5011_v25 = vmax.f32 %v4929_v39, 0.0  ;;  %v6426_v62 = vld [vmem:[%s6659_s13 + $0x242] sm:$0xff] }
 0x2c6   : > { %v2737_v36 = vld [vmem:[#allocation2 + $0xf8] sm:$0xff]  ;;  %4619 = vst.msk [vmem:[#allocation2 + $0xd8] sm:$0xff] %vm283_vm0, %v4587_v34  ;;  %v3714_v10 = vld [vmem:[#allocation2 + $0x68] sm:$0xff]  ;;  %3958 = vst.msk [vmem:[#allocation2 + $0xe0] sm:$0xff] %vm283_vm0, %v3926_v30  ;;  %v4508_v45 = vmul.f32 %v6426_v62, %v10903_v41  ;;  %v3516_v11 = vmul.f32 %v6426_v62, %v10893_v29  ;;  %v3187_v30 = vmul.f32 %v6427_v42, %v11230_v60 }
 0x2c7   : > { %v2769_v8 = vadd.f32 %v2737_v36, %v2705_v19  ;;  %v3746_v35 = vadd.f32 %v3714_v10, %v3682_v47  ;;  %3130 = vst.msk [vmem:[#allocation2 + $0xf0] sm:$0xff] %vm283_vm0, %v3098_v58  ;;  %5027 = vst.msk [vmem:[%s11249_s6 + $0x18] sm:$0xff] %vm283_vm0, %v4995_v16  ;;  %v5010_v47 = vmax.f32 %v4924_v6, 0.0  ;;  %v5959_v34 = vld [vmem:[%s6659_s13 + $0x381] sm:$0xff]  ;;  %v5692_v58 = vld [vmem:[%s6659_s13 + $0x312] sm:$0xff]  ;;  %v3683_v16 = vmul.f32 %v6427_v42, %v10950_v54 }
 0x2c8   : > { %5043 = vst.msk [vmem:[%s11249_s6 + $0x98] sm:$0xff] %vm283_vm0, %v5011_v25  ;;  %v4179_v25 = vmul.f32 %v6427_v42, %v11170_v26 }
 0x2c9   : > { %2801 = vst.msk [vmem:[#allocation2 + $0xf8] sm:$0xff] %vm283_vm0, %v2769_v8  ;;  %3778 = vst.msk [vmem:[#allocation2 + $0x68] sm:$0xff] %vm283_vm0, %v3746_v35  ;;  %v3367_v8 = vmul.f32 %v11323_v5, %v5959_v34  ;;  %v4012_v35 = vmul.f32 %v6426_v62, %v11127_v23 }
 0x2ca   : > { %v3563_v14 = vld [vmem:[#allocation2 + $0xe8] sm:$0xff]  ;;  %v4375_v7 = vld [vmem:[#allocation2 + $0x60] sm:$0xff]  ;;  %5042 = vst.msk [vmem:[%s11249_s6 + $0x90] sm:$0xff] %vm283_vm0, %v5010_v47 }
 0x2cb   : > { %v3595_v63 = vadd.f32 %v3563_v14, %v3531_v15  ;;  %v4407_v37 = vadd.f32 %v4375_v7, %v4343_v40  ;;  %v4194_v15 = vmul.f32 %v11170_v26, %v11275_v51  ;;  %v3035_v40 = vmul.f32 %v11151_v3, %v5692_v58 }
 0x2cc   : > { %v3383_v31 = vld [vmem:[#allocation2 + $0x70] sm:$0xff]  ;;  %v3051_v43 = vld [vmem:[#allocation2 + $0x78] sm:$0xff]  ;;  %v3863_v3 = vmul.f32 %v11077_v4, %v5959_v34 }
 0x2cd   : > { %3627 = vst.msk [vmem:[#allocation2 + $0xe8] sm:$0xff] %vm283_vm0, %v3595_v63  ;;  %v4651_v33 = vld [vmem:[#allocation2 + $0xd8] sm:$0xff]  ;;  %4439 = vst.msk [vmem:[#allocation2 + $0x60] sm:$0xff] %vm283_vm0, %v4407_v37  ;;  %v3415_v50 = vadd.f32 %v3383_v31, %v3351_v9  ;;  %v3083_v17 = vadd.f32 %v3051_v43, %v3019_v38  ;;  %v4059_v56 = vld [vmem:[#allocation2 + $0xe0] sm:$0xff] }
 0x2ce   : > { %6134 = vmatmul.mubr.msk.f32.gmra.mxu1 %vm283_vm0, %v4651_v33  ;;  %v3234_v12 = vld [vmem:[#allocation2 + $0xf0] sm:$0xff]  ;;  %v4091_v27 = vadd.f32 %v4059_v56, %v4027_v46  ;;  %v4359_v33 = vmul.f32 %v11268_v2, %v5959_v34 }
 0x2cf   : > { %3447 = vst.msk [vmem:[#allocation2 + $0x70] sm:$0xff] %vm283_vm0, %v3415_v50  ;;  %v3266_v53 = vadd.f32 %v3234_v12, %v3202_v20  ;;  %3115 = vst.msk [vmem:[#allocation2 + $0x78] sm:$0xff] %vm283_vm0, %v3083_v17  ;;  %v11339_v20 = vld [vmem:[%s6659_s13 + $0x390] sm:$0xff] }
 0x2d0   : > { %v2902_v55 = vld [vmem:[#allocation2 + $0xf8] sm:$0xff]  ;;  %v3879_v19 = vld [vmem:[#allocation2 + $0x68] sm:$0xff]  ;;  %4123 = vst.msk [vmem:[#allocation2 + $0xe0] sm:$0xff] %vm283_vm0, %v4091_v27  ;;  %v6102_v31 = vpop.f32.mrf.mxu0  ;;  %v3203_v49 = vmul.f32 %v11230_v60, %v11339_v20 }
 0x2d1   : > { %v2934_v18 = vadd.f32 %v2902_v55, %v2870_v44  ;;  %v3911_v52 = vadd.f32 %v3879_v19, %v3847_v48  ;;  %3298 = vst.msk [vmem:[#allocation2 + $0xf0] sm:$0xff] %vm283_vm0, %v3266_v53  ;;  %v4859_v39 = vadd.f32 %v6102_v31, %v11220_v28  ;;  %v11350_v48 = vld [vmem:[%s11598_s1 + $0x14] ss:$0 sm:$0xff] }
 0x2d2   : > { %v3532_v54 = vmul.f32 %v11350_v48, %v5992_v24  ;;  %v4853_v50 = vpop.f32.mrf.mxu0  ;;  %v5993_v31 = vld [vmem:[%s6659_s13 + $0x392] sm:$0xff] }
 0x2d3   : > { %2966 = vst.msk [vmem:[#allocation2 + $0xf8] sm:$0xff] %vm283_vm0, %v2934_v18  ;;  %3943 = vst.msk [vmem:[#allocation2 + $0x68] sm:$0xff] %vm283_vm0, %v3911_v52  ;;  %v4997_v56 = vmax.f32 %v4859_v39, 0.0  ;;  %v4854_v12 = vadd.f32 %v11220_v28, %v4853_v50 }
 0x2d4   : > { %v3730_v22 = vld [vmem:[#allocation2 + $0xe8] sm:$0xff]  ;;  %v4540_v41 = vld [vmem:[#allocation2 + $0x60] sm:$0xff] }
 0x2d5   : > { %v3762_v36 = vadd.f32 %v3730_v22, %v3698_v61  ;;  %v4572_v10 = vadd.f32 %v4540_v41, %v4508_v45  ;;  %5029 = vst.msk [vmem:[%s11249_s6 + $0x28] sm:$0xff] %vm283_vm0, %v4997_v56  ;;  %v4996_v19 = vmax.f32 %v4854_v12, 0.0  ;;  %v4028_v45 = vmul.f32 %v11127_v23, %v5992_v24  ;;  %v5960_v41 = vld [vmem:[%s6659_s13 + $0x391] sm:$0xff] }
 0x2d6   : > { %v3548_v29 = vld [vmem:[#allocation2 + $0x70] sm:$0xff]  ;;  %v3219_v0 = vld [vmem:[#allocation2 + $0x78] sm:$0xff] }
 0x2d7   : > { %3794 = vst.msk [vmem:[#allocation2 + $0xe8] sm:$0xff] %vm283_vm0, %v3762_v36  ;;  %4604 = vst.msk [vmem:[#allocation2 + $0x60] sm:$0xff] %vm283_vm0, %v4572_v10  ;;  %v3580_v1 = vadd.f32 %v3548_v29, %v3516_v11  ;;  %v3251_v51 = vadd.f32 %v3219_v0, %v3187_v30  ;;  %v4226_v14 = vld [vmem:[#allocation2 + $0xe0] sm:$0xff]  ;;  %v3848_v36 = vmul.f32 %v6429_v21, %v11077_v4  ;;  %v6431_v10 = vld [vmem:[%s6659_s13 + $0x252] sm:$0xff] }
 0x2d8   : > { %v3399_v9 = vld [vmem:[#allocation2 + $0xf0] sm:$0xff]  ;;  %v4258_v38 = vadd.f32 %v4226_v14, %v4194_v15  ;;  %v6126_v47 = vpop.f32.mrf.mxu1  ;;  %5028 = vst.msk [vmem:[%s11249_s6 + $0x20] sm:$0xff] %vm283_vm0, %v4996_v19  ;;  %v3517_v15 = vmul.f32 %v6431_v10, %v11350_v48  ;;  %v11380_v0 = vld [vmem:[%s11598_s1 + $0x1a] ss:$0 sm:$0xff] }
 0x2d9   : > { %3612 = vst.msk [vmem:[#allocation2 + $0x70] sm:$0xff] %vm283_vm0, %v3580_v1  ;;  %v3431_v57 = vadd.f32 %v3399_v9, %v3367_v8  ;;  %3283 = vst.msk [vmem:[#allocation2 + $0x78] sm:$0xff] %vm283_vm0, %v3251_v51  ;;  %v4939_v34 = vadd.f32 %v6126_v47, %v11220_v28  ;;  %v3368_v9 = vmul.f32 %v11323_v5, %v5960_v41  ;;  %v6435_v47 = vld [vmem:[%s6659_s13 + $0x261] sm:$0xff] }
 0x2da   : > { %v3067_v59 = vld [vmem:[#allocation2 + $0xf8] sm:$0xff]  ;;  %v4044_v7 = vld [vmem:[#allocation2 + $0x68] sm:$0xff]  ;;  %4290 = vst.msk [vmem:[#allocation2 + $0xe0] sm:$0xff] %vm283_vm0, %v4258_v38  ;;  %v4933_v11 = vpop.f32.mrf.mxu1  ;;  %v4344_v38 = vmul.f32 %v6429_v21, %v11268_v2  ;;  %v4195_v5 = vmul.f32 %v11170_v26, %v11339_v20 }
 0x2db   : > { %v3099_v46 = vadd.f32 %v3067_v59, %v3035_v40  ;;  %v4076_v63 = vadd.f32 %v4044_v7, %v4012_v35  ;;  %3463 = vst.msk [vmem:[#allocation2 + $0xf0] sm:$0xff] %vm283_vm0, %v3431_v57  ;;  %v5013_v42 = vmax.f32 %v4939_v34, 0.0  ;;  %v4934_v30 = vadd.f32 %v11220_v28, %v4933_v11  ;;  %v11386_v35 = vld [vmem:[%s11598_s1 + $0x15] ss:$0 sm:$0xff] }
 0x2dc   : > { %v4524_v40 = vmul.f32 %v11380_v0, %v5992_v24  ;;  %v3699_v1 = vmul.f32 %v11386_v35, %v11339_v20  ;;  %v3864_v20 = vmul.f32 %v11077_v4, %v5960_v41 }
 0x2dd   : > { %3131 = vst.msk [vmem:[#allocation2 + $0xf8] sm:$0xff] %vm283_vm0, %v3099_v46  ;;  %4108 = vst.msk [vmem:[#allocation2 + $0x68] sm:$0xff] %vm283_vm0, %v4076_v63  ;;  %v5012_v29 = vmax.f32 %v4934_v30, 0.0 }
 0x2de   : > { %v3895_v37 = vld [vmem:[#allocation2 + $0xe8] sm:$0xff]  ;;  %v4636_v43 = vld [vmem:[#allocation2 + $0x60] sm:$0xff]  ;;  %5045 = vst.msk [vmem:[%s11249_s6 + $0xa8] sm:$0xff] %vm283_vm0, %v5013_v42 }
 0x2df   : > { %v3927_v44 = vadd.f32 %v3895_v37, %v3863_v3  ;;  %6112 = vmatprep.mubr.msk.f32.mxu0 %vm283_vm0, %v4636_v43  ;;  %5044 = vst.msk [vmem:[%s11249_s6 + $0xa0] sm:$0xff] %vm283_vm0, %v5012_v29  ;;  %v4013_v43 = vmul.f32 %v6431_v10, %v11127_v23 }
 0x2e0   : > { %v3715_v17 = vld [vmem:[#allocation2 + $0x70] sm:$0xff]  ;;  %v3384_v13 = vld [vmem:[#allocation2 + $0x78] sm:$0xff] }
 0x2e1   : > { %3959 = vst.msk [vmem:[#allocation2 + $0xe8] sm:$0xff] %vm283_vm0, %v3927_v44  ;;  %v3747_v6 = vadd.f32 %v3715_v17, %v3683_v16  ;;  %v3416_v27 = vadd.f32 %v3384_v13, %v3352_v32  ;;  %v4391_v53 = vld [vmem:[#allocation2 + $0xe0] sm:$0xff]  ;;  %v3533_v17 = vmul.f32 %v11350_v48, %v5993_v31  ;;  %v4509_v13 = vmul.f32 %v11380_v0, %v6431_v10 }
 0x2e2   : > { %v3564_v55 = vld [vmem:[#allocation2 + $0xf0] sm:$0xff]  ;;  %v4423_v61 = vadd.f32 %v4391_v53, %v4359_v33  ;;  %v6434_v44 = vld [vmem:[%s6659_s13 + $0x260] sm:$0xff] }
 0x2e3   : > { %3779 = vst.msk [vmem:[#allocation2 + $0x70] sm:$0xff] %vm283_vm0, %v3747_v6  ;;  %v3596_v18 = vadd.f32 %v3564_v55, %v3532_v54  ;;  %3448 = vst.msk [vmem:[#allocation2 + $0x78] sm:$0xff] %vm283_vm0, %v3416_v27  ;;  %v3684_v39 = vmul.f32 %v6434_v44, %v11386_v35  ;;  %v4360_v55 = vmul.f32 %v11268_v2, %v5960_v41 }
 0x2e4   : > { %v3235_v60 = vld [vmem:[#allocation2 + $0xf8] sm:$0xff]  ;;  %v4211_v62 = vld [vmem:[#allocation2 + $0x68] sm:$0xff]  ;;  %4455 = vst.msk [vmem:[#allocation2 + $0xe0] sm:$0xff] %vm283_vm0, %v4423_v61 }
 0x2e5   : > { %v3267_v52 = vadd.f32 %v3235_v60, %v3203_v49  ;;  %v4243_v22 = vadd.f32 %v4211_v62, %v4179_v25  ;;  %3628 = vst.msk [vmem:[#allocation2 + $0xf0] sm:$0xff] %vm283_vm0, %v3596_v18  ;;  %v4180_v18 = vmul.f32 %v6434_v44, %v11170_v26  ;;  %v5928_v60 = vld [vmem:[%s6659_s13 + $0x3a0] sm:$0xff]  ;;  %v3849_v62 = vmul.f32 %v6435_v47, %v11077_v4 }
 0x2e6   : > { %v3700_v11 = vmul.f32 %v11386_v35, %v5928_v60 }
 0x2e7   : > { %3299 = vst.msk [vmem:[#allocation2 + $0xf8] sm:$0xff] %vm283_vm0, %v3267_v52  ;;  %4275 = vst.msk [vmem:[#allocation2 + $0x68] sm:$0xff] %vm283_vm0, %v4243_v22  ;;  %v4029_v52 = vmul.f32 %v11127_v23, %v5993_v31 }
 0x2e8   : > { %v4060_v58 = vld [vmem:[#allocation2 + $0xe8] sm:$0xff] }
 0x2e9   : > { %v4092_v8 = vadd.f32 %v4060_v58, %v4028_v45 }
 0x2ea   : > { %v3880_v51 = vld [vmem:[#allocation2 + $0x70] sm:$0xff]  ;;  %v3549_v14 = vld [vmem:[#allocation2 + $0x78] sm:$0xff] }
 0x2eb   : > { %4124 = vst.msk [vmem:[#allocation2 + $0xe8] sm:$0xff] %vm283_vm0, %v4092_v8  ;;  %v3912_v57 = vadd.f32 %v3880_v51, %v3848_v36  ;;  %v3581_v59 = vadd.f32 %v3549_v14, %v3517_v15  ;;  %v4556_v7 = vld [vmem:[#allocation2 + $0xe0] sm:$0xff]  ;;  %v4525_v8 = vmul.f32 %v11380_v0, %v5993_v31 }
 0x2ec   : > { %v3731_v3 = vld [vmem:[#allocation2 + $0xf0] sm:$0xff]  ;;  %v4588_v46 = vadd.f32 %v4556_v7, %v4524_v40 }
 0x2ed   : > { %3944 = vst.msk [vmem:[#allocation2 + $0x70] sm:$0xff] %vm283_vm0, %v3912_v57  ;;  %v3763_v63 = vadd.f32 %v3731_v3, %v3699_v1  ;;  %3613 = vst.msk [vmem:[#allocation2 + $0x78] sm:$0xff] %vm283_vm0, %v3581_v59  ;;  %v6436_v57 = vld [vmem:[%s6659_s13 + $0x262] sm:$0xff] }
 0x2ee   : > { %v3400_v24 = vld [vmem:[#allocation2 + $0xf8] sm:$0xff]  ;;  %v4376_v37 = vld [vmem:[#allocation2 + $0x68] sm:$0xff]  ;;  %4620 = vst.msk [vmem:[#allocation2 + $0xe0] sm:$0xff] %vm283_vm0, %v4588_v46  ;;  %v4014_v59 = vmul.f32 %v6436_v57, %v11127_v23  ;;  %v4196_v46 = vmul.f32 %v11170_v26, %v5928_v60 }
 0x2ef   : > { %v3432_v16 = vadd.f32 %v3400_v24, %v3368_v9  ;;  %v4408_v21 = vadd.f32 %v4376_v37, %v4344_v38  ;;  %3795 = vst.msk [vmem:[#allocation2 + $0xf0] sm:$0xff] %vm283_vm0, %v3763_v63  ;;  %v4345_v9 = vmul.f32 %v6435_v47, %v11268_v2  ;;  %v5961_v38 = vld [vmem:[%s6659_s13 + $0x3a1] sm:$0xff]  ;;  %v5929_v47 = vld [vmem:[%s6659_s13 + $0x3b0] sm:$0xff] }
 0x2f0   : > { %v3865_v37 = vmul.f32 %v11077_v4, %v5961_v38 }
 0x2f1   : > { %3464 = vst.msk [vmem:[#allocation2 + $0xf8] sm:$0xff] %vm283_vm0, %v3432_v16  ;;  %4440 = vst.msk [vmem:[#allocation2 + $0x68] sm:$0xff] %vm283_vm0, %v4408_v21 }
 0x2f2   : > { %v4227_v32 = vld [vmem:[#allocation2 + $0xe8] sm:$0xff] }
 0x2f3   : > { %v4259_v33 = vadd.f32 %v4227_v32, %v4195_v5 }
 0x2f4   : > { %v4045_v54 = vld [vmem:[#allocation2 + $0x70] sm:$0xff]  ;;  %v3716_v50 = vld [vmem:[#allocation2 + $0x78] sm:$0xff] }
 0x2f5   : > { %4291 = vst.msk [vmem:[#allocation2 + $0xe8] sm:$0xff] %vm283_vm0, %v4259_v33  ;;  %v4077_v49 = vadd.f32 %v4045_v54, %v4013_v43  ;;  %v3748_v56 = vadd.f32 %v3716_v50, %v3684_v39  ;;  %v4652_v12 = vld [vmem:[#allocation2 + $0xe0] sm:$0xff]  ;;  %v4510_v33 = vmul.f32 %v6436_v57, %v11380_v0  ;;  %v6437_v54 = vld [vmem:[%s6659_s13 + $0x270] sm:$0xff] }
 0x2f6   : > { %v3896_v25 = vld [vmem:[#allocation2 + $0xf0] sm:$0xff]  ;;  %6136 = vmatprep.mubr.msk.f32.mxu1 %vm283_vm0, %v4652_v12  ;;  %v4181_v50 = vmul.f32 %v6437_v54, %v11170_v26 }
 0x2f7   : > { %4109 = vst.msk [vmem:[#allocation2 + $0x70] sm:$0xff] %vm283_vm0, %v4077_v49  ;;  %v3928_v6 = vadd.f32 %v3896_v25, %v3864_v20  ;;  %3780 = vst.msk [vmem:[#allocation2 + $0x78] sm:$0xff] %vm283_vm0, %v3748_v56  ;;  %v5994_v20 = vld [vmem:[%s6659_s13 + $0x3a2] sm:$0xff]  ;;  %v4361_v56 = vmul.f32 %v11268_v2, %v5961_v38 }
 0x2f8   : > { %v3565_v27 = vld [vmem:[#allocation2 + $0xf8] sm:$0xff]  ;;  %v4541_v53 = vld [vmem:[#allocation2 + $0x68] sm:$0xff] }
 0x2f9   : > { %v3597_v48 = vadd.f32 %v3565_v27, %v3533_v17  ;;  %v4573_v19 = vadd.f32 %v4541_v53, %v4509_v13  ;;  %3960 = vst.msk [vmem:[#allocation2 + $0xf0] sm:$0xff] %vm283_vm0, %v3928_v6  ;;  %v4030_v6 = vmul.f32 %v11127_v23, %v5994_v20  ;;  %v6438_v23 = vld [vmem:[%s6659_s13 + $0x271] sm:$0xff] }
 0x2fa   : > { %v4346_v60 = vmul.f32 %v6438_v23, %v11268_v2 }
 0x2fb   : > { %3629 = vst.msk [vmem:[#allocation2 + $0xf8] sm:$0xff] %vm283_vm0, %v3597_v48  ;;  %4605 = vst.msk [vmem:[#allocation2 + $0x68] sm:$0xff] %vm283_vm0, %v4573_v19 }
 0x2fc   : > { %v4392_v61 = vld [vmem:[#allocation2 + $0xe8] sm:$0xff]  ;;  %v6105_v10 = vpop.f32.mrf.mxu0 }
 0x2fd   : > { %v4424_v45 = vadd.f32 %v4392_v61, %v4360_v55  ;;  %v4869_v40 = vadd.f32 %v6105_v10, %v11220_v28  ;;  %v5962_v10 = vld [vmem:[%s6659_s13 + $0x3b1] sm:$0xff] }
 0x2fe   : > { %v4212_v34 = vld [vmem:[#allocation2 + $0x70] sm:$0xff]  ;;  %v3881_v22 = vld [vmem:[#allocation2 + $0x78] sm:$0xff]  ;;  %v4863_v35 = vpop.f32.mrf.mxu0 }
 0x2ff   : > { %4456 = vst.msk [vmem:[#allocation2 + $0xe8] sm:$0xff] %vm283_vm0, %v4424_v45  ;;  %v4244_v42 = vadd.f32 %v4212_v34, %v4180_v18  ;;  %v3913_v30 = vadd.f32 %v3881_v22, %v3849_v62  ;;  %v4999_v1 = vmax.f32 %v4869_v40, 0.0  ;;  %v4864_v51 = vadd.f32 %v11220_v28, %v4863_v35 }
 0x300   : > { %v4061_v58 = vld [vmem:[#allocation2 + $0xf0] sm:$0xff]  ;;  %v4526_v62 = vmul.f32 %v11380_v0, %v5994_v20  ;;  %v4197_v34 = vmul.f32 %v11170_v26, %v5929_v47  ;;  %v4362_v26 = vmul.f32 %v11268_v2, %v5962_v10 }
 0x301   : > { %4276 = vst.msk [vmem:[#allocation2 + $0x70] sm:$0xff] %vm283_vm0, %v4244_v42  ;;  %v4093_v41 = vadd.f32 %v4061_v58, %v4029_v52  ;;  %3945 = vst.msk [vmem:[#allocation2 + $0x78] sm:$0xff] %vm283_vm0, %v3913_v30  ;;  %v4998_v3 = vmax.f32 %v4864_v51, 0.0 }
 0x302   : > { %v3732_v36 = vld [vmem:[#allocation2 + $0xf8] sm:$0xff]  ;;  %v4637_v15 = vld [vmem:[#allocation2 + $0x68] sm:$0xff]  ;;  %5031 = vst.msk [vmem:[%s11249_s6 + $0x38] sm:$0xff] %vm283_vm0, %v4999_v1 }
 0x303   : > { %v3764_v29 = vadd.f32 %v3732_v36, %v3700_v11  ;;  %6113 = vmatmul.mubr.msk.f32.gmra.mxu0 %vm283_vm0, %v4637_v15  ;;  %4125 = vst.msk [vmem:[#allocation2 + $0xf0] sm:$0xff] %vm283_vm0, %v4093_v41  ;;  %5030 = vst.msk [vmem:[%s11249_s6 + $0x30] sm:$0xff] %vm283_vm0, %v4998_v3  ;;  %v6439_v41 = vld [vmem:[%s6659_s13 + $0x272] sm:$0xff] }
 0x304   : > { %v4511_v36 = vmul.f32 %v6439_v41, %v11380_v0  ;;  %v5995_v1 = vld [vmem:[%s6659_s13 + $0x3b2] sm:$0xff]  ;;  %s6037_s13 = sshll.u32 %s6516_s18, 5  ;;  %s11546_s18 = scalar_lea.sflag [#allocation4], %s202_s14 }
 0x305   : > { %3796 = vst.msk [vmem:[#allocation2 + $0xf8] sm:$0xff] %vm283_vm0, %v3764_v29  ;;  %s5070_s9 = sadd.s32 %s6037_s13, %s6033_s8 }
 0x306   : > { %v4557_v14 = vld [vmem:[#allocation2 + $0xe8] sm:$0xff]  ;;  %s6034_s10 = sshll.u32 %s5070_s9, 7 }
 0x307   : > { %v4589_v7 = vadd.f32 %v4557_v14, %v4525_v8  ;;  %v4527_v14 = vmul.f32 %v11380_v0, %v5995_v1  ;;  %s11536_s27 = scalar_lea.hbm %s11601_s4, %s6034_s10 }
 0x308   : > { %v4377_v63 = vld [vmem:[#allocation2 + $0x70] sm:$0xff]  ;;  %v4046_v24 = vld [vmem:[#allocation2 + $0x78] sm:$0xff] }
 0x309   : > { %4621 = vst.msk [vmem:[#allocation2 + $0xe8] sm:$0xff] %vm283_vm0, %v4589_v7  ;;  %v4409_v5 = vadd.f32 %v4377_v63, %v4345_v9  ;;  %v4078_v16 = vadd.f32 %v4046_v24, %v4014_v59 }
 0x30a   : > { %v4228_v21 = vld [vmem:[#allocation2 + $0xf0] sm:$0xff] }
 0x30b   : > { %4441 = vst.msk [vmem:[#allocation2 + $0x70] sm:$0xff] %vm283_vm0, %v4409_v5  ;;  %v4260_v32 = vadd.f32 %v4228_v21, %v4196_v46  ;;  %4110 = vst.msk [vmem:[#allocation2 + $0x78] sm:$0xff] %vm283_vm0, %v4078_v16  ;;  %v6129_v44 = vpop.f32.mrf.mxu1 }
 0x30c   : > { %v3897_v31 = vld [vmem:[#allocation2 + $0xf8] sm:$0xff]  ;;  %v4949_v4 = vadd.f32 %v6129_v44, %v11220_v28 }
 0x30d   : > { %v3929_v43 = vadd.f32 %v3897_v31, %v3865_v37  ;;  %4292 = vst.msk [vmem:[#allocation2 + $0xf0] sm:$0xff] %vm283_vm0, %v4260_v32  ;;  %v4943_v17 = vpop.f32.mrf.mxu1 }
 0x30e   : > { %v5015_v13 = vmax.f32 %v4949_v4, 0.0  ;;  %v4944_v49 = vadd.f32 %v11220_v28, %v4943_v17 }
 0x30f   : > { %3961 = vst.msk [vmem:[#allocation2 + $0xf8] sm:$0xff] %vm283_vm0, %v3929_v43 }
 0x310   : > { %v4653_v39 = vld [vmem:[#allocation2 + $0xe8] sm:$0xff]  ;;  %5047 = vst.msk [vmem:[%s11249_s6 + $0xb8] sm:$0xff] %vm283_vm0, %v5015_v13  ;;  %v5014_v27 = vmax.f32 %v4944_v49, 0.0 }
 0x311   : > { %6137 = vmatmul.mubr.msk.f32.gmra.mxu1 %vm283_vm0, %v4653_v39 }
 0x312   : > { %v4542_v12 = vld [vmem:[#allocation2 + $0x70] sm:$0xff]  ;;  %v4213_v25 = vld [vmem:[#allocation2 + $0x78] sm:$0xff]  ;;  %5046 = vst.msk [vmem:[%s11249_s6 + $0xb0] sm:$0xff] %vm283_vm0, %v5014_v27 }
 0x313   : > { %v4574_v53 = vadd.f32 %v4542_v12, %v4510_v33  ;;  %v4245_v55 = vadd.f32 %v4213_v25, %v4181_v50 }
 0x314   : > { %v4393_v48 = vld [vmem:[#allocation2 + $0xf0] sm:$0xff] }
 0x315   : > { %4606 = vst.msk [vmem:[#allocation2 + $0x70] sm:$0xff] %vm283_vm0, %v4574_v53  ;;  %v4425_v19 = vadd.f32 %v4393_v48, %v4361_v56  ;;  %4277 = vst.msk [vmem:[#allocation2 + $0x78] sm:$0xff] %vm283_vm0, %v4245_v55 }
 0x316   : > { %v4062_v61 = vld [vmem:[#allocation2 + $0xf8] sm:$0xff] }
 0x317   : > { %v4094_v18 = vadd.f32 %v4062_v61, %v4030_v6  ;;  %4457 = vst.msk [vmem:[#allocation2 + $0xf0] sm:$0xff] %vm283_vm0, %v4425_v19 }
 0x319   : > { %4126 = vst.msk [vmem:[#allocation2 + $0xf8] sm:$0xff] %vm283_vm0, %v4094_v18 }
 0x31c   : > { %v4638_v45 = vld [vmem:[#allocation2 + $0x70] sm:$0xff]  ;;  %v4378_v52 = vld [vmem:[#allocation2 + $0x78] sm:$0xff] }
 0x31d   : > { %6115 = vmatprep.mubr.msk.f32.mxu0 %vm283_vm0, %v4638_v45  ;;  %v4410_v22 = vadd.f32 %v4378_v52, %v4346_v60 }
 0x31e   : > { %v4558_v11 = vld [vmem:[#allocation2 + $0xf0] sm:$0xff] }
 0x31f   : > { %v4590_v42 = vadd.f32 %v4558_v11, %v4526_v62  ;;  %4442 = vst.msk [vmem:[#allocation2 + $0x78] sm:$0xff] %vm283_vm0, %v4410_v22 }
 0x320   : > { %v4229_v30 = vld [vmem:[#allocation2 + $0xf8] sm:$0xff] }
 0x321   : > { %v4261_v58 = vadd.f32 %v4229_v30, %v4197_v34  ;;  %4622 = vst.msk [vmem:[#allocation2 + $0xf0] sm:$0xff] %vm283_vm0, %v4590_v42 }
 0x323   : > { %4293 = vst.msk [vmem:[#allocation2 + $0xf8] sm:$0xff] %vm283_vm0, %v4261_v58 }
 0x326   : > { %v4543_v15 = vld [vmem:[#allocation2 + $0x78] sm:$0xff] }
 0x327   : > { %v4575_v8 = vadd.f32 %v4543_v15, %v4511_v36 }
 0x328   : > { %v4654_v29 = vld [vmem:[#allocation2 + $0xf0] sm:$0xff] }
 0x329   : > { %6139 = vmatprep.mubr.msk.f32.mxu1 %vm283_vm0, %v4654_v29  ;;  %4607 = vst.msk [vmem:[#allocation2 + $0x78] sm:$0xff] %vm283_vm0, %v4575_v8 }
 0x32a   : > { %v4394_v40 = vld [vmem:[#allocation2 + $0xf8] sm:$0xff] }
 0x32b   : > { %v4426_v35 = vadd.f32 %v4394_v40, %v4362_v26 }
 0x32d   : > { %4458 = vst.msk [vmem:[#allocation2 + $0xf8] sm:$0xff] %vm283_vm0, %v4426_v35 }
 0x330   : > { %v4639_v51 = vld [vmem:[#allocation2 + $0x78] sm:$0xff] }
 0x331   : > { %6116 = vmatmul.mubr.msk.f32.gmra.mxu0 %vm283_vm0, %v4639_v51 }
 0x334   : > { %v4559_v9 = vld [vmem:[#allocation2 + $0xf8] sm:$0xff] }
 0x335   : > { %v4591_v2 = vadd.f32 %v4559_v9, %v4527_v14 }
 0x337   : > { %4623 = vst.msk [vmem:[#allocation2 + $0xf8] sm:$0xff] %vm283_vm0, %v4591_v2 }
 0x33e   : > { %v4655_v38 = vld [vmem:[#allocation2 + $0xf8] sm:$0xff] }
 0x33f   : > { %6140 = vmatmul.mubr.msk.f32.gmra.mxu1 %vm283_vm0, %v4655_v38 }
 0x344   : > { %v6108_v57 = vpop.f32.mrf.mxu0 }
 0x345   : > { %v4879_v59 = vadd.f32 %v6108_v57, %v11220_v28 }
 0x346   : > { %v4873_v7 = vpop.f32.mrf.mxu0 }
 0x347   : > { %v5001_v3 = vmax.f32 %v4879_v59, 0.0  ;;  %v4874_v46 = vadd.f32 %v11220_v28, %v4873_v7 }
 0x349   : > { %5033 = vst.msk [vmem:[%s11249_s6 + $0x48] sm:$0xff] %vm283_vm0, %v5001_v3  ;;  %v5000_v0 = vmax.f32 %v4874_v46, 0.0 }
 0x34b   : > { %5032 = vst.msk [vmem:[%s11249_s6 + $0x40] sm:$0xff] %vm283_vm0, %v5000_v0 }
 0x354   : > { %v6132_v63 = vpop.f32.mrf.mxu1 }
 0x355   : > { %v4959_v24 = vadd.f32 %v6132_v63, %v11220_v28 }
 0x356   : > { %v4953_v37 = vpop.f32.mrf.mxu1 }
 0x357   : > { %v5017_v5 = vmax.f32 %v4959_v24, 0.0  ;;  %v4954_v16 = vadd.f32 %v11220_v28, %v4953_v37 }
 0x359   : > { %5049 = vst.msk [vmem:[%s11249_s6 + $0xc8] sm:$0xff] %vm283_vm0, %v5017_v5  ;;  %v5016_v21 = vmax.f32 %v4954_v16, 0.0 }
 0x35b   : > { %5048 = vst.msk [vmem:[%s11249_s6 + $0xc0] sm:$0xff] %vm283_vm0, %v5016_v21 }
 0x37f   : > { %v6111_v32 = vpop.f32.mrf.mxu0 }
 0x380   : > { %v4889_v31 = vadd.f32 %v6111_v32, %v11220_v28 }
 0x381   : > { %v4883_v43 = vpop.f32.mrf.mxu0 }
 0x382   : > { %v5003_v44 = vmax.f32 %v4889_v31, 0.0  ;;  %v4884_v4 = vadd.f32 %v11220_v28, %v4883_v43 }
 0x384   : > { %5035 = vst.msk [vmem:[%s11249_s6 + $0x58] sm:$0xff] %vm283_vm0, %v5003_v44  ;;  %v5002_v39 = vmax.f32 %v4884_v4, 0.0 }
 0x386   : > { %5034 = vst.msk [vmem:[%s11249_s6 + $0x50] sm:$0xff] %vm283_vm0, %v5002_v39 }
 0x38e   : > { %v6135_v33 = vpop.f32.mrf.mxu1 }
 0x38f   : > { %v4969_v20 = vadd.f32 %v6135_v33, %v11220_v28 }
 0x390   : > { %v4963_v54 = vpop.f32.mrf.mxu1 }
 0x391   : > { %v5019_v50 = vmax.f32 %v4969_v20, 0.0  ;;  %v4964_v17 = vadd.f32 %v11220_v28, %v4963_v54 }
 0x393   : > { %5051 = vst.msk [vmem:[%s11249_s6 + $0xd8] sm:$0xff] %vm283_vm0, %v5019_v50  ;;  %v5018_v13 = vmax.f32 %v4964_v17, 0.0 }
 0x395   : > { %5050 = vst.msk [vmem:[%s11249_s6 + $0xd0] sm:$0xff] %vm283_vm0, %v5018_v13 }
 0x3c3   : > { %v6114_v49 = vpop.f32.mrf.mxu0 }
 0x3c4   : > { %v4899_v56 = vadd.f32 %v6114_v49, %v11220_v28 }
 0x3c5   : > { %v4893_v12 = vpop.f32.mrf.mxu0 }
 0x3c6   : > { %v5005_v25 = vmax.f32 %v4899_v56, 0.0  ;;  %v4894_v6 = vadd.f32 %v11220_v28, %v4893_v12 }
 0x3c8   : > { %5037 = vst.msk [vmem:[%s11249_s6 + $0x68] sm:$0xff] %vm283_vm0, %v5005_v25  ;;  %v5004_v27 = vmax.f32 %v4894_v6, 0.0 }
 0x3ca   : > { %5036 = vst.msk [vmem:[%s11249_s6 + $0x60] sm:$0xff] %vm283_vm0, %v5004_v27 }
 0x3d1   : > { %v6138_v53 = vpop.f32.mrf.mxu1 }
 0x3d2   : > { %v4979_v55 = vadd.f32 %v6138_v53, %v11220_v28 }
 0x3d3   : > { %v4973_v48 = vpop.f32.mrf.mxu1 }
 0x3d4   : > { %v5021_v19 = vmax.f32 %v4979_v55, 0.0  ;;  %v4974_v61 = vadd.f32 %v11220_v28, %v4973_v48 }
 0x3d6   : > { %5053 = vst.msk [vmem:[%s11249_s6 + $0xe8] sm:$0xff] %vm283_vm0, %v5021_v19  ;;  %v5020_v18 = vmax.f32 %v4974_v61, 0.0 }
 0x3d8   : > { %5052 = vst.msk [vmem:[%s11249_s6 + $0xe0] sm:$0xff] %vm283_vm0, %v5020_v18 }
 0x3f1   : > { %v6117_v23 = vpop.f32.mrf.mxu0 }
 0x3f2   : > { %v4909_v60 = vadd.f32 %v6117_v23, %v11220_v28 }
 0x3f3   : > { %v4903_v47 = vpop.f32.mrf.mxu0 }
 0x3f4   : > { %v5007_v62 = vmax.f32 %v4909_v60, 0.0  ;;  %v4904_v45 = vadd.f32 %v11220_v28, %v4903_v47 }
 0x3f6   : > { %5039 = vst.msk [vmem:[%s11249_s6 + $0x78] sm:$0xff] %vm283_vm0, %v5007_v62  ;;  %v5006_v52 = vmax.f32 %v4904_v45, 0.0 }
 0x3f8   : > { %5038 = vst.msk [vmem:[%s11249_s6 + $0x70] sm:$0xff] %vm283_vm0, %v5006_v52 }
 0x3ff   : > { %v6141_v34 = vpop.f32.mrf.mxu1 }
 0x400   : > { %v4989_v22 = vadd.f32 %v6141_v34, %v11220_v28 }
 0x401   : > { %v4983_v11 = vpop.f32.mrf.mxu1 }
 0x402   : > { %v5023_v42 = vmax.f32 %v4989_v22, 0.0  ;;  %v4984_v30 = vadd.f32 %v11220_v28, %v4983_v11 }
 0x404   : > { %5055 = vst.msk [vmem:[%s11249_s6 + $0xf8] sm:$0xff] %vm283_vm0, %v5023_v42  ;;  %v5022_v58 = vmax.f32 %v4984_v30, 0.0 }
 0x406   : > { %5054 = vst.msk [vmem:[%s11249_s6 + $0xf0] sm:$0xff] %vm283_vm0, %v5022_v58 }
 0x407   : > { %6453 = shalt.err (!%p6450_p6)
}
 0x408   : > { %s6454_s14 = scalar_lea.hbm %s11536_s27, 4096  ;;  %s6458_s8 = scalar_lea.hbm %s11601_s4, 16384 }
 0x409   : > { %p6455_p7 = scmp.ne.s32.totalorder %s11536_s27, %s6454_s14  ;;  %p6459_p11 = scmp.lt.s32.totalorder %s11536_s27, %s11601_s4 }
 0x40a   : > { %p6460_p12 = scmp.lt.s32.totalorder %s6458_s8, %s6454_s14 }
 0x40b   : > { %p6456_p9 = pnand %p6455_p7, %p6613_p3 }
 0x40c   : > { %p6461_p13 = por %p6460_p12, %p6459_p11 }
 0x40d   : > { %p6457_p10 = pneg %p6456_p9 }
 0x40f   : > { %p6462_p0 = pnand %p6461_p13, %p6457_p10 }
 0x411   : > { %6465 = shalt.err (!%p6462_p0)
}
 0x412   : > { %s6535_s12 = smov 128   ;;  %s6536_s24 = smov 8  }
 0x413   : > { %6159 = dma.vmem_to_hbm [thread:$0]  (%p6613_p3), %s11538_s11, 4096, %s11536_s27, %s11546_s18, %s6535_s12, %s6535_s12, %s6536_s24  }
 0x414 PF: > { %p6165_p1 = scmp.ge.s32.totalorder %s6532_s22, 2  ;;  %s5088_s19 = sand.u32 1, %s6504_s15  }
 0x415   : > { %s5089_s23 = scalar_lea.sflag [#allocation4], %s5088_s19 }
 0x416   : > { %p6162_p2 = pnand %p6165_p1, %p6622_p8 }
 0x418   : > { %p6163_p4 = pneg %p6162_p2 }
 0x41a   : > { %6499 = dma.done.wait (%p6163_p4), %s5089_s23, 4096  }
 0x41b   : > { %6501 = vsyncadd (%p6163_p4), %s5089_s23, 4294963200  ;;  %s17_s22 = sadd.s32 1, %s6532_s22   ;;  %s12002_s15 = smov %s6508_s16 }
 0x41c   : > { %p14_p5 = scmp.ge.s32.totalorder %s17_s22, 6   ;;  %s12003_s16 = smov %s6512_s17 }
 0x41d   : > { %s12004_s17 = smov %s6631_s7  ;;  %s12005_s18 = smov %s6524_s20 }
 0x41e   : > { %s12006_s19 = smov %s6528_s21  ;;  %s12007_s20 = smov %s12010_s25 }
 0x41f   : > { %s12008_s21 = smov %s12014_s26  ;;  %16 = sbr.rel (!%p14_p5) target bundleno = 5 (0x5), region = 80 }
 0x424   :  { %5094 = vsyncpa [#allocation4], 1 }
 0x425   :  { %5096 = vsyncpa [#allocation4 + $0x1], 1 }

</bundles_post_ra>
